<compile_context>
chip_gen: v6e
topology: v6e:2x2x1
jax: 0.10.0
libtpu: 0.0.40
codegen_flags: <defaults>
</compile_context>

<pallas_src>
import jax
import jax.numpy as jnp
import numpy as np
from jax import lax
from jax.experimental import pallas as pl
from jax.experimental.pallas import tpu as pltpu


# ----------------------------- Pallas kernels ------------------------------

def _conv_pool_kernel(p_ref, w_ref, b_ref, o_ref):
    """Fused conv (im2col matmul) + bias + ReLU + 3x3/stride-3 max-pool.

    p_ref : [9, R, K]  im2col patches (bf16); axis 0 = pooling-window offset
            (dh, dw), axis 1 = pooled output position (n, ph, pw),
            axis 2 = patch feature in PyTorch (c, ki, kj) order.
    w_ref : [K, C] bf16;  b_ref : [1, C] f32;  o_ref : [R, C].

    Since ReLU is monotone and the bias is identical for all window offsets,
      max_d relu(P_d @ W + b) == relu(max_d(P_d @ W) + b),
    so the pool folds into the matmul accumulation loop (no reshape/transpose).
    """
    w = w_ref[...]
    m = jnp.dot(p_ref[0], w, preferred_element_type=jnp.float32)
    for d in range(1, 9):                       # static unroll, 9 MXU pushes
        m = jnp.maximum(m, jnp.dot(p_ref[d], w, preferred_element_type=jnp.float32))
    o_ref[...] = jnp.maximum(m + b_ref[...], 0.0).astype(o_ref.dtype)


def _fc_fused_kernel(x_ref, w1_ref, b1_ref, w2_ref, b2_ref, w3_ref, b3_ref, o_ref):
    """Fused fc1 -> relu -> fc2 -> relu -> fc3; all operands VMEM-resident."""
    f32 = jnp.float32
    h = jnp.dot(x_ref[...], w1_ref[...], preferred_element_type=f32) + b1_ref[...]
    h = jnp.maximum(h, 0.0)
    h = jnp.dot(h.astype(w2_ref.dtype), w2_ref[...], preferred_element_type=f32) + b2_ref[...]
    h = jnp.maximum(h, 0.0)
    o = jnp.dot(h.astype(w3_ref.dtype), w3_ref[...], preferred_element_type=f32) + b3_ref[...]
    o_ref[...] = o.astype(o_ref.dtype)


# ----------------------------- Pallas wrappers ------------------------------

def pallas_conv_relu_pool(patches, w, b, out_dtype):
    """patches: [9, R, K] -> relu(conv+bias) max-pooled activation [R, C]."""
    _, R, K = patches.shape
    C = w.shape[1]
    return pl.pallas_call(
        _conv_pool_kernel,
        out_shape=jax.ShapeDtypeStruct((R, C), out_dtype),
        grid=(1,),
        in_specs=[
            pl.BlockSpec((9, R, K), lambda i: (0, 0, 0)),
            pl.BlockSpec((K, C), lambda i: (0, 0)),
            pl.BlockSpec((1, C), lambda i: (0, 0)),
        ],
        out_specs=pl.BlockSpec((R, C), lambda i: (0, 0)),
        compiler_params=pltpu.CompilerParams(
            dimension_semantics=("arbitrary",)),
    )(patches, w, b)


def pallas_fc_layers(x, p):
    """Fused fc1(relu)->fc2(relu)->fc3 on x:[M,500] bf16 -> [M,15] f32."""
    M = x.shape[0]
    n_out = p["fc3_w"].shape[1]
    args = (x, p["fc1_w"], p["fc1_b"], p["fc2_w"], p["fc2_b"], p["fc3_w"], p["fc3_b"])
    in_specs = [pl.BlockSpec(t.shape, lambda i, nd=t.ndim: (0,) * nd) for t in args]
    return pl.pallas_call(
        _fc_fused_kernel,
        out_shape=jax.ShapeDtypeStruct((M, n_out), jnp.float32),
        grid=(1,),
        in_specs=in_specs,
        out_specs=pl.BlockSpec((M, n_out), lambda i: (0, 0)),
        compiler_params=pltpu.CompilerParams(
            dimension_semantics=("arbitrary",)),
    )(*args)


# ----------------------------- im2col (XLA glue) -----------------------------

def _pool_ordered_patches(x, k, pooled_hw):
    """NHWC x:[N,H,W,C] -> patches [9, N*PH*PW, C*k*k], un-padded K.

    Axis 0 enumerates the 3x3 pooling-window offsets (dh, dw); axis 1 the
    pooled output positions (n, ph, pw); the feature axis follows PyTorch's
    weight.reshape(OutC, -1) order (c, ki, kj).  The conv position selected
    for group (dh, dw) at (ph, pw) is (3*ph+dh, 3*pw+dw)."""
    N, H, W, C = x.shape
    OH, OW = H - k + 1, W - k + 1
    PH, PW = pooled_hw
    cols = [x[:, i:i + OH, j:j + OW, :] for i in range(k) for j in range(k)]
    pf = jnp.stack(cols, axis=-1)                       # [N, OH, OW, C, k*k]
    groups = []
    for dh in range(3):
        for dw in range(3):
            g = pf[:, dh::3, dw::3][:, :PH, :PW]        # [N, PH, PW, C, k*k]
            groups.append(g.reshape(N * PH * PW, C * k * k))
    return jnp.stack(groups, axis=0)                    # [9, N*PH*PW, C*k*k]


# ----------------------------- parameters -----------------------------------

def init_params(key):
    """Deterministic PyTorch-default-style init (uniform +/- 1/sqrt(fan_in))."""
    ks = jax.random.split(key, 10)

    def u(k, shape, fan_in):
        bound = 1.0 / jnp.sqrt(fan_in)
        return jax.random.uniform(k, shape, jnp.float32, -bound, bound)

    return {
        "conv1_w": u(ks[0], (10, 1, 7, 7), 1 * 7 * 7),
        "conv1_b": u(ks[1], (10,), 1 * 7 * 7),
        "conv2_w": u(ks[2], (20, 10, 7, 7), 10 * 7 * 7),
        "conv2_b": u(ks[3], (20,), 10 * 7 * 7),
        "fc1_w": u(ks[4], (500, 120), 500),
        "fc1_b": u(ks[5], (120,), 500),
        "fc2_w": u(ks[6], (120, 84), 120),
        "fc2_b": u(ks[7], (84,), 120),
        "fc3_w": u(ks[8], (84, 15), 84),
        "fc3_b": u(ks[9], (15,), 84),
    }


def prepare_params(p):
    """One-time repack: matmul orientation, bf16 operands, f32 biases, fc1 rows
    permuted from NCHW-flatten to NHWC-flatten order.  No zero-padding."""
    bf16, f32 = jnp.bfloat16, jnp.float32
    # PyTorch flattens NCHW (c,h,w); we flatten NHWC (h,w,c) -> permute rows once.
    fc1_w = p["fc1_w"].reshape(20, 5, 5, 120).transpose(1, 2, 0, 3).reshape(500, 120)
    return {
        "c1_w": p["conv1_w"].reshape(10, 49).T.astype(bf16),     # [49, 10]
        "c1_b": p["conv1_b"].reshape(1, 10).astype(f32),
        "c2_w": p["conv2_w"].reshape(20, 490).T.astype(bf16),    # [490, 20]
        "c2_b": p["conv2_b"].reshape(1, 20).astype(f32),
        "fc1_w": fc1_w.astype(bf16),                              # [500, 120]
        "fc1_b": p["fc1_b"].reshape(1, 120).astype(f32),
        "fc2_w": p["fc2_w"].astype(bf16),                         # [120, 84]
        "fc2_b": p["fc2_b"].reshape(1, 84).astype(f32),
        "fc3_w": p["fc3_w"].astype(bf16),                         # [84, 15]
        "fc3_b": p["fc3_b"].reshape(1, 15).astype(f32),
    }


# ----------------------------- SimpleNet forward ----------------------------

def simple_net_forward(x, mp):
    """x: [N, 1, H, W] (NCHW, f32) -> [N, 15] (f32 raw scores)."""
    N, _, H, W = x.shape
    bf16 = jnp.bfloat16
    xh = x.transpose(0, 2, 3, 1).astype(bf16)                     # NHWC bf16

    # conv1(7x7) + ReLU + maxpool(3,3), one fused pallas_call
    PH1, PW1 = (H - 6) // 3, (W - 6) // 3
    p1 = _pool_ordered_patches(xh, 7, (PH1, PW1))                 # [9, N*22*22, 49]
    h1 = pallas_conv_relu_pool(p1, mp["c1_w"], mp["c1_b"], bf16)  # [N*22*22, 10]
    h1 = h1.reshape(N, PH1, PW1, 10)                              # NHWC

    # conv2(7x7) + ReLU + maxpool(3,3, floor), one fused pallas_call
    PH2, PW2 = (PH1 - 6) // 3, (PW1 - 6) // 3
    p2 = _pool_ordered_patches(h1, 7, (PH2, PW2))                 # [9, N*5*5, 490]
    h2 = pallas_conv_relu_pool(p2, mp["c2_w"], mp["c2_b"], bf16)  # [N*25, 20]

    # x.view(-1, 500): NHWC flatten (fc1 rows pre-permuted to match);
    # pad rows to one full sublane tile, slice back after the fused fc call.
    flat = h2.reshape(N, PH2 * PW2 * 20)                          # [N, 500]
    m_pad = -(-N // 8) * 8
    if m_pad != N:
        flat = jnp.pad(flat, ((0, m_pad - N), (0, 0)))
    out = pallas_fc_layers(flat, mp)                              # [m_pad, 15] f32
    return out[:N]


# TODO(synk): self.loss_criterion (CrossEntropyLoss, reduction='sum') is defined
# in __init__ but never used in forward(); it is intentionally not implemented.


# ----------------------------- pure-JAX reference ---------------------------

def _ref_pool_nchw(x):
    N, C, H, W = x.shape
    PH, PW = H // 3, W // 3
    x = x[:, :, :PH * 3, :PW * 3].reshape(N, C, PH, 3, PW, 3)
    return x.max(axis=(3, 5))


def reference_forward(x, p):
    dn = ("NCHW", "OIHW", "NCHW")
    y = lax.conv_general_dilated(x, p["conv1_w"], (1, 1), "VALID", dimension_numbers=dn)
    y = jnp.maximum(y + p["conv1_b"][None, :, None, None], 0.0)
    y = _ref_pool_nchw(y)
    y = lax.conv_general_dilated(y, p["conv2_w"], (1, 1), "VALID", dimension_numbers=dn)
    y = jnp.maximum(y + p["conv2_b"][None, :, None, None], 0.0)
    y = _ref_pool_nchw(y)
    y = y.reshape(-1, 500)
    y = jnp.maximum(y @ p["fc1_w"] + p["fc1_b"], 0.0)
    y = jnp.maximum(y @ p["fc2_w"] + p["fc2_b"], 0.0)
    return y @ p["fc3_w"] + p["fc3_b"]


if __name__ == "__main__":
    key = jax.random.PRNGKey(0)
    k_x, k_p = jax.random.split(key)
    # Spatial size must make the flatten land on 500 = 20*5*5 features:
    # 72 -> conv7 -> 66 -> pool3 -> 22 -> conv7 -> 16 -> pool3(floor) -> 5.
    x = jax.random.normal(k_x, (2, 1, 72, 72), jnp.float32)
    params = init_params(k_p)
    prepared = prepare_params(params)

    fwd = jax.jit(simple_net_forward)
    out = jax.block_until_ready(fwd(x, prepared))
    assert out.shape == (2, 15), out.shape
    assert out.dtype == jnp.float32

    ref = jax.block_until_ready(reference_forward(x, params))
    np.testing.assert_allclose(np.asarray(out), np.asarray(ref), rtol=0.1, atol=0.05)
    print("KERNEL_OK")
</pallas_src>

<mosaic_0001>
module attributes {stable_mosaic.version = 11 : i64} {
  func.func @_conv_pool_kernel(%arg0: i32, %arg1: memref<9x968x49xbf16, #tpu.memory_space<vmem>>, %arg2: memref<49x10xbf16, #tpu.memory_space<vmem>>, %arg3: memref<1x10xf32, #tpu.memory_space<vmem>>, %arg4: memref<968x10xbf16, #tpu.memory_space<vmem>>) attributes {dimension_semantics = [#tpu.dimension_semantics<arbitrary>], iteration_bounds = array<i64: 1>, scalar_prefetch = 0 : i64, scratch_operands = 0 : i64, tpu.core_type = #tpu.core_type<tc>, window_params = [{pipeline_mode = #tpu.pipeline_mode<synchronous>, transform_indices = @transform_0, window_bounds = array<i64: 9, 968, 49>}, {pipeline_mode = #tpu.pipeline_mode<synchronous>, transform_indices = @transform_1, window_bounds = array<i64: 49, 10>}, {pipeline_mode = #tpu.pipeline_mode<synchronous>, transform_indices = @transform_2, window_bounds = array<i64: 1, 10>}, {pipeline_mode = #tpu.pipeline_mode<synchronous>, transform_indices = @transform_3, window_bounds = array<i64: 968, 10>}]} {
    %c0 = arith.constant 0 : index
    %c0_0 = arith.constant 0 : index
    %0 = vector.load %arg2[%c0, %c0_0] : memref<49x10xbf16, #tpu.memory_space<vmem>>, vector<49x10xbf16>
    %c0_1 = arith.constant 0 : index
    %c0_2 = arith.constant 0 : index
    %c0_3 = arith.constant 0 : index
    %1 = vector.load %arg1[%c0_1, %c0_2, %c0_3] : memref<9x968x49xbf16, #tpu.memory_space<vmem>>, vector<1x968x49xbf16>
    %2 = vector.shape_cast %1 : vector<1x968x49xbf16> to vector<968x49xbf16>
    %cst = arith.constant dense<0.000000e+00> : vector<968x10xf32>
    %3 = tpu.matmul %2, %0, %cst {dimension_numbers = #tpu.dot_dimension_numbers<[1], [0], [0], [1], [0, 0, 1, 1], [], []>} : vector<968x49xbf16>, vector<49x10xbf16>, vector<968x10xf32> -> vector<968x10xf32>
    %c1 = arith.constant 1 : index
    %c0_4 = arith.constant 0 : index
    %c0_5 = arith.constant 0 : index
    %4 = vector.load %arg1[%c1, %c0_4, %c0_5] : memref<9x968x49xbf16, #tpu.memory_space<vmem>>, vector<1x968x49xbf16>
    %5 = vector.shape_cast %4 : vector<1x968x49xbf16> to vector<968x49xbf16>
    %cst_6 = arith.constant dense<0.000000e+00> : vector<968x10xf32>
    %6 = tpu.matmul %5, %0, %cst_6 {dimension_numbers = #tpu.dot_dimension_numbers<[1], [0], [0], [1], [0, 0, 1, 1], [], []>} : vector<968x49xbf16>, vector<49x10xbf16>, vector<968x10xf32> -> vector<968x10xf32>
    %7 = arith.maximumf %3, %6 : vector<968x10xf32>
    %c2 = arith.constant 2 : index
    %c0_7 = arith.constant 0 : index
    %c0_8 = arith.constant 0 : index
    %8 = vector.load %arg1[%c2, %c0_7, %c0_8] : memref<9x968x49xbf16, #tpu.memory_space<vmem>>, vector<1x968x49xbf16>
    %9 = vector.shape_cast %8 : vector<1x968x49xbf16> to vector<968x49xbf16>
    %cst_9 = arith.constant dense<0.000000e+00> : vector<968x10xf32>
    %10 = tpu.matmul %9, %0, %cst_9 {dimension_numbers = #tpu.dot_dimension_numbers<[1], [0], [0], [1], [0, 0, 1, 1], [], []>} : vector<968x49xbf16>, vector<49x10xbf16>, vector<968x10xf32> -> vector<968x10xf32>
    %11 = arith.maximumf %7, %10 : vector<968x10xf32>
    %c3 = arith.constant 3 : index
    %c0_10 = arith.constant 0 : index
    %c0_11 = arith.constant 0 : index
    %12 = vector.load %arg1[%c3, %c0_10, %c0_11] : memref<9x968x49xbf16, #tpu.memory_space<vmem>>, vector<1x968x49xbf16>
    %13 = vector.shape_cast %12 : vector<1x968x49xbf16> to vector<968x49xbf16>
    %cst_12 = arith.constant dense<0.000000e+00> : vector<968x10xf32>
    %14 = tpu.matmul %13, %0, %cst_12 {dimension_numbers = #tpu.dot_dimension_numbers<[1], [0], [0], [1], [0, 0, 1, 1], [], []>} : vector<968x49xbf16>, vector<49x10xbf16>, vector<968x10xf32> -> vector<968x10xf32>
    %15 = arith.maximumf %11, %14 : vector<968x10xf32>
    %c4 = arith.constant 4 : index
    %c0_13 = arith.constant 0 : index
    %c0_14 = arith.constant 0 : index
    %16 = vector.load %arg1[%c4, %c0_13, %c0_14] : memref<9x968x49xbf16, #tpu.memory_space<vmem>>, vector<1x968x49xbf16>
    %17 = vector.shape_cast %16 : vector<1x968x49xbf16> to vector<968x49xbf16>
    %cst_15 = arith.constant dense<0.000000e+00> : vector<968x10xf32>
    %18 = tpu.matmul %17, %0, %cst_15 {dimension_numbers = #tpu.dot_dimension_numbers<[1], [0], [0], [1], [0, 0, 1, 1], [], []>} : vector<968x49xbf16>, vector<49x10xbf16>, vector<968x10xf32> -> vector<968x10xf32>
    %19 = arith.maximumf %15, %18 : vector<968x10xf32>
    %c5 = arith.constant 5 : index
    %c0_16 = arith.constant 0 : index
    %c0_17 = arith.constant 0 : index
    %20 = vector.load %arg1[%c5, %c0_16, %c0_17] : memref<9x968x49xbf16, #tpu.memory_space<vmem>>, vector<1x968x49xbf16>
    %21 = vector.shape_cast %20 : vector<1x968x49xbf16> to vector<968x49xbf16>
    %cst_18 = arith.constant dense<0.000000e+00> : vector<968x10xf32>
    %22 = tpu.matmul %21, %0, %cst_18 {dimension_numbers = #tpu.dot_dimension_numbers<[1], [0], [0], [1], [0, 0, 1, 1], [], []>} : vector<968x49xbf16>, vector<49x10xbf16>, vector<968x10xf32> -> vector<968x10xf32>
    %23 = arith.maximumf %19, %22 : vector<968x10xf32>
    %c6 = arith.constant 6 : index
    %c0_19 = arith.constant 0 : index
    %c0_20 = arith.constant 0 : index
    %24 = vector.load %arg1[%c6, %c0_19, %c0_20] : memref<9x968x49xbf16, #tpu.memory_space<vmem>>, vector<1x968x49xbf16>
    %25 = vector.shape_cast %24 : vector<1x968x49xbf16> to vector<968x49xbf16>
    %cst_21 = arith.constant dense<0.000000e+00> : vector<968x10xf32>
    %26 = tpu.matmul %25, %0, %cst_21 {dimension_numbers = #tpu.dot_dimension_numbers<[1], [0], [0], [1], [0, 0, 1, 1], [], []>} : vector<968x49xbf16>, vector<49x10xbf16>, vector<968x10xf32> -> vector<968x10xf32>
    %27 = arith.maximumf %23, %26 : vector<968x10xf32>
    %c7 = arith.constant 7 : index
    %c0_22 = arith.constant 0 : index
    %c0_23 = arith.constant 0 : index
    %28 = vector.load %arg1[%c7, %c0_22, %c0_23] : memref<9x968x49xbf16, #tpu.memory_space<vmem>>, vector<1x968x49xbf16>
    %29 = vector.shape_cast %28 : vector<1x968x49xbf16> to vector<968x49xbf16>
    %cst_24 = arith.constant dense<0.000000e+00> : vector<968x10xf32>
    %30 = tpu.matmul %29, %0, %cst_24 {dimension_numbers = #tpu.dot_dimension_numbers<[1], [0], [0], [1], [0, 0, 1, 1], [], []>} : vector<968x49xbf16>, vector<49x10xbf16>, vector<968x10xf32> -> vector<968x10xf32>
    %31 = arith.maximumf %27, %30 : vector<968x10xf32>
    %c8 = arith.constant 8 : index
    %c0_25 = arith.constant 0 : index
    %c0_26 = arith.constant 0 : index
    %32 = vector.load %arg1[%c8, %c0_25, %c0_26] : memref<9x968x49xbf16, #tpu.memory_space<vmem>>, vector<1x968x49xbf16>
    %33 = vector.shape_cast %32 : vector<1x968x49xbf16> to vector<968x49xbf16>
    %cst_27 = arith.constant dense<0.000000e+00> : vector<968x10xf32>
    %34 = tpu.matmul %33, %0, %cst_27 {dimension_numbers = #tpu.dot_dimension_numbers<[1], [0], [0], [1], [0, 0, 1, 1], [], []>} : vector<968x49xbf16>, vector<49x10xbf16>, vector<968x10xf32> -> vector<968x10xf32>
    %35 = arith.maximumf %31, %34 : vector<968x10xf32>
    %c0_28 = arith.constant 0 : index
    %c0_29 = arith.constant 0 : index
    %36 = vector.load %arg3[%c0_28, %c0_29] : memref<1x10xf32, #tpu.memory_space<vmem>>, vector<1x10xf32>
    %37 = vector.broadcast %36 : vector<1x10xf32> to vector<968x10xf32>
    %38 = arith.addf %35, %37 : vector<968x10xf32>
    %cst_30 = arith.constant 0.000000e+00 : f32
    %39 = vector.broadcast %cst_30 : f32 to vector<968x10xf32>
    %40 = arith.maximumf %38, %39 : vector<968x10xf32>
    %41 = arith.truncf %40 : vector<968x10xf32> to vector<968x10xbf16>
    %c0_31 = arith.constant 0 : index
    %c0_32 = arith.constant 0 : index
    %42 = vector.load %arg4[%c0_31, %c0_32] : memref<968x10xbf16, #tpu.memory_space<vmem>>, vector<968x10xbf16>
    tpu.vector_store %arg4[%c0_31, %c0_32], %41 {strides = array<i32>} : memref<968x10xbf16, #tpu.memory_space<vmem>>, vector<968x10xbf16>,
    return
  }
  func.func @transform_0(%arg0: i32) -> (i32, i32, i32) {
    %c0_i32 = arith.constant 0 : i32
    %c0_i32_0 = arith.constant 0 : i32
    %c0_i32_1 = arith.constant 0 : i32
    %c0_i32_2 = arith.constant 0 : i32
    return %c0_i32, %c0_i32_0, %c0_i32_1 : i32, i32, i32
  }
  func.func @transform_1(%arg0: i32) -> (i32, i32) {
    %c0_i32 = arith.constant 0 : i32
    %c0_i32_0 = arith.constant 0 : i32
    %c0_i32_1 = arith.constant 0 : i32
    return %c0_i32, %c0_i32_0 : i32, i32
  }
  func.func @transform_2(%arg0: i32) -> (i32, i32) {
    %c0_i32 = arith.constant 0 : i32
    %c0_i32_0 = arith.constant 0 : i32
    %c0_i32_1 = arith.constant 0 : i32
    return %c0_i32, %c0_i32_0 : i32, i32
  }
  func.func @transform_3(%arg0: i32) -> (i32, i32) {
    %c0_i32 = arith.constant 0 : i32
    %c0_i32_0 = arith.constant 0 : i32
    %c0_i32_1 = arith.constant 0 : i32
    return %c0_i32, %c0_i32_0 : i32, i32
  }
}

module attributes {stable_mosaic.version = 11 : i64} {
  func.func @_conv_pool_kernel(%arg0: i32, %arg1: memref<9x50x490xbf16, #tpu.memory_space<vmem>>, %arg2: memref<490x20xbf16, #tpu.memory_space<vmem>>, %arg3: memref<1x20xf32, #tpu.memory_space<vmem>>, %arg4: memref<50x20xbf16, #tpu.memory_space<vmem>>) attributes {dimension_semantics = [#tpu.dimension_semantics<arbitrary>], iteration_bounds = array<i64: 1>, scalar_prefetch = 0 : i64, scratch_operands = 0 : i64, tpu.core_type = #tpu.core_type<tc>, window_params = [{pipeline_mode = #tpu.pipeline_mode<synchronous>, transform_indices = @transform_0, window_bounds = array<i64: 9, 50, 490>}, {pipeline_mode = #tpu.pipeline_mode<synchronous>, transform_indices = @transform_1, window_bounds = array<i64: 490, 20>}, {pipeline_mode = #tpu.pipeline_mode<synchronous>, transform_indices = @transform_2, window_bounds = array<i64: 1, 20>}, {pipeline_mode = #tpu.pipeline_mode<synchronous>, transform_indices = @transform_3, window_bounds = array<i64: 50, 20>}]} {
    %c0 = arith.constant 0 : index
    %c0_0 = arith.constant 0 : index
    %0 = vector.load %arg2[%c0, %c0_0] : memref<490x20xbf16, #tpu.memory_space<vmem>>, vector<490x20xbf16>
    %c0_1 = arith.constant 0 : index
    %c0_2 = arith.constant 0 : index
    %c0_3 = arith.constant 0 : index
    %1 = vector.load %arg1[%c0_1, %c0_2, %c0_3] : memref<9x50x490xbf16, #tpu.memory_space<vmem>>, vector<1x50x490xbf16>
    %2 = vector.shape_cast %1 : vector<1x50x490xbf16> to vector<50x490xbf16>
    %cst = arith.constant dense<0.000000e+00> : vector<50x20xf32>
    %3 = tpu.matmul %2, %0, %cst {dimension_numbers = #tpu.dot_dimension_numbers<[1], [0], [0], [1], [0, 0, 1, 1], [], []>} : vector<50x490xbf16>, vector<490x20xbf16>, vector<50x20xf32> -> vector<50x20xf32>
    %c1 = arith.constant 1 : index
    %c0_4 = arith.constant 0 : index
    %c0_5 = arith.constant 0 : index
    %4 = vector.load %arg1[%c1, %c0_4, %c0_5] : memref<9x50x490xbf16, #tpu.memory_space<vmem>>, vector<1x50x490xbf16>
    %5 = vector.shape_cast %4 : vector<1x50x490xbf16> to vector<50x490xbf16>
    %cst_6 = arith.constant dense<0.000000e+00> : vector<50x20xf32>
    %6 = tpu.matmul %5, %0, %cst_6 {dimension_numbers = #tpu.dot_dimension_numbers<[1], [0], [0], [1], [0, 0, 1, 1], [], []>} : vector<50x490xbf16>, vector<490x20xbf16>, vector<50x20xf32> -> vector<50x20xf32>
    %7 = arith.maximumf %3, %6 : vector<50x20xf32>
    %c2 = arith.constant 2 : index
    %c0_7 = arith.constant 0 : index
    %c0_8 = arith.constant 0 : index
    %8 = vector.load %arg1[%c2, %c0_7, %c0_8] : memref<9x50x490xbf16, #tpu.memory_space<vmem>>, vector<1x50x490xbf16>
    %9 = vector.shape_cast %8 : vector<1x50x490xbf16> to vector<50x490xbf16>
    %cst_9 = arith.constant dense<0.000000e+00> : vector<50x20xf32>
    %10 = tpu.matmul %9, %0, %cst_9 {dimension_numbers = #tpu.dot_dimension_numbers<[1], [0], [0], [1], [0, 0, 1, 1], [], []>} : vector<50x490xbf16>, vector<490x20xbf16>, vector<50x20xf32> -> vector<50x20xf32>
    %11 = arith.maximumf %7, %10 : vector<50x20xf32>
    %c3 = arith.constant 3 : index
    %c0_10 = arith.constant 0 : index
    %c0_11 = arith.constant 0 : index
    %12 = vector.load %arg1[%c3, %c0_10, %c0_11] : memref<9x50x490xbf16, #tpu.memory_space<vmem>>, vector<1x50x490xbf16>
    %13 = vector.shape_cast %12 : vector<1x50x490xbf16> to vector<50x490xbf16>
    %cst_12 = arith.constant dense<0.000000e+00> : vector<50x20xf32>
    %14 = tpu.matmul %13, %0, %cst_12 {dimension_numbers = #tpu.dot_dimension_numbers<[1], [0], [0], [1], [0, 0, 1, 1], [], []>} : vector<50x490xbf16>, vector<490x20xbf16>, vector<50x20xf32> -> vector<50x20xf32>
    %15 = arith.maximumf %11, %14 : vector<50x20xf32>
    %c4 = arith.constant 4 : index
    %c0_13 = arith.constant 0 : index
    %c0_14 = arith.constant 0 : index
    %16 = vector.load %arg1[%c4, %c0_13, %c0_14] : memref<9x50x490xbf16, #tpu.memory_space<vmem>>, vector<1x50x490xbf16>
    %17 = vector.shape_cast %16 : vector<1x50x490xbf16> to vector<50x490xbf16>
    %cst_15 = arith.constant dense<0.000000e+00> : vector<50x20xf32>
    %18 = tpu.matmul %17, %0, %cst_15 {dimension_numbers = #tpu.dot_dimension_numbers<[1], [0], [0], [1], [0, 0, 1, 1], [], []>} : vector<50x490xbf16>, vector<490x20xbf16>, vector<50x20xf32> -> vector<50x20xf32>
    %19 = arith.maximumf %15, %18 : vector<50x20xf32>
    %c5 = arith.constant 5 : index
    %c0_16 = arith.constant 0 : index
    %c0_17 = arith.constant 0 : index
    %20 = vector.load %arg1[%c5, %c0_16, %c0_17] : memref<9x50x490xbf16, #tpu.memory_space<vmem>>, vector<1x50x490xbf16>
    %21 = vector.shape_cast %20 : vector<1x50x490xbf16> to vector<50x490xbf16>
    %cst_18 = arith.constant dense<0.000000e+00> : vector<50x20xf32>
    %22 = tpu.matmul %21, %0, %cst_18 {dimension_numbers = #tpu.dot_dimension_numbers<[1], [0], [0], [1], [0, 0, 1, 1], [], []>} : vector<50x490xbf16>, vector<490x20xbf16>, vector<50x20xf32> -> vector<50x20xf32>
    %23 = arith.maximumf %19, %22 : vector<50x20xf32>
    %c6 = arith.constant 6 : index
    %c0_19 = arith.constant 0 : index
    %c0_20 = arith.constant 0 : index
    %24 = vector.load %arg1[%c6, %c0_19, %c0_20] : memref<9x50x490xbf16, #tpu.memory_space<vmem>>, vector<1x50x490xbf16>
    %25 = vector.shape_cast %24 : vector<1x50x490xbf16> to vector<50x490xbf16>
    %cst_21 = arith.constant dense<0.000000e+00> : vector<50x20xf32>
    %26 = tpu.matmul %25, %0, %cst_21 {dimension_numbers = #tpu.dot_dimension_numbers<[1], [0], [0], [1], [0, 0, 1, 1], [], []>} : vector<50x490xbf16>, vector<490x20xbf16>, vector<50x20xf32> -> vector<50x20xf32>
    %27 = arith.maximumf %23, %26 : vector<50x20xf32>
    %c7 = arith.constant 7 : index
    %c0_22 = arith.constant 0 : index
    %c0_23 = arith.constant 0 : index
    %28 = vector.load %arg1[%c7, %c0_22, %c0_23] : memref<9x50x490xbf16, #tpu.memory_space<vmem>>, vector<1x50x490xbf16>
    %29 = vector.shape_cast %28 : vector<1x50x490xbf16> to vector<50x490xbf16>
    %cst_24 = arith.constant dense<0.000000e+00> : vector<50x20xf32>
    %30 = tpu.matmul %29, %0, %cst_24 {dimension_numbers = #tpu.dot_dimension_numbers<[1], [0], [0], [1], [0, 0, 1, 1], [], []>} : vector<50x490xbf16>, vector<490x20xbf16>, vector<50x20xf32> -> vector<50x20xf32>
    %31 = arith.maximumf %27, %30 : vector<50x20xf32>
    %c8 = arith.constant 8 : index
    %c0_25 = arith.constant 0 : index
    %c0_26 = arith.constant 0 : index
    %32 = vector.load %arg1[%c8, %c0_25, %c0_26] : memref<9x50x490xbf16, #tpu.memory_space<vmem>>, vector<1x50x490xbf16>
    %33 = vector.shape_cast %32 : vector<1x50x490xbf16> to vector<50x490xbf16>
    %cst_27 = arith.constant dense<0.000000e+00> : vector<50x20xf32>
    %34 = tpu.matmul %33, %0, %cst_27 {dimension_numbers = #tpu.dot_dimension_numbers<[1], [0], [0], [1], [0, 0, 1, 1], [], []>} : vector<50x490xbf16>, vector<490x20xbf16>, vector<50x20xf32> -> vector<50x20xf32>
    %35 = arith.maximumf %31, %34 : vector<50x20xf32>
    %c0_28 = arith.constant 0 : index
    %c0_29 = arith.constant 0 : index
    %36 = vector.load %arg3[%c0_28, %c0_29] : memref<1x20xf32, #tpu.memory_space<vmem>>, vector<1x20xf32>
    %37 = vector.broadcast %36 : vector<1x20xf32> to vector<50x20xf32>
    %38 = arith.addf %35, %37 : vector<50x20xf32>
    %cst_30 = arith.constant 0.000000e+00 : f32
    %39 = vector.broadcast %cst_30 : f32 to vector<50x20xf32>
    %40 = arith.maximumf %38, %39 : vector<50x20xf32>
    %41 = arith.truncf %40 : vector<50x20xf32> to vector<50x20xbf16>
    %c0_31 = arith.constant 0 : index
    %c0_32 = arith.constant 0 : index
    %42 = vector.load %arg4[%c0_31, %c0_32] : memref<50x20xbf16, #tpu.memory_space<vmem>>, vector<50x20xbf16>
    tpu.vector_store %arg4[%c0_31, %c0_32], %41 {strides = array<i32>} : memref<50x20xbf16, #tpu.memory_space<vmem>>, vector<50x20xbf16>,
    return
  }
  func.func @transform_0(%arg0: i32) -> (i32, i32, i32) {
    %c0_i32 = arith.constant 0 : i32
    %c0_i32_0 = arith.constant 0 : i32
    %c0_i32_1 = arith.constant 0 : i32
    %c0_i32_2 = arith.constant 0 : i32
    return %c0_i32, %c0_i32_0, %c0_i32_1 : i32, i32, i32
  }
  func.func @transform_1(%arg0: i32) -> (i32, i32) {
    %c0_i32 = arith.constant 0 : i32
    %c0_i32_0 = arith.constant 0 : i32
    %c0_i32_1 = arith.constant 0 : i32
    return %c0_i32, %c0_i32_0 : i32, i32
  }
  func.func @transform_2(%arg0: i32) -> (i32, i32) {
    %c0_i32 = arith.constant 0 : i32
    %c0_i32_0 = arith.constant 0 : i32
    %c0_i32_1 = arith.constant 0 : i32
    return %c0_i32, %c0_i32_0 : i32, i32
  }
  func.func @transform_3(%arg0: i32) -> (i32, i32) {
    %c0_i32 = arith.constant 0 : i32
    %c0_i32_0 = arith.constant 0 : i32
    %c0_i32_1 = arith.constant 0 : i32
    return %c0_i32, %c0_i32_0 : i32, i32
  }
}

module attributes {stable_mosaic.version = 11 : i64} {
  func.func @_fc_fused_kernel(%arg0: i32, %arg1: memref<8x500xbf16, #tpu.memory_space<vmem>>, %arg2: memref<500x120xbf16, #tpu.memory_space<vmem>>, %arg3: memref<1x120xf32, #tpu.memory_space<vmem>>, %arg4: memref<120x84xbf16, #tpu.memory_space<vmem>>, %arg5: memref<1x84xf32, #tpu.memory_space<vmem>>, %arg6: memref<84x15xbf16, #tpu.memory_space<vmem>>, %arg7: memref<1x15xf32, #tpu.memory_space<vmem>>, %arg8: memref<8x15xf32, #tpu.memory_space<vmem>>) attributes {dimension_semantics = [#tpu.dimension_semantics<arbitrary>], iteration_bounds = array<i64: 1>, scalar_prefetch = 0 : i64, scratch_operands = 0 : i64, tpu.core_type = #tpu.core_type<tc>, window_params = [{pipeline_mode = #tpu.pipeline_mode<synchronous>, transform_indices = @transform_0, window_bounds = array<i64: 8, 500>}, {pipeline_mode = #tpu.pipeline_mode<synchronous>, transform_indices = @transform_1, window_bounds = array<i64: 500, 120>}, {pipeline_mode = #tpu.pipeline_mode<synchronous>, transform_indices = @transform_2, window_bounds = array<i64: 1, 120>}, {pipeline_mode = #tpu.pipeline_mode<synchronous>, transform_indices = @transform_3, window_bounds = array<i64: 120, 84>}, {pipeline_mode = #tpu.pipeline_mode<synchronous>, transform_indices = @transform_4, window_bounds = array<i64: 1, 84>}, {pipeline_mode = #tpu.pipeline_mode<synchronous>, transform_indices = @transform_5, window_bounds = array<i64: 84, 15>}, {pipeline_mode = #tpu.pipeline_mode<synchronous>, transform_indices = @transform_6, window_bounds = array<i64: 1, 15>}, {pipeline_mode = #tpu.pipeline_mode<synchronous>, transform_indices = @transform_7, window_bounds = array<i64: 8, 15>}]} {
    %c0 = arith.constant 0 : index
    %c0_0 = arith.constant 0 : index
    %0 = vector.load %arg1[%c0, %c0_0] : memref<8x500xbf16, #tpu.memory_space<vmem>>, vector<8x500xbf16>
    %c0_1 = arith.constant 0 : index
    %c0_2 = arith.constant 0 : index
    %1 = vector.load %arg2[%c0_1, %c0_2] : memref<500x120xbf16, #tpu.memory_space<vmem>>, vector<500x120xbf16>
    %cst = arith.constant dense<0.000000e+00> : vector<8x120xf32>
    %2 = tpu.matmul %0, %1, %cst {dimension_numbers = #tpu.dot_dimension_numbers<[1], [0], [0], [1], [0, 0, 1, 1], [], []>} : vector<8x500xbf16>, vector<500x120xbf16>, vector<8x120xf32> -> vector<8x120xf32>
    %c0_3 = arith.constant 0 : index
    %c0_4 = arith.constant 0 : index
    %3 = vector.load %arg3[%c0_3, %c0_4] : memref<1x120xf32, #tpu.memory_space<vmem>>, vector<1x120xf32>
    %4 = vector.broadcast %3 : vector<1x120xf32> to vector<8x120xf32>
    %5 = arith.addf %2, %4 : vector<8x120xf32>
    %cst_5 = arith.constant 0.000000e+00 : f32
    %6 = vector.broadcast %cst_5 : f32 to vector<8x120xf32>
    %7 = arith.maximumf %5, %6 : vector<8x120xf32>
    %8 = arith.truncf %7 : vector<8x120xf32> to vector<8x120xbf16>
    %c0_6 = arith.constant 0 : index
    %c0_7 = arith.constant 0 : index
    %9 = vector.load %arg4[%c0_6, %c0_7] : memref<120x84xbf16, #tpu.memory_space<vmem>>, vector<120x84xbf16>
    %cst_8 = arith.constant dense<0.000000e+00> : vector<8x84xf32>
    %10 = tpu.matmul %8, %9, %cst_8 {dimension_numbers = #tpu.dot_dimension_numbers<[1], [0], [0], [1], [0, 0, 1, 1], [], []>} : vector<8x120xbf16>, vector<120x84xbf16>, vector<8x84xf32> -> vector<8x84xf32>
    %c0_9 = arith.constant 0 : index
    %c0_10 = arith.constant 0 : index
    %11 = vector.load %arg5[%c0_9, %c0_10] : memref<1x84xf32, #tpu.memory_space<vmem>>, vector<1x84xf32>
    %12 = vector.broadcast %11 : vector<1x84xf32> to vector<8x84xf32>
    %13 = arith.addf %10, %12 : vector<8x84xf32>
    %cst_11 = arith.constant 0.000000e+00 : f32
    %14 = vector.broadcast %cst_11 : f32 to vector<8x84xf32>
    %15 = arith.maximumf %13, %14 : vector<8x84xf32>
    %16 = arith.truncf %15 : vector<8x84xf32> to vector<8x84xbf16>
    %c0_12 = arith.constant 0 : index
    %c0_13 = arith.constant 0 : index
    %17 = vector.load %arg6[%c0_12, %c0_13] : memref<84x15xbf16, #tpu.memory_space<vmem>>, vector<84x15xbf16>
    %cst_14 = arith.constant dense<0.000000e+00> : vector<8x15xf32>
    %18 = tpu.matmul %16, %17, %cst_14 {dimension_numbers = #tpu.dot_dimension_numbers<[1], [0], [0], [1], [0, 0, 1, 1], [], []>} : vector<8x84xbf16>, vector<84x15xbf16>, vector<8x15xf32> -> vector<8x15xf32>
    %c0_15 = arith.constant 0 : index
    %c0_16 = arith.constant 0 : index
    %19 = vector.load %arg7[%c0_15, %c0_16] : memref<1x15xf32, #tpu.memory_space<vmem>>, vector<1x15xf32>
    %20 = vector.broadcast %19 : vector<1x15xf32> to vector<8x15xf32>
    %21 = arith.addf %18, %20 : vector<8x15xf32>
    %c0_17 = arith.constant 0 : index
    %c0_18 = arith.constant 0 : index
    %22 = vector.load %arg8[%c0_17, %c0_18] : memref<8x15xf32, #tpu.memory_space<vmem>>, vector<8x15xf32>
    tpu.vector_store %arg8[%c0_17, %c0_18], %21 {strides = array<i32>} : memref<8x15xf32, #tpu.memory_space<vmem>>, vector<8x15xf32>,
    return
  }
  func.func @transform_0(%arg0: i32) -> (i32, i32) {
    %c0_i32 = arith.constant 0 : i32
    %c0_i32_0 = arith.constant 0 : i32
    %c0_i32_1 = arith.constant 0 : i32
    return %c0_i32, %c0_i32_0 : i32, i32
  }
  func.func @transform_1(%arg0: i32) -> (i32, i32) {
    %c0_i32 = arith.constant 0 : i32
    %c0_i32_0 = arith.constant 0 : i32
    %c0_i32_1 = arith.constant 0 : i32
    return %c0_i32, %c0_i32_0 : i32, i32
  }
  func.func @transform_2(%arg0: i32) -> (i32, i32) {
    %c0_i32 = arith.constant 0 : i32
    %c0_i32_0 = arith.constant 0 : i32
    %c0_i32_1 = arith.constant 0 : i32
    return %c0_i32, %c0_i32_0 : i32, i32
  }
  func.func @transform_3(%arg0: i32) -> (i32, i32) {
    %c0_i32 = arith.constant 0 : i32
    %c0_i32_0 = arith.constant 0 : i32
    %c0_i32_1 = arith.constant 0 : i32
    return %c0_i32, %c0_i32_0 : i32, i32
  }
  func.func @transform_4(%arg0: i32) -> (i32, i32) {
    %c0_i32 = arith.constant 0 : i32
    %c0_i32_0 = arith.constant 0 : i32
    %c0_i32_1 = arith.constant 0 : i32
    return %c0_i32, %c0_i32_0 : i32, i32
  }
  func.func @transform_5(%arg0: i32) -> (i32, i32) {
    %c0_i32 = arith.constant 0 : i32
    %c0_i32_0 = arith.constant 0 : i32
    %c0_i32_1 = arith.constant 0 : i32
    return %c0_i32, %c0_i32_0 : i32, i32
  }
  func.func @transform_6(%arg0: i32) -> (i32, i32) {
    %c0_i32 = arith.constant 0 : i32
    %c0_i32_0 = arith.constant 0 : i32
    %c0_i32_1 = arith.constant 0 : i32
    return %c0_i32, %c0_i32_0 : i32, i32
  }
  func.func @transform_7(%arg0: i32) -> (i32, i32) {
    %c0_i32 = arith.constant 0 : i32
    %c0_i32_0 = arith.constant 0 : i32
    %c0_i32_1 = arith.constant 0 : i32
    return %c0_i32, %c0_i32_0 : i32, i32
  }
}

</mosaic_0001>

<bundles_post_ra>
// kernel: simple_net_forward.3
= control target key start
LH: loop header
LB: loop body
LE: loop exit
PB: predicated region body
PF: predicated region fallthrough
CT: control target
= control target key end

     0   :  { %vm651_vm0 = vcmask 1040384   ;;  %v23256_v0 = vmov 0.0   ;;  %v17771_v2 = vmov 0   ;;  %vm17772_vm1 = vmmov 0   ;;  %s23250_s1 = inlined_call_operand.vmem [shape: bf16[49,10], index: 1, kind: input, shape index: {}]   ;;  %s23251_s0 = inlined_call_operand.vmem [shape: bf16[9,968,49], index: 0, kind: input, shape index: {}]   ;;  %s23252_s2 = inlined_call_operand.vmem [shape: f32[1,10], index: 2, kind: input, shape index: {}]   ;;  %s23253_s3 = inlined_call_operand.vmem [shape: bf16[968,10], index: 3, kind: output, shape index: {}]  }
   0x1   :  { %14927 = vmatprep.subr.bf16.mxu0 %v23256_v0  ;;  %17195 = vmatprep.subr.bf16.mxu1 %v23256_v0  ;;  %v17206_v1 = vld [vmem:[%s23250_s1 + $0x18] ss:$0 sps:$4 sm:$0x11]   ;;  %v653_v3 = vsel %vm651_vm0, 65535, %v17771_v2  ;;  %v17207_v5 = vld [vmem:[%s23250_s1 + $0x10] sm:$0xff]   ;;  %v17208_v6 = vld [vmem:[%s23250_s1 + $0x8] sm:$0xff]  }
   0x2   :  { %14935 = vmatprep.mubr.msk.bf16.mxu0 %vm17772_vm1, %v23256_v0  ;;  %15059 = vmatprep.mubr.msk.bf16.mxu1 %vm17772_vm1, %v23256_v0  ;;  %v17802_v4 = vand.u32 %v17206_v1, %v653_v3  ;;  %v17209_v7 = vld [vmem:[%s23250_s1] sm:$0xff]   ;;  %v17211_v9 = vld [vmem:[%s23251_s0 + $0xf8] sm:$0xff]   ;;  %vm467_vm2 = vcmask 400384   ;;  %v17212_v10 = vld [vmem:[%s23251_s0 + $0x8] sm:$0xff]   ;;  %vm11903_vm3 = vcmask 76800  }
   0x3   :  { %v17210_v8 = vld [vmem:[%s23251_s0] sm:$0xff]   ;;  %v17214_v12 = vld [vmem:[%s23251_s0 + $0x10] sm:$0xff]   ;;  %v17215_v13 = vld [vmem:[%s23251_s0 + $0x108] sm:$0xff]  }
   0x4   :  { %23259 = vst [vmem:[#allocation2_spill] sm:$0xff] %v17802_v4  ;;  %14928 = vmatpush3.bf16.msra.mxu0 %v17802_v4  ;;  %17199 = vmatpush3.bf16.msra.mxu1 %v17802_v4  ;;  %v17213_v11 = vld [vmem:[%s23251_s0 + $0x100] sm:$0xff]   ;;  %v17216_v14 = vld [vmem:[%s23251_s0 + $0x18] sm:$0xff]   ;;  %v17217_v15 = vld [vmem:[%s23251_s0 + $0x110] sm:$0xff]  }
   0x5   :  { %14929 = vmatprep.subr.bf16.mxu0 %v23256_v0  ;;  %17196 = vmatprep.subr.bf16.mxu1 %v23256_v0  ;;  %v17218_v16 = vld [vmem:[%s23251_s0 + $0x20] sm:$0xff]   ;;  %v17219_v17 = vld [vmem:[%s23251_s0 + $0x118] sm:$0xff]   ;;  %v17220_v18 = vld [vmem:[%s23251_s0 + $0x28] sm:$0xff]  }
   0x6   :  { %v17221_v19 = vld [vmem:[%s23251_s0 + $0x120] sm:$0xff]   ;;  %v17222_v20 = vld [vmem:[%s23251_s0 + $0x30] sm:$0xff]   ;;  %v17223_v21 = vld [vmem:[%s23251_s0 + $0x128] sm:$0xff]  }
   0x7   :  { %v17224_v22 = vld [vmem:[%s23251_s0 + $0x38] sm:$0xff]   ;;  %v17225_v23 = vld [vmem:[%s23251_s0 + $0x130] sm:$0xff]   ;;  %v17226_v24 = vld [vmem:[%s23251_s0 + $0x40] sm:$0xff]  }
   0x8   :  { %14930 = vmatpush3.bf16.msra.mxu0 %v17207_v5  ;;  %17200 = vmatpush3.bf16.msra.mxu1 %v17207_v5  ;;  %v17227_v25 = vld [vmem:[%s23251_s0 + $0x138] sm:$0xff]   ;;  %v17228_v26 = vld [vmem:[%s23251_s0 + $0x48] sm:$0xff]   ;;  %v17229_v27 = vld [vmem:[%s23251_s0 + $0x140] sm:$0xff]  }
   0x9   :  { %14931 = vmatprep.subr.bf16.mxu0 %v23256_v0  ;;  %17197 = vmatprep.subr.bf16.mxu1 %v23256_v0  ;;  %v17230_v28 = vld [vmem:[%s23251_s0 + $0x50] sm:$0xff]   ;;  %v17231_v29 = vld [vmem:[%s23251_s0 + $0x148] sm:$0xff]   ;;  %v17232_v30 = vld [vmem:[%s23251_s0 + $0x58] sm:$0xff]  }
   0xa   :  { %v17233_v31 = vld [vmem:[%s23251_s0 + $0x150] sm:$0xff]   ;;  %v17234_v32 = vld [vmem:[%s23251_s0 + $0x60] sm:$0xff]   ;;  %v17235_v33 = vld [vmem:[%s23251_s0 + $0x158] sm:$0xff]  }
   0xb   :  { %v17236_v34 = vld [vmem:[%s23251_s0 + $0x68] sm:$0xff]   ;;  %v17237_v35 = vld [vmem:[%s23251_s0 + $0x160] sm:$0xff]   ;;  %v17238_v36 = vld [vmem:[%s23251_s0 + $0x70] sm:$0xff]  }
   0xc   :  { %14932 = vmatpush3.bf16.msra.mxu0 %v17208_v6  ;;  %17201 = vmatpush3.bf16.msra.mxu1 %v17208_v6  ;;  %v17239_v37 = vld [vmem:[%s23251_s0 + $0x168] sm:$0xff]   ;;  %v17240_v38 = vld [vmem:[%s23251_s0 + $0x78] sm:$0xff]   ;;  %v17241_v39 = vld [vmem:[%s23251_s0 + $0x170] sm:$0xff]  }
   0xd   :  { %14933 = vmatprep.subr.bf16.mxu0 %v23256_v0  ;;  %17198 = vmatprep.subr.bf16.mxu1 %v23256_v0  ;;  %v17242_v40 = vld [vmem:[%s23251_s0 + $0x80] sm:$0xff]   ;;  %v17243_v41 = vld [vmem:[%s23251_s0 + $0x178] sm:$0xff]   ;;  %v17244_v42 = vld [vmem:[%s23251_s0 + $0x88] sm:$0xff]  }
   0xe   :  { %v17245_v43 = vld [vmem:[%s23251_s0 + $0x180] sm:$0xff]   ;;  %v17246_v44 = vld [vmem:[%s23251_s0 + $0x90] sm:$0xff]   ;;  %v17247_v45 = vld [vmem:[%s23251_s0 + $0x188] sm:$0xff]  }
   0xf   :  { %v17248_v46 = vld [vmem:[%s23251_s0 + $0x98] sm:$0xff]   ;;  %v17249_v47 = vld [vmem:[%s23251_s0 + $0x190] sm:$0xff]   ;;  %v17250_v48 = vld [vmem:[%s23251_s0 + $0xa0] sm:$0xff]  }
  0x10   :  { %14934 = vmatpush3.bf16.msra.mxu0 %v17209_v7  ;;  %17202 = vmatpush3.bf16.msra.mxu1 %v17209_v7  ;;  %v17251_v49 = vld [vmem:[%s23251_s0 + $0x198] sm:$0xff]   ;;  %v17252_v50 = vld [vmem:[%s23251_s0 + $0xa8] sm:$0xff]   ;;  %v17253_v51 = vld [vmem:[%s23251_s0 + $0x1a0] sm:$0xff]  }
  0x11   :  { %15431 = vmatprep.subr.bf16.mxu0 %v23256_v0  ;;  %15179 = vmatprep.subr.bf16.mxu1 %v23256_v0  ;;  %v17254_v52 = vld [vmem:[%s23251_s0 + $0xb0] sm:$0xff]   ;;  %v17255_v53 = vld [vmem:[%s23251_s0 + $0x1a8] sm:$0xff]   ;;  %v17256_v54 = vld [vmem:[%s23251_s0 + $0xb8] sm:$0xff]  }
  0x12   :  { %v17257_v55 = vld [vmem:[%s23251_s0 + $0x1b0] sm:$0xff]   ;;  %v17258_v56 = vld [vmem:[%s23251_s0 + $0xc0] sm:$0xff]   ;;  %v17259_v57 = vld [vmem:[%s23251_s0 + $0x1b8] sm:$0xff]  }
  0x13   :  { %14936 = vmatmul.mubr.msk.bf16.vlgmr.msra.gmra.mxu0 %vm467_vm2, %v17210_v8  ;;  %15060 = vmatmul.mubr.msk.bf16.vlgmr.msra.gmra.mxu1 %vm467_vm2, %v17211_v9  ;;  %v17260_v62 = vld [vmem:[%s23251_s0 + $0xc8] sm:$0xff]   ;;  %v17261_v63 = vld [vmem:[%s23251_s0 + $0x1c0] sm:$0xff]  }
  0x14   :  { %15432 = vmatpush3.bf16.msra.mxu0 %v17802_v4  ;;  %14939 = vmatprep.mubr.msk.bf16.mxu0 %vm17772_vm1, %v23256_v0 }
  0x15   :  { %15063 = vmatprep.mubr.msk.bf16.mxu1 %vm17772_vm1, %v23256_v0  ;;  %15180 = vmatpush3.bf16.msra.mxu1 %v17802_v4 }
  0x16   :  { %15433 = vmatprep.subr.bf16.mxu0 %v23256_v0  ;;  %15181 = vmatprep.subr.bf16.mxu1 %v23256_v0 }
  0x18   :  { %15434 = vmatpush3.bf16.msra.mxu0 %v17207_v5 }
  0x19   :  { %15182 = vmatpush3.bf16.msra.mxu1 %v17207_v5  ;;  %15435 = vmatprep.subr.bf16.mxu0 %v23256_v0 }
  0x1a   :  { %15183 = vmatprep.subr.bf16.mxu1 %v23256_v0 }
  0x1b   :  { %14940 = vmatmul.mubr.msk.bf16.gmra.mxu0 %vm467_vm2, %v17212_v10  ;;  %15064 = vmatmul.mubr.msk.bf16.gmra.mxu1 %vm467_vm2, %v17213_v11  ;;  %v17262_v10 = vld [vmem:[%s23251_s0 + $0xd0] sm:$0xff]   ;;  %v17263_v11 = vld [vmem:[%s23251_s0 + $0x1c8] sm:$0xff]  }
  0x1c   :  { %14943 = vmatprep.mubr.msk.bf16.mxu0 %vm17772_vm1, %v23256_v0  ;;  %15067 = vmatprep.mubr.msk.bf16.mxu1 %vm17772_vm1, %v23256_v0 }
  0x1d   :  { %15436 = vmatpush3.bf16.msra.mxu0 %v17208_v6  ;;  %15184 = vmatpush3.bf16.msra.mxu1 %v17208_v6 }
  0x1e   :  { %15185 = vmatprep.subr.bf16.mxu1 %v23256_v0  ;;  %15437 = vmatprep.subr.bf16.mxu0 %v23256_v0 }
  0x21   :  { %15186 = vmatpush3.bf16.msra.mxu1 %v17209_v7  ;;  %15438 = vmatpush3.bf16.msra.mxu0 %v17209_v7 }
  0x22   :  { %15683 = vmatprep.subr.bf16.mxu1 %v23256_v0  ;;  %15935 = vmatprep.subr.bf16.mxu0 %v23256_v0 }
  0x23   :  { %14944 = vmatmul.mubr.msk.bf16.gmra.mxu0 %vm467_vm2, %v17214_v12  ;;  %15068 = vmatmul.mubr.msk.bf16.gmra.mxu1 %vm467_vm2, %v17215_v13 }
  0x24   :  { %14947 = vmatprep.mubr.msk.bf16.mxu0 %vm17772_vm1, %v23256_v0  ;;  %15071 = vmatprep.mubr.msk.bf16.mxu1 %vm17772_vm1, %v23256_v0 }
  0x2b   :  { %14948 = vmatmul.mubr.msk.bf16.gmra.mxu0 %vm467_vm2, %v17216_v14  ;;  %15072 = vmatmul.mubr.msk.bf16.gmra.mxu1 %vm467_vm2, %v17217_v15 }
  0x2c   :  { %14951 = vmatprep.mubr.msk.bf16.mxu0 %vm17772_vm1, %v23256_v0  ;;  %15075 = vmatprep.mubr.msk.bf16.mxu1 %vm17772_vm1, %v23256_v0 }
  0x33   :  { %14952 = vmatmul.mubr.msk.bf16.gmra.mxu0 %vm467_vm2, %v17218_v16  ;;  %15076 = vmatmul.mubr.msk.bf16.gmra.mxu1 %vm467_vm2, %v17219_v17 }
  0x34   :  { %14955 = vmatprep.mubr.msk.bf16.mxu0 %vm17772_vm1, %v23256_v0  ;;  %15079 = vmatprep.mubr.msk.bf16.mxu1 %vm17772_vm1, %v23256_v0 }
  0x3b   :  { %14956 = vmatmul.mubr.msk.bf16.gmra.mxu0 %vm467_vm2, %v17220_v18  ;;  %15080 = vmatmul.mubr.msk.bf16.gmra.mxu1 %vm467_vm2, %v17221_v19 }
  0x3c   :  { %14959 = vmatprep.mubr.msk.bf16.mxu0 %vm17772_vm1, %v23256_v0  ;;  %15083 = vmatprep.mubr.msk.bf16.mxu1 %vm17772_vm1, %v23256_v0 }
  0x43   :  { %14960 = vmatmul.mubr.msk.bf16.gmra.mxu0 %vm467_vm2, %v17222_v20  ;;  %15084 = vmatmul.mubr.msk.bf16.gmra.mxu1 %vm467_vm2, %v17223_v21  ;;  %v17264_v20 = vld [vmem:[%s23251_s0 + $0xd8] sm:$0xff]   ;;  %v17265_v21 = vld [vmem:[%s23251_s0 + $0x1d0] sm:$0xff]  }
  0x44   :  { %14963 = vmatprep.mubr.msk.bf16.mxu0 %vm17772_vm1, %v23256_v0  ;;  %15087 = vmatprep.mubr.msk.bf16.mxu1 %vm17772_vm1, %v23256_v0 }
  0x4b   :  { %14964 = vmatmul.mubr.msk.bf16.gmra.mxu0 %vm467_vm2, %v17224_v22  ;;  %15088 = vmatmul.mubr.msk.bf16.gmra.mxu1 %vm467_vm2, %v17225_v23 }
  0x4c   :  { %14967 = vmatprep.mubr.msk.bf16.mxu0 %vm17772_vm1, %v23256_v0  ;;  %15091 = vmatprep.mubr.msk.bf16.mxu1 %vm17772_vm1, %v23256_v0 }
  0x53   :  { %14968 = vmatmul.mubr.msk.bf16.gmra.mxu0 %vm467_vm2, %v17226_v24  ;;  %15092 = vmatmul.mubr.msk.bf16.gmra.mxu1 %vm467_vm2, %v17227_v25 }
  0x54   :  { %14971 = vmatprep.mubr.msk.bf16.mxu0 %vm17772_vm1, %v23256_v0  ;;  %15095 = vmatprep.mubr.msk.bf16.mxu1 %vm17772_vm1, %v23256_v0 }
  0x5b   :  { %14972 = vmatmul.mubr.msk.bf16.gmra.mxu0 %vm467_vm2, %v17228_v26  ;;  %15096 = vmatmul.mubr.msk.bf16.gmra.mxu1 %vm467_vm2, %v17229_v27 }
  0x5c   :  { %14975 = vmatprep.mubr.msk.bf16.mxu0 %vm17772_vm1, %v23256_v0  ;;  %15099 = vmatprep.mubr.msk.bf16.mxu1 %vm17772_vm1, %v23256_v0 }
  0x63   :  { %14976 = vmatmul.mubr.msk.bf16.gmra.mxu0 %vm467_vm2, %v17230_v28  ;;  %15100 = vmatmul.mubr.msk.bf16.gmra.mxu1 %vm467_vm2, %v17231_v29 }
  0x64   :  { %14979 = vmatprep.mubr.msk.bf16.mxu0 %vm17772_vm1, %v23256_v0  ;;  %15103 = vmatprep.mubr.msk.bf16.mxu1 %vm17772_vm1, %v23256_v0 }
  0x6b   :  { %14980 = vmatmul.mubr.msk.bf16.gmra.mxu0 %vm467_vm2, %v17232_v30  ;;  %15104 = vmatmul.mubr.msk.bf16.gmra.mxu1 %vm467_vm2, %v17233_v31  ;;  %v17266_v30 = vld [vmem:[%s23251_s0 + $0xe0] sm:$0xff]   ;;  %v17267_v31 = vld [vmem:[%s23251_s0 + $0x1d8] sm:$0xff]  }
  0x6c   :  { %14983 = vmatprep.mubr.msk.bf16.mxu0 %vm17772_vm1, %v23256_v0  ;;  %15107 = vmatprep.mubr.msk.bf16.mxu1 %vm17772_vm1, %v23256_v0 }
  0x73   :  { %14984 = vmatmul.mubr.msk.bf16.gmra.mxu0 %vm467_vm2, %v17234_v32  ;;  %15108 = vmatmul.mubr.msk.bf16.gmra.mxu1 %vm467_vm2, %v17235_v33 }
  0x74   :  { %14987 = vmatprep.mubr.msk.bf16.mxu0 %vm17772_vm1, %v23256_v0  ;;  %15111 = vmatprep.mubr.msk.bf16.mxu1 %vm17772_vm1, %v23256_v0 }
  0x7b   :  { %14988 = vmatmul.mubr.msk.bf16.gmra.mxu0 %vm467_vm2, %v17236_v34  ;;  %15112 = vmatmul.mubr.msk.bf16.gmra.mxu1 %vm467_vm2, %v17237_v35 }
  0x7c   :  { %14991 = vmatprep.mubr.msk.bf16.mxu0 %vm17772_vm1, %v23256_v0  ;;  %15115 = vmatprep.mubr.msk.bf16.mxu1 %vm17772_vm1, %v23256_v0 }
  0x83   :  { %14992 = vmatmul.mubr.msk.bf16.gmra.mxu0 %vm467_vm2, %v17238_v36  ;;  %15116 = vmatmul.mubr.msk.bf16.gmra.mxu1 %vm467_vm2, %v17239_v37 }
  0x84   :  { %14995 = vmatprep.mubr.msk.bf16.mxu0 %vm17772_vm1, %v23256_v0  ;;  %15119 = vmatprep.mubr.msk.bf16.mxu1 %vm17772_vm1, %v23256_v0 }
  0x8b   :  { %14996 = vmatmul.mubr.msk.bf16.gmra.mxu0 %vm467_vm2, %v17240_v38  ;;  %15120 = vmatmul.mubr.msk.bf16.gmra.mxu1 %vm467_vm2, %v17241_v39 }
  0x8c   :  { %14999 = vmatprep.mubr.msk.bf16.mxu0 %vm17772_vm1, %v23256_v0  ;;  %15123 = vmatprep.mubr.msk.bf16.mxu1 %vm17772_vm1, %v23256_v0 }
  0x93   :  { %15000 = vmatmul.mubr.msk.bf16.gmra.mxu0 %vm467_vm2, %v17242_v40  ;;  %15124 = vmatmul.mubr.msk.bf16.gmra.mxu1 %vm467_vm2, %v17243_v41  ;;  %v17268_v40 = vld [vmem:[%s23251_s0 + $0xe8] sm:$0xff]   ;;  %v17269_v41 = vld [vmem:[%s23251_s0 + $0x1e0] ss:$0 sps:$4 sm:$0xff]  }
  0x94   :  { %15003 = vmatprep.mubr.msk.bf16.mxu0 %vm17772_vm1, %v23256_v0  ;;  %15127 = vmatprep.mubr.msk.bf16.mxu1 %vm17772_vm1, %v23256_v0 }
  0x9b   :  { %15004 = vmatmul.mubr.msk.bf16.gmra.mxu0 %vm467_vm2, %v17244_v42  ;;  %15128 = vmatmul.mubr.msk.bf16.gmra.mxu1 %vm467_vm2, %v17245_v43 }
  0x9c   :  { %15007 = vmatprep.mubr.msk.bf16.mxu0 %vm17772_vm1, %v23256_v0  ;;  %15131 = vmatprep.mubr.msk.bf16.mxu1 %vm17772_vm1, %v23256_v0 }
  0xa3   :  { %15008 = vmatmul.mubr.msk.bf16.gmra.mxu0 %vm467_vm2, %v17246_v44  ;;  %15132 = vmatmul.mubr.msk.bf16.gmra.mxu1 %vm467_vm2, %v17247_v45 }
  0xa4   :  { %15011 = vmatprep.mubr.msk.bf16.mxu0 %vm17772_vm1, %v23256_v0  ;;  %15135 = vmatprep.mubr.msk.bf16.mxu1 %vm17772_vm1, %v23256_v0 }
  0xab   :  { %15012 = vmatmul.mubr.msk.bf16.gmra.mxu0 %vm467_vm2, %v17248_v46  ;;  %15136 = vmatmul.mubr.msk.bf16.gmra.mxu1 %vm467_vm2, %v17249_v47 }
  0xac   :  { %15015 = vmatprep.mubr.msk.bf16.mxu0 %vm17772_vm1, %v23256_v0  ;;  %15139 = vmatprep.mubr.msk.bf16.mxu1 %vm17772_vm1, %v23256_v0 }
  0xb3   :  { %15016 = vmatmul.mubr.msk.bf16.gmra.mxu0 %vm467_vm2, %v17250_v48  ;;  %15140 = vmatmul.mubr.msk.bf16.gmra.mxu1 %vm467_vm2, %v17251_v49 }
  0xb4   :  { %15019 = vmatprep.mubr.msk.bf16.mxu0 %vm17772_vm1, %v23256_v0  ;;  %15143 = vmatprep.mubr.msk.bf16.mxu1 %vm17772_vm1, %v23256_v0 }
  0xbb   :  { %15020 = vmatmul.mubr.msk.bf16.gmra.mxu0 %vm467_vm2, %v17252_v50  ;;  %15144 = vmatmul.mubr.msk.bf16.gmra.mxu1 %vm467_vm2, %v17253_v51  ;;  %v17270_v50 = vld [vmem:[%s23251_s0 + $0xf0] sm:$0xff]   ;;  %v17271_v51 = vld [vmem:[%s23251_s0 + $0x1e4] sm:$0xff]  }
  0xbc   :  { %15023 = vmatprep.mubr.msk.bf16.mxu0 %vm17772_vm1, %v23256_v0  ;;  %15147 = vmatprep.mubr.msk.bf16.mxu1 %vm17772_vm1, %v23256_v0 }
  0xc3   :  { %15024 = vmatmul.mubr.msk.bf16.gmra.mxu0 %vm467_vm2, %v17254_v52  ;;  %15148 = vmatmul.mubr.msk.bf16.gmra.mxu1 %vm467_vm2, %v17255_v53 }
  0xc4   :  { %15027 = vmatprep.mubr.msk.bf16.mxu0 %vm17772_vm1, %v23256_v0  ;;  %15151 = vmatprep.mubr.msk.bf16.mxu1 %vm17772_vm1, %v23256_v0 }
  0xcb   :  { %15028 = vmatmul.mubr.msk.bf16.gmra.mxu0 %vm467_vm2, %v17256_v54  ;;  %15152 = vmatmul.mubr.msk.bf16.gmra.mxu1 %vm467_vm2, %v17257_v55 }
  0xcc   :  { %15031 = vmatprep.mubr.msk.bf16.mxu0 %vm17772_vm1, %v23256_v0  ;;  %15155 = vmatprep.mubr.msk.bf16.mxu1 %vm17772_vm1, %v23256_v0 }
  0xd3   :  { %v18127_v58 = vpop.f32.mrf.mxu0  ;;  %15032 = vmatmul.mubr.msk.bf16.gmra.mxu0 %vm467_vm2, %v17258_v56  ;;  %v18130_v59 = vpop.f32.mrf.mxu1  ;;  %15156 = vmatmul.mubr.msk.bf16.gmra.mxu1 %vm467_vm2, %v17259_v57 }
  0xd4   :  { %23260 = vst [vmem:[#allocation3_spill] sm:$0xff] %v18130_v59  ;;  %15035 = vmatprep.mubr.msk.bf16.mxu0 %vm17772_vm1, %v23256_v0  ;;  %15159 = vmatprep.mubr.msk.bf16.mxu1 %vm17772_vm1, %v23256_v0 }
  0xd5   :  { %v14937_v60 = vpop.f32.mrf.mxu0  ;;  %v15061_v61 = vpop.f32.mrf.mxu1 }
  0xd7   :  { %v18143_v1 = vpop.f32.mrf.mxu0  ;;  %v18145_v2 = vpop.f32.mrf.mxu1 }
  0xd8   :  { %23261 = vst [vmem:[#allocation4_spill] sm:$0xff] %v18145_v2 }
  0xd9   :  { %v14938_v3 = vpop.f32.mrf.mxu0  ;;  %v15062_v5 = vpop.f32.mrf.mxu1 }
  0xdb   :  { %v18147_v6 = vpop.f32.mrf.mxu0  ;;  %15036 = vmatmul.mubr.msk.bf16.gmra.mxu0 %vm467_vm2, %v17260_v62  ;;  %v18150_v7 = vpop.f32.mrf.mxu1  ;;  %15160 = vmatmul.mubr.msk.bf16.gmra.mxu1 %vm467_vm2, %v17261_v63  ;;  %v17272_v62 = vld [vmem:[%s23251_s0 + $0x1ec] sm:$0xff]  }
  0xdc   :  { %23262 = vst [vmem:[#allocation5_spill] sm:$0xff] %v18150_v7  ;;  %15039 = vmatprep.mubr.msk.bf16.mxu0 %vm17772_vm1, %v23256_v0  ;;  %15163 = vmatprep.mubr.msk.bf16.mxu1 %vm17772_vm1, %v23256_v0  ;;  %v17273_v63 = vld [vmem:[%s23251_s0 + $0x3c8] sm:$0xff]  }
  0xdd   :  { %v14941_v8 = vpop.f32.mrf.mxu0  ;;  %v15065_v9 = vpop.f32.mrf.mxu1 }
  0xdf   :  { %v18163_v12 = vpop.f32.mrf.mxu0  ;;  %v18165_v13 = vpop.f32.mrf.mxu1 }
  0xe0   :  { %23263 = vst [vmem:[#allocation6_spill] sm:$0xff] %v18165_v13 }
  0xe1   :  { %v14942_v14 = vpop.f32.mrf.mxu0  ;;  %v15066_v15 = vpop.f32.mrf.mxu1 }
  0xe3   :  { %v18167_v16 = vpop.f32.mrf.mxu0  ;;  %15040 = vmatmul.mubr.msk.bf16.gmra.mxu0 %vm467_vm2, %v17262_v10  ;;  %v18170_v17 = vpop.f32.mrf.mxu1  ;;  %15164 = vmatmul.mubr.msk.bf16.gmra.mxu1 %vm467_vm2, %v17263_v11  ;;  %v17759_v10 = vld [vmem:[%s23250_s1 + $0x10] sm:$0xff]  }
  0xe4   :  { %23264 = vst [vmem:[#allocation7_spill] sm:$0xff] %v18170_v17  ;;  %15043 = vmatprep.mubr.msk.bf16.mxu0 %vm17772_vm1, %v23256_v0  ;;  %15167 = vmatprep.mubr.msk.bf16.mxu1 %vm17772_vm1, %v23256_v0 }
  0xe5   :  { %v14945_v18 = vpop.f32.mrf.mxu0  ;;  %v15069_v19 = vpop.f32.mrf.mxu1 }
  0xe6   :  { %v17274_v19 = vld [vmem:[%s23251_s0 + $0x1f4] sm:$0xff]  }
  0xe7   :  { %v18183_v22 = vpop.f32.mrf.mxu0  ;;  %v18185_v23 = vpop.f32.mrf.mxu1 }
  0xe8   :  { %23265 = vst [vmem:[#allocation8_spill] sm:$0xff] %v18185_v23 }
  0xe9   :  { %v14946_v24 = vpop.f32.mrf.mxu0  ;;  %v15070_v25 = vpop.f32.mrf.mxu1 }
  0xeb   :  { %v18187_v26 = vpop.f32.mrf.mxu0  ;;  %15044 = vmatmul.mubr.msk.bf16.gmra.mxu0 %vm467_vm2, %v17264_v20  ;;  %v18190_v27 = vpop.f32.mrf.mxu1  ;;  %15168 = vmatmul.mubr.msk.bf16.gmra.mxu1 %vm467_vm2, %v17265_v21  ;;  %v17275_v20 = vld [vmem:[%s23251_s0 + $0x3d0] sm:$0xff]   ;;  %v17760_v21 = vld [vmem:[%s23250_s1 + $0x8] sm:$0xff]  }
  0xec   :  { %23266 = vst [vmem:[#allocation9_spill] sm:$0xff] %v18190_v27  ;;  %15047 = vmatprep.mubr.msk.bf16.mxu0 %vm17772_vm1, %v23256_v0  ;;  %15171 = vmatprep.mubr.msk.bf16.mxu1 %vm17772_vm1, %v23256_v0 }
  0xed   :  { %v14949_v28 = vpop.f32.mrf.mxu0  ;;  %v15073_v29 = vpop.f32.mrf.mxu1 }
  0xef   :  { %v18203_v32 = vpop.f32.mrf.mxu0  ;;  %v18205_v33 = vpop.f32.mrf.mxu1 }
  0xf0   :  { %23267 = vst [vmem:[#allocation10_spill] sm:$0xff] %v18205_v33 }
  0xf1   :  { %v14950_v34 = vpop.f32.mrf.mxu0  ;;  %v15074_v35 = vpop.f32.mrf.mxu1 }
  0xf3   :  { %v18207_v36 = vpop.f32.mrf.mxu0  ;;  %15048 = vmatmul.mubr.msk.bf16.gmra.mxu0 %vm467_vm2, %v17266_v30  ;;  %v18210_v37 = vpop.f32.mrf.mxu1  ;;  %15172 = vmatmul.mubr.msk.bf16.gmra.mxu1 %vm467_vm2, %v17267_v31  ;;  %v17761_v30 = vld [vmem:[%s23250_s1] sm:$0xff]  }
  0xf4   :  { %23268 = vst [vmem:[#allocation11_spill] sm:$0xff] %v18210_v37  ;;  %15051 = vmatprep.mubr.msk.bf16.mxu0 %vm17772_vm1, %v23256_v0  ;;  %15175 = vmatprep.mubr.msk.bf16.mxu1 %vm17772_vm1, %v23256_v0 }
  0xf5   :  { %v14953_v38 = vpop.f32.mrf.mxu0  ;;  %v15077_v39 = vpop.f32.mrf.mxu1 }
  0xf6   :  { %v17276_v39 = vld [vmem:[%s23251_s0 + $0x1fc] sm:$0xff]  }
  0xf7   :  { %v18223_v42 = vpop.f32.mrf.mxu0  ;;  %v18225_v43 = vpop.f32.mrf.mxu1 }
  0xf8   :  { %23269 = vst [vmem:[#allocation12_spill] sm:$0xff] %v18225_v43 }
  0xf9   :  { %v14954_v44 = vpop.f32.mrf.mxu0  ;;  %v15078_v45 = vpop.f32.mrf.mxu1 }
  0xfb   :  { %v18227_v46 = vpop.f32.mrf.mxu0  ;;  %15052 = vmatmul.mubr.msk.bf16.gmra.mxu0 %vm467_vm2, %v17268_v40  ;;  %v18230_v47 = vpop.f32.mrf.mxu1  ;;  %15176 = vmatmul.mubr.msk.bf16.gmra.mxu1 %vm467_vm2, %v17269_v41  ;;  %v17277_v40 = vld [vmem:[%s23251_s0 + $0x3d8] sm:$0xff]  }
  0xfc   :  { %23270 = vst [vmem:[#allocation13_spill] sm:$0xff] %v18230_v47  ;;  %15055 = vmatprep.mubr.msk.bf16.mxu0 %vm17772_vm1, %v23256_v0  ;;  %15187 = vmatprep.mubr.msk.bf16.mxu1 %vm17772_vm1, %v23256_v0 }
  0xfd   :  { %v14957_v48 = vpop.f32.mrf.mxu0  ;;  %v15081_v49 = vpop.f32.mrf.mxu1 }
  0xff   :  { %v18243_v52 = vpop.f32.mrf.mxu0  ;;  %v18245_v53 = vpop.f32.mrf.mxu1 }
 0x100   :  { %23271 = vst [vmem:[#allocation14_spill] sm:$0xff] %v18245_v53 }
 0x101   :  { %v14958_v54 = vpop.f32.mrf.mxu0  ;;  %v15082_v55 = vpop.f32.mrf.mxu1 }
 0x102   :  { %v17278_v55 = vld [vmem:[%s23251_s0 + $0x204] sm:$0xff]  }
 0x103   :  { %v18247_v56 = vpop.f32.mrf.mxu0  ;;  %15056 = vmatmul.mubr.msk.bf16.gmra.mxu0 %vm467_vm2, %v17270_v50  ;;  %v18250_v57 = vpop.f32.mrf.mxu1  ;;  %15188 = vmatmul.mubr.msk.bf16.vlgmr.msra.gmra.mxu1 %vm467_vm2, %v17271_v51 }
 0x104   :  { %23272 = vst [vmem:[#allocation15_spill] sm:$0xff] %v18250_v57  ;;  %15191 = vmatprep.mubr.msk.bf16.mxu1 %vm17772_vm1, %v23256_v0  ;;  %15439 = vmatprep.mubr.msk.bf16.mxu0 %vm17772_vm1, %v23256_v0 }
 0x105   :  { %v14961_v60 = vpop.f32.mrf.mxu0  ;;  %v15085_v61 = vpop.f32.mrf.mxu1  ;;  %15684 = vmatpush3.bf16.msra.mxu1 %v17802_v4 }
 0x106   :  { %15685 = vmatprep.subr.bf16.mxu1 %v23256_v0  ;;  %v17279_v60 = vld [vmem:[%s23251_s0 + $0x3e0] sm:$0xff]  }
 0x107   :  { %v18265_v3 = vpop.f32.mrf.mxu0  ;;  %v18267_v5 = vpop.f32.mrf.mxu1 }
 0x108   :  { %23273 = vst [vmem:[#allocation16_spill] sm:$0xff] %v18267_v5 }
 0x109   :  { %v14962_v8 = vpop.f32.mrf.mxu0  ;;  %v15086_v9 = vpop.f32.mrf.mxu1  ;;  %15686 = vmatpush3.bf16.msra.mxu1 %v17759_v10 }
 0x10a   :  { %15687 = vmatprep.subr.bf16.mxu1 %v23256_v0 }
 0x10b   :  { %v18273_v11 = vpop.f32.mrf.mxu0  ;;  %v18275_v14 = vpop.f32.mrf.mxu1  ;;  %15192 = vmatmul.mubr.msk.bf16.gmra.mxu1 %vm467_vm2, %v17272_v62  ;;  %15440 = vmatmul.mubr.msk.bf16.vlgmr.msra.gmra.mxu0 %vm467_vm2, %v17273_v63 }
 0x10c   :  { %23274 = vst [vmem:[#allocation17_spill] sm:$0xff] %v18275_v14  ;;  %15936 = vmatpush3.bf16.msra.mxu0 %v17802_v4  ;;  %15195 = vmatprep.mubr.msk.bf16.mxu1 %vm17772_vm1, %v23256_v0 }
 0x10d   :  { %v14965_v15 = vpop.f32.mrf.mxu0  ;;  %v15089_v18 = vpop.f32.mrf.mxu1  ;;  %15443 = vmatprep.mubr.msk.bf16.mxu0 %vm17772_vm1, %v23256_v0  ;;  %15937 = vmatprep.subr.bf16.mxu0 %v23256_v0 }
 0x10e   :  { %15688 = vmatpush3.bf16.msra.mxu1 %v17760_v21 }
 0x10f   :  { %v18294_v24 = vpop.f32.mrf.mxu0  ;;  %v18296_v25 = vpop.f32.mrf.mxu1  ;;  %15689 = vmatprep.subr.bf16.mxu1 %v23256_v0 }
 0x110   :  { %23275 = vst [vmem:[#allocation18_spill] sm:$0xff] %v18296_v25  ;;  %15938 = vmatpush3.bf16.msra.mxu0 %v17759_v10 }
 0x111   :  { %v14966_v28 = vpop.f32.mrf.mxu0  ;;  %v15090_v29 = vpop.f32.mrf.mxu1  ;;  %15939 = vmatprep.subr.bf16.mxu0 %v23256_v0 }
 0x112   :  { %15690 = vmatpush3.bf16.msra.mxu1 %v17761_v30 }
 0x113   :  { %v18303_v31 = vpop.f32.mrf.mxu0  ;;  %v18305_v34 = vpop.f32.mrf.mxu1  ;;  %15196 = vmatmul.mubr.msk.bf16.gmra.mxu1 %vm467_vm2, %v17274_v19  ;;  %15444 = vmatmul.mubr.msk.bf16.gmra.mxu0 %vm467_vm2, %v17275_v20  ;;  %v17280_v19 = vld [vmem:[%s23251_s0 + $0x20c] sm:$0xff]  }
 0x114   :  { %23276 = vst [vmem:[#allocation19_spill] sm:$0xff] %v18305_v34  ;;  %15199 = vmatprep.mubr.msk.bf16.mxu1 %vm17772_vm1, %v23256_v0  ;;  %15447 = vmatprep.mubr.msk.bf16.mxu0 %vm17772_vm1, %v23256_v0  ;;  %v17281_v20 = vld [vmem:[%s23251_s0 + $0x3e8] sm:$0xff]  }
 0x115   :  { %v14969_v35 = vpop.f32.mrf.mxu0  ;;  %v15093_v38 = vpop.f32.mrf.mxu1  ;;  %15940 = vmatpush3.bf16.msra.mxu0 %v17760_v21  ;;  %16187 = vmatprep.subr.bf16.mxu1 %v23256_v0 }
 0x116   :  { %15941 = vmatprep.subr.bf16.mxu0 %v23256_v0 }
 0x117   :  { %v18321_v41 = vpop.f32.mrf.mxu0  ;;  %v18323_v44 = vpop.f32.mrf.mxu1 }
 0x118   :  { %23277 = vst [vmem:[#allocation20_spill] sm:$0xff] %v18323_v44 }
 0x119   :  { %v14970_v45 = vpop.f32.mrf.mxu0  ;;  %v15094_v48 = vpop.f32.mrf.mxu1  ;;  %15942 = vmatpush3.bf16.msra.mxu0 %v17761_v30 }
 0x11a   :  { %16439 = vmatprep.subr.bf16.mxu0 %v23256_v0  ;;  %v17282_v45 = vld [vmem:[%s23251_s0 + $0x214] sm:$0xff]  }
 0x11b   :  { %v18326_v49 = vpop.f32.mrf.mxu0  ;;  %v18328_v50 = vpop.f32.mrf.mxu1  ;;  %15200 = vmatmul.mubr.msk.bf16.gmra.mxu1 %vm467_vm2, %v17276_v39  ;;  %15448 = vmatmul.mubr.msk.bf16.gmra.mxu0 %vm467_vm2, %v17277_v40  ;;  %v17283_v48 = vld [vmem:[%s23251_s0 + $0x3f0] sm:$0xff]  }
 0x11c   :  { %23278 = vst [vmem:[#allocation21_spill] sm:$0xff] %v18328_v50  ;;  %15203 = vmatprep.mubr.msk.bf16.mxu1 %vm17772_vm1, %v23256_v0  ;;  %15451 = vmatprep.mubr.msk.bf16.mxu0 %vm17772_vm1, %v23256_v0 }
 0x11d   :  { %v14973_v51 = vpop.f32.mrf.mxu0  ;;  %v15097_v54 = vpop.f32.mrf.mxu1 }
 0x11f   :  { %v18342_v61 = vpop.f32.mrf.mxu0  ;;  %v18344_v62 = vpop.f32.mrf.mxu1 }
 0x120   :  { %23279 = vst [vmem:[#allocation22_spill] sm:$0xff] %v18344_v62 }
 0x121   :  { %v14974_v63 = vpop.f32.mrf.mxu0  ;;  %v15098_v8 = vpop.f32.mrf.mxu1 }
 0x123   :  { %v18346_v9 = vpop.f32.mrf.mxu0  ;;  %v18348_v10 = vpop.f32.mrf.mxu1  ;;  %15204 = vmatmul.mubr.msk.bf16.gmra.mxu1 %vm467_vm2, %v17278_v55  ;;  %15452 = vmatmul.mubr.msk.bf16.gmra.mxu0 %vm467_vm2, %v17279_v60 }
 0x124   :  { %23280 = vst [vmem:[#allocation23_spill] sm:$0xff] %v18348_v10  ;;  %15207 = vmatprep.mubr.msk.bf16.mxu1 %vm17772_vm1, %v23256_v0  ;;  %15455 = vmatprep.mubr.msk.bf16.mxu0 %vm17772_vm1, %v23256_v0 }
 0x125   :  { %v14977_v15 = vpop.f32.mrf.mxu0  ;;  %v15101_v18 = vpop.f32.mrf.mxu1 }
 0x127   :  { %v18362_v21 = vpop.f32.mrf.mxu0  ;;  %v18364_v28 = vpop.f32.mrf.mxu1 }
 0x128   :  { %23281 = vst [vmem:[#allocation24_spill] sm:$0xff] %v18364_v28 }
 0x129   :  { %v14978_v29 = vpop.f32.mrf.mxu0  ;;  %v15102_v30 = vpop.f32.mrf.mxu1 }
 0x12b   :  { %v18366_v35 = vpop.f32.mrf.mxu0  ;;  %v18368_v38 = vpop.f32.mrf.mxu1  ;;  %15208 = vmatmul.mubr.msk.bf16.gmra.mxu1 %vm467_vm2, %v17280_v19  ;;  %15456 = vmatmul.mubr.msk.bf16.gmra.mxu0 %vm467_vm2, %v17281_v20  ;;  %v17284_v19 = vld [vmem:[%s23251_s0 + $0x21c] sm:$0xff]  }
 0x12c   :  { %23282 = vst [vmem:[#allocation25_spill] sm:$0xff] %v18368_v38  ;;  %15211 = vmatprep.mubr.msk.bf16.mxu1 %vm17772_vm1, %v23256_v0  ;;  %15459 = vmatprep.mubr.msk.bf16.mxu0 %vm17772_vm1, %v23256_v0  ;;  %v17285_v20 = vld [vmem:[%s23251_s0 + $0x3f8] sm:$0xff]  }
 0x12d   :  { %v14981_v39 = vpop.f32.mrf.mxu0  ;;  %v15105_v40 = vpop.f32.mrf.mxu1 }
 0x12f   :  { %v18382_v51 = vpop.f32.mrf.mxu0  ;;  %v18384_v54 = vpop.f32.mrf.mxu1 }
 0x130   :  { %23283 = vst [vmem:[#allocation26_spill] sm:$0xff] %v18384_v54 }
 0x131   :  { %v14982_v55 = vpop.f32.mrf.mxu0  ;;  %v15106_v60 = vpop.f32.mrf.mxu1 }
 0x133   :  { %v18386_v63 = vpop.f32.mrf.mxu0  ;;  %v18388_v8 = vpop.f32.mrf.mxu1  ;;  %15212 = vmatmul.mubr.msk.bf16.gmra.mxu1 %vm467_vm2, %v17282_v45  ;;  %15460 = vmatmul.mubr.msk.bf16.gmra.mxu0 %vm467_vm2, %v17283_v48 }
 0x134   :  { %23284 = vst [vmem:[#allocation27_spill] sm:$0xff] %v18388_v8  ;;  %15215 = vmatprep.mubr.msk.bf16.mxu1 %vm17772_vm1, %v23256_v0  ;;  %15463 = vmatprep.mubr.msk.bf16.mxu0 %vm17772_vm1, %v23256_v0 }
 0x135   :  { %v14985_v15 = vpop.f32.mrf.mxu0  ;;  %v15109_v18 = vpop.f32.mrf.mxu1 }
 0x136   :  { %v17286_v15 = vld [vmem:[%s23251_s0 + $0x224] sm:$0xff]  }
 0x137   :  { %v18402_v29 = vpop.f32.mrf.mxu0  ;;  %v18404_v30 = vpop.f32.mrf.mxu1  ;;  %v17287_v18 = vld [vmem:[%s23251_s0 + $0x400] sm:$0xff]  }
 0x138   :  { %23285 = vst [vmem:[#allocation28_spill] sm:$0xff] %v18404_v30 }
 0x139   :  { %v14986_v39 = vpop.f32.mrf.mxu0  ;;  %v15110_v40 = vpop.f32.mrf.mxu1 }
 0x13b   :  { %v18406_v45 = vpop.f32.mrf.mxu0  ;;  %v18408_v48 = vpop.f32.mrf.mxu1  ;;  %15216 = vmatmul.mubr.msk.bf16.gmra.mxu1 %vm467_vm2, %v17284_v19  ;;  %15464 = vmatmul.mubr.msk.bf16.gmra.mxu0 %vm467_vm2, %v17285_v20 }
 0x13c   :  { %23286 = vst [vmem:[#allocation29_spill] sm:$0xff] %v18408_v48  ;;  %15219 = vmatprep.mubr.msk.bf16.mxu1 %vm17772_vm1, %v23256_v0  ;;  %15467 = vmatprep.mubr.msk.bf16.mxu0 %vm17772_vm1, %v23256_v0 }
 0x13d   :  { %v14989_v55 = vpop.f32.mrf.mxu0  ;;  %v15113_v60 = vpop.f32.mrf.mxu1 }
 0x13f   :  { %v18422_v39 = vpop.f32.mrf.mxu0  ;;  %v18424_v19 = vpop.f32.mrf.mxu1 }
 0x140   :  { %23287 = vst [vmem:[#allocation30_spill] sm:$0xff] %v18424_v19 }
 0x141   :  { %v14990_v20 = vpop.f32.mrf.mxu0  ;;  %v15114_v40 = vpop.f32.mrf.mxu1 }
 0x142   :  { %v17288_v20 = vld [vmem:[%s23251_s0 + $0x22c] sm:$0xff]  }
 0x143   :  { %v18426_v48 = vpop.f32.mrf.mxu0  ;;  %v18428_v30 = vpop.f32.mrf.mxu1  ;;  %15220 = vmatmul.mubr.msk.bf16.gmra.mxu1 %vm467_vm2, %v17286_v15  ;;  %15468 = vmatmul.mubr.msk.bf16.gmra.mxu0 %vm467_vm2, %v17287_v18  ;;  %v17289_v40 = vld [vmem:[%s23251_s0 + $0x408] sm:$0xff]  }
 0x144   :  { %23288 = vst [vmem:[#allocation31_spill] sm:$0xff] %v18428_v30  ;;  %15223 = vmatprep.mubr.msk.bf16.mxu1 %vm17772_vm1, %v23256_v0  ;;  %15471 = vmatprep.mubr.msk.bf16.mxu0 %vm17772_vm1, %v23256_v0 }
 0x145   :  { %v14993_v55 = vpop.f32.mrf.mxu0  ;;  %v15117_v60 = vpop.f32.mrf.mxu1 }
 0x147   :  { %v18442_v30 = vpop.f32.mrf.mxu0  ;;  %v18444_v15 = vpop.f32.mrf.mxu1 }
 0x148   :  { %23289 = vst [vmem:[#allocation32_spill] sm:$0xff] %v18444_v15 }
 0x149   :  { %v14994_v18 = vpop.f32.mrf.mxu0  ;;  %v15118_v19 = vpop.f32.mrf.mxu1 }
 0x14a   :  { %v17290_v19 = vld [vmem:[%s23251_s0 + $0x234] sm:$0xff]  }
 0x14b   :  { %v18446_v8 = vpop.f32.mrf.mxu0  ;;  %v18448_v54 = vpop.f32.mrf.mxu1  ;;  %15224 = vmatmul.mubr.msk.bf16.gmra.mxu1 %vm467_vm2, %v17288_v20  ;;  %15472 = vmatmul.mubr.msk.bf16.gmra.mxu0 %vm467_vm2, %v17289_v40  ;;  %v17291_v18 = vld [vmem:[%s23251_s0 + $0x410] sm:$0xff]  }
 0x14c   :  { %23290 = vst [vmem:[#allocation33_spill] sm:$0xff] %v18448_v54  ;;  %15227 = vmatprep.mubr.msk.bf16.mxu1 %vm17772_vm1, %v23256_v0  ;;  %15475 = vmatprep.mubr.msk.bf16.mxu0 %vm17772_vm1, %v23256_v0 }
 0x14d   :  { %v14997_v55 = vpop.f32.mrf.mxu0  ;;  %v15121_v60 = vpop.f32.mrf.mxu1 }
 0x14f   :  { %v18462_v54 = vpop.f32.mrf.mxu0  ;;  %v18464_v20 = vpop.f32.mrf.mxu1 }
 0x150   :  { %23291 = vst [vmem:[#allocation34_spill] sm:$0xff] %v18464_v20 }
 0x151   :  { %v14998_v40 = vpop.f32.mrf.mxu0  ;;  %v15122_v15 = vpop.f32.mrf.mxu1 }
 0x152   :  { %v17292_v15 = vld [vmem:[%s23251_s0 + $0x23c] sm:$0xff]  }
 0x153   :  { %v18466_v38 = vpop.f32.mrf.mxu0  ;;  %v18468_v28 = vpop.f32.mrf.mxu1  ;;  %15228 = vmatmul.mubr.msk.bf16.gmra.mxu1 %vm467_vm2, %v17290_v19  ;;  %15476 = vmatmul.mubr.msk.bf16.gmra.mxu0 %vm467_vm2, %v17291_v18  ;;  %v17293_v40 = vld [vmem:[%s23251_s0 + $0x418] sm:$0xff]  }
 0x154   :  { %23292 = vst [vmem:[#allocation35_spill] sm:$0xff] %v18468_v28  ;;  %15231 = vmatprep.mubr.msk.bf16.mxu1 %vm17772_vm1, %v23256_v0  ;;  %15479 = vmatprep.mubr.msk.bf16.mxu0 %vm17772_vm1, %v23256_v0 }
 0x155   :  { %v15001_v55 = vpop.f32.mrf.mxu0  ;;  %v15125_v60 = vpop.f32.mrf.mxu1 }
 0x157   :  { %v18482_v28 = vpop.f32.mrf.mxu0  ;;  %v18484_v19 = vpop.f32.mrf.mxu1 }
 0x158   :  { %23293 = vst [vmem:[#allocation36_spill] sm:$0xff] %v18484_v19 }
 0x159   :  { %v15002_v18 = vpop.f32.mrf.mxu0  ;;  %v15126_v20 = vpop.f32.mrf.mxu1 }
 0x15a   :  { %v17294_v20 = vld [vmem:[%s23251_s0 + $0x244] sm:$0xff]  }
 0x15b   :  { %v18486_v10 = vpop.f32.mrf.mxu0  ;;  %v18488_v62 = vpop.f32.mrf.mxu1  ;;  %15232 = vmatmul.mubr.msk.bf16.gmra.mxu1 %vm467_vm2, %v17292_v15  ;;  %15480 = vmatmul.mubr.msk.bf16.gmra.mxu0 %vm467_vm2, %v17293_v40  ;;  %v17295_v18 = vld [vmem:[%s23251_s0 + $0x420] sm:$0xff]  }
 0x15c   :  { %23294 = vst [vmem:[#allocation37_spill] sm:$0xff] %v18488_v62  ;;  %15235 = vmatprep.mubr.msk.bf16.mxu1 %vm17772_vm1, %v23256_v0  ;;  %15483 = vmatprep.mubr.msk.bf16.mxu0 %vm17772_vm1, %v23256_v0 }
 0x15d   :  { %v15005_v55 = vpop.f32.mrf.mxu0  ;;  %v15129_v60 = vpop.f32.mrf.mxu1 }
 0x15f   :  { %v18502_v62 = vpop.f32.mrf.mxu0  ;;  %v18504_v15 = vpop.f32.mrf.mxu1 }
 0x160   :  { %23295 = vst [vmem:[#allocation38_spill] sm:$0xff] %v18504_v15 }
 0x161   :  { %v15006_v40 = vpop.f32.mrf.mxu0  ;;  %v15130_v19 = vpop.f32.mrf.mxu1 }
 0x162   :  { %v17296_v19 = vld [vmem:[%s23251_s0 + $0x24c] sm:$0xff]  }
 0x163   :  { %v18506_v50 = vpop.f32.mrf.mxu0  ;;  %v18508_v44 = vpop.f32.mrf.mxu1  ;;  %15236 = vmatmul.mubr.msk.bf16.gmra.mxu1 %vm467_vm2, %v17294_v20  ;;  %15484 = vmatmul.mubr.msk.bf16.gmra.mxu0 %vm467_vm2, %v17295_v18  ;;  %v17297_v40 = vld [vmem:[%s23251_s0 + $0x428] sm:$0xff]  }
 0x164   :  { %23296 = vst [vmem:[#allocation39_spill] sm:$0xff] %v18508_v44  ;;  %15239 = vmatprep.mubr.msk.bf16.mxu1 %vm17772_vm1, %v23256_v0  ;;  %15487 = vmatprep.mubr.msk.bf16.mxu0 %vm17772_vm1, %v23256_v0 }
 0x165   :  { %v15009_v55 = vpop.f32.mrf.mxu0  ;;  %v15133_v60 = vpop.f32.mrf.mxu1 }
 0x167   :  { %v18522_v44 = vpop.f32.mrf.mxu0  ;;  %v18524_v20 = vpop.f32.mrf.mxu1 }
 0x168   :  { %23297 = vst [vmem:[#allocation40_spill] sm:$0xff] %v18524_v20 }
 0x169   :  { %v15010_v18 = vpop.f32.mrf.mxu0  ;;  %v15134_v15 = vpop.f32.mrf.mxu1 }
 0x16a   :  { %v17298_v15 = vld [vmem:[%s23251_s0 + $0x254] sm:$0xff]  }
 0x16b   :  { %v18526_v34 = vpop.f32.mrf.mxu0  ;;  %v18528_v25 = vpop.f32.mrf.mxu1  ;;  %15240 = vmatmul.mubr.msk.bf16.gmra.mxu1 %vm467_vm2, %v17296_v19  ;;  %15488 = vmatmul.mubr.msk.bf16.gmra.mxu0 %vm467_vm2, %v17297_v40  ;;  %v17299_v18 = vld [vmem:[%s23251_s0 + $0x430] sm:$0xff]  }
 0x16c   :  { %23298 = vst [vmem:[#allocation41_spill] sm:$0xff] %v18528_v25  ;;  %15243 = vmatprep.mubr.msk.bf16.mxu1 %vm17772_vm1, %v23256_v0  ;;  %15491 = vmatprep.mubr.msk.bf16.mxu0 %vm17772_vm1, %v23256_v0 }
 0x16d   :  { %v15013_v55 = vpop.f32.mrf.mxu0  ;;  %v15137_v60 = vpop.f32.mrf.mxu1 }
 0x16f   :  { %v18542_v25 = vpop.f32.mrf.mxu0  ;;  %v18544_v19 = vpop.f32.mrf.mxu1 }
 0x170   :  { %23299 = vst [vmem:[#allocation42_spill] sm:$0xff] %v18544_v19 }
 0x171   :  { %v15014_v40 = vpop.f32.mrf.mxu0  ;;  %v15138_v20 = vpop.f32.mrf.mxu1 }
 0x172   :  { %v17300_v20 = vld [vmem:[%s23251_s0 + $0x25c] sm:$0xff]  }
 0x173   :  { %v18546_v14 = vpop.f32.mrf.mxu0  ;;  %v18548_v5 = vpop.f32.mrf.mxu1  ;;  %15244 = vmatmul.mubr.msk.bf16.gmra.mxu1 %vm467_vm2, %v17298_v15  ;;  %15492 = vmatmul.mubr.msk.bf16.gmra.mxu0 %vm467_vm2, %v17299_v18  ;;  %v17301_v40 = vld [vmem:[%s23251_s0 + $0x438] sm:$0xff]  }
 0x174   :  { %23300 = vst [vmem:[#allocation43_spill] sm:$0xff] %v18548_v5  ;;  %15247 = vmatprep.mubr.msk.bf16.mxu1 %vm17772_vm1, %v23256_v0  ;;  %15495 = vmatprep.mubr.msk.bf16.mxu0 %vm17772_vm1, %v23256_v0 }
 0x175   :  { %v15017_v55 = vpop.f32.mrf.mxu0  ;;  %v15141_v60 = vpop.f32.mrf.mxu1 }
 0x177   :  { %v18562_v5 = vpop.f32.mrf.mxu0  ;;  %v18564_v15 = vpop.f32.mrf.mxu1 }
 0x178   :  { %23301 = vst [vmem:[#allocation44_spill] sm:$0xff] %v18564_v15 }
 0x179   :  { %v15018_v18 = vpop.f32.mrf.mxu0  ;;  %v15142_v19 = vpop.f32.mrf.mxu1 }
 0x17a   :  { %v17302_v19 = vld [vmem:[%s23251_s0 + $0x264] sm:$0xff]  }
 0x17b   :  { %v18566_v57 = vpop.f32.mrf.mxu0  ;;  %v18568_v53 = vpop.f32.mrf.mxu1  ;;  %15248 = vmatmul.mubr.msk.bf16.gmra.mxu1 %vm467_vm2, %v17300_v20  ;;  %15496 = vmatmul.mubr.msk.bf16.gmra.mxu0 %vm467_vm2, %v17301_v40  ;;  %v17303_v18 = vld [vmem:[%s23251_s0 + $0x440] sm:$0xff]  }
 0x17c   :  { %23302 = vst [vmem:[#allocation45_spill] sm:$0xff] %v18568_v53  ;;  %15251 = vmatprep.mubr.msk.bf16.mxu1 %vm17772_vm1, %v23256_v0  ;;  %15499 = vmatprep.mubr.msk.bf16.mxu0 %vm17772_vm1, %v23256_v0 }
 0x17d   :  { %v15021_v55 = vpop.f32.mrf.mxu0  ;;  %v15145_v60 = vpop.f32.mrf.mxu1 }
 0x17f   :  { %v18582_v53 = vpop.f32.mrf.mxu0  ;;  %v18584_v20 = vpop.f32.mrf.mxu1 }
 0x180   :  { %23303 = vst [vmem:[#allocation46_spill] sm:$0xff] %v18584_v20 }
 0x181   :  { %v15022_v40 = vpop.f32.mrf.mxu0  ;;  %v15146_v15 = vpop.f32.mrf.mxu1 }
 0x182   :  { %v17304_v15 = vld [vmem:[%s23251_s0 + $0x26c] sm:$0xff]  }
 0x183   :  { %v18586_v4 = vpop.f32.mrf.mxu0  ;;  %v18588_v47 = vpop.f32.mrf.mxu1  ;;  %15252 = vmatmul.mubr.msk.bf16.gmra.mxu1 %vm467_vm2, %v17302_v19  ;;  %15500 = vmatmul.mubr.msk.bf16.gmra.mxu0 %vm467_vm2, %v17303_v18  ;;  %v17305_v40 = vld [vmem:[%s23251_s0 + $0x448] sm:$0xff]  }
 0x184   :  { %23304 = vst [vmem:[#allocation47_spill] sm:$0xff] %v18588_v47  ;;  %15255 = vmatprep.mubr.msk.bf16.mxu1 %vm17772_vm1, %v23256_v0  ;;  %15503 = vmatprep.mubr.msk.bf16.mxu0 %vm17772_vm1, %v23256_v0 }
 0x185   :  { %v15025_v55 = vpop.f32.mrf.mxu0  ;;  %v15149_v60 = vpop.f32.mrf.mxu1 }
 0x187   :  { %v18602_v47 = vpop.f32.mrf.mxu0  ;;  %v18604_v19 = vpop.f32.mrf.mxu1 }
 0x188   :  { %23305 = vst [vmem:[#allocation48_spill] sm:$0xff] %v18604_v19 }
 0x189   :  { %v15026_v18 = vpop.f32.mrf.mxu0  ;;  %v15150_v20 = vpop.f32.mrf.mxu1 }
 0x18a   :  { %v17306_v20 = vld [vmem:[%s23251_s0 + $0x274] sm:$0xff]  }
 0x18b   :  { %v18606_v43 = vpop.f32.mrf.mxu0  ;;  %v18608_v37 = vpop.f32.mrf.mxu1  ;;  %15256 = vmatmul.mubr.msk.bf16.gmra.mxu1 %vm467_vm2, %v17304_v15  ;;  %15504 = vmatmul.mubr.msk.bf16.gmra.mxu0 %vm467_vm2, %v17305_v40  ;;  %v17307_v18 = vld [vmem:[%s23251_s0 + $0x450] sm:$0xff]  }
 0x18c   :  { %23306 = vst [vmem:[#allocation49_spill] sm:$0xff] %v18608_v37  ;;  %15259 = vmatprep.mubr.msk.bf16.mxu1 %vm17772_vm1, %v23256_v0  ;;  %15507 = vmatprep.mubr.msk.bf16.mxu0 %vm17772_vm1, %v23256_v0 }
 0x18d   :  { %v15029_v55 = vpop.f32.mrf.mxu0  ;;  %v15153_v60 = vpop.f32.mrf.mxu1 }
 0x18f   :  { %v18622_v37 = vpop.f32.mrf.mxu0  ;;  %v18624_v15 = vpop.f32.mrf.mxu1 }
 0x190   :  { %23307 = vst [vmem:[#allocation50_spill] sm:$0xff] %v18624_v15 }
 0x191   :  { %v15030_v40 = vpop.f32.mrf.mxu0  ;;  %v15154_v19 = vpop.f32.mrf.mxu1 }
 0x192   :  { %v17308_v19 = vld [vmem:[%s23251_s0 + $0x27c] sm:$0xff]  }
 0x193   :  { %v18626_v33 = vpop.f32.mrf.mxu0  ;;  %v18628_v27 = vpop.f32.mrf.mxu1  ;;  %15260 = vmatmul.mubr.msk.bf16.gmra.mxu1 %vm467_vm2, %v17306_v20  ;;  %15508 = vmatmul.mubr.msk.bf16.gmra.mxu0 %vm467_vm2, %v17307_v18  ;;  %v17309_v40 = vld [vmem:[%s23251_s0 + $0x458] sm:$0xff]  }
 0x194   :  { %23308 = vst [vmem:[#allocation51_spill] sm:$0xff] %v18628_v27  ;;  %15263 = vmatprep.mubr.msk.bf16.mxu1 %vm17772_vm1, %v23256_v0  ;;  %15511 = vmatprep.mubr.msk.bf16.mxu0 %vm17772_vm1, %v23256_v0 }
 0x195   :  { %v15033_v55 = vpop.f32.mrf.mxu0  ;;  %v15157_v60 = vpop.f32.mrf.mxu1 }
 0x197   :  { %v18642_v27 = vpop.f32.mrf.mxu0  ;;  %v18644_v20 = vpop.f32.mrf.mxu1 }
 0x198   :  { %23309 = vst [vmem:[#allocation52_spill] sm:$0xff] %v18644_v20 }
 0x199   :  { %v15034_v18 = vpop.f32.mrf.mxu0  ;;  %v15158_v15 = vpop.f32.mrf.mxu1 }
 0x19a   :  { %v17310_v15 = vld [vmem:[%s23251_s0 + $0x284] sm:$0xff]  }
 0x19b   :  { %v18646_v23 = vpop.f32.mrf.mxu0  ;;  %v18648_v17 = vpop.f32.mrf.mxu1  ;;  %15264 = vmatmul.mubr.msk.bf16.gmra.mxu1 %vm467_vm2, %v17308_v19  ;;  %15512 = vmatmul.mubr.msk.bf16.gmra.mxu0 %vm467_vm2, %v17309_v40  ;;  %v17311_v19 = vld [vmem:[%s23251_s0 + $0x460] sm:$0xff]  }
 0x19c   :  { %23310 = vst [vmem:[#allocation53_spill] sm:$0xff] %v18648_v17  ;;  %15267 = vmatprep.mubr.msk.bf16.mxu1 %vm17772_vm1, %v23256_v0  ;;  %15515 = vmatprep.mubr.msk.bf16.mxu0 %vm17772_vm1, %v23256_v0 }
 0x19d   :  { %v15037_v55 = vpop.f32.mrf.mxu0  ;;  %v15161_v60 = vpop.f32.mrf.mxu1 }
 0x19f   :  { %v18656_v13 = vpop.f32.mrf.mxu0  ;;  %v18658_v18 = vpop.f32.mrf.mxu1 }
 0x1a0   :  { %23311 = vst [vmem:[#allocation54_spill] sm:$0xff] %v18656_v13  ;;  %23312 = vst [vmem:[#allocation55_spill] sm:$0xff] %v18658_v18 }
 0x1a1   :  { %v15038_v40 = vpop.f32.mrf.mxu0  ;;  %v15162_v17 = vpop.f32.mrf.mxu1 }
 0x1a2   :  { %v17312_v17 = vld [vmem:[%s23251_s0 + $0x28c] sm:$0xff]  }
 0x1a3   :  { %v18666_v20 = vpop.f32.mrf.mxu0  ;;  %v18668_v7 = vpop.f32.mrf.mxu1  ;;  %15268 = vmatmul.mubr.msk.bf16.gmra.mxu1 %vm467_vm2, %v17310_v15  ;;  %15516 = vmatmul.mubr.msk.bf16.gmra.mxu0 %vm467_vm2, %v17311_v19  ;;  %v17313_v15 = vld [vmem:[%s23251_s0 + $0x468] sm:$0xff]  }
 0x1a4   :  { %23313 = vst [vmem:[#allocation56_spill] sm:$0xff] %v18666_v20  ;;  %23314 = vst [vmem:[#allocation57_spill] sm:$0xff] %v18668_v7  ;;  %15271 = vmatprep.mubr.msk.bf16.mxu1 %vm17772_vm1, %v23256_v0  ;;  %15519 = vmatprep.mubr.msk.bf16.mxu0 %vm17772_vm1, %v23256_v0 }
 0x1a5   :  { %v15041_v55 = vpop.f32.mrf.mxu0  ;;  %v15165_v60 = vpop.f32.mrf.mxu1 }
 0x1a7   :  { %v18676_v18 = vpop.f32.mrf.mxu0  ;;  %v18678_v40 = vpop.f32.mrf.mxu1 }
 0x1a8   :  { %23315 = vst [vmem:[#allocation58_spill] sm:$0xff] %v18676_v18  ;;  %23316 = vst [vmem:[#allocation59_spill] sm:$0xff] %v18678_v40 }
 0x1a9   :  { %v15042_v19 = vpop.f32.mrf.mxu0  ;;  %v15166_v7 = vpop.f32.mrf.mxu1 }
 0x1aa   :  { %v17314_v7 = vld [vmem:[%s23251_s0 + $0x294] sm:$0xff]  }
 0x1ab   :  { %v18686_v2 = vpop.f32.mrf.mxu0  ;;  %v18688_v59 = vpop.f32.mrf.mxu1  ;;  %15272 = vmatmul.mubr.msk.bf16.gmra.mxu1 %vm467_vm2, %v17312_v17  ;;  %15520 = vmatmul.mubr.msk.bf16.gmra.mxu0 %vm467_vm2, %v17313_v15  ;;  %v17315_v17 = vld [vmem:[%s23251_s0 + $0x470] sm:$0xff]  }
 0x1ac   :  { %23317 = vst [vmem:[#allocation60_spill] sm:$0xff] %v18686_v2  ;;  %23318 = vst [vmem:[#allocation61_spill] sm:$0xff] %v18688_v59  ;;  %15275 = vmatprep.mubr.msk.bf16.mxu1 %vm17772_vm1, %v23256_v0  ;;  %15523 = vmatprep.mubr.msk.bf16.mxu0 %vm17772_vm1, %v23256_v0 }
 0x1ad   :  { %v15045_v55 = vpop.f32.mrf.mxu0  ;;  %v15169_v60 = vpop.f32.mrf.mxu1 }
 0x1af   :  { %v18696_v40 = vpop.f32.mrf.mxu0  ;;  %v18698_v19 = vpop.f32.mrf.mxu1 }
 0x1b0   :  { %23319 = vst [vmem:[#allocation62_spill] sm:$0xff] %v18696_v40  ;;  %23320 = vst [vmem:[#allocation63_spill] sm:$0xff] %v18698_v19 }
 0x1b1   :  { %v15046_v15 = vpop.f32.mrf.mxu0  ;;  %v15170_v59 = vpop.f32.mrf.mxu1 }
 0x1b2   :  { %v17316_v59 = vld [vmem:[%s23251_s0 + $0x29c] sm:$0xff]  }
 0x1b3   :  { %v18706_v2 = vpop.f32.mrf.mxu0  ;;  %v18708_v18 = vpop.f32.mrf.mxu1  ;;  %15276 = vmatmul.mubr.msk.bf16.gmra.mxu1 %vm467_vm2, %v17314_v7  ;;  %15524 = vmatmul.mubr.msk.bf16.gmra.mxu0 %vm467_vm2, %v17315_v17  ;;  %v17317_v7 = vld [vmem:[%s23251_s0 + $0x478] sm:$0xff]  }
 0x1b4   :  { %23321 = vst [vmem:[#allocation64_spill] sm:$0xff] %v18706_v2  ;;  %23322 = vst [vmem:[#allocation65_spill] sm:$0xff] %v18708_v18  ;;  %15279 = vmatprep.mubr.msk.bf16.mxu1 %vm17772_vm1, %v23256_v0  ;;  %15527 = vmatprep.mubr.msk.bf16.mxu0 %vm17772_vm1, %v23256_v0 }
 0x1b5   :  { %v15049_v55 = vpop.f32.mrf.mxu0  ;;  %v15173_v60 = vpop.f32.mrf.mxu1 }
 0x1b7   :  { %v18716_v19 = vpop.f32.mrf.mxu0  ;;  %v18718_v15 = vpop.f32.mrf.mxu1 }
 0x1b8   :  { %23323 = vst [vmem:[#allocation66_spill] sm:$0xff] %v18716_v19  ;;  %23324 = vst [vmem:[#allocation67_spill] sm:$0xff] %v18718_v15 }
 0x1b9   :  { %v15050_v17 = vpop.f32.mrf.mxu0  ;;  %v15174_v18 = vpop.f32.mrf.mxu1 }
 0x1ba   :  { %v17318_v18 = vld [vmem:[%s23251_s0 + $0x2a4] sm:$0xff]  }
 0x1bb   :  { %v18726_v2 = vpop.f32.mrf.mxu0  ;;  %v18728_v40 = vpop.f32.mrf.mxu1  ;;  %15280 = vmatmul.mubr.msk.bf16.gmra.mxu1 %vm467_vm2, %v17316_v59  ;;  %15528 = vmatmul.mubr.msk.bf16.gmra.mxu0 %vm467_vm2, %v17317_v7  ;;  %v17319_v59 = vld [vmem:[%s23251_s0 + $0x480] sm:$0xff]  }
 0x1bc   :  { %23325 = vst [vmem:[#allocation68_spill] sm:$0xff] %v18726_v2  ;;  %23326 = vst [vmem:[#allocation69_spill] sm:$0xff] %v18728_v40  ;;  %15283 = vmatprep.mubr.msk.bf16.mxu1 %vm17772_vm1, %v23256_v0  ;;  %15531 = vmatprep.mubr.msk.bf16.mxu0 %vm17772_vm1, %v23256_v0 }
 0x1bd   :  { %v15053_v55 = vpop.f32.mrf.mxu0  ;;  %v15177_v60 = vpop.f32.mrf.mxu1 }
 0x1bf   :  { %v18736_v15 = vpop.f32.mrf.mxu0  ;;  %v1174_v17 = vpop.f32.mrf.mxu1 }
 0x1c0   :  { %23327 = vst [vmem:[#allocation70_spill] sm:$0xff] %v18736_v15 }
 0x1c1   :  { %v15054_v7 = vpop.f32.mrf.mxu0  ;;  %v15178_v40 = vpop.f32.mrf.mxu1 }
 0x1c2   :  { %v17320_v40 = vld [vmem:[%s23251_s0 + $0x2ac] sm:$0xff]  }
 0x1c3   :  { %v18744_v2 = vpop.f32.mrf.mxu0  ;;  %v1819_v19 = vpop.f32.mrf.mxu1  ;;  %15284 = vmatmul.mubr.msk.bf16.gmra.mxu1 %vm467_vm2, %v17318_v18  ;;  %15532 = vmatmul.mubr.msk.bf16.gmra.mxu0 %vm467_vm2, %v17319_v59  ;;  %v17321_v18 = vld [vmem:[%s23251_s0 + $0x488] sm:$0xff]  }
 0x1c4   :  { %23328 = vst [vmem:[#allocation71_spill] sm:$0xff] %v18744_v2  ;;  %15287 = vmatprep.mubr.msk.bf16.mxu1 %vm17772_vm1, %v23256_v0  ;;  %15535 = vmatprep.mubr.msk.bf16.mxu0 %vm17772_vm1, %v23256_v0  ;;  %v2305_v2 = vmax.f32 %v18127_v58, %v1819_v19  ;;  %v17322_v19 = vld [vmem:[%s23251_s0 + $0x2b4] sm:$0xff]  }
 0x1c5   :  { %v15057_v55 = vpop.f32.mrf.mxu0  ;;  %v15189_v60 = vpop.f32.mrf.mxu1 }
 0x1c7   :  { %v18752_v17 = vpop.f32.mrf.mxu0  ;;  %v1822_v15 = vpop.f32.mrf.mxu1 }
 0x1c8   :  { %23329 = vst [vmem:[#allocation72_spill] sm:$0xff] %v18752_v17 }
 0x1c9   :  { %v15058_v59 = vpop.f32.mrf.mxu0  ;;  %v15190_v7 = vpop.f32.mrf.mxu1 }
 0x1ca   :  { %v2306_v59 = vmax.f32 %v18143_v1, %v1822_v15  ;;  %v23331_v15 = vmov 0.0  }
 0x1cb   :  { %v1827_v20 = vpop.f32.mrf.mxu1  ;;  %15288 = vmatmul.mubr.msk.bf16.gmra.mxu1 %vm467_vm2, %v17320_v40  ;;  %v3068_v55 = vpop.f32.mrf.mxu0  ;;  %15536 = vmatmul.mubr.msk.bf16.gmra.mxu0 %vm467_vm2, %v17321_v18 }
 0x1cc   :  { %v18763_v60 = vmax.f32 %v2305_v2, %v3068_v55  ;;  %15291 = vmatprep.mubr.msk.bf16.mxu1 %vm17772_vm1, %v23256_v0  ;;  %15539 = vmatprep.mubr.msk.bf16.mxu0 %vm17772_vm1, %v23256_v0  ;;  %v17323_v2 = vld [vmem:[%s23251_s0 + $0x490] sm:$0xff]   ;;  %v2307_v0 = vmax.f32 %v18147_v6, %v1827_v20  ;;  %v17324_v20 = vld [vmem:[%s23251_s0 + $0x2bc] sm:$0xff]  }
 0x1cd   :  { %v15193_v17 = vpop.f32.mrf.mxu1  ;;  %v15441_v13 = vpop.f32.mrf.mxu0 }
 0x1cf   :  { %v1830_v7 = vpop.f32.mrf.mxu1  ;;  %v3071_v58 = vpop.f32.mrf.mxu0 }
 0x1d0   :  { %v18776_v40 = vmax.f32 %v2306_v59, %v3071_v58 }
 0x1d1   :  { %v15194_v18 = vpop.f32.mrf.mxu1  ;;  %v15442_v55 = vpop.f32.mrf.mxu0 }
 0x1d2   :  { %v2308_v18 = vmax.f32 %v18163_v12, %v1830_v7 }
 0x1d3   :  { %v1835_v17 = vpop.f32.mrf.mxu1  ;;  %15292 = vmatmul.mubr.msk.bf16.gmra.mxu1 %vm467_vm2, %v17322_v19  ;;  %v3076_v1 = vpop.f32.mrf.mxu0  ;;  %15540 = vmatmul.mubr.msk.bf16.gmra.mxu0 %vm467_vm2, %v17323_v2 }
 0x1d4   :  { %v18781_v13 = vmax.f32 %v2307_v0, %v3076_v1  ;;  %15295 = vmatprep.mubr.msk.bf16.mxu1 %vm17772_vm1, %v23331_v15  ;;  %15543 = vmatprep.mubr.msk.bf16.mxu0 %vm17772_vm1, %v23331_v15  ;;  %v17325_v0 = vld [vmem:[%s23251_s0 + $0x498] sm:$0xff]  }
 0x1d5   :  { %v15197_v59 = vpop.f32.mrf.mxu1  ;;  %v15445_v58 = vpop.f32.mrf.mxu0 }
 0x1d6   :  { %23330 = vst [vmem:[#allocation73_spill] sm:$0xff] %v18781_v13  ;;  %v2309_v13 = vmax.f32 %v18167_v16, %v1835_v17  ;;  %v17326_v17 = vld [vmem:[%s23251_s0 + $0x2c4] sm:$0xff]  }
 0x1d7   :  { %v1838_v55 = vpop.f32.mrf.mxu1  ;;  %v3079_v6 = vpop.f32.mrf.mxu0 }
 0x1d8   :  { %v18794_v19 = vmax.f32 %v2308_v18, %v3079_v6  ;;  %v2310_v6 = vmax.f32 %v18183_v22, %v1838_v55 }
 0x1d9   :  { %v15198_v2 = vpop.f32.mrf.mxu1  ;;  %v15446_v1 = vpop.f32.mrf.mxu0 }
 0x1db   :  { %v1843_v59 = vpop.f32.mrf.mxu1  ;;  %15296 = vmatmul.mubr.msk.bf16.gmra.mxu1 %vm467_vm2, %v17324_v20  ;;  %v3084_v12 = vpop.f32.mrf.mxu0  ;;  %15544 = vmatmul.mubr.msk.bf16.gmra.mxu0 %vm467_vm2, %v17325_v0 }
 0x1dc   :  { %v18799_v7 = vmax.f32 %v2309_v13, %v3084_v12  ;;  %15299 = vmatprep.mubr.msk.bf16.mxu1 %vm17772_vm1, %v23331_v15  ;;  %15547 = vmatprep.mubr.msk.bf16.mxu0 %vm17772_vm1, %v23331_v15  ;;  %v17327_v13 = vld [vmem:[%s23251_s0 + $0x4a0] sm:$0xff]   ;;  %v2311_v12 = vmax.f32 %v18187_v26, %v1843_v59  ;;  %v17328_v59 = vld [vmem:[%s23251_s0 + $0x2cc] sm:$0xff]  }
 0x1dd   :  { %v15201_v58 = vpop.f32.mrf.mxu1  ;;  %v15449_v18 = vpop.f32.mrf.mxu0 }
 0x1df   :  { %v1846_v2 = vpop.f32.mrf.mxu1  ;;  %v3087_v16 = vpop.f32.mrf.mxu0 }
 0x1e0   :  { %v18812_v20 = vmax.f32 %v2310_v6, %v3087_v16  ;;  %v2312_v16 = vmax.f32 %v18203_v32, %v1846_v2 }
 0x1e1   :  { %v15202_v0 = vpop.f32.mrf.mxu1  ;;  %v15450_v1 = vpop.f32.mrf.mxu0 }
 0x1e3   :  { %v1851_v58 = vpop.f32.mrf.mxu1  ;;  %15300 = vmatmul.mubr.msk.bf16.gmra.mxu1 %vm467_vm2, %v17326_v17  ;;  %v3092_v22 = vpop.f32.mrf.mxu0  ;;  %15548 = vmatmul.mubr.msk.bf16.gmra.mxu0 %vm467_vm2, %v17327_v13  ;;  %v17329_v17 = vld [vmem:[%s23251_s0 + $0x4a8] sm:$0xff]  }
 0x1e4   :  { %v18817_v55 = vmax.f32 %v2311_v12, %v3092_v22  ;;  %15303 = vmatprep.mubr.msk.bf16.mxu1 %vm17772_vm1, %v23331_v15  ;;  %15551 = vmatprep.mubr.msk.bf16.mxu0 %vm17772_vm1, %v23331_v15  ;;  %v2313_v22 = vmax.f32 %v18207_v36, %v1851_v58  ;;  %v17330_v58 = vld [vmem:[%s23251_s0 + $0x2d4] sm:$0xff]  }
 0x1e5   :  { %v15205_v18 = vpop.f32.mrf.mxu1  ;;  %v15453_v6 = vpop.f32.mrf.mxu0 }
 0x1e7   :  { %v1854_v0 = vpop.f32.mrf.mxu1  ;;  %v3095_v26 = vpop.f32.mrf.mxu0 }
 0x1e8   :  { %v18830_v13 = vmax.f32 %v2312_v16, %v3095_v26  ;;  %v2314_v26 = vmax.f32 %v18223_v42, %v1854_v0 }
 0x1e9   :  { %v15206_v1 = vpop.f32.mrf.mxu1  ;;  %v15454_v12 = vpop.f32.mrf.mxu0 }
 0x1eb   :  { %v1859_v18 = vpop.f32.mrf.mxu1  ;;  %15304 = vmatmul.mubr.msk.bf16.gmra.mxu1 %vm467_vm2, %v17328_v59  ;;  %v3100_v32 = vpop.f32.mrf.mxu0  ;;  %15552 = vmatmul.mubr.msk.bf16.gmra.mxu0 %vm467_vm2, %v17329_v17  ;;  %v17331_v59 = vld [vmem:[%s23251_s0 + $0x4b0] sm:$0xff]  }
 0x1ec   :  { %v18835_v2 = vmax.f32 %v2313_v22, %v3100_v32  ;;  %15307 = vmatprep.mubr.msk.bf16.mxu1 %vm17772_vm1, %v23331_v15  ;;  %15555 = vmatprep.mubr.msk.bf16.mxu0 %vm17772_vm1, %v23331_v15  ;;  %v2315_v32 = vmax.f32 %v18227_v46, %v1859_v18  ;;  %v17332_v18 = vld [vmem:[%s23251_s0 + $0x2dc] sm:$0xff]  }
 0x1ed   :  { %v15209_v6 = vpop.f32.mrf.mxu1  ;;  %v15457_v16 = vpop.f32.mrf.mxu0 }
 0x1ef   :  { %v1862_v1 = vpop.f32.mrf.mxu1  ;;  %v3103_v36 = vpop.f32.mrf.mxu0 }
 0x1f0   :  { %v18848_v17 = vmax.f32 %v2314_v26, %v3103_v36  ;;  %v2316_v36 = vmax.f32 %v18243_v52, %v1862_v1 }
 0x1f1   :  { %v15210_v12 = vpop.f32.mrf.mxu1  ;;  %v15458_v22 = vpop.f32.mrf.mxu0 }
 0x1f3   :  { %v1867_v6 = vpop.f32.mrf.mxu1  ;;  %15308 = vmatmul.mubr.msk.bf16.gmra.mxu1 %vm467_vm2, %v17330_v58  ;;  %v3108_v42 = vpop.f32.mrf.mxu0  ;;  %15556 = vmatmul.mubr.msk.bf16.gmra.mxu0 %vm467_vm2, %v17331_v59  ;;  %v17333_v58 = vld [vmem:[%s23251_s0 + $0x4b8] sm:$0xff]  }
 0x1f4   :  { %v18853_v0 = vmax.f32 %v2315_v32, %v3108_v42  ;;  %15311 = vmatprep.mubr.msk.bf16.mxu1 %vm17772_vm1, %v23331_v15  ;;  %15559 = vmatprep.mubr.msk.bf16.mxu0 %vm17772_vm1, %v23331_v15  ;;  %v2317_v42 = vmax.f32 %v18247_v56, %v1867_v6  ;;  %v17334_v6 = vld [vmem:[%s23251_s0 + $0x2e4] sm:$0xff]  }
 0x1f5   :  { %v15213_v16 = vpop.f32.mrf.mxu1  ;;  %v15461_v26 = vpop.f32.mrf.mxu0 }
 0x1f7   :  { %v1870_v12 = vpop.f32.mrf.mxu1  ;;  %v3111_v46 = vpop.f32.mrf.mxu0 }
 0x1f8   :  { %v18866_v59 = vmax.f32 %v2316_v36, %v3111_v46  ;;  %v2318_v46 = vmax.f32 %v18265_v3, %v1870_v12 }
 0x1f9   :  { %v15214_v22 = vpop.f32.mrf.mxu1  ;;  %v15462_v32 = vpop.f32.mrf.mxu0 }
 0x1fb   :  { %v1875_v16 = vpop.f32.mrf.mxu1  ;;  %15312 = vmatmul.mubr.msk.bf16.gmra.mxu1 %vm467_vm2, %v17332_v18  ;;  %v3116_v52 = vpop.f32.mrf.mxu0  ;;  %15560 = vmatmul.mubr.msk.bf16.gmra.mxu0 %vm467_vm2, %v17333_v58  ;;  %v17335_v18 = vld [vmem:[%s23251_s0 + $0x4c0] sm:$0xff]  }
 0x1fc   :  { %v18871_v1 = vmax.f32 %v2317_v42, %v3116_v52  ;;  %15315 = vmatprep.mubr.msk.bf16.mxu1 %vm17772_vm1, %v23331_v15  ;;  %15563 = vmatprep.mubr.msk.bf16.mxu0 %vm17772_vm1, %v23331_v15  ;;  %v2319_v52 = vmax.f32 %v18273_v11, %v1875_v16  ;;  %v17336_v16 = vld [vmem:[%s23251_s0 + $0x2ec] sm:$0xff]  }
 0x1fd   :  { %v15217_v26 = vpop.f32.mrf.mxu1  ;;  %v15465_v36 = vpop.f32.mrf.mxu0 }
 0x1ff   :  { %v1878_v22 = vpop.f32.mrf.mxu1  ;;  %v3119_v56 = vpop.f32.mrf.mxu0 }
 0x200   :  { %v18884_v58 = vmax.f32 %v2318_v46, %v3119_v56  ;;  %v2320_v56 = vmax.f32 %v18294_v24, %v1878_v22 }
 0x201   :  { %v15218_v32 = vpop.f32.mrf.mxu1  ;;  %v15466_v42 = vpop.f32.mrf.mxu0 }
 0x203   :  { %v1883_v26 = vpop.f32.mrf.mxu1  ;;  %15316 = vmatmul.mubr.msk.bf16.gmra.mxu1 %vm467_vm2, %v17334_v6  ;;  %v3124_v3 = vpop.f32.mrf.mxu0  ;;  %15564 = vmatmul.mubr.msk.bf16.gmra.mxu0 %vm467_vm2, %v17335_v18  ;;  %v17337_v6 = vld [vmem:[%s23251_s0 + $0x4c8] sm:$0xff]  }
 0x204   :  { %v18889_v12 = vmax.f32 %v2319_v52, %v3124_v3  ;;  %15319 = vmatprep.mubr.msk.bf16.mxu1 %vm17772_vm1, %v23331_v15  ;;  %15567 = vmatprep.mubr.msk.bf16.mxu0 %vm17772_vm1, %v23331_v15  ;;  %v2321_v3 = vmax.f32 %v18303_v31, %v1883_v26  ;;  %v17338_v26 = vld [vmem:[%s23251_s0 + $0x2f4] sm:$0xff]  }
 0x205   :  { %v15221_v36 = vpop.f32.mrf.mxu1  ;;  %v15469_v46 = vpop.f32.mrf.mxu0 }
 0x207   :  { %v1886_v32 = vpop.f32.mrf.mxu1  ;;  %v3127_v11 = vpop.f32.mrf.mxu0 }
 0x208   :  { %v18902_v18 = vmax.f32 %v2320_v56, %v3127_v11  ;;  %v2322_v11 = vmax.f32 %v18321_v41, %v1886_v32 }
 0x209   :  { %v15222_v42 = vpop.f32.mrf.mxu1  ;;  %v15470_v52 = vpop.f32.mrf.mxu0 }
 0x20b   :  { %v1891_v36 = vpop.f32.mrf.mxu1  ;;  %15320 = vmatmul.mubr.msk.bf16.gmra.mxu1 %vm467_vm2, %v17336_v16  ;;  %v3132_v24 = vpop.f32.mrf.mxu0  ;;  %15568 = vmatmul.mubr.msk.bf16.gmra.mxu0 %vm467_vm2, %v17337_v6  ;;  %v17339_v16 = vld [vmem:[%s23251_s0 + $0x4d0] sm:$0xff]  }
 0x20c   :  { %v18907_v22 = vmax.f32 %v2321_v3, %v3132_v24  ;;  %15323 = vmatprep.mubr.msk.bf16.mxu1 %vm17772_vm1, %v23331_v15  ;;  %15571 = vmatprep.mubr.msk.bf16.mxu0 %vm17772_vm1, %v23331_v15  ;;  %v2323_v24 = vmax.f32 %v18326_v49, %v1891_v36  ;;  %v17340_v36 = vld [vmem:[%s23251_s0 + $0x2fc] sm:$0xff]  }
 0x20d   :  { %v15225_v46 = vpop.f32.mrf.mxu1  ;;  %v15473_v56 = vpop.f32.mrf.mxu0 }
 0x20f   :  { %v1894_v42 = vpop.f32.mrf.mxu1  ;;  %v3135_v31 = vpop.f32.mrf.mxu0 }
 0x210   :  { %v18920_v6 = vmax.f32 %v2322_v11, %v3135_v31  ;;  %v2324_v31 = vmax.f32 %v18342_v61, %v1894_v42 }
 0x211   :  { %v15226_v52 = vpop.f32.mrf.mxu1  ;;  %v15474_v3 = vpop.f32.mrf.mxu0 }
 0x213   :  { %v1899_v46 = vpop.f32.mrf.mxu1  ;;  %15324 = vmatmul.mubr.msk.bf16.gmra.mxu1 %vm467_vm2, %v17338_v26  ;;  %v3140_v41 = vpop.f32.mrf.mxu0  ;;  %15572 = vmatmul.mubr.msk.bf16.gmra.mxu0 %vm467_vm2, %v17339_v16  ;;  %v17341_v26 = vld [vmem:[%s23251_s0 + $0x4d8] sm:$0xff]  }
 0x214   :  { %v18925_v32 = vmax.f32 %v2323_v24, %v3140_v41  ;;  %15327 = vmatprep.mubr.msk.bf16.mxu1 %vm17772_vm1, %v23331_v15  ;;  %15575 = vmatprep.mubr.msk.bf16.mxu0 %vm17772_vm1, %v23331_v15  ;;  %v2325_v41 = vmax.f32 %v18346_v9, %v1899_v46  ;;  %v17342_v46 = vld [vmem:[%s23251_s0 + $0x304] sm:$0xff]  }
 0x215   :  { %v15229_v56 = vpop.f32.mrf.mxu1  ;;  %v15477_v11 = vpop.f32.mrf.mxu0 }
 0x217   :  { %v1902_v52 = vpop.f32.mrf.mxu1  ;;  %v3143_v49 = vpop.f32.mrf.mxu0 }
 0x218   :  { %v18938_v16 = vmax.f32 %v2324_v31, %v3143_v49  ;;  %v2326_v49 = vmax.f32 %v18362_v21, %v1902_v52 }
 0x219   :  { %v15230_v3 = vpop.f32.mrf.mxu1  ;;  %v15478_v24 = vpop.f32.mrf.mxu0 }
 0x21b   :  { %v1907_v56 = vpop.f32.mrf.mxu1  ;;  %15328 = vmatmul.mubr.msk.bf16.gmra.mxu1 %vm467_vm2, %v17340_v36  ;;  %v3148_v61 = vpop.f32.mrf.mxu0  ;;  %15576 = vmatmul.mubr.msk.bf16.gmra.mxu0 %vm467_vm2, %v17341_v26  ;;  %v17343_v36 = vld [vmem:[%s23251_s0 + $0x4e0] sm:$0xff]  }
 0x21c   :  { %v18943_v42 = vmax.f32 %v2325_v41, %v3148_v61  ;;  %15331 = vmatprep.mubr.msk.bf16.mxu1 %vm17772_vm1, %v23331_v15  ;;  %15579 = vmatprep.mubr.msk.bf16.mxu0 %vm17772_vm1, %v23331_v15  ;;  %v2327_v61 = vmax.f32 %v18366_v35, %v1907_v56  ;;  %v17344_v56 = vld [vmem:[%s23251_s0 + $0x30c] sm:$0xff]  }
 0x21d   :  { %v15233_v11 = vpop.f32.mrf.mxu1  ;;  %v15481_v31 = vpop.f32.mrf.mxu0 }
 0x21f   :  { %v1910_v3 = vpop.f32.mrf.mxu1  ;;  %v3151_v9 = vpop.f32.mrf.mxu0 }
 0x220   :  { %v18956_v26 = vmax.f32 %v2326_v49, %v3151_v9  ;;  %v2328_v9 = vmax.f32 %v18382_v51, %v1910_v3 }
 0x221   :  { %v15234_v24 = vpop.f32.mrf.mxu1  ;;  %v15482_v41 = vpop.f32.mrf.mxu0 }
 0x223   :  { %v1915_v11 = vpop.f32.mrf.mxu1  ;;  %15332 = vmatmul.mubr.msk.bf16.gmra.mxu1 %vm467_vm2, %v17342_v46  ;;  %v3156_v21 = vpop.f32.mrf.mxu0  ;;  %15580 = vmatmul.mubr.msk.bf16.gmra.mxu0 %vm467_vm2, %v17343_v36  ;;  %v17345_v46 = vld [vmem:[%s23251_s0 + $0x4e8] sm:$0xff]  }
 0x224   :  { %v18961_v52 = vmax.f32 %v2327_v61, %v3156_v21  ;;  %15335 = vmatprep.mubr.msk.bf16.mxu1 %vm17772_vm1, %v23331_v15  ;;  %15583 = vmatprep.mubr.msk.bf16.mxu0 %vm17772_vm1, %v23331_v15  ;;  %v2329_v21 = vmax.f32 %v18386_v63, %v1915_v11  ;;  %v17346_v11 = vld [vmem:[%s23251_s0 + $0x314] sm:$0xff]  }
 0x225   :  { %v15237_v31 = vpop.f32.mrf.mxu1  ;;  %v15485_v49 = vpop.f32.mrf.mxu0 }
 0x227   :  { %v1918_v24 = vpop.f32.mrf.mxu1  ;;  %v3159_v35 = vpop.f32.mrf.mxu0 }
 0x228   :  { %v18974_v36 = vmax.f32 %v2328_v9, %v3159_v35  ;;  %v2330_v35 = vmax.f32 %v18402_v29, %v1918_v24 }
 0x229   :  { %v15238_v41 = vpop.f32.mrf.mxu1  ;;  %v15486_v61 = vpop.f32.mrf.mxu0 }
 0x22b   :  { %v1923_v31 = vpop.f32.mrf.mxu1  ;;  %15336 = vmatmul.mubr.msk.bf16.gmra.mxu1 %vm467_vm2, %v17344_v56  ;;  %v3164_v51 = vpop.f32.mrf.mxu0  ;;  %15584 = vmatmul.mubr.msk.bf16.gmra.mxu0 %vm467_vm2, %v17345_v46  ;;  %v17347_v56 = vld [vmem:[%s23251_s0 + $0x4f0] sm:$0xff]  }
 0x22c   :  { %v18979_v3 = vmax.f32 %v2329_v21, %v3164_v51  ;;  %15339 = vmatprep.mubr.msk.bf16.mxu1 %vm17772_vm1, %v23331_v15  ;;  %15587 = vmatprep.mubr.msk.bf16.mxu0 %vm17772_vm1, %v23331_v15  ;;  %v2331_v51 = vmax.f32 %v18406_v45, %v1923_v31  ;;  %v17348_v31 = vld [vmem:[%s23251_s0 + $0x31c] sm:$0xff]  }
 0x22d   :  { %v15241_v49 = vpop.f32.mrf.mxu1  ;;  %v15489_v9 = vpop.f32.mrf.mxu0 }
 0x22f   :  { %v1926_v41 = vpop.f32.mrf.mxu1  ;;  %v3167_v63 = vpop.f32.mrf.mxu0 }
 0x230   :  { %v18992_v46 = vmax.f32 %v2330_v35, %v3167_v63  ;;  %v2332_v63 = vmax.f32 %v18422_v39, %v1926_v41 }
 0x231   :  { %v15242_v61 = vpop.f32.mrf.mxu1  ;;  %v15490_v21 = vpop.f32.mrf.mxu0 }
 0x233   :  { %v1931_v49 = vpop.f32.mrf.mxu1  ;;  %15340 = vmatmul.mubr.msk.bf16.gmra.mxu1 %vm467_vm2, %v17346_v11  ;;  %v3172_v29 = vpop.f32.mrf.mxu0  ;;  %15588 = vmatmul.mubr.msk.bf16.gmra.mxu0 %vm467_vm2, %v17347_v56  ;;  %v17349_v11 = vld [vmem:[%s23251_s0 + $0x4f8] sm:$0xff]  }
 0x234   :  { %v18997_v24 = vmax.f32 %v2331_v51, %v3172_v29  ;;  %15343 = vmatprep.mubr.msk.bf16.mxu1 %vm17772_vm1, %v23331_v15  ;;  %15591 = vmatprep.mubr.msk.bf16.mxu0 %vm17772_vm1, %v23331_v15  ;;  %v2333_v29 = vmax.f32 %v18426_v48, %v1931_v49  ;;  %v17350_v49 = vld [vmem:[%s23251_s0 + $0x324] sm:$0xff]  }
 0x235   :  { %v15245_v9 = vpop.f32.mrf.mxu1  ;;  %v15493_v35 = vpop.f32.mrf.mxu0 }
 0x237   :  { %v1934_v61 = vpop.f32.mrf.mxu1  ;;  %v3175_v45 = vpop.f32.mrf.mxu0 }
 0x238   :  { %v19010_v56 = vmax.f32 %v2332_v63, %v3175_v45  ;;  %v2334_v45 = vmax.f32 %v18442_v30, %v1934_v61 }
 0x239   :  { %v15246_v21 = vpop.f32.mrf.mxu1  ;;  %v15494_v51 = vpop.f32.mrf.mxu0 }
 0x23b   :  { %v1939_v9 = vpop.f32.mrf.mxu1  ;;  %15344 = vmatmul.mubr.msk.bf16.gmra.mxu1 %vm467_vm2, %v17348_v31  ;;  %v3180_v39 = vpop.f32.mrf.mxu0  ;;  %15592 = vmatmul.mubr.msk.bf16.gmra.mxu0 %vm467_vm2, %v17349_v11  ;;  %v17351_v31 = vld [vmem:[%s23251_s0 + $0x500] sm:$0xff]  }
 0x23c   :  { %v19015_v41 = vmax.f32 %v2333_v29, %v3180_v39  ;;  %15347 = vmatprep.mubr.msk.bf16.mxu1 %vm17772_vm1, %v23331_v15  ;;  %15595 = vmatprep.mubr.msk.bf16.mxu0 %vm17772_vm1, %v23331_v15  ;;  %v2335_v39 = vmax.f32 %v18446_v8, %v1939_v9  ;;  %v17352_v9 = vld [vmem:[%s23251_s0 + $0x32c] sm:$0xff]  }
 0x23d   :  { %v15249_v35 = vpop.f32.mrf.mxu1  ;;  %v15497_v63 = vpop.f32.mrf.mxu0 }
 0x23f   :  { %v1942_v21 = vpop.f32.mrf.mxu1  ;;  %v3183_v48 = vpop.f32.mrf.mxu0 }
 0x240   :  { %v19028_v11 = vmax.f32 %v2334_v45, %v3183_v48  ;;  %v2336_v48 = vmax.f32 %v18462_v54, %v1942_v21 }
 0x241   :  { %v15250_v51 = vpop.f32.mrf.mxu1  ;;  %v15498_v29 = vpop.f32.mrf.mxu0 }
 0x243   :  { %v1947_v35 = vpop.f32.mrf.mxu1  ;;  %15348 = vmatmul.mubr.msk.bf16.gmra.mxu1 %vm467_vm2, %v17350_v49  ;;  %v3188_v30 = vpop.f32.mrf.mxu0  ;;  %15596 = vmatmul.mubr.msk.bf16.gmra.mxu0 %vm467_vm2, %v17351_v31  ;;  %v17353_v49 = vld [vmem:[%s23251_s0 + $0x508] sm:$0xff]  }
 0x244   :  { %v19033_v61 = vmax.f32 %v2335_v39, %v3188_v30  ;;  %15351 = vmatprep.mubr.msk.bf16.mxu1 %vm17772_vm1, %v23331_v15  ;;  %15599 = vmatprep.mubr.msk.bf16.mxu0 %vm17772_vm1, %v23331_v15  ;;  %v2337_v30 = vmax.f32 %v18466_v38, %v1947_v35  ;;  %v17354_v35 = vld [vmem:[%s23251_s0 + $0x334] sm:$0xff]  }
 0x245   :  { %v15253_v63 = vpop.f32.mrf.mxu1  ;;  %v15501_v45 = vpop.f32.mrf.mxu0 }
 0x247   :  { %v1950_v51 = vpop.f32.mrf.mxu1  ;;  %v3191_v8 = vpop.f32.mrf.mxu0 }
 0x248   :  { %v19046_v31 = vmax.f32 %v2336_v48, %v3191_v8  ;;  %v2338_v8 = vmax.f32 %v18482_v28, %v1950_v51 }
 0x249   :  { %v15254_v29 = vpop.f32.mrf.mxu1  ;;  %v15502_v39 = vpop.f32.mrf.mxu0 }
 0x24b   :  { %v1955_v63 = vpop.f32.mrf.mxu1  ;;  %15352 = vmatmul.mubr.msk.bf16.gmra.mxu1 %vm467_vm2, %v17352_v9  ;;  %v3196_v54 = vpop.f32.mrf.mxu0  ;;  %15600 = vmatmul.mubr.msk.bf16.gmra.mxu0 %vm467_vm2, %v17353_v49  ;;  %v17355_v9 = vld [vmem:[%s23251_s0 + $0x510] sm:$0xff]  }
 0x24c   :  { %v19051_v21 = vmax.f32 %v2337_v30, %v3196_v54  ;;  %15355 = vmatprep.mubr.msk.bf16.mxu1 %vm17772_vm1, %v23331_v15  ;;  %15603 = vmatprep.mubr.msk.bf16.mxu0 %vm17772_vm1, %v23331_v15  ;;  %v2339_v54 = vmax.f32 %v18486_v10, %v1955_v63  ;;  %v17356_v63 = vld [vmem:[%s23251_s0 + $0x33c] sm:$0xff]  }
 0x24d   :  { %v15257_v45 = vpop.f32.mrf.mxu1  ;;  %v15505_v48 = vpop.f32.mrf.mxu0 }
 0x24f   :  { %v1958_v29 = vpop.f32.mrf.mxu1  ;;  %v3199_v38 = vpop.f32.mrf.mxu0 }
 0x250   :  { %v19064_v49 = vmax.f32 %v2338_v8, %v3199_v38  ;;  %v2340_v38 = vmax.f32 %v18502_v62, %v1958_v29 }
 0x251   :  { %v15258_v39 = vpop.f32.mrf.mxu1  ;;  %v15506_v30 = vpop.f32.mrf.mxu0 }
 0x253   :  { %v1963_v45 = vpop.f32.mrf.mxu1  ;;  %15356 = vmatmul.mubr.msk.bf16.gmra.mxu1 %vm467_vm2, %v17354_v35  ;;  %v3204_v28 = vpop.f32.mrf.mxu0  ;;  %15604 = vmatmul.mubr.msk.bf16.gmra.mxu0 %vm467_vm2, %v17355_v9  ;;  %v17357_v35 = vld [vmem:[%s23251_s0 + $0x518] sm:$0xff]  }
 0x254   :  { %v19069_v51 = vmax.f32 %v2339_v54, %v3204_v28  ;;  %15359 = vmatprep.mubr.msk.bf16.mxu1 %vm17772_vm1, %v23331_v15  ;;  %15607 = vmatprep.mubr.msk.bf16.mxu0 %vm17772_vm1, %v23331_v15  ;;  %v2341_v28 = vmax.f32 %v18506_v50, %v1963_v45  ;;  %v17358_v45 = vld [vmem:[%s23251_s0 + $0x344] sm:$0xff]  }
 0x255   :  { %v15261_v48 = vpop.f32.mrf.mxu1  ;;  %v15509_v8 = vpop.f32.mrf.mxu0 }
 0x257   :  { %v1966_v39 = vpop.f32.mrf.mxu1  ;;  %v3207_v10 = vpop.f32.mrf.mxu0 }
 0x258   :  { %v19082_v9 = vmax.f32 %v2340_v38, %v3207_v10  ;;  %v2342_v10 = vmax.f32 %v18522_v44, %v1966_v39 }
 0x259   :  { %v15262_v30 = vpop.f32.mrf.mxu1  ;;  %v15510_v54 = vpop.f32.mrf.mxu0 }
 0x25b   :  { %v1971_v48 = vpop.f32.mrf.mxu1  ;;  %15360 = vmatmul.mubr.msk.bf16.gmra.mxu1 %vm467_vm2, %v17356_v63  ;;  %v3212_v62 = vpop.f32.mrf.mxu0  ;;  %15608 = vmatmul.mubr.msk.bf16.gmra.mxu0 %vm467_vm2, %v17357_v35  ;;  %v17359_v63 = vld [vmem:[%s23251_s0 + $0x520] sm:$0xff]  }
 0x25c   :  { %v19087_v29 = vmax.f32 %v2341_v28, %v3212_v62  ;;  %15363 = vmatprep.mubr.msk.bf16.mxu1 %vm17772_vm1, %v23331_v15  ;;  %15611 = vmatprep.mubr.msk.bf16.mxu0 %vm17772_vm1, %v23331_v15  ;;  %v2343_v62 = vmax.f32 %v18526_v34, %v1971_v48  ;;  %v17360_v48 = vld [vmem:[%s23251_s0 + $0x34c] sm:$0xff]  }
 0x25d   :  { %v15265_v8 = vpop.f32.mrf.mxu1  ;;  %v15513_v38 = vpop.f32.mrf.mxu0 }
 0x25f   :  { %v1974_v30 = vpop.f32.mrf.mxu1  ;;  %v3215_v50 = vpop.f32.mrf.mxu0 }
 0x260   :  { %v19100_v35 = vmax.f32 %v2342_v10, %v3215_v50  ;;  %v2344_v50 = vmax.f32 %v18542_v25, %v1974_v30 }
 0x261   :  { %v15266_v54 = vpop.f32.mrf.mxu1  ;;  %v15514_v28 = vpop.f32.mrf.mxu0 }
 0x263   :  { %v1979_v8 = vpop.f32.mrf.mxu1  ;;  %15364 = vmatmul.mubr.msk.bf16.gmra.mxu1 %vm467_vm2, %v17358_v45  ;;  %v3220_v44 = vpop.f32.mrf.mxu0  ;;  %15612 = vmatmul.mubr.msk.bf16.gmra.mxu0 %vm467_vm2, %v17359_v63  ;;  %v17361_v45 = vld [vmem:[%s23251_s0 + $0x528] sm:$0xff]  }
 0x264   :  { %v19105_v39 = vmax.f32 %v2343_v62, %v3220_v44  ;;  %15367 = vmatprep.mubr.msk.bf16.mxu1 %vm17772_vm1, %v23331_v15  ;;  %15615 = vmatprep.mubr.msk.bf16.mxu0 %vm17772_vm1, %v23331_v15  ;;  %v2345_v44 = vmax.f32 %v18546_v14, %v1979_v8  ;;  %v17362_v8 = vld [vmem:[%s23251_s0 + $0x354] sm:$0xff]  }
 0x265   :  { %v15269_v38 = vpop.f32.mrf.mxu1  ;;  %v15517_v10 = vpop.f32.mrf.mxu0 }
 0x267   :  { %v1982_v54 = vpop.f32.mrf.mxu1  ;;  %v3223_v34 = vpop.f32.mrf.mxu0 }
 0x268   :  { %v19118_v63 = vmax.f32 %v2344_v50, %v3223_v34  ;;  %v2346_v34 = vmax.f32 %v18562_v5, %v1982_v54 }
 0x269   :  { %v15270_v28 = vpop.f32.mrf.mxu1  ;;  %v15518_v62 = vpop.f32.mrf.mxu0 }
 0x26b   :  { %v1987_v38 = vpop.f32.mrf.mxu1  ;;  %15368 = vmatmul.mubr.msk.bf16.gmra.mxu1 %vm467_vm2, %v17360_v48  ;;  %v3228_v25 = vpop.f32.mrf.mxu0  ;;  %15616 = vmatmul.mubr.msk.bf16.gmra.mxu0 %vm467_vm2, %v17361_v45  ;;  %v17363_v48 = vld [vmem:[%s23251_s0 + $0x530] sm:$0xff]  }
 0x26c   :  { %v19123_v30 = vmax.f32 %v2345_v44, %v3228_v25  ;;  %15371 = vmatprep.mubr.msk.bf16.mxu1 %vm17772_vm1, %v23331_v15  ;;  %15619 = vmatprep.mubr.msk.bf16.mxu0 %vm17772_vm1, %v23331_v15  ;;  %v2347_v25 = vmax.f32 %v18566_v57, %v1987_v38  ;;  %v17364_v38 = vld [vmem:[%s23251_s0 + $0x35c] sm:$0xff]  }
 0x26d   :  { %v15273_v10 = vpop.f32.mrf.mxu1  ;;  %v15521_v50 = vpop.f32.mrf.mxu0 }
 0x26f   :  { %v1990_v28 = vpop.f32.mrf.mxu1  ;;  %v3231_v14 = vpop.f32.mrf.mxu0 }
 0x270   :  { %v19136_v45 = vmax.f32 %v2346_v34, %v3231_v14  ;;  %v2348_v14 = vmax.f32 %v18582_v53, %v1990_v28 }
 0x271   :  { %v15274_v62 = vpop.f32.mrf.mxu1  ;;  %v15522_v44 = vpop.f32.mrf.mxu0 }
 0x273   :  { %v1995_v10 = vpop.f32.mrf.mxu1  ;;  %15372 = vmatmul.mubr.msk.bf16.gmra.mxu1 %vm467_vm2, %v17362_v8  ;;  %v3236_v5 = vpop.f32.mrf.mxu0  ;;  %15620 = vmatmul.mubr.msk.bf16.gmra.mxu0 %vm467_vm2, %v17363_v48  ;;  %v17365_v8 = vld [vmem:[%s23251_s0 + $0x538] sm:$0xff]  }
 0x274   :  { %v19141_v54 = vmax.f32 %v2347_v25, %v3236_v5  ;;  %15375 = vmatprep.mubr.msk.bf16.mxu1 %vm17772_vm1, %v23331_v15  ;;  %15623 = vmatprep.mubr.msk.bf16.mxu0 %vm17772_vm1, %v23331_v15  ;;  %v2349_v5 = vmax.f32 %v18586_v4, %v1995_v10  ;;  %v17366_v10 = vld [vmem:[%s23251_s0 + $0x364] sm:$0xff]  }
 0x275   :  { %v15277_v50 = vpop.f32.mrf.mxu1  ;;  %v15525_v34 = vpop.f32.mrf.mxu0 }
 0x277   :  { %v1998_v62 = vpop.f32.mrf.mxu1  ;;  %v3239_v57 = vpop.f32.mrf.mxu0 }
 0x278   :  { %v19154_v48 = vmax.f32 %v2348_v14, %v3239_v57  ;;  %v2350_v57 = vmax.f32 %v18602_v47, %v1998_v62 }
 0x279   :  { %v15278_v44 = vpop.f32.mrf.mxu1  ;;  %v15526_v25 = vpop.f32.mrf.mxu0 }
 0x27b   :  { %v2003_v50 = vpop.f32.mrf.mxu1  ;;  %15376 = vmatmul.mubr.msk.bf16.gmra.mxu1 %vm467_vm2, %v17364_v38  ;;  %v3244_v53 = vpop.f32.mrf.mxu0  ;;  %15624 = vmatmul.mubr.msk.bf16.gmra.mxu0 %vm467_vm2, %v17365_v8  ;;  %v17367_v38 = vld [vmem:[%s23251_s0 + $0x540] sm:$0xff]  }
 0x27c   :  { %v19159_v28 = vmax.f32 %v2349_v5, %v3244_v53  ;;  %15379 = vmatprep.mubr.msk.bf16.mxu1 %vm17772_vm1, %v23331_v15  ;;  %15627 = vmatprep.mubr.msk.bf16.mxu0 %vm17772_vm1, %v23331_v15  ;;  %v2351_v53 = vmax.f32 %v18606_v43, %v2003_v50  ;;  %v17368_v50 = vld [vmem:[%s23251_s0 + $0x36c] sm:$0xff]  }
 0x27d   :  { %v15281_v34 = vpop.f32.mrf.mxu1  ;;  %v15529_v14 = vpop.f32.mrf.mxu0 }
 0x27f   :  { %v2006_v44 = vpop.f32.mrf.mxu1  ;;  %v3247_v4 = vpop.f32.mrf.mxu0 }
 0x280   :  { %v19172_v8 = vmax.f32 %v2350_v57, %v3247_v4  ;;  %v2352_v4 = vmax.f32 %v18622_v37, %v2006_v44 }
 0x281   :  { %v15282_v25 = vpop.f32.mrf.mxu1  ;;  %v15530_v5 = vpop.f32.mrf.mxu0 }
 0x283   :  { %v2011_v34 = vpop.f32.mrf.mxu1  ;;  %15380 = vmatmul.mubr.msk.bf16.gmra.mxu1 %vm467_vm2, %v17366_v10  ;;  %v3252_v47 = vpop.f32.mrf.mxu0  ;;  %15628 = vmatmul.mubr.msk.bf16.gmra.mxu0 %vm467_vm2, %v17367_v38  ;;  %v17369_v10 = vld [vmem:[%s23251_s0 + $0x548] sm:$0xff]  }
 0x284   :  { %v19177_v62 = vmax.f32 %v2351_v53, %v3252_v47  ;;  %15383 = vmatprep.mubr.msk.bf16.mxu1 %vm17772_vm1, %v23331_v15  ;;  %15631 = vmatprep.mubr.msk.bf16.mxu0 %vm17772_vm1, %v23331_v15  ;;  %v2353_v47 = vmax.f32 %v18626_v33, %v2011_v34  ;;  %v17370_v34 = vld [vmem:[%s23251_s0 + $0x374] sm:$0xff]  }
 0x285   :  { %v15285_v14 = vpop.f32.mrf.mxu1  ;;  %v15533_v57 = vpop.f32.mrf.mxu0 }
 0x287   :  { %v2014_v25 = vpop.f32.mrf.mxu1  ;;  %v3255_v43 = vpop.f32.mrf.mxu0 }
 0x288   :  { %v19190_v38 = vmax.f32 %v2352_v4, %v3255_v43  ;;  %v2354_v43 = vmax.f32 %v18642_v27, %v2014_v25 }
 0x289   :  { %v15286_v5 = vpop.f32.mrf.mxu1  ;;  %v15534_v53 = vpop.f32.mrf.mxu0 }
 0x28b   :  { %v2019_v14 = vpop.f32.mrf.mxu1  ;;  %15384 = vmatmul.mubr.msk.bf16.gmra.mxu1 %vm467_vm2, %v17368_v50  ;;  %v3260_v37 = vpop.f32.mrf.mxu0  ;;  %15632 = vmatmul.mubr.msk.bf16.gmra.mxu0 %vm467_vm2, %v17369_v10  ;;  %v17371_v50 = vld [vmem:[%s23251_s0 + $0x550] sm:$0xff]  }
 0x28c   :  { %v19195_v44 = vmax.f32 %v2353_v47, %v3260_v37  ;;  %15387 = vmatprep.mubr.msk.bf16.mxu1 %vm17772_vm1, %v23331_v15  ;;  %15635 = vmatprep.mubr.msk.bf16.mxu0 %vm17772_vm1, %v23331_v15  ;;  %v2355_v37 = vmax.f32 %v18646_v23, %v2019_v14  ;;  %v17372_v14 = vld [vmem:[%s23251_s0 + $0x37c] sm:$0xff]  }
 0x28d   :  { %v15289_v57 = vpop.f32.mrf.mxu1  ;;  %v15537_v4 = vpop.f32.mrf.mxu0 }
 0x28e   :  { %23332 = vst [vmem:[#allocation74_spill] sm:$0xff] %v19195_v44 }
 0x28f   :  { %v2022_v5 = vpop.f32.mrf.mxu1  ;;  %v3263_v33 = vpop.f32.mrf.mxu0 }
 0x290   :  { %v19208_v10 = vmax.f32 %v2354_v43, %v3263_v33  ;;  %v23335_v33 = vld [vmem:[#allocation54_spill] sm:$0xff] }
 0x291   :  { %v15290_v53 = vpop.f32.mrf.mxu1  ;;  %v15538_v47 = vpop.f32.mrf.mxu0 }
 0x292   :  { %23333 = vst [vmem:[#allocation75_spill] sm:$0xff] %v19208_v10  ;;  %v2356_v53 = vmax.f32 %v23335_v33, %v2022_v5 }
 0x293   :  { %v2027_v57 = vpop.f32.mrf.mxu1  ;;  %15388 = vmatmul.mubr.msk.bf16.gmra.mxu1 %vm467_vm2, %v17370_v34  ;;  %v3268_v27 = vpop.f32.mrf.mxu0  ;;  %15636 = vmatmul.mubr.msk.bf16.gmra.mxu0 %vm467_vm2, %v17371_v50  ;;  %v17373_v34 = vld [vmem:[%s23251_s0 + $0x558] sm:$0xff]  }
 0x294   :  { %v19213_v25 = vmax.f32 %v2355_v37, %v3268_v27  ;;  %15391 = vmatprep.mubr.msk.bf16.mxu1 %vm17772_vm1, %v23331_v15  ;;  %15639 = vmatprep.mubr.msk.bf16.mxu0 %vm17772_vm1, %v23331_v15 }
 0x295   :  { %v15293_v4 = vpop.f32.mrf.mxu1  ;;  %v15541_v43 = vpop.f32.mrf.mxu0 }
 0x296   :  { %23334 = vst [vmem:[#allocation76_spill] sm:$0xff] %v19213_v25  ;;  %v23337_v25 = vld [vmem:[#allocation56_spill] sm:$0xff] }
 0x297   :  { %v2030_v47 = vpop.f32.mrf.mxu1  ;;  %v3271_v23 = vpop.f32.mrf.mxu0  ;;  %v2357_v10 = vmax.f32 %v23337_v25, %v2027_v57  ;;  %v17374_v25 = vld [vmem:[%s23251_s0 + $0x384] sm:$0xff]  }
 0x298   :  { %v19226_v50 = vmax.f32 %v2356_v53, %v3271_v23  ;;  %v23339_v23 = vld [vmem:[#allocation58_spill] sm:$0xff] }
 0x299   :  { %v15294_v37 = vpop.f32.mrf.mxu1  ;;  %v15542_v27 = vpop.f32.mrf.mxu0 }
 0x29a   :  { %23336 = vst [vmem:[#allocation54_spill] sm:$0xff] %v19226_v50  ;;  %v2358_v37 = vmax.f32 %v23339_v23, %v2030_v47 }
 0x29b   :  { %v2035_v4 = vpop.f32.mrf.mxu1  ;;  %15392 = vmatmul.mubr.msk.bf16.gmra.mxu1 %vm467_vm2, %v17372_v14  ;;  %v3276_v5 = vpop.f32.mrf.mxu0  ;;  %15640 = vmatmul.mubr.msk.bf16.gmra.mxu0 %vm467_vm2, %v17373_v34 }
 0x29c   :  { %v19231_v43 = vmax.f32 %v2357_v10, %v3276_v5  ;;  %15395 = vmatprep.mubr.msk.bf16.mxu1 %vm17772_vm1, %v23331_v15  ;;  %15643 = vmatprep.mubr.msk.bf16.mxu0 %vm17772_vm1, %v23331_v15  ;;  %v17375_v10 = vld [vmem:[%s23251_s0 + $0x560] sm:$0xff]  }
 0x29d   :  { %v15297_v33 = vpop.f32.mrf.mxu1  ;;  %v15545_v53 = vpop.f32.mrf.mxu0 }
 0x29e   :  { %23338 = vst [vmem:[#allocation56_spill] sm:$0xff] %v19231_v43  ;;  %v23341_v43 = vld [vmem:[#allocation60_spill] sm:$0xff] }
 0x29f   :  { %v2038_v27 = vpop.f32.mrf.mxu1  ;;  %v3279_v57 = vpop.f32.mrf.mxu0  ;;  %v2359_v50 = vmax.f32 %v23341_v43, %v2035_v4  ;;  %v17376_v43 = vld [vmem:[%s23251_s0 + $0x38c] sm:$0xff]  }
 0x2a0   :  { %v19244_v14 = vmax.f32 %v2358_v37, %v3279_v57  ;;  %v23343_v57 = vld [vmem:[#allocation62_spill] sm:$0xff] }
 0x2a1   :  { %v15298_v34 = vpop.f32.mrf.mxu1  ;;  %v15546_v5 = vpop.f32.mrf.mxu0 }
 0x2a2   :  { %23340 = vst [vmem:[#allocation58_spill] sm:$0xff] %v19244_v14  ;;  %v2360_v34 = vmax.f32 %v23343_v57, %v2038_v27 }
 0x2a3   :  { %v2043_v33 = vpop.f32.mrf.mxu1  ;;  %15396 = vmatmul.mubr.msk.bf16.gmra.mxu1 %vm467_vm2, %v17374_v25  ;;  %v3284_v47 = vpop.f32.mrf.mxu0  ;;  %15644 = vmatmul.mubr.msk.bf16.gmra.mxu0 %vm467_vm2, %v17375_v10 }
 0x2a4   :  { %v19249_v53 = vmax.f32 %v2359_v50, %v3284_v47  ;;  %15399 = vmatprep.mubr.msk.bf16.mxu1 %vm17772_vm1, %v23331_v15  ;;  %15647 = vmatprep.mubr.msk.bf16.mxu0 %vm17772_vm1, %v23331_v15  ;;  %v17377_v50 = vld [vmem:[%s23251_s0 + $0x568] sm:$0xff]  }
 0x2a5   :  { %v15301_v23 = vpop.f32.mrf.mxu1  ;;  %v15549_v37 = vpop.f32.mrf.mxu0 }
 0x2a6   :  { %23342 = vst [vmem:[#allocation60_spill] sm:$0xff] %v19249_v53  ;;  %v23345_v53 = vld [vmem:[#allocation64_spill] sm:$0xff] }
 0x2a7   :  { %v2046_v5 = vpop.f32.mrf.mxu1  ;;  %v3287_v4 = vpop.f32.mrf.mxu0  ;;  %v2361_v14 = vmax.f32 %v23345_v53, %v2043_v33  ;;  %v17378_v53 = vld [vmem:[%s23251_s0 + $0x394] sm:$0xff]  }
 0x2a8   :  { %v19262_v25 = vmax.f32 %v2360_v34, %v3287_v4  ;;  %v23347_v4 = vld [vmem:[#allocation66_spill] sm:$0xff] }
 0x2a9   :  { %v15302_v10 = vpop.f32.mrf.mxu1  ;;  %v15550_v47 = vpop.f32.mrf.mxu0 }
 0x2aa   :  { %23344 = vst [vmem:[#allocation62_spill] sm:$0xff] %v19262_v25  ;;  %v2362_v10 = vmax.f32 %v23347_v4, %v2046_v5 }
 0x2ab   :  { %v2051_v23 = vpop.f32.mrf.mxu1  ;;  %15400 = vmatmul.mubr.msk.bf16.gmra.mxu1 %vm467_vm2, %v17376_v43  ;;  %v3292_v27 = vpop.f32.mrf.mxu0  ;;  %15648 = vmatmul.mubr.msk.bf16.gmra.mxu0 %vm467_vm2, %v17377_v50 }
 0x2ac   :  { %v19267_v37 = vmax.f32 %v2361_v14, %v3292_v27  ;;  %15403 = vmatprep.mubr.msk.bf16.mxu1 %vm17772_vm1, %v23331_v15  ;;  %15651 = vmatprep.mubr.msk.bf16.mxu0 %vm17772_vm1, %v23331_v15  ;;  %v17379_v14 = vld [vmem:[%s23251_s0 + $0x570] sm:$0xff]  }
 0x2ad   :  { %v15305_v57 = vpop.f32.mrf.mxu1  ;;  %v15553_v34 = vpop.f32.mrf.mxu0 }
 0x2ae   :  { %23346 = vst [vmem:[#allocation64_spill] sm:$0xff] %v19267_v37  ;;  %v23349_v37 = vld [vmem:[#allocation68_spill] sm:$0xff] }
 0x2af   :  { %v2054_v47 = vpop.f32.mrf.mxu1  ;;  %v3295_v33 = vpop.f32.mrf.mxu0  ;;  %v2363_v25 = vmax.f32 %v23349_v37, %v2051_v23  ;;  %v17380_v37 = vld [vmem:[%s23251_s0 + $0x39c] sm:$0xff]  }
 0x2b0   :  { %v19280_v43 = vmax.f32 %v2362_v10, %v3295_v33  ;;  %v23351_v33 = vld [vmem:[#allocation70_spill] sm:$0xff] }
 0x2b1   :  { %v15306_v50 = vpop.f32.mrf.mxu1  ;;  %v15554_v27 = vpop.f32.mrf.mxu0 }
 0x2b2   :  { %23348 = vst [vmem:[#allocation66_spill] sm:$0xff] %v19280_v43  ;;  %v2364_v50 = vmax.f32 %v23351_v33, %v2054_v47 }
 0x2b3   :  { %v2059_v57 = vpop.f32.mrf.mxu1  ;;  %15404 = vmatmul.mubr.msk.bf16.gmra.mxu1 %vm467_vm2, %v17378_v53  ;;  %v3300_v5 = vpop.f32.mrf.mxu0  ;;  %15652 = vmatmul.mubr.msk.bf16.gmra.mxu0 %vm467_vm2, %v17379_v14 }
 0x2b4   :  { %v19285_v34 = vmax.f32 %v2363_v25, %v3300_v5  ;;  %15407 = vmatprep.mubr.msk.bf16.mxu1 %vm17772_vm1, %v23331_v15  ;;  %15655 = vmatprep.mubr.msk.bf16.mxu0 %vm17772_vm1, %v23331_v15  ;;  %v17381_v25 = vld [vmem:[%s23251_s0 + $0x578] sm:$0xff]  }
 0x2b5   :  { %v15309_v4 = vpop.f32.mrf.mxu1  ;;  %v15557_v10 = vpop.f32.mrf.mxu0 }
 0x2b6   :  { %23350 = vst [vmem:[#allocation68_spill] sm:$0xff] %v19285_v34  ;;  %v23353_v34 = vld [vmem:[#allocation71_spill] sm:$0xff] }
 0x2b7   :  { %v2062_v27 = vpop.f32.mrf.mxu1  ;;  %v3303_v23 = vpop.f32.mrf.mxu0  ;;  %v2365_v43 = vmax.f32 %v23353_v34, %v2059_v57  ;;  %v17382_v34 = vld [vmem:[%s23251_s0 + $0x3a4] sm:$0xff]  }
 0x2b8   :  { %v19298_v53 = vmax.f32 %v2364_v50, %v3303_v23  ;;  %v23355_v23 = vld [vmem:[#allocation72_spill] sm:$0xff] }
 0x2b9   :  { %v15310_v14 = vpop.f32.mrf.mxu1  ;;  %v15558_v5 = vpop.f32.mrf.mxu0 }
 0x2ba   :  { %23352 = vst [vmem:[#allocation70_spill] sm:$0xff] %v19298_v53  ;;  %v2366_v14 = vmax.f32 %v23355_v23, %v2062_v27 }
 0x2bb   :  { %v2067_v4 = vpop.f32.mrf.mxu1  ;;  %15408 = vmatmul.mubr.msk.bf16.gmra.mxu1 %vm467_vm2, %v17380_v37  ;;  %v3308_v47 = vpop.f32.mrf.mxu0  ;;  %15656 = vmatmul.mubr.msk.bf16.gmra.mxu0 %vm467_vm2, %v17381_v25 }
 0x2bc   :  { %v19303_v10 = vmax.f32 %v2365_v43, %v3308_v47  ;;  %15411 = vmatprep.mubr.msk.bf16.mxu1 %vm17772_vm1, %v23331_v15  ;;  %15659 = vmatprep.mubr.msk.bf16.mxu0 %vm17772_vm1, %v23331_v15  ;;  %v17383_v43 = vld [vmem:[%s23251_s0 + $0x580] sm:$0xff]  }
 0x2bd   :  { %v15313_v33 = vpop.f32.mrf.mxu1  ;;  %v15561_v50 = vpop.f32.mrf.mxu0 }
 0x2be   :  { %23354 = vst [vmem:[#allocation71_spill] sm:$0xff] %v19303_v10  ;;  %v23357_v10 = vld [vmem:[#allocation3_spill] sm:$0xff] }
 0x2bf   :  { %v2070_v5 = vpop.f32.mrf.mxu1  ;;  %v3311_v57 = vpop.f32.mrf.mxu0  ;;  %v2367_v53 = vmax.f32 %v23357_v10, %v2067_v4  ;;  %v17384_v10 = vld [vmem:[%s23251_s0 + $0x3ac] sm:$0xff]  }
 0x2c0   :  { %v19316_v37 = vmax.f32 %v2366_v14, %v3311_v57  ;;  %v23359_v57 = vld [vmem:[#allocation4_spill] sm:$0xff] }
 0x2c1   :  { %v15314_v25 = vpop.f32.mrf.mxu1  ;;  %v15562_v47 = vpop.f32.mrf.mxu0 }
 0x2c2   :  { %23356 = vst [vmem:[#allocation72_spill] sm:$0xff] %v19316_v37  ;;  %v2368_v25 = vmax.f32 %v23359_v57, %v2070_v5 }
 0x2c3   :  { %v2075_v33 = vpop.f32.mrf.mxu1  ;;  %15412 = vmatmul.mubr.msk.bf16.gmra.mxu1 %vm467_vm2, %v17382_v34  ;;  %v3316_v27 = vpop.f32.mrf.mxu0  ;;  %15660 = vmatmul.mubr.msk.bf16.gmra.mxu0 %vm467_vm2, %v17383_v43 }
 0x2c4   :  { %v19321_v50 = vmax.f32 %v2367_v53, %v3316_v27  ;;  %15415 = vmatprep.mubr.msk.bf16.mxu1 %vm17772_vm1, %v23331_v15  ;;  %15663 = vmatprep.mubr.msk.bf16.mxu0 %vm17772_vm1, %v23331_v15  ;;  %v17385_v53 = vld [vmem:[%s23251_s0 + $0x588] sm:$0xff]  }
 0x2c5   :  { %v15317_v23 = vpop.f32.mrf.mxu1  ;;  %v15565_v14 = vpop.f32.mrf.mxu0 }
 0x2c6   :  { %23358 = vst [vmem:[#allocation3_spill] sm:$0xff] %v19321_v50  ;;  %v23361_v50 = vld [vmem:[#allocation5_spill] sm:$0xff] }
 0x2c7   :  { %v2078_v47 = vpop.f32.mrf.mxu1  ;;  %v3319_v4 = vpop.f32.mrf.mxu0  ;;  %v2369_v37 = vmax.f32 %v23361_v50, %v2075_v33  ;;  %v17386_v50 = vld [vmem:[%s23251_s0 + $0x3b4] sm:$0xff]  }
 0x2c8   :  { %v19334_v34 = vmax.f32 %v2368_v25, %v3319_v4  ;;  %v23363_v4 = vld [vmem:[#allocation6_spill] sm:$0xff] }
 0x2c9   :  { %v15318_v43 = vpop.f32.mrf.mxu1  ;;  %v15566_v27 = vpop.f32.mrf.mxu0 }
 0x2ca   :  { %23360 = vst [vmem:[#allocation4_spill] sm:$0xff] %v19334_v34  ;;  %v2370_v43 = vmax.f32 %v23363_v4, %v2078_v47 }
 0x2cb   :  { %v2083_v23 = vpop.f32.mrf.mxu1  ;;  %15416 = vmatmul.mubr.msk.bf16.gmra.mxu1 %vm467_vm2, %v17384_v10  ;;  %v3324_v5 = vpop.f32.mrf.mxu0  ;;  %15664 = vmatmul.mubr.msk.bf16.gmra.mxu0 %vm467_vm2, %v17385_v53 }
 0x2cc   :  { %v19339_v14 = vmax.f32 %v2369_v37, %v3324_v5  ;;  %15419 = vmatprep.mubr.msk.bf16.mxu1 %vm17772_vm1, %v23331_v15  ;;  %15667 = vmatprep.mubr.msk.bf16.mxu0 %vm17772_vm1, %v23331_v15  ;;  %v17387_v37 = vld [vmem:[%s23251_s0 + $0x590] sm:$0xff]  }
 0x2cd   :  { %v15321_v57 = vpop.f32.mrf.mxu1  ;;  %v15569_v25 = vpop.f32.mrf.mxu0 }
 0x2ce   :  { %23362 = vst [vmem:[#allocation5_spill] sm:$0xff] %v19339_v14  ;;  %v23365_v14 = vld [vmem:[#allocation7_spill] sm:$0xff] }
 0x2cf   :  { %v2086_v27 = vpop.f32.mrf.mxu1  ;;  %v3327_v33 = vpop.f32.mrf.mxu0  ;;  %v2371_v34 = vmax.f32 %v23365_v14, %v2083_v23  ;;  %v17388_v14 = vld [vmem:[%s23251_s0 + $0x3bc] sm:$0xff]  }
 0x2d0   :  { %v19352_v10 = vmax.f32 %v2370_v43, %v3327_v33  ;;  %v23367_v33 = vld [vmem:[#allocation8_spill] sm:$0xff] }
 0x2d1   :  { %v15322_v53 = vpop.f32.mrf.mxu1  ;;  %v15570_v5 = vpop.f32.mrf.mxu0 }
 0x2d2   :  { %23364 = vst [vmem:[#allocation6_spill] sm:$0xff] %v19352_v10  ;;  %v2372_v53 = vmax.f32 %v23367_v33, %v2086_v27 }
 0x2d3   :  { %v2091_v57 = vpop.f32.mrf.mxu1  ;;  %15420 = vmatmul.mubr.msk.bf16.gmra.mxu1 %vm467_vm2, %v17386_v50  ;;  %v3332_v47 = vpop.f32.mrf.mxu0  ;;  %15668 = vmatmul.mubr.msk.bf16.gmra.mxu0 %vm467_vm2, %v17387_v37 }
 0x2d4   :  { %v19357_v25 = vmax.f32 %v2371_v34, %v3332_v47  ;;  %15423 = vmatprep.mubr.msk.bf16.mxu1 %vm17772_vm1, %v23331_v15  ;;  %15671 = vmatprep.mubr.msk.bf16.mxu0 %vm17772_vm1, %v23331_v15  ;;  %v17389_v34 = vld [vmem:[%s23251_s0 + $0x598] sm:$0xff]  }
 0x2d5   :  { %v15325_v4 = vpop.f32.mrf.mxu1  ;;  %v15573_v43 = vpop.f32.mrf.mxu0 }
 0x2d6   :  { %23366 = vst [vmem:[#allocation7_spill] sm:$0xff] %v19357_v25  ;;  %v23369_v25 = vld [vmem:[#allocation9_spill] sm:$0xff] }
 0x2d7   :  { %v2094_v5 = vpop.f32.mrf.mxu1  ;;  %v3335_v23 = vpop.f32.mrf.mxu0  ;;  %v2373_v10 = vmax.f32 %v23369_v25, %v2091_v57  ;;  %v17390_v25 = vld [vmem:[%s23251_s0 + $0x3c4] ss:$0 sps:$4 sm:$0xff]  }
 0x2d8   :  { %v19370_v50 = vmax.f32 %v2372_v53, %v3335_v23  ;;  %v23371_v23 = vld [vmem:[#allocation10_spill] sm:$0xff] }
 0x2d9   :  { %v15326_v37 = vpop.f32.mrf.mxu1  ;;  %v15574_v47 = vpop.f32.mrf.mxu0 }
 0x2da   :  { %23368 = vst [vmem:[#allocation8_spill] sm:$0xff] %v19370_v50  ;;  %v2374_v37 = vmax.f32 %v23371_v23, %v2094_v5 }
 0x2db   :  { %v2099_v4 = vpop.f32.mrf.mxu1  ;;  %15424 = vmatmul.mubr.msk.bf16.gmra.mxu1 %vm467_vm2, %v17388_v14  ;;  %v3340_v27 = vpop.f32.mrf.mxu0  ;;  %15672 = vmatmul.mubr.msk.bf16.gmra.mxu0 %vm467_vm2, %v17389_v34 }
 0x2dc   :  { %v19375_v43 = vmax.f32 %v2373_v10, %v3340_v27  ;;  %15427 = vmatprep.mubr.msk.bf16.mxu1 %vm17772_vm1, %v23331_v15  ;;  %15675 = vmatprep.mubr.msk.bf16.mxu0 %vm17772_vm1, %v23331_v15  ;;  %v17391_v10 = vld [vmem:[%s23251_s0 + $0x5a0] sm:$0xff]  }
 0x2dd   :  { %v15329_v33 = vpop.f32.mrf.mxu1  ;;  %v15577_v53 = vpop.f32.mrf.mxu0 }
 0x2de   :  { %23370 = vst [vmem:[#allocation9_spill] sm:$0xff] %v19375_v43  ;;  %v23373_v43 = vld [vmem:[#allocation11_spill] sm:$0xff] }
 0x2df   :  { %v2102_v47 = vpop.f32.mrf.mxu1  ;;  %v3343_v57 = vpop.f32.mrf.mxu0  ;;  %v2375_v50 = vmax.f32 %v23373_v43, %v2099_v4  ;;  %v17392_v43 = vld [vmem:[%s23251_s0 + $0x5a8] ss:$0 sps:$4 sm:$0xff]  }
 0x2e0   :  { %v19388_v14 = vmax.f32 %v2374_v37, %v3343_v57  ;;  %v23375_v57 = vld [vmem:[#allocation12_spill] sm:$0xff] }
 0x2e1   :  { %v15330_v34 = vpop.f32.mrf.mxu1  ;;  %v15578_v27 = vpop.f32.mrf.mxu0 }
 0x2e2   :  { %23372 = vst [vmem:[#allocation10_spill] sm:$0xff] %v19388_v14  ;;  %v2376_v34 = vmax.f32 %v23375_v57, %v2102_v47 }
 0x2e3   :  { %v2107_v33 = vpop.f32.mrf.mxu1  ;;  %15428 = vmatmul.mubr.msk.bf16.gmra.mxu1 %vm467_vm2, %v17390_v25  ;;  %v3348_v5 = vpop.f32.mrf.mxu0  ;;  %15676 = vmatmul.mubr.msk.bf16.gmra.mxu0 %vm467_vm2, %v17391_v10 }
 0x2e4   :  { %v19393_v53 = vmax.f32 %v2375_v50, %v3348_v5  ;;  %15679 = vmatprep.mubr.msk.bf16.mxu0 %vm17772_vm1, %v23331_v15  ;;  %15691 = vmatprep.mubr.msk.bf16.mxu1 %vm17772_vm1, %v23331_v15  ;;  %v17393_v50 = vld [vmem:[%s23251_s0 + $0x5ac] sm:$0xff]  }
 0x2e5   :  { %v15333_v23 = vpop.f32.mrf.mxu1  ;;  %v15581_v37 = vpop.f32.mrf.mxu0 }
 0x2e6   :  { %23374 = vst [vmem:[#allocation11_spill] sm:$0xff] %v19393_v53  ;;  %v23377_v53 = vld [vmem:[#allocation13_spill] sm:$0xff] }
 0x2e7   :  { %v2110_v27 = vpop.f32.mrf.mxu1  ;;  %v3351_v4 = vpop.f32.mrf.mxu0  ;;  %v2377_v14 = vmax.f32 %v23377_v53, %v2107_v33 }
 0x2e8   :  { %v19406_v25 = vmax.f32 %v2376_v34, %v3351_v4  ;;  %v23379_v4 = vld [vmem:[#allocation2_spill] sm:$0xff] }
 0x2e9   :  { %v15334_v10 = vpop.f32.mrf.mxu1  ;;  %v15582_v5 = vpop.f32.mrf.mxu0 }
 0x2ea   :  { %23376 = vst [vmem:[#allocation12_spill] sm:$0xff] %v19406_v25  ;;  %v23380_v10 = vld [vmem:[#allocation14_spill] sm:$0xff] }
 0x2eb   :  { %v2115_v23 = vpop.f32.mrf.mxu1  ;;  %v3356_v37 = vpop.f32.mrf.mxu0  ;;  %15680 = vmatmul.mubr.msk.bf16.gmra.mxu0 %vm467_vm2, %v17392_v43  ;;  %15692 = vmatmul.mubr.msk.bf16.vlgmr.msra.gmra.mxu1 %vm467_vm2, %v17393_v50  ;;  %v2378_v33 = vmax.f32 %v23380_v10, %v2110_v27  ;;  %v17395_v50 = vld [vmem:[%s23251_s0 + $0x790] sm:$0xff]  }
 0x2ec   :  { %v19411_v47 = vmax.f32 %v2377_v14, %v3356_v37  ;;  %15695 = vmatprep.mubr.msk.bf16.mxu1 %vm17772_vm1, %v23331_v15  ;;  %15943 = vmatprep.mubr.msk.bf16.mxu0 %vm17772_vm1, %v23331_v15  ;;  %v17394_v14 = vld [vmem:[%s23251_s0 + $0x5b4] sm:$0xff]  }
 0x2ed   :  { %v15337_v57 = vpop.f32.mrf.mxu1  ;;  %v15585_v34 = vpop.f32.mrf.mxu0  ;;  %16188 = vmatpush3.bf16.msra.mxu1 %v23379_v4  ;;  %v17762_v27 = vld [vmem:[%s23250_s1 + $0x10] sm:$0xff]  }
 0x2ee   :  { %23378 = vst [vmem:[#allocation13_spill] sm:$0xff] %v19411_v47  ;;  %16189 = vmatprep.subr.bf16.mxu1 %v23331_v15  ;;  %v23382_v34 = vld [vmem:[#allocation15_spill] sm:$0xff] }
 0x2ef   :  { %v2118_v53 = vpop.f32.mrf.mxu1  ;;  %v3359_v43 = vpop.f32.mrf.mxu0  ;;  %v2379_v10 = vmax.f32 %v23382_v34, %v2115_v23  ;;  %v23384_v23 = vld [vmem:[#allocation16_spill] sm:$0xff]  ;;  %v17397_v34 = vld [vmem:[%s23251_s0 + $0x798] sm:$0xff]  }
 0x2f0   :  { %v19426_v5 = vmax.f32 %v2378_v33, %v3359_v43 }
 0x2f1   :  { %v15338_v37 = vpop.f32.mrf.mxu1  ;;  %v15586_v57 = vpop.f32.mrf.mxu0  ;;  %16190 = vmatpush3.bf16.msra.mxu1 %v17762_v27 }
 0x2f2   :  { %23381 = vst [vmem:[#allocation14_spill] sm:$0xff] %v19426_v5  ;;  %16191 = vmatprep.subr.bf16.mxu1 %v23331_v15  ;;  %v2380_v37 = vmax.f32 %v23384_v23, %v2118_v53  ;;  %v17396_v57 = vld [vmem:[%s23251_s0 + $0x5bc] sm:$0xff]  }
 0x2f3   :  { %v2123_v47 = vpop.f32.mrf.mxu1  ;;  %v3364_v25 = vpop.f32.mrf.mxu0  ;;  %15696 = vmatmul.mubr.msk.bf16.gmra.mxu1 %vm467_vm2, %v17394_v14  ;;  %15944 = vmatmul.mubr.msk.bf16.vlgmr.msra.gmra.mxu0 %vm467_vm2, %v17395_v50  ;;  %v17763_v14 = vld [vmem:[%s23250_s1 + $0x8] sm:$0xff]  }
 0x2f4   :  { %v19435_v44 = vmax.f32 %v2379_v10, %v3364_v25  ;;  %16440 = vmatpush3.bf16.msra.mxu0 %v23379_v4  ;;  %15699 = vmatprep.mubr.msk.bf16.mxu1 %vm17772_vm1, %v23331_v15  ;;  %v17764_v4 = vld [vmem:[%s23250_s1] sm:$0xff]  }
 0x2f5   :  { %v15341_v33 = vpop.f32.mrf.mxu1  ;;  %v15589_v43 = vpop.f32.mrf.mxu0  ;;  %15947 = vmatprep.mubr.msk.bf16.mxu0 %vm17772_vm1, %v23331_v15  ;;  %16441 = vmatprep.subr.bf16.mxu0 %v23331_v15 }
 0x2f6   :  { %23383 = vst [vmem:[#allocation15_spill] sm:$0xff] %v19435_v44  ;;  %16192 = vmatpush3.bf16.msra.mxu1 %v17763_v14  ;;  %v23385_v43 = vld [vmem:[#allocation17_spill] sm:$0xff] }
 0x2f7   :  { %v2126_v25 = vpop.f32.mrf.mxu1  ;;  %v3367_v50 = vpop.f32.mrf.mxu0  ;;  %16193 = vmatprep.subr.bf16.mxu1 %v23331_v15  ;;  %v2381_v23 = vmax.f32 %v23385_v43, %v2123_v47 }
 0x2f8   :  { %v19454_v10 = vmax.f32 %v2380_v37, %v3367_v50  ;;  %16442 = vmatpush3.bf16.msra.mxu0 %v17762_v27  ;;  %v23387_v50 = vld [vmem:[#allocation18_spill] sm:$0xff] }
 0x2f9   :  { %v15342_v53 = vpop.f32.mrf.mxu1  ;;  %v15590_v33 = vpop.f32.mrf.mxu0  ;;  %16443 = vmatprep.subr.bf16.mxu0 %v23331_v15 }
 0x2fa   :  { %16194 = vmatpush3.bf16.msra.mxu1 %v17764_v4  ;;  %v2382_v53 = vmax.f32 %v23387_v50, %v2126_v25 }
 0x2fb   :  { %v2131_v44 = vpop.f32.mrf.mxu1  ;;  %v3372_v5 = vpop.f32.mrf.mxu0  ;;  %15700 = vmatmul.mubr.msk.bf16.gmra.mxu1 %vm467_vm2, %v17396_v57  ;;  %15948 = vmatmul.mubr.msk.bf16.gmra.mxu0 %vm467_vm2, %v17397_v34  ;;  %v17399_v34 = vld [vmem:[%s23251_s0 + $0x7a0] sm:$0xff]  }
 0x2fc   :  { %v19463_v37 = vmax.f32 %v2381_v23, %v3372_v5  ;;  %15703 = vmatprep.mubr.msk.bf16.mxu1 %vm17772_vm1, %v23331_v15  ;;  %15951 = vmatprep.mubr.msk.bf16.mxu0 %vm17772_vm1, %v23331_v15  ;;  %v17398_v5 = vld [vmem:[%s23251_s0 + $0x5c4] sm:$0xff]  }
 0x2fd   :  { %v15345_v47 = vpop.f32.mrf.mxu1  ;;  %v15593_v27 = vpop.f32.mrf.mxu0  ;;  %16444 = vmatpush3.bf16.msra.mxu0 %v17763_v14  ;;  %16691 = vmatprep.subr.bf16.mxu1 %v23331_v15 }
 0x2fe   :  { %23386 = vst [vmem:[#allocation16_spill] sm:$0xff] %v19463_v37  ;;  %16445 = vmatprep.subr.bf16.mxu0 %v23331_v15  ;;  %v23389_v47 = vld [vmem:[#allocation19_spill] sm:$0xff] }
 0x2ff   :  { %v2134_v57 = vpop.f32.mrf.mxu1  ;;  %v3375_v33 = vpop.f32.mrf.mxu0  ;;  %v2383_v27 = vmax.f32 %v23389_v47, %v2131_v44 }
 0x300   :  { %v19478_v43 = vmax.f32 %v2382_v53, %v3375_v33  ;;  %v23391_v33 = vld [vmem:[#allocation20_spill] sm:$0xff] }
 0x301   :  { %v15346_v23 = vpop.f32.mrf.mxu1  ;;  %v15594_v14 = vpop.f32.mrf.mxu0  ;;  %16446 = vmatpush3.bf16.msra.mxu0 %v17764_v4  ;;  %v2384_v44 = vmax.f32 %v23391_v33, %v2134_v57 }
 0x302   :  { %23388 = vst [vmem:[#allocation17_spill] sm:$0xff] %v19478_v43  ;;  %16943 = vmatprep.subr.bf16.mxu0 %v23331_v15 }
 0x303   :  { %v2139_v25 = vpop.f32.mrf.mxu1  ;;  %v3380_v50 = vpop.f32.mrf.mxu0  ;;  %15704 = vmatmul.mubr.msk.bf16.gmra.mxu1 %vm467_vm2, %v17398_v5  ;;  %15952 = vmatmul.mubr.msk.bf16.gmra.mxu0 %vm467_vm2, %v17399_v34  ;;  %v17400_v5 = vld [vmem:[%s23251_s0 + $0x5cc] sm:$0xff]  }
 0x304   :  { %v19484_v37 = vmax.f32 %v2383_v27, %v3380_v50  ;;  %15707 = vmatprep.mubr.msk.bf16.mxu1 %vm17772_vm1, %v23331_v15  ;;  %15955 = vmatprep.mubr.msk.bf16.mxu0 %vm17772_vm1, %v23331_v15  ;;  %v17401_v34 = vld [vmem:[%s23251_s0 + $0x7a8] sm:$0xff]  }
 0x305   :  { %v15349_v53 = vpop.f32.mrf.mxu1  ;;  %v15597_v4 = vpop.f32.mrf.mxu0 }
 0x306   :  { %23390 = vst [vmem:[#allocation18_spill] sm:$0xff] %v19484_v37  ;;  %v23393_v37 = vld [vmem:[#allocation21_spill] sm:$0xff] }
 0x307   :  { %v2142_v23 = vpop.f32.mrf.mxu1  ;;  %v3383_v14 = vpop.f32.mrf.mxu0  ;;  %v2385_v43 = vmax.f32 %v23393_v37, %v2139_v25  ;;  %v17402_v25 = vld [vmem:[%s23251_s0 + $0x5d4] sm:$0xff]  }
 0x308   :  { %v19497_v47 = vmax.f32 %v2384_v44, %v3383_v14  ;;  %v23395_v14 = vld [vmem:[#allocation22_spill] sm:$0xff] }
 0x309   :  { %v15350_v27 = vpop.f32.mrf.mxu1  ;;  %v15598_v50 = vpop.f32.mrf.mxu0 }
 0x30a   :  { %23392 = vst [vmem:[#allocation19_spill] sm:$0xff] %v19497_v47  ;;  %v2386_v27 = vmax.f32 %v23395_v14, %v2142_v23 }
 0x30b   :  { %v2147_v53 = vpop.f32.mrf.mxu1  ;;  %v3388_v4 = vpop.f32.mrf.mxu0  ;;  %15708 = vmatmul.mubr.msk.bf16.gmra.mxu1 %vm467_vm2, %v17400_v5  ;;  %15956 = vmatmul.mubr.msk.bf16.gmra.mxu0 %vm467_vm2, %v17401_v34 }
 0x30c   :  { %v19502_v57 = vmax.f32 %v2385_v43, %v3388_v4  ;;  %15711 = vmatprep.mubr.msk.bf16.mxu1 %vm17772_vm1, %v23331_v15  ;;  %15959 = vmatprep.mubr.msk.bf16.mxu0 %vm17772_vm1, %v23331_v15  ;;  %v17403_v43 = vld [vmem:[%s23251_s0 + $0x7b0] sm:$0xff]  }
 0x30d   :  { %v15353_v33 = vpop.f32.mrf.mxu1  ;;  %v15601_v44 = vpop.f32.mrf.mxu0 }
 0x30e   :  { %23394 = vst [vmem:[#allocation20_spill] sm:$0xff] %v19502_v57  ;;  %v23397_v57 = vld [vmem:[#allocation23_spill] sm:$0xff] }
 0x30f   :  { %v2150_v50 = vpop.f32.mrf.mxu1  ;;  %v3391_v37 = vpop.f32.mrf.mxu0  ;;  %v2387_v47 = vmax.f32 %v23397_v57, %v2147_v53  ;;  %v17404_v57 = vld [vmem:[%s23251_s0 + $0x5dc] sm:$0xff]  }
 0x310   :  { %v19515_v5 = vmax.f32 %v2386_v27, %v3391_v37  ;;  %v23399_v37 = vld [vmem:[#allocation24_spill] sm:$0xff] }
 0x311   :  { %v15354_v34 = vpop.f32.mrf.mxu1  ;;  %v15602_v4 = vpop.f32.mrf.mxu0 }
 0x312   :  { %23396 = vst [vmem:[#allocation21_spill] sm:$0xff] %v19515_v5  ;;  %v2388_v34 = vmax.f32 %v23399_v37, %v2150_v50 }
 0x313   :  { %v2155_v33 = vpop.f32.mrf.mxu1  ;;  %v3396_v44 = vpop.f32.mrf.mxu0  ;;  %15712 = vmatmul.mubr.msk.bf16.gmra.mxu1 %vm467_vm2, %v17402_v25  ;;  %15960 = vmatmul.mubr.msk.bf16.gmra.mxu0 %vm467_vm2, %v17403_v43 }
 0x314   :  { %v19520_v23 = vmax.f32 %v2387_v47, %v3396_v44  ;;  %15715 = vmatprep.mubr.msk.bf16.mxu1 %vm17772_vm1, %v23331_v15  ;;  %15963 = vmatprep.mubr.msk.bf16.mxu0 %vm17772_vm1, %v23331_v15  ;;  %v17405_v47 = vld [vmem:[%s23251_s0 + $0x7b8] sm:$0xff]  }
 0x315   :  { %v15357_v14 = vpop.f32.mrf.mxu1  ;;  %v15605_v27 = vpop.f32.mrf.mxu0 }
 0x316   :  { %23398 = vst [vmem:[#allocation22_spill] sm:$0xff] %v19520_v23  ;;  %v23401_v23 = vld [vmem:[#allocation25_spill] sm:$0xff] }
 0x317   :  { %v2158_v4 = vpop.f32.mrf.mxu1  ;;  %v3399_v53 = vpop.f32.mrf.mxu0  ;;  %v2389_v5 = vmax.f32 %v23401_v23, %v2155_v33  ;;  %v17406_v23 = vld [vmem:[%s23251_s0 + $0x5e4] sm:$0xff]  }
 0x318   :  { %v19533_v25 = vmax.f32 %v2388_v34, %v3399_v53  ;;  %v23403_v53 = vld [vmem:[#allocation26_spill] sm:$0xff] }
 0x319   :  { %v15358_v43 = vpop.f32.mrf.mxu1  ;;  %v15606_v44 = vpop.f32.mrf.mxu0 }
 0x31a   :  { %23400 = vst [vmem:[#allocation23_spill] sm:$0xff] %v19533_v25  ;;  %v2390_v43 = vmax.f32 %v23403_v53, %v2158_v4 }
 0x31b   :  { %v2163_v14 = vpop.f32.mrf.mxu1  ;;  %v3404_v27 = vpop.f32.mrf.mxu0  ;;  %15716 = vmatmul.mubr.msk.bf16.gmra.mxu1 %vm467_vm2, %v17404_v57  ;;  %15964 = vmatmul.mubr.msk.bf16.gmra.mxu0 %vm467_vm2, %v17405_v47 }
 0x31c   :  { %v19538_v50 = vmax.f32 %v2389_v5, %v3404_v27  ;;  %15719 = vmatprep.mubr.msk.bf16.mxu1 %vm17772_vm1, %v23331_v15  ;;  %15967 = vmatprep.mubr.msk.bf16.mxu0 %vm17772_vm1, %v23331_v15  ;;  %v17407_v5 = vld [vmem:[%s23251_s0 + $0x7c0] sm:$0xff]  }
 0x31d   :  { %v15361_v37 = vpop.f32.mrf.mxu1  ;;  %v15609_v34 = vpop.f32.mrf.mxu0 }
 0x31e   :  { %23402 = vst [vmem:[#allocation24_spill] sm:$0xff] %v19538_v50  ;;  %v23405_v50 = vld [vmem:[#allocation27_spill] sm:$0xff] }
 0x31f   :  { %v2166_v44 = vpop.f32.mrf.mxu1  ;;  %v3407_v33 = vpop.f32.mrf.mxu0  ;;  %v2391_v25 = vmax.f32 %v23405_v50, %v2163_v14  ;;  %v17408_v50 = vld [vmem:[%s23251_s0 + $0x5ec] sm:$0xff]  }
 0x320   :  { %v19551_v57 = vmax.f32 %v2390_v43, %v3407_v33  ;;  %v23407_v33 = vld [vmem:[#allocation28_spill] sm:$0xff] }
 0x321   :  { %v15362_v47 = vpop.f32.mrf.mxu1  ;;  %v15610_v27 = vpop.f32.mrf.mxu0 }
 0x322   :  { %23404 = vst [vmem:[#allocation25_spill] sm:$0xff] %v19551_v57  ;;  %v2392_v47 = vmax.f32 %v23407_v33, %v2166_v44 }
 0x323   :  { %v2171_v37 = vpop.f32.mrf.mxu1  ;;  %v3412_v34 = vpop.f32.mrf.mxu0  ;;  %15720 = vmatmul.mubr.msk.bf16.gmra.mxu1 %vm467_vm2, %v17406_v23  ;;  %15968 = vmatmul.mubr.msk.bf16.gmra.mxu0 %vm467_vm2, %v17407_v5 }
 0x324   :  { %v19556_v4 = vmax.f32 %v2391_v25, %v3412_v34  ;;  %15723 = vmatprep.mubr.msk.bf16.mxu1 %vm17772_vm1, %v23331_v15  ;;  %15971 = vmatprep.mubr.msk.bf16.mxu0 %vm17772_vm1, %v23331_v15  ;;  %v17409_v25 = vld [vmem:[%s23251_s0 + $0x7c8] sm:$0xff]  }
 0x325   :  { %v15365_v53 = vpop.f32.mrf.mxu1  ;;  %v15613_v43 = vpop.f32.mrf.mxu0 }
 0x326   :  { %23406 = vst [vmem:[#allocation26_spill] sm:$0xff] %v19556_v4  ;;  %v23409_v4 = vld [vmem:[#allocation29_spill] sm:$0xff] }
 0x327   :  { %v2174_v27 = vpop.f32.mrf.mxu1  ;;  %v3415_v14 = vpop.f32.mrf.mxu0  ;;  %v2393_v57 = vmax.f32 %v23409_v4, %v2171_v37  ;;  %v17410_v4 = vld [vmem:[%s23251_s0 + $0x5f4] sm:$0xff]  }
 0x328   :  { %v19569_v23 = vmax.f32 %v2392_v47, %v3415_v14  ;;  %v23411_v14 = vld [vmem:[#allocation30_spill] sm:$0xff] }
 0x329   :  { %v15366_v5 = vpop.f32.mrf.mxu1  ;;  %v15614_v34 = vpop.f32.mrf.mxu0 }
 0x32a   :  { %23408 = vst [vmem:[#allocation27_spill] sm:$0xff] %v19569_v23  ;;  %v2394_v5 = vmax.f32 %v23411_v14, %v2174_v27 }
 0x32b   :  { %v2179_v53 = vpop.f32.mrf.mxu1  ;;  %v3420_v43 = vpop.f32.mrf.mxu0  ;;  %15724 = vmatmul.mubr.msk.bf16.gmra.mxu1 %vm467_vm2, %v17408_v50  ;;  %15972 = vmatmul.mubr.msk.bf16.gmra.mxu0 %vm467_vm2, %v17409_v25 }
 0x32c   :  { %v19574_v44 = vmax.f32 %v2393_v57, %v3420_v43  ;;  %15727 = vmatprep.mubr.msk.bf16.mxu1 %vm17772_vm1, %v23331_v15  ;;  %15975 = vmatprep.mubr.msk.bf16.mxu0 %vm17772_vm1, %v23331_v15  ;;  %v17411_v57 = vld [vmem:[%s23251_s0 + $0x7d0] sm:$0xff]  }
 0x32d   :  { %v15369_v33 = vpop.f32.mrf.mxu1  ;;  %v15617_v47 = vpop.f32.mrf.mxu0 }
 0x32e   :  { %23410 = vst [vmem:[#allocation28_spill] sm:$0xff] %v19574_v44  ;;  %v23413_v44 = vld [vmem:[#allocation31_spill] sm:$0xff] }
 0x32f   :  { %v2182_v34 = vpop.f32.mrf.mxu1  ;;  %v3423_v37 = vpop.f32.mrf.mxu0  ;;  %v2395_v23 = vmax.f32 %v23413_v44, %v2179_v53  ;;  %v17412_v44 = vld [vmem:[%s23251_s0 + $0x5fc] sm:$0xff]  }
 0x330   :  { %v19587_v50 = vmax.f32 %v2394_v5, %v3423_v37  ;;  %v23415_v37 = vld [vmem:[#allocation32_spill] sm:$0xff] }
 0x331   :  { %v15370_v25 = vpop.f32.mrf.mxu1  ;;  %v15618_v43 = vpop.f32.mrf.mxu0 }
 0x332   :  { %23412 = vst [vmem:[#allocation29_spill] sm:$0xff] %v19587_v50  ;;  %v2396_v25 = vmax.f32 %v23415_v37, %v2182_v34 }
 0x333   :  { %v2187_v33 = vpop.f32.mrf.mxu1  ;;  %v3428_v47 = vpop.f32.mrf.mxu0  ;;  %15728 = vmatmul.mubr.msk.bf16.gmra.mxu1 %vm467_vm2, %v17410_v4  ;;  %15976 = vmatmul.mubr.msk.bf16.gmra.mxu0 %vm467_vm2, %v17411_v57 }
 0x334   :  { %v19592_v27 = vmax.f32 %v2395_v23, %v3428_v47  ;;  %15731 = vmatprep.mubr.msk.bf16.mxu1 %vm17772_vm1, %v23331_v15  ;;  %15979 = vmatprep.mubr.msk.bf16.mxu0 %vm17772_vm1, %v23331_v15  ;;  %v17413_v23 = vld [vmem:[%s23251_s0 + $0x7d8] sm:$0xff]  }
 0x335   :  { %v15373_v14 = vpop.f32.mrf.mxu1  ;;  %v15621_v5 = vpop.f32.mrf.mxu0 }
 0x336   :  { %23414 = vst [vmem:[#allocation30_spill] sm:$0xff] %v19592_v27  ;;  %v23417_v27 = vld [vmem:[#allocation33_spill] sm:$0xff] }
 0x337   :  { %v2190_v43 = vpop.f32.mrf.mxu1  ;;  %v3431_v53 = vpop.f32.mrf.mxu0  ;;  %v2397_v50 = vmax.f32 %v23417_v27, %v2187_v33  ;;  %v17414_v27 = vld [vmem:[%s23251_s0 + $0x604] sm:$0xff]  }
 0x338   :  { %v19605_v4 = vmax.f32 %v2396_v25, %v3431_v53  ;;  %v23419_v53 = vld [vmem:[#allocation34_spill] sm:$0xff] }
 0x339   :  { %v15374_v57 = vpop.f32.mrf.mxu1  ;;  %v15622_v47 = vpop.f32.mrf.mxu0 }
 0x33a   :  { %23416 = vst [vmem:[#allocation31_spill] sm:$0xff] %v19605_v4  ;;  %v2398_v57 = vmax.f32 %v23419_v53, %v2190_v43 }
 0x33b   :  { %v2195_v14 = vpop.f32.mrf.mxu1  ;;  %v3436_v5 = vpop.f32.mrf.mxu0  ;;  %15732 = vmatmul.mubr.msk.bf16.gmra.mxu1 %vm467_vm2, %v17412_v44  ;;  %15980 = vmatmul.mubr.msk.bf16.gmra.mxu0 %vm467_vm2, %v17413_v23 }
 0x33c   :  { %v19610_v34 = vmax.f32 %v2397_v50, %v3436_v5  ;;  %15735 = vmatprep.mubr.msk.bf16.mxu1 %vm17772_vm1, %v23331_v15  ;;  %15983 = vmatprep.mubr.msk.bf16.mxu0 %vm17772_vm1, %v23331_v15  ;;  %v17415_v50 = vld [vmem:[%s23251_s0 + $0x7e0] sm:$0xff]  }
 0x33d   :  { %v15377_v37 = vpop.f32.mrf.mxu1  ;;  %v15625_v25 = vpop.f32.mrf.mxu0 }
 0x33e   :  { %23418 = vst [vmem:[#allocation32_spill] sm:$0xff] %v19610_v34  ;;  %v23421_v34 = vld [vmem:[#allocation35_spill] sm:$0xff] }
 0x33f   :  { %v2198_v47 = vpop.f32.mrf.mxu1  ;;  %v3439_v33 = vpop.f32.mrf.mxu0  ;;  %v2399_v4 = vmax.f32 %v23421_v34, %v2195_v14  ;;  %v17416_v34 = vld [vmem:[%s23251_s0 + $0x60c] sm:$0xff]  }
 0x340   :  { %v19623_v44 = vmax.f32 %v2398_v57, %v3439_v33  ;;  %v23423_v33 = vld [vmem:[#allocation36_spill] sm:$0xff] }
 0x341   :  { %v15378_v23 = vpop.f32.mrf.mxu1  ;;  %v15626_v5 = vpop.f32.mrf.mxu0 }
 0x342   :  { %23420 = vst [vmem:[#allocation33_spill] sm:$0xff] %v19623_v44  ;;  %v2400_v23 = vmax.f32 %v23423_v33, %v2198_v47 }
 0x343   :  { %v2203_v37 = vpop.f32.mrf.mxu1  ;;  %v3444_v25 = vpop.f32.mrf.mxu0  ;;  %15736 = vmatmul.mubr.msk.bf16.gmra.mxu1 %vm467_vm2, %v17414_v27  ;;  %15984 = vmatmul.mubr.msk.bf16.gmra.mxu0 %vm467_vm2, %v17415_v50 }
 0x344   :  { %v19628_v43 = vmax.f32 %v2399_v4, %v3444_v25  ;;  %15739 = vmatprep.mubr.msk.bf16.mxu1 %vm17772_vm1, %v23331_v15  ;;  %15987 = vmatprep.mubr.msk.bf16.mxu0 %vm17772_vm1, %v23331_v15  ;;  %v17417_v4 = vld [vmem:[%s23251_s0 + $0x7e8] sm:$0xff]  }
 0x345   :  { %v15381_v53 = vpop.f32.mrf.mxu1  ;;  %v15629_v57 = vpop.f32.mrf.mxu0 }
 0x346   :  { %23422 = vst [vmem:[#allocation34_spill] sm:$0xff] %v19628_v43  ;;  %v23425_v43 = vld [vmem:[#allocation37_spill] sm:$0xff] }
 0x347   :  { %v2206_v5 = vpop.f32.mrf.mxu1  ;;  %v3447_v14 = vpop.f32.mrf.mxu0  ;;  %v2401_v44 = vmax.f32 %v23425_v43, %v2203_v37  ;;  %v17418_v43 = vld [vmem:[%s23251_s0 + $0x614] sm:$0xff]  }
 0x348   :  { %v19641_v27 = vmax.f32 %v2400_v23, %v3447_v14  ;;  %v23427_v14 = vld [vmem:[#allocation38_spill] sm:$0xff] }
 0x349   :  { %v15382_v50 = vpop.f32.mrf.mxu1  ;;  %v15630_v25 = vpop.f32.mrf.mxu0 }
 0x34a   :  { %23424 = vst [vmem:[#allocation35_spill] sm:$0xff] %v19641_v27  ;;  %v2402_v50 = vmax.f32 %v23427_v14, %v2206_v5 }
 0x34b   :  { %v2211_v53 = vpop.f32.mrf.mxu1  ;;  %v3452_v57 = vpop.f32.mrf.mxu0  ;;  %15740 = vmatmul.mubr.msk.bf16.gmra.mxu1 %vm467_vm2, %v17416_v34  ;;  %15988 = vmatmul.mubr.msk.bf16.gmra.mxu0 %vm467_vm2, %v17417_v4 }
 0x34c   :  { %v19646_v47 = vmax.f32 %v2401_v44, %v3452_v57  ;;  %15743 = vmatprep.mubr.msk.bf16.mxu1 %vm17772_vm1, %v23331_v15  ;;  %15991 = vmatprep.mubr.msk.bf16.mxu0 %vm17772_vm1, %v23331_v15  ;;  %v17419_v44 = vld [vmem:[%s23251_s0 + $0x7f0] sm:$0xff]  }
 0x34d   :  { %v15385_v33 = vpop.f32.mrf.mxu1  ;;  %v15633_v23 = vpop.f32.mrf.mxu0 }
 0x34e   :  { %23426 = vst [vmem:[#allocation36_spill] sm:$0xff] %v19646_v47  ;;  %v23429_v47 = vld [vmem:[#allocation39_spill] sm:$0xff] }
 0x34f   :  { %v2214_v25 = vpop.f32.mrf.mxu1  ;;  %v3455_v37 = vpop.f32.mrf.mxu0  ;;  %v2403_v27 = vmax.f32 %v23429_v47, %v2211_v53  ;;  %v17420_v47 = vld [vmem:[%s23251_s0 + $0x61c] sm:$0xff]  }
 0x350   :  { %v19659_v34 = vmax.f32 %v2402_v50, %v3455_v37  ;;  %v23431_v37 = vld [vmem:[#allocation40_spill] sm:$0xff] }
 0x351   :  { %v15386_v4 = vpop.f32.mrf.mxu1  ;;  %v15634_v57 = vpop.f32.mrf.mxu0 }
 0x352   :  { %23428 = vst [vmem:[#allocation37_spill] sm:$0xff] %v19659_v34  ;;  %v2404_v4 = vmax.f32 %v23431_v37, %v2214_v25 }
 0x353   :  { %v2219_v33 = vpop.f32.mrf.mxu1  ;;  %v3460_v23 = vpop.f32.mrf.mxu0  ;;  %15744 = vmatmul.mubr.msk.bf16.gmra.mxu1 %vm467_vm2, %v17418_v43  ;;  %15992 = vmatmul.mubr.msk.bf16.gmra.mxu0 %vm467_vm2, %v17419_v44 }
 0x354   :  { %v19664_v5 = vmax.f32 %v2403_v27, %v3460_v23  ;;  %15747 = vmatprep.mubr.msk.bf16.mxu1 %vm17772_vm1, %v23331_v15  ;;  %15995 = vmatprep.mubr.msk.bf16.mxu0 %vm17772_vm1, %v23331_v15  ;;  %v17421_v27 = vld [vmem:[%s23251_s0 + $0x7f8] sm:$0xff]  }
 0x355   :  { %v15389_v14 = vpop.f32.mrf.mxu1  ;;  %v15637_v50 = vpop.f32.mrf.mxu0 }
 0x356   :  { %23430 = vst [vmem:[#allocation38_spill] sm:$0xff] %v19664_v5  ;;  %v23433_v5 = vld [vmem:[#allocation41_spill] sm:$0xff] }
 0x357   :  { %v2222_v57 = vpop.f32.mrf.mxu1  ;;  %v3463_v53 = vpop.f32.mrf.mxu0  ;;  %v2405_v34 = vmax.f32 %v23433_v5, %v2219_v33  ;;  %v17422_v5 = vld [vmem:[%s23251_s0 + $0x624] sm:$0xff]  }
 0x358   :  { %v19677_v43 = vmax.f32 %v2404_v4, %v3463_v53  ;;  %v23435_v53 = vld [vmem:[#allocation42_spill] sm:$0xff] }
 0x359   :  { %v15390_v44 = vpop.f32.mrf.mxu1  ;;  %v15638_v23 = vpop.f32.mrf.mxu0 }
 0x35a   :  { %23432 = vst [vmem:[#allocation39_spill] sm:$0xff] %v19677_v43  ;;  %v2406_v44 = vmax.f32 %v23435_v53, %v2222_v57 }
 0x35b   :  { %v2227_v14 = vpop.f32.mrf.mxu1  ;;  %v3468_v50 = vpop.f32.mrf.mxu0  ;;  %15748 = vmatmul.mubr.msk.bf16.gmra.mxu1 %vm467_vm2, %v17420_v47  ;;  %15996 = vmatmul.mubr.msk.bf16.gmra.mxu0 %vm467_vm2, %v17421_v27 }
 0x35c   :  { %v19682_v25 = vmax.f32 %v2405_v34, %v3468_v50  ;;  %15751 = vmatprep.mubr.msk.bf16.mxu1 %vm17772_vm1, %v23331_v15  ;;  %15999 = vmatprep.mubr.msk.bf16.mxu0 %vm17772_vm1, %v23331_v15  ;;  %v17423_v34 = vld [vmem:[%s23251_s0 + $0x800] sm:$0xff]  }
 0x35d   :  { %v15393_v37 = vpop.f32.mrf.mxu1  ;;  %v15641_v4 = vpop.f32.mrf.mxu0 }
 0x35e   :  { %23434 = vst [vmem:[#allocation40_spill] sm:$0xff] %v19682_v25  ;;  %v23437_v25 = vld [vmem:[#allocation43_spill] sm:$0xff] }
 0x35f   :  { %v2230_v23 = vpop.f32.mrf.mxu1  ;;  %v3471_v33 = vpop.f32.mrf.mxu0  ;;  %v2407_v43 = vmax.f32 %v23437_v25, %v2227_v14  ;;  %v17424_v25 = vld [vmem:[%s23251_s0 + $0x62c] sm:$0xff]  }
 0x360   :  { %v19695_v47 = vmax.f32 %v2406_v44, %v3471_v33  ;;  %v23439_v33 = vld [vmem:[#allocation44_spill] sm:$0xff] }
 0x361   :  { %v15394_v27 = vpop.f32.mrf.mxu1  ;;  %v15642_v50 = vpop.f32.mrf.mxu0 }
 0x362   :  { %23436 = vst [vmem:[#allocation41_spill] sm:$0xff] %v19695_v47  ;;  %v2408_v27 = vmax.f32 %v23439_v33, %v2230_v23 }
 0x363   :  { %v2235_v37 = vpop.f32.mrf.mxu1  ;;  %v3476_v4 = vpop.f32.mrf.mxu0  ;;  %15752 = vmatmul.mubr.msk.bf16.gmra.mxu1 %vm467_vm2, %v17422_v5  ;;  %16000 = vmatmul.mubr.msk.bf16.gmra.mxu0 %vm467_vm2, %v17423_v34 }
 0x364   :  { %v19700_v57 = vmax.f32 %v2407_v43, %v3476_v4  ;;  %15755 = vmatprep.mubr.msk.bf16.mxu1 %vm17772_vm1, %v23331_v15  ;;  %16003 = vmatprep.mubr.msk.bf16.mxu0 %vm17772_vm1, %v23331_v15  ;;  %v17425_v43 = vld [vmem:[%s23251_s0 + $0x808] sm:$0xff]  }
 0x365   :  { %v15397_v53 = vpop.f32.mrf.mxu1  ;;  %v15645_v44 = vpop.f32.mrf.mxu0 }
 0x366   :  { %23438 = vst [vmem:[#allocation42_spill] sm:$0xff] %v19700_v57  ;;  %v23441_v57 = vld [vmem:[#allocation45_spill] sm:$0xff] }
 0x367   :  { %v2238_v50 = vpop.f32.mrf.mxu1  ;;  %v3479_v14 = vpop.f32.mrf.mxu0  ;;  %v2409_v47 = vmax.f32 %v23441_v57, %v2235_v37  ;;  %v17426_v57 = vld [vmem:[%s23251_s0 + $0x634] sm:$0xff]  }
 0x368   :  { %v19713_v5 = vmax.f32 %v2408_v27, %v3479_v14  ;;  %v23443_v14 = vld [vmem:[#allocation46_spill] sm:$0xff] }
 0x369   :  { %v15398_v34 = vpop.f32.mrf.mxu1  ;;  %v15646_v4 = vpop.f32.mrf.mxu0 }
 0x36a   :  { %23440 = vst [vmem:[#allocation43_spill] sm:$0xff] %v19713_v5  ;;  %v2410_v34 = vmax.f32 %v23443_v14, %v2238_v50 }
 0x36b   :  { %v2243_v53 = vpop.f32.mrf.mxu1  ;;  %v3484_v44 = vpop.f32.mrf.mxu0  ;;  %15756 = vmatmul.mubr.msk.bf16.gmra.mxu1 %vm467_vm2, %v17424_v25  ;;  %16004 = vmatmul.mubr.msk.bf16.gmra.mxu0 %vm467_vm2, %v17425_v43 }
 0x36c   :  { %v19718_v23 = vmax.f32 %v2409_v47, %v3484_v44  ;;  %15759 = vmatprep.mubr.msk.bf16.mxu1 %vm17772_vm1, %v23331_v15  ;;  %16007 = vmatprep.mubr.msk.bf16.mxu0 %vm17772_vm1, %v23331_v15  ;;  %v17427_v47 = vld [vmem:[%s23251_s0 + $0x810] sm:$0xff]  }
 0x36d   :  { %v15401_v33 = vpop.f32.mrf.mxu1  ;;  %v15649_v27 = vpop.f32.mrf.mxu0 }
 0x36e   :  { %23442 = vst [vmem:[#allocation44_spill] sm:$0xff] %v19718_v23  ;;  %v23445_v23 = vld [vmem:[#allocation47_spill] sm:$0xff] }
 0x36f   :  { %v2246_v4 = vpop.f32.mrf.mxu1  ;;  %v3487_v37 = vpop.f32.mrf.mxu0  ;;  %v2411_v5 = vmax.f32 %v23445_v23, %v2243_v53  ;;  %v17428_v23 = vld [vmem:[%s23251_s0 + $0x63c] sm:$0xff]  }
 0x370   :  { %v19731_v25 = vmax.f32 %v2410_v34, %v3487_v37  ;;  %v23447_v37 = vld [vmem:[#allocation48_spill] sm:$0xff] }
 0x371   :  { %v15402_v43 = vpop.f32.mrf.mxu1  ;;  %v15650_v44 = vpop.f32.mrf.mxu0 }
 0x372   :  { %23444 = vst [vmem:[#allocation45_spill] sm:$0xff] %v19731_v25  ;;  %v2412_v43 = vmax.f32 %v23447_v37, %v2246_v4 }
 0x373   :  { %v2251_v33 = vpop.f32.mrf.mxu1  ;;  %v3492_v27 = vpop.f32.mrf.mxu0  ;;  %15760 = vmatmul.mubr.msk.bf16.gmra.mxu1 %vm467_vm2, %v17426_v57  ;;  %16008 = vmatmul.mubr.msk.bf16.gmra.mxu0 %vm467_vm2, %v17427_v47 }
 0x374   :  { %v19736_v50 = vmax.f32 %v2411_v5, %v3492_v27  ;;  %15763 = vmatprep.mubr.msk.bf16.mxu1 %vm17772_vm1, %v23331_v15  ;;  %16011 = vmatprep.mubr.msk.bf16.mxu0 %vm17772_vm1, %v23331_v15  ;;  %v17429_v5 = vld [vmem:[%s23251_s0 + $0x818] sm:$0xff]  }
 0x375   :  { %v15405_v14 = vpop.f32.mrf.mxu1  ;;  %v15653_v34 = vpop.f32.mrf.mxu0 }
 0x376   :  { %23446 = vst [vmem:[#allocation46_spill] sm:$0xff] %v19736_v50  ;;  %v23449_v50 = vld [vmem:[#allocation49_spill] sm:$0xff] }
 0x377   :  { %v2254_v44 = vpop.f32.mrf.mxu1  ;;  %v3495_v53 = vpop.f32.mrf.mxu0  ;;  %v2413_v25 = vmax.f32 %v23449_v50, %v2251_v33  ;;  %v17430_v50 = vld [vmem:[%s23251_s0 + $0x644] sm:$0xff]  }
 0x378   :  { %v19749_v57 = vmax.f32 %v2412_v43, %v3495_v53  ;;  %v23451_v53 = vld [vmem:[#allocation50_spill] sm:$0xff] }
 0x379   :  { %v15406_v47 = vpop.f32.mrf.mxu1  ;;  %v15654_v27 = vpop.f32.mrf.mxu0 }
 0x37a   :  { %23448 = vst [vmem:[#allocation47_spill] sm:$0xff] %v19749_v57  ;;  %v2414_v47 = vmax.f32 %v23451_v53, %v2254_v44 }
 0x37b   :  { %v2259_v14 = vpop.f32.mrf.mxu1  ;;  %v3500_v34 = vpop.f32.mrf.mxu0  ;;  %15764 = vmatmul.mubr.msk.bf16.gmra.mxu1 %vm467_vm2, %v17428_v23  ;;  %16012 = vmatmul.mubr.msk.bf16.gmra.mxu0 %vm467_vm2, %v17429_v5 }
 0x37c   :  { %v19754_v4 = vmax.f32 %v2413_v25, %v3500_v34  ;;  %15767 = vmatprep.mubr.msk.bf16.mxu1 %vm17772_vm1, %v23331_v15  ;;  %16015 = vmatprep.mubr.msk.bf16.mxu0 %vm17772_vm1, %v23331_v15  ;;  %v17431_v25 = vld [vmem:[%s23251_s0 + $0x820] sm:$0xff]  }
 0x37d   :  { %v15409_v37 = vpop.f32.mrf.mxu1  ;;  %v15657_v43 = vpop.f32.mrf.mxu0 }
 0x37e   :  { %23450 = vst [vmem:[#allocation48_spill] sm:$0xff] %v19754_v4  ;;  %v23453_v4 = vld [vmem:[#allocation51_spill] sm:$0xff] }
 0x37f   :  { %v2262_v27 = vpop.f32.mrf.mxu1  ;;  %v3503_v33 = vpop.f32.mrf.mxu0  ;;  %v2415_v57 = vmax.f32 %v23453_v4, %v2259_v14  ;;  %v17432_v4 = vld [vmem:[%s23251_s0 + $0x64c] sm:$0xff]  }
 0x380   :  { %v19767_v23 = vmax.f32 %v2414_v47, %v3503_v33  ;;  %v23455_v33 = vld [vmem:[#allocation52_spill] sm:$0xff] }
 0x381   :  { %v15410_v5 = vpop.f32.mrf.mxu1  ;;  %v15658_v34 = vpop.f32.mrf.mxu0 }
 0x382   :  { %23452 = vst [vmem:[#allocation49_spill] sm:$0xff] %v19767_v23  ;;  %v2416_v5 = vmax.f32 %v23455_v33, %v2262_v27 }
 0x383   :  { %v2267_v37 = vpop.f32.mrf.mxu1  ;;  %v3508_v43 = vpop.f32.mrf.mxu0  ;;  %15768 = vmatmul.mubr.msk.bf16.gmra.mxu1 %vm467_vm2, %v17430_v50  ;;  %16016 = vmatmul.mubr.msk.bf16.gmra.mxu0 %vm467_vm2, %v17431_v25 }
 0x384   :  { %v19772_v44 = vmax.f32 %v2415_v57, %v3508_v43  ;;  %15771 = vmatprep.mubr.msk.bf16.mxu1 %vm17772_vm1, %v23331_v15  ;;  %16019 = vmatprep.mubr.msk.bf16.mxu0 %vm17772_vm1, %v23331_v15  ;;  %v17433_v57 = vld [vmem:[%s23251_s0 + $0x828] sm:$0xff]  }
 0x385   :  { %v15413_v53 = vpop.f32.mrf.mxu1  ;;  %v15661_v47 = vpop.f32.mrf.mxu0 }
 0x386   :  { %23454 = vst [vmem:[#allocation50_spill] sm:$0xff] %v19772_v44  ;;  %v23457_v44 = vld [vmem:[#allocation53_spill] sm:$0xff] }
 0x387   :  { %v2270_v34 = vpop.f32.mrf.mxu1  ;;  %v3511_v14 = vpop.f32.mrf.mxu0  ;;  %v2417_v23 = vmax.f32 %v23457_v44, %v2267_v37  ;;  %v17434_v44 = vld [vmem:[%s23251_s0 + $0x654] sm:$0xff]  }
 0x388   :  { %v19785_v50 = vmax.f32 %v2416_v5, %v3511_v14  ;;  %v23459_v14 = vld [vmem:[#allocation55_spill] sm:$0xff] }
 0x389   :  { %v15414_v25 = vpop.f32.mrf.mxu1  ;;  %v15662_v43 = vpop.f32.mrf.mxu0 }
 0x38a   :  { %23456 = vst [vmem:[#allocation51_spill] sm:$0xff] %v19785_v50  ;;  %v2418_v25 = vmax.f32 %v23459_v14, %v2270_v34 }
 0x38b   :  { %v2275_v53 = vpop.f32.mrf.mxu1  ;;  %v3516_v47 = vpop.f32.mrf.mxu0  ;;  %15772 = vmatmul.mubr.msk.bf16.gmra.mxu1 %vm467_vm2, %v17432_v4  ;;  %16020 = vmatmul.mubr.msk.bf16.gmra.mxu0 %vm467_vm2, %v17433_v57 }
 0x38c   :  { %v19790_v27 = vmax.f32 %v2417_v23, %v3516_v47  ;;  %15775 = vmatprep.mubr.msk.bf16.mxu1 %vm17772_vm1, %v23331_v15  ;;  %16023 = vmatprep.mubr.msk.bf16.mxu0 %vm17772_vm1, %v23331_v15  ;;  %v17435_v23 = vld [vmem:[%s23251_s0 + $0x830] sm:$0xff]  }
 0x38d   :  { %v15417_v33 = vpop.f32.mrf.mxu1  ;;  %v15665_v5 = vpop.f32.mrf.mxu0 }
 0x38e   :  { %23458 = vst [vmem:[#allocation52_spill] sm:$0xff] %v19790_v27  ;;  %v23461_v27 = vld [vmem:[#allocation57_spill] sm:$0xff] }
 0x38f   :  { %v2278_v43 = vpop.f32.mrf.mxu1  ;;  %v3519_v37 = vpop.f32.mrf.mxu0  ;;  %v2419_v50 = vmax.f32 %v23461_v27, %v2275_v53  ;;  %v17436_v27 = vld [vmem:[%s23251_s0 + $0x65c] sm:$0xff]  }
 0x390   :  { %v19803_v4 = vmax.f32 %v2418_v25, %v3519_v37  ;;  %v23463_v37 = vld [vmem:[#allocation59_spill] sm:$0xff] }
 0x391   :  { %v15418_v57 = vpop.f32.mrf.mxu1  ;;  %v15666_v47 = vpop.f32.mrf.mxu0 }
 0x392   :  { %23460 = vst [vmem:[#allocation53_spill] sm:$0xff] %v19803_v4  ;;  %v2420_v57 = vmax.f32 %v23463_v37, %v2278_v43 }
 0x393   :  { %v2283_v33 = vpop.f32.mrf.mxu1  ;;  %v3524_v5 = vpop.f32.mrf.mxu0  ;;  %15776 = vmatmul.mubr.msk.bf16.gmra.mxu1 %vm467_vm2, %v17434_v44  ;;  %16024 = vmatmul.mubr.msk.bf16.gmra.mxu0 %vm467_vm2, %v17435_v23 }
 0x394   :  { %v19808_v34 = vmax.f32 %v2419_v50, %v3524_v5  ;;  %15779 = vmatprep.mubr.msk.bf16.mxu1 %vm17772_vm1, %v23331_v15  ;;  %16027 = vmatprep.mubr.msk.bf16.mxu0 %vm17772_vm1, %v23331_v15  ;;  %v17437_v50 = vld [vmem:[%s23251_s0 + $0x838] sm:$0xff]  }
 0x395   :  { %v15421_v14 = vpop.f32.mrf.mxu1  ;;  %v15669_v25 = vpop.f32.mrf.mxu0 }
 0x396   :  { %23462 = vst [vmem:[#allocation55_spill] sm:$0xff] %v19808_v34  ;;  %v23465_v34 = vld [vmem:[#allocation61_spill] sm:$0xff] }
 0x397   :  { %v2286_v47 = vpop.f32.mrf.mxu1  ;;  %v3527_v53 = vpop.f32.mrf.mxu0  ;;  %v2421_v4 = vmax.f32 %v23465_v34, %v2283_v33  ;;  %v17438_v34 = vld [vmem:[%s23251_s0 + $0x664] sm:$0xff]  }
 0x398   :  { %v19821_v44 = vmax.f32 %v2420_v57, %v3527_v53  ;;  %v23467_v53 = vld [vmem:[#allocation63_spill] sm:$0xff] }
 0x399   :  { %v15422_v23 = vpop.f32.mrf.mxu1  ;;  %v15670_v5 = vpop.f32.mrf.mxu0 }
 0x39a   :  { %23464 = vst [vmem:[#allocation57_spill] sm:$0xff] %v19821_v44  ;;  %v2422_v23 = vmax.f32 %v23467_v53, %v2286_v47 }
 0x39b   :  { %v2291_v14 = vpop.f32.mrf.mxu1  ;;  %v3532_v25 = vpop.f32.mrf.mxu0  ;;  %15780 = vmatmul.mubr.msk.bf16.gmra.mxu1 %vm467_vm2, %v17436_v27  ;;  %16028 = vmatmul.mubr.msk.bf16.gmra.mxu0 %vm467_vm2, %v17437_v50 }
 0x39c   :  { %v19826_v43 = vmax.f32 %v2421_v4, %v3532_v25  ;;  %15783 = vmatprep.mubr.msk.bf16.mxu1 %vm17772_vm1, %v23331_v15  ;;  %16031 = vmatprep.mubr.msk.bf16.mxu0 %vm17772_vm1, %v23331_v15  ;;  %v17439_v4 = vld [vmem:[%s23251_s0 + $0x840] sm:$0xff]  }
 0x39d   :  { %v15425_v37 = vpop.f32.mrf.mxu1  ;;  %v15673_v57 = vpop.f32.mrf.mxu0 }
 0x39e   :  { %23466 = vst [vmem:[#allocation59_spill] sm:$0xff] %v19826_v43  ;;  %v23469_v43 = vld [vmem:[#allocation65_spill] sm:$0xff] }
 0x39f   :  { %v2294_v5 = vpop.f32.mrf.mxu1  ;;  %v3535_v33 = vpop.f32.mrf.mxu0  ;;  %v2423_v44 = vmax.f32 %v23469_v43, %v2291_v14  ;;  %v17440_v43 = vld [vmem:[%s23251_s0 + $0x66c] sm:$0xff]  }
 0x3a0   :  { %v19839_v27 = vmax.f32 %v2422_v23, %v3535_v33  ;;  %v23471_v33 = vld [vmem:[#allocation67_spill] sm:$0xff] }
 0x3a1   :  { %v15426_v50 = vpop.f32.mrf.mxu1  ;;  %v15674_v25 = vpop.f32.mrf.mxu0 }
 0x3a2   :  { %23468 = vst [vmem:[#allocation61_spill] sm:$0xff] %v19839_v27  ;;  %v2424_v50 = vmax.f32 %v23471_v33, %v2294_v5 }
 0x3a3   :  { %v2299_v37 = vpop.f32.mrf.mxu1  ;;  %v3540_v57 = vpop.f32.mrf.mxu0  ;;  %15784 = vmatmul.mubr.msk.bf16.gmra.mxu1 %vm467_vm2, %v17438_v34  ;;  %16032 = vmatmul.mubr.msk.bf16.gmra.mxu0 %vm467_vm2, %v17439_v4 }
 0x3a4   :  { %v19844_v47 = vmax.f32 %v2423_v44, %v3540_v57  ;;  %15787 = vmatprep.mubr.msk.bf16.mxu1 %vm17772_vm1, %v23331_v15  ;;  %16035 = vmatprep.mubr.msk.bf16.mxu0 %vm17772_vm1, %v23331_v15  ;;  %v17441_v44 = vld [vmem:[%s23251_s0 + $0x848] sm:$0xff]  }
 0x3a5   :  { %v15429_v53 = vpop.f32.mrf.mxu1  ;;  %v15677_v23 = vpop.f32.mrf.mxu0 }
 0x3a6   :  { %23470 = vst [vmem:[#allocation63_spill] sm:$0xff] %v19844_v47  ;;  %v23472_v47 = vld [vmem:[#allocation69_spill] sm:$0xff] }
 0x3a7   :  { %v2302_v25 = vpop.f32.mrf.mxu1  ;;  %v3543_v14 = vpop.f32.mrf.mxu0  ;;  %v2425_v27 = vmax.f32 %v23472_v47, %v2299_v37  ;;  %v17442_v47 = vld [vmem:[%s23251_s0 + $0x674] sm:$0xff]  }
 0x3a8   :  { %v19857_v34 = vmax.f32 %v2424_v50, %v3543_v14 }
 0x3a9   :  { %v15430_v4 = vpop.f32.mrf.mxu1  ;;  %v15678_v57 = vpop.f32.mrf.mxu0 }
 0x3ab   :  { %v3548_v53 = vpop.f32.mrf.mxu0  ;;  %v4317_v23 = vpop.f32.mrf.mxu1  ;;  %15788 = vmatmul.mubr.msk.bf16.gmra.mxu1 %vm467_vm2, %v17440_v43  ;;  %16036 = vmatmul.mubr.msk.bf16.gmra.mxu0 %vm467_vm2, %v17441_v44 }
 0x3ac   :  { %v19862_v5 = vmax.f32 %v2425_v27, %v3548_v53  ;;  %v4803_v33 = vmax.f32 %v18763_v60, %v4317_v23  ;;  %15791 = vmatprep.mubr.msk.bf16.mxu1 %vm17772_vm1, %v23331_v15  ;;  %16039 = vmatprep.mubr.msk.bf16.mxu0 %vm17772_vm1, %v23331_v15  ;;  %v17443_v27 = vld [vmem:[%s23251_s0 + $0x850] sm:$0xff]   ;;  %v23473_v53 = vld [vmem:[#allocation73_spill] sm:$0xff] }
 0x3ad   :  { %v15681_v50 = vpop.f32.mrf.mxu0  ;;  %v15693_v25 = vpop.f32.mrf.mxu1 }
 0x3af   :  { %v3551_v14 = vpop.f32.mrf.mxu0  ;;  %v4320_v37 = vpop.f32.mrf.mxu1 }
 0x3b0   :  { %v4804_v60 = vmax.f32 %v18776_v40, %v4320_v37 }
 0x3b1   :  { %v15682_v43 = vpop.f32.mrf.mxu0  ;;  %v15694_v44 = vpop.f32.mrf.mxu1 }
 0x3b3   :  { %v4325_v4 = vpop.f32.mrf.mxu1  ;;  %15792 = vmatmul.mubr.msk.bf16.gmra.mxu1 %vm467_vm2, %v17442_v47  ;;  %v5566_v57 = vpop.f32.mrf.mxu0  ;;  %16040 = vmatmul.mubr.msk.bf16.gmra.mxu0 %vm467_vm2, %v17443_v27  ;;  %v17444_v47 = vld [vmem:[%s23251_s0 + $0x67c] sm:$0xff]  }
 0x3b4   :  { %v4805_v23 = vmax.f32 %v23473_v53, %v4325_v4  ;;  %v19879_v50 = vmax.f32 %v4803_v33, %v5566_v57  ;;  %15795 = vmatprep.mubr.msk.bf16.mxu1 %vm17772_vm1, %v23331_v15  ;;  %16043 = vmatprep.mubr.msk.bf16.mxu0 %vm17772_vm1, %v23331_v15  ;;  %v17445_v27 = vld [vmem:[%s23251_s0 + $0x858] sm:$0xff]  }
 0x3b5   :  { %v15697_v25 = vpop.f32.mrf.mxu1  ;;  %v15945_v40 = vpop.f32.mrf.mxu0 }
 0x3b7   :  { %v4328_v14 = vpop.f32.mrf.mxu1  ;;  %v5569_v37 = vpop.f32.mrf.mxu0 }
 0x3b8   :  { %v4806_v33 = vmax.f32 %v18794_v19, %v4328_v14  ;;  %v19892_v43 = vmax.f32 %v4804_v60, %v5569_v37 }
 0x3b9   :  { %v15698_v44 = vpop.f32.mrf.mxu1  ;;  %v15946_v4 = vpop.f32.mrf.mxu0 }
 0x3bb   :  { %v4333_v57 = vpop.f32.mrf.mxu1  ;;  %15796 = vmatmul.mubr.msk.bf16.gmra.mxu1 %vm467_vm2, %v17444_v47  ;;  %v5574_v53 = vpop.f32.mrf.mxu0  ;;  %16044 = vmatmul.mubr.msk.bf16.gmra.mxu0 %vm467_vm2, %v17445_v27  ;;  %v17446_v47 = vld [vmem:[%s23251_s0 + $0x684] sm:$0xff]  }
 0x3bc   :  { %v4807_v25 = vmax.f32 %v18799_v7, %v4333_v57  ;;  %v19897_v40 = vmax.f32 %v4805_v23, %v5574_v53  ;;  %15799 = vmatprep.mubr.msk.bf16.mxu1 %vm17772_vm1, %v23331_v15  ;;  %16047 = vmatprep.mubr.msk.bf16.mxu0 %vm17772_vm1, %v23331_v15  ;;  %v17447_v7 = vld [vmem:[%s23251_s0 + $0x860] sm:$0xff]  }
 0x3bd   :  { %v15701_v19 = vpop.f32.mrf.mxu1  ;;  %v15949_v60 = vpop.f32.mrf.mxu0 }
 0x3bf   :  { %v4336_v14 = vpop.f32.mrf.mxu1  ;;  %v5577_v37 = vpop.f32.mrf.mxu0 }
 0x3c0   :  { %v4808_v23 = vmax.f32 %v18812_v20, %v4336_v14  ;;  %v19910_v27 = vmax.f32 %v4806_v33, %v5577_v37 }
 0x3c1   :  { %v15702_v44 = vpop.f32.mrf.mxu1  ;;  %v15950_v4 = vpop.f32.mrf.mxu0 }
 0x3c3   :  { %v4341_v57 = vpop.f32.mrf.mxu1  ;;  %15800 = vmatmul.mubr.msk.bf16.gmra.mxu1 %vm467_vm2, %v17446_v47  ;;  %v5582_v53 = vpop.f32.mrf.mxu0  ;;  %16048 = vmatmul.mubr.msk.bf16.gmra.mxu0 %vm467_vm2, %v17447_v7  ;;  %v17448_v47 = vld [vmem:[%s23251_s0 + $0x68c] sm:$0xff]  }
 0x3c4   :  { %v4809_v19 = vmax.f32 %v18817_v55, %v4341_v57  ;;  %v19915_v60 = vmax.f32 %v4807_v25, %v5582_v53  ;;  %15803 = vmatprep.mubr.msk.bf16.mxu1 %vm17772_vm1, %v23331_v15  ;;  %16051 = vmatprep.mubr.msk.bf16.mxu0 %vm17772_vm1, %v23331_v15  ;;  %v17449_v55 = vld [vmem:[%s23251_s0 + $0x868] sm:$0xff]  }
 0x3c5   :  { %v15705_v20 = vpop.f32.mrf.mxu1  ;;  %v15953_v33 = vpop.f32.mrf.mxu0 }
 0x3c7   :  { %v4344_v14 = vpop.f32.mrf.mxu1  ;;  %v5585_v37 = vpop.f32.mrf.mxu0 }
 0x3c8   :  { %v4810_v25 = vmax.f32 %v18830_v13, %v4344_v14  ;;  %v19928_v7 = vmax.f32 %v4808_v23, %v5585_v37 }
 0x3c9   :  { %v15706_v44 = vpop.f32.mrf.mxu1  ;;  %v15954_v4 = vpop.f32.mrf.mxu0 }
 0x3cb   :  { %v4349_v57 = vpop.f32.mrf.mxu1  ;;  %15804 = vmatmul.mubr.msk.bf16.gmra.mxu1 %vm467_vm2, %v17448_v47  ;;  %v5590_v53 = vpop.f32.mrf.mxu0  ;;  %16052 = vmatmul.mubr.msk.bf16.gmra.mxu0 %vm467_vm2, %v17449_v55  ;;  %v17450_v47 = vld [vmem:[%s23251_s0 + $0x694] sm:$0xff]  }
 0x3cc   :  { %v4811_v20 = vmax.f32 %v18835_v2, %v4349_v57  ;;  %v19933_v33 = vmax.f32 %v4809_v19, %v5590_v53  ;;  %15807 = vmatprep.mubr.msk.bf16.mxu1 %vm17772_vm1, %v23331_v15  ;;  %16055 = vmatprep.mubr.msk.bf16.mxu0 %vm17772_vm1, %v23331_v15  ;;  %v17451_v2 = vld [vmem:[%s23251_s0 + $0x870] sm:$0xff]  }
 0x3cd   :  { %v15709_v13 = vpop.f32.mrf.mxu1  ;;  %v15957_v23 = vpop.f32.mrf.mxu0 }
 0x3cf   :  { %v4352_v14 = vpop.f32.mrf.mxu1  ;;  %v5593_v37 = vpop.f32.mrf.mxu0 }
 0x3d0   :  { %v4812_v19 = vmax.f32 %v18848_v17, %v4352_v14  ;;  %v19946_v55 = vmax.f32 %v4810_v25, %v5593_v37 }
 0x3d1   :  { %v15710_v44 = vpop.f32.mrf.mxu1  ;;  %v15958_v4 = vpop.f32.mrf.mxu0 }
 0x3d3   :  { %v4357_v57 = vpop.f32.mrf.mxu1  ;;  %15808 = vmatmul.mubr.msk.bf16.gmra.mxu1 %vm467_vm2, %v17450_v47  ;;  %v5598_v53 = vpop.f32.mrf.mxu0  ;;  %16056 = vmatmul.mubr.msk.bf16.gmra.mxu0 %vm467_vm2, %v17451_v2  ;;  %v17452_v47 = vld [vmem:[%s23251_s0 + $0x69c] sm:$0xff]  }
 0x3d4   :  { %v4813_v13 = vmax.f32 %v18853_v0, %v4357_v57  ;;  %v19951_v23 = vmax.f32 %v4811_v20, %v5598_v53  ;;  %15811 = vmatprep.mubr.msk.bf16.mxu1 %vm17772_vm1, %v23331_v15  ;;  %16059 = vmatprep.mubr.msk.bf16.mxu0 %vm17772_vm1, %v23331_v15  ;;  %v17453_v0 = vld [vmem:[%s23251_s0 + $0x878] sm:$0xff]  }
 0x3d5   :  { %v15713_v17 = vpop.f32.mrf.mxu1  ;;  %v15961_v25 = vpop.f32.mrf.mxu0 }
 0x3d7   :  { %v4360_v14 = vpop.f32.mrf.mxu1  ;;  %v5601_v37 = vpop.f32.mrf.mxu0 }
 0x3d8   :  { %v4814_v20 = vmax.f32 %v18866_v59, %v4360_v14  ;;  %v19964_v2 = vmax.f32 %v4812_v19, %v5601_v37 }
 0x3d9   :  { %v15714_v44 = vpop.f32.mrf.mxu1  ;;  %v15962_v4 = vpop.f32.mrf.mxu0 }
 0x3db   :  { %v4365_v57 = vpop.f32.mrf.mxu1  ;;  %15812 = vmatmul.mubr.msk.bf16.gmra.mxu1 %vm467_vm2, %v17452_v47  ;;  %v5606_v53 = vpop.f32.mrf.mxu0  ;;  %16060 = vmatmul.mubr.msk.bf16.gmra.mxu0 %vm467_vm2, %v17453_v0  ;;  %v17454_v47 = vld [vmem:[%s23251_s0 + $0x6a4] sm:$0xff]  }
 0x3dc   :  { %v4815_v17 = vmax.f32 %v18871_v1, %v4365_v57  ;;  %v19969_v25 = vmax.f32 %v4813_v13, %v5606_v53  ;;  %15815 = vmatprep.mubr.msk.bf16.mxu1 %vm17772_vm1, %v23331_v15  ;;  %16063 = vmatprep.mubr.msk.bf16.mxu0 %vm17772_vm1, %v23331_v15  ;;  %v17455_v1 = vld [vmem:[%s23251_s0 + $0x880] sm:$0xff]  }
 0x3dd   :  { %v15717_v59 = vpop.f32.mrf.mxu1  ;;  %v15965_v19 = vpop.f32.mrf.mxu0 }
 0x3df   :  { %v4368_v14 = vpop.f32.mrf.mxu1  ;;  %v5609_v37 = vpop.f32.mrf.mxu0 }
 0x3e0   :  { %v4816_v13 = vmax.f32 %v18884_v58, %v4368_v14  ;;  %v19982_v0 = vmax.f32 %v4814_v20, %v5609_v37 }
 0x3e1   :  { %v15718_v44 = vpop.f32.mrf.mxu1  ;;  %v15966_v4 = vpop.f32.mrf.mxu0 }
 0x3e3   :  { %v4373_v57 = vpop.f32.mrf.mxu1  ;;  %15816 = vmatmul.mubr.msk.bf16.gmra.mxu1 %vm467_vm2, %v17454_v47  ;;  %v5614_v53 = vpop.f32.mrf.mxu0  ;;  %16064 = vmatmul.mubr.msk.bf16.gmra.mxu0 %vm467_vm2, %v17455_v1  ;;  %v17456_v47 = vld [vmem:[%s23251_s0 + $0x6ac] sm:$0xff]  }
 0x3e4   :  { %v4817_v59 = vmax.f32 %v18889_v12, %v4373_v57  ;;  %v19987_v19 = vmax.f32 %v4815_v17, %v5614_v53  ;;  %15819 = vmatprep.mubr.msk.bf16.mxu1 %vm17772_vm1, %v23331_v15  ;;  %16067 = vmatprep.mubr.msk.bf16.mxu0 %vm17772_vm1, %v23331_v15  ;;  %v17457_v12 = vld [vmem:[%s23251_s0 + $0x888] sm:$0xff]  }
 0x3e5   :  { %v15721_v58 = vpop.f32.mrf.mxu1  ;;  %v15969_v20 = vpop.f32.mrf.mxu0 }
 0x3e7   :  { %v4376_v14 = vpop.f32.mrf.mxu1  ;;  %v5617_v37 = vpop.f32.mrf.mxu0 }
 0x3e8   :  { %v4818_v17 = vmax.f32 %v18902_v18, %v4376_v14  ;;  %v20000_v1 = vmax.f32 %v4816_v13, %v5617_v37 }
 0x3e9   :  { %v15722_v44 = vpop.f32.mrf.mxu1  ;;  %v15970_v4 = vpop.f32.mrf.mxu0 }
 0x3eb   :  { %v4381_v57 = vpop.f32.mrf.mxu1  ;;  %15820 = vmatmul.mubr.msk.bf16.gmra.mxu1 %vm467_vm2, %v17456_v47  ;;  %v5622_v53 = vpop.f32.mrf.mxu0  ;;  %16068 = vmatmul.mubr.msk.bf16.gmra.mxu0 %vm467_vm2, %v17457_v12  ;;  %v17458_v47 = vld [vmem:[%s23251_s0 + $0x6b4] sm:$0xff]  }
 0x3ec   :  { %v4819_v58 = vmax.f32 %v18907_v22, %v4381_v57  ;;  %v20005_v20 = vmax.f32 %v4817_v59, %v5622_v53  ;;  %15823 = vmatprep.mubr.msk.bf16.mxu1 %vm17772_vm1, %v23331_v15  ;;  %16071 = vmatprep.mubr.msk.bf16.mxu0 %vm17772_vm1, %v23331_v15  ;;  %v17459_v22 = vld [vmem:[%s23251_s0 + $0x890] sm:$0xff]  }
 0x3ed   :  { %v15725_v18 = vpop.f32.mrf.mxu1  ;;  %v15973_v13 = vpop.f32.mrf.mxu0 }
 0x3ef   :  { %v4384_v14 = vpop.f32.mrf.mxu1  ;;  %v5625_v37 = vpop.f32.mrf.mxu0 }
 0x3f0   :  { %v4820_v59 = vmax.f32 %v18920_v6, %v4384_v14  ;;  %v20018_v12 = vmax.f32 %v4818_v17, %v5625_v37 }
 0x3f1   :  { %v15726_v44 = vpop.f32.mrf.mxu1  ;;  %v15974_v4 = vpop.f32.mrf.mxu0 }
 0x3f3   :  { %v4389_v57 = vpop.f32.mrf.mxu1  ;;  %15824 = vmatmul.mubr.msk.bf16.gmra.mxu1 %vm467_vm2, %v17458_v47  ;;  %v5630_v53 = vpop.f32.mrf.mxu0  ;;  %16072 = vmatmul.mubr.msk.bf16.gmra.mxu0 %vm467_vm2, %v17459_v22  ;;  %v17460_v47 = vld [vmem:[%s23251_s0 + $0x6bc] sm:$0xff]  }
 0x3f4   :  { %v4821_v18 = vmax.f32 %v18925_v32, %v4389_v57  ;;  %v20023_v13 = vmax.f32 %v4819_v58, %v5630_v53  ;;  %15827 = vmatprep.mubr.msk.bf16.mxu1 %vm17772_vm1, %v23331_v15  ;;  %16075 = vmatprep.mubr.msk.bf16.mxu0 %vm17772_vm1, %v23331_v15  ;;  %v17461_v32 = vld [vmem:[%s23251_s0 + $0x898] sm:$0xff]  }
 0x3f5   :  { %v15729_v6 = vpop.f32.mrf.mxu1  ;;  %v15977_v17 = vpop.f32.mrf.mxu0 }
 0x3f7   :  { %v4392_v14 = vpop.f32.mrf.mxu1  ;;  %v5633_v37 = vpop.f32.mrf.mxu0 }
 0x3f8   :  { %v4822_v58 = vmax.f32 %v18938_v16, %v4392_v14  ;;  %v20036_v22 = vmax.f32 %v4820_v59, %v5633_v37 }
 0x3f9   :  { %v15730_v44 = vpop.f32.mrf.mxu1  ;;  %v15978_v4 = vpop.f32.mrf.mxu0 }
 0x3fb   :  { %v4397_v57 = vpop.f32.mrf.mxu1  ;;  %15828 = vmatmul.mubr.msk.bf16.gmra.mxu1 %vm467_vm2, %v17460_v47  ;;  %v5638_v53 = vpop.f32.mrf.mxu0  ;;  %16076 = vmatmul.mubr.msk.bf16.gmra.mxu0 %vm467_vm2, %v17461_v32  ;;  %v17462_v47 = vld [vmem:[%s23251_s0 + $0x6c4] sm:$0xff]  }
 0x3fc   :  { %v4823_v6 = vmax.f32 %v18943_v42, %v4397_v57  ;;  %v20041_v17 = vmax.f32 %v4821_v18, %v5638_v53  ;;  %15831 = vmatprep.mubr.msk.bf16.mxu1 %vm17772_vm1, %v23331_v15  ;;  %16079 = vmatprep.mubr.msk.bf16.mxu0 %vm17772_vm1, %v23331_v15  ;;  %v17463_v42 = vld [vmem:[%s23251_s0 + $0x8a0] sm:$0xff]  }
 0x3fd   :  { %v15733_v16 = vpop.f32.mrf.mxu1  ;;  %v15981_v59 = vpop.f32.mrf.mxu0 }
 0x3ff   :  { %v4400_v14 = vpop.f32.mrf.mxu1  ;;  %v5641_v37 = vpop.f32.mrf.mxu0 }
 0x400   :  { %v4824_v18 = vmax.f32 %v18956_v26, %v4400_v14  ;;  %v20054_v32 = vmax.f32 %v4822_v58, %v5641_v37 }
 0x401   :  { %v15734_v44 = vpop.f32.mrf.mxu1  ;;  %v15982_v4 = vpop.f32.mrf.mxu0 }
 0x403   :  { %v4405_v57 = vpop.f32.mrf.mxu1  ;;  %15832 = vmatmul.mubr.msk.bf16.gmra.mxu1 %vm467_vm2, %v17462_v47  ;;  %v5646_v53 = vpop.f32.mrf.mxu0  ;;  %16080 = vmatmul.mubr.msk.bf16.gmra.mxu0 %vm467_vm2, %v17463_v42  ;;  %v17464_v47 = vld [vmem:[%s23251_s0 + $0x6cc] sm:$0xff]  }
 0x404   :  { %v4825_v16 = vmax.f32 %v18961_v52, %v4405_v57  ;;  %v20059_v59 = vmax.f32 %v4823_v6, %v5646_v53  ;;  %15835 = vmatprep.mubr.msk.bf16.mxu1 %vm17772_vm1, %v23331_v15  ;;  %16083 = vmatprep.mubr.msk.bf16.mxu0 %vm17772_vm1, %v23331_v15  ;;  %v17465_v52 = vld [vmem:[%s23251_s0 + $0x8a8] sm:$0xff]  }
 0x405   :  { %v15737_v26 = vpop.f32.mrf.mxu1  ;;  %v15985_v58 = vpop.f32.mrf.mxu0 }
 0x407   :  { %v4408_v14 = vpop.f32.mrf.mxu1  ;;  %v5649_v37 = vpop.f32.mrf.mxu0 }
 0x408   :  { %v4826_v6 = vmax.f32 %v18974_v36, %v4408_v14  ;;  %v20072_v42 = vmax.f32 %v4824_v18, %v5649_v37 }
 0x409   :  { %v15738_v44 = vpop.f32.mrf.mxu1  ;;  %v15986_v4 = vpop.f32.mrf.mxu0 }
 0x40b   :  { %v4413_v57 = vpop.f32.mrf.mxu1  ;;  %15836 = vmatmul.mubr.msk.bf16.gmra.mxu1 %vm467_vm2, %v17464_v47  ;;  %v5654_v53 = vpop.f32.mrf.mxu0  ;;  %16084 = vmatmul.mubr.msk.bf16.gmra.mxu0 %vm467_vm2, %v17465_v52  ;;  %v17466_v47 = vld [vmem:[%s23251_s0 + $0x6d4] sm:$0xff]  }
 0x40c   :  { %v4827_v26 = vmax.f32 %v18979_v3, %v4413_v57  ;;  %v20077_v58 = vmax.f32 %v4825_v16, %v5654_v53  ;;  %15839 = vmatprep.mubr.msk.bf16.mxu1 %vm17772_vm1, %v23331_v15  ;;  %16087 = vmatprep.mubr.msk.bf16.mxu0 %vm17772_vm1, %v23331_v15  ;;  %v17467_v3 = vld [vmem:[%s23251_s0 + $0x8b0] sm:$0xff]  }
 0x40d   :  { %v15741_v36 = vpop.f32.mrf.mxu1  ;;  %v15989_v18 = vpop.f32.mrf.mxu0 }
 0x40f   :  { %v4416_v14 = vpop.f32.mrf.mxu1  ;;  %v5657_v37 = vpop.f32.mrf.mxu0 }
 0x410   :  { %v4828_v16 = vmax.f32 %v18992_v46, %v4416_v14  ;;  %v20090_v52 = vmax.f32 %v4826_v6, %v5657_v37 }
 0x411   :  { %v15742_v44 = vpop.f32.mrf.mxu1  ;;  %v15990_v4 = vpop.f32.mrf.mxu0 }
 0x413   :  { %v4421_v57 = vpop.f32.mrf.mxu1  ;;  %15840 = vmatmul.mubr.msk.bf16.gmra.mxu1 %vm467_vm2, %v17466_v47  ;;  %v5662_v53 = vpop.f32.mrf.mxu0  ;;  %16088 = vmatmul.mubr.msk.bf16.gmra.mxu0 %vm467_vm2, %v17467_v3  ;;  %v17468_v47 = vld [vmem:[%s23251_s0 + $0x6dc] sm:$0xff]  }
 0x414   :  { %v4829_v36 = vmax.f32 %v18997_v24, %v4421_v57  ;;  %v20095_v18 = vmax.f32 %v4827_v26, %v5662_v53  ;;  %15843 = vmatprep.mubr.msk.bf16.mxu1 %vm17772_vm1, %v23331_v15  ;;  %16091 = vmatprep.mubr.msk.bf16.mxu0 %vm17772_vm1, %v23331_v15  ;;  %v17469_v24 = vld [vmem:[%s23251_s0 + $0x8b8] sm:$0xff]  }
 0x415   :  { %v15745_v46 = vpop.f32.mrf.mxu1  ;;  %v15993_v6 = vpop.f32.mrf.mxu0 }
 0x417   :  { %v4424_v14 = vpop.f32.mrf.mxu1  ;;  %v5665_v37 = vpop.f32.mrf.mxu0 }
 0x418   :  { %v4830_v26 = vmax.f32 %v19010_v56, %v4424_v14  ;;  %v20108_v3 = vmax.f32 %v4828_v16, %v5665_v37 }
 0x419   :  { %v15746_v44 = vpop.f32.mrf.mxu1  ;;  %v15994_v4 = vpop.f32.mrf.mxu0 }
 0x41b   :  { %v4429_v57 = vpop.f32.mrf.mxu1  ;;  %15844 = vmatmul.mubr.msk.bf16.gmra.mxu1 %vm467_vm2, %v17468_v47  ;;  %v5670_v53 = vpop.f32.mrf.mxu0  ;;  %16092 = vmatmul.mubr.msk.bf16.gmra.mxu0 %vm467_vm2, %v17469_v24  ;;  %v17470_v47 = vld [vmem:[%s23251_s0 + $0x6e4] sm:$0xff]  }
 0x41c   :  { %v4831_v46 = vmax.f32 %v19015_v41, %v4429_v57  ;;  %v20113_v6 = vmax.f32 %v4829_v36, %v5670_v53  ;;  %15847 = vmatprep.mubr.msk.bf16.mxu1 %vm17772_vm1, %v23331_v15  ;;  %16095 = vmatprep.mubr.msk.bf16.mxu0 %vm17772_vm1, %v23331_v15  ;;  %v17471_v41 = vld [vmem:[%s23251_s0 + $0x8c0] sm:$0xff]  }
 0x41d   :  { %v15749_v56 = vpop.f32.mrf.mxu1  ;;  %v15997_v16 = vpop.f32.mrf.mxu0 }
 0x41f   :  { %v4432_v14 = vpop.f32.mrf.mxu1  ;;  %v5673_v37 = vpop.f32.mrf.mxu0 }
 0x420   :  { %v4832_v36 = vmax.f32 %v19028_v11, %v4432_v14  ;;  %v20126_v24 = vmax.f32 %v4830_v26, %v5673_v37 }
 0x421   :  { %v15750_v44 = vpop.f32.mrf.mxu1  ;;  %v15998_v4 = vpop.f32.mrf.mxu0 }
 0x423   :  { %v4437_v57 = vpop.f32.mrf.mxu1  ;;  %15848 = vmatmul.mubr.msk.bf16.gmra.mxu1 %vm467_vm2, %v17470_v47  ;;  %v5678_v53 = vpop.f32.mrf.mxu0  ;;  %16096 = vmatmul.mubr.msk.bf16.gmra.mxu0 %vm467_vm2, %v17471_v41  ;;  %v17472_v47 = vld [vmem:[%s23251_s0 + $0x6ec] sm:$0xff]  }
 0x424   :  { %v4833_v56 = vmax.f32 %v19033_v61, %v4437_v57  ;;  %v20131_v16 = vmax.f32 %v4831_v46, %v5678_v53  ;;  %15851 = vmatprep.mubr.msk.bf16.mxu1 %vm17772_vm1, %v23331_v15  ;;  %16099 = vmatprep.mubr.msk.bf16.mxu0 %vm17772_vm1, %v23331_v15  ;;  %v17473_v61 = vld [vmem:[%s23251_s0 + $0x8c8] sm:$0xff]  }
 0x425   :  { %v15753_v11 = vpop.f32.mrf.mxu1  ;;  %v16001_v26 = vpop.f32.mrf.mxu0 }
 0x427   :  { %v4440_v14 = vpop.f32.mrf.mxu1  ;;  %v5681_v37 = vpop.f32.mrf.mxu0 }
 0x428   :  { %v4834_v46 = vmax.f32 %v19046_v31, %v4440_v14  ;;  %v20144_v41 = vmax.f32 %v4832_v36, %v5681_v37 }
 0x429   :  { %v15754_v44 = vpop.f32.mrf.mxu1  ;;  %v16002_v4 = vpop.f32.mrf.mxu0 }
 0x42b   :  { %v4445_v57 = vpop.f32.mrf.mxu1  ;;  %15852 = vmatmul.mubr.msk.bf16.gmra.mxu1 %vm467_vm2, %v17472_v47  ;;  %v5686_v53 = vpop.f32.mrf.mxu0  ;;  %16100 = vmatmul.mubr.msk.bf16.gmra.mxu0 %vm467_vm2, %v17473_v61  ;;  %v17474_v47 = vld [vmem:[%s23251_s0 + $0x6f4] sm:$0xff]  }
 0x42c   :  { %v4835_v11 = vmax.f32 %v19051_v21, %v4445_v57  ;;  %v20149_v26 = vmax.f32 %v4833_v56, %v5686_v53  ;;  %15855 = vmatprep.mubr.msk.bf16.mxu1 %vm17772_vm1, %v23331_v15  ;;  %16103 = vmatprep.mubr.msk.bf16.mxu0 %vm17772_vm1, %v23331_v15  ;;  %v17475_v21 = vld [vmem:[%s23251_s0 + $0x8d0] sm:$0xff]  }
 0x42d   :  { %v15757_v31 = vpop.f32.mrf.mxu1  ;;  %v16005_v36 = vpop.f32.mrf.mxu0 }
 0x42f   :  { %v4448_v14 = vpop.f32.mrf.mxu1  ;;  %v5689_v37 = vpop.f32.mrf.mxu0 }
 0x430   :  { %v4836_v56 = vmax.f32 %v19064_v49, %v4448_v14  ;;  %v20162_v61 = vmax.f32 %v4834_v46, %v5689_v37 }
 0x431   :  { %v15758_v44 = vpop.f32.mrf.mxu1  ;;  %v16006_v4 = vpop.f32.mrf.mxu0 }
 0x433   :  { %v4453_v57 = vpop.f32.mrf.mxu1  ;;  %15856 = vmatmul.mubr.msk.bf16.gmra.mxu1 %vm467_vm2, %v17474_v47  ;;  %v5694_v53 = vpop.f32.mrf.mxu0  ;;  %16104 = vmatmul.mubr.msk.bf16.gmra.mxu0 %vm467_vm2, %v17475_v21  ;;  %v17476_v47 = vld [vmem:[%s23251_s0 + $0x6fc] sm:$0xff]  }
 0x434   :  { %v4837_v31 = vmax.f32 %v19069_v51, %v4453_v57  ;;  %v20167_v36 = vmax.f32 %v4835_v11, %v5694_v53  ;;  %15859 = vmatprep.mubr.msk.bf16.mxu1 %vm17772_vm1, %v23331_v15  ;;  %16107 = vmatprep.mubr.msk.bf16.mxu0 %vm17772_vm1, %v23331_v15  ;;  %v17477_v51 = vld [vmem:[%s23251_s0 + $0x8d8] sm:$0xff]  }
 0x435   :  { %v15761_v49 = vpop.f32.mrf.mxu1  ;;  %v16009_v46 = vpop.f32.mrf.mxu0 }
 0x437   :  { %v4456_v14 = vpop.f32.mrf.mxu1  ;;  %v5697_v37 = vpop.f32.mrf.mxu0 }
 0x438   :  { %v4838_v11 = vmax.f32 %v19082_v9, %v4456_v14  ;;  %v20180_v21 = vmax.f32 %v4836_v56, %v5697_v37 }
 0x439   :  { %v15762_v44 = vpop.f32.mrf.mxu1  ;;  %v16010_v4 = vpop.f32.mrf.mxu0 }
 0x43b   :  { %v4461_v57 = vpop.f32.mrf.mxu1  ;;  %15860 = vmatmul.mubr.msk.bf16.gmra.mxu1 %vm467_vm2, %v17476_v47  ;;  %v5702_v53 = vpop.f32.mrf.mxu0  ;;  %16108 = vmatmul.mubr.msk.bf16.gmra.mxu0 %vm467_vm2, %v17477_v51  ;;  %v17478_v47 = vld [vmem:[%s23251_s0 + $0x704] sm:$0xff]  }
 0x43c   :  { %v4839_v49 = vmax.f32 %v19087_v29, %v4461_v57  ;;  %v20185_v46 = vmax.f32 %v4837_v31, %v5702_v53  ;;  %15863 = vmatprep.mubr.msk.bf16.mxu1 %vm17772_vm1, %v23331_v15  ;;  %16111 = vmatprep.mubr.msk.bf16.mxu0 %vm17772_vm1, %v23331_v15  ;;  %v17479_v29 = vld [vmem:[%s23251_s0 + $0x8e0] sm:$0xff]  }
 0x43d   :  { %v15765_v9 = vpop.f32.mrf.mxu1  ;;  %v16013_v56 = vpop.f32.mrf.mxu0 }
 0x43f   :  { %v4464_v14 = vpop.f32.mrf.mxu1  ;;  %v5705_v37 = vpop.f32.mrf.mxu0 }
 0x440   :  { %v4840_v31 = vmax.f32 %v19100_v35, %v4464_v14  ;;  %v20198_v51 = vmax.f32 %v4838_v11, %v5705_v37 }
 0x441   :  { %v15766_v44 = vpop.f32.mrf.mxu1  ;;  %v16014_v4 = vpop.f32.mrf.mxu0 }
 0x443   :  { %v4469_v57 = vpop.f32.mrf.mxu1  ;;  %15864 = vmatmul.mubr.msk.bf16.gmra.mxu1 %vm467_vm2, %v17478_v47  ;;  %v5710_v53 = vpop.f32.mrf.mxu0  ;;  %16112 = vmatmul.mubr.msk.bf16.gmra.mxu0 %vm467_vm2, %v17479_v29  ;;  %v17480_v47 = vld [vmem:[%s23251_s0 + $0x70c] sm:$0xff]  }
 0x444   :  { %v4841_v9 = vmax.f32 %v19105_v39, %v4469_v57  ;;  %v20203_v56 = vmax.f32 %v4839_v49, %v5710_v53  ;;  %15867 = vmatprep.mubr.msk.bf16.mxu1 %vm17772_vm1, %v23331_v15  ;;  %16115 = vmatprep.mubr.msk.bf16.mxu0 %vm17772_vm1, %v23331_v15  ;;  %v17481_v39 = vld [vmem:[%s23251_s0 + $0x8e8] sm:$0xff]  }
 0x445   :  { %v15769_v35 = vpop.f32.mrf.mxu1  ;;  %v16017_v11 = vpop.f32.mrf.mxu0 }
 0x447   :  { %v4472_v14 = vpop.f32.mrf.mxu1  ;;  %v5713_v37 = vpop.f32.mrf.mxu0 }
 0x448   :  { %v4842_v49 = vmax.f32 %v19118_v63, %v4472_v14  ;;  %v20216_v29 = vmax.f32 %v4840_v31, %v5713_v37 }
 0x449   :  { %v15770_v44 = vpop.f32.mrf.mxu1  ;;  %v16018_v4 = vpop.f32.mrf.mxu0 }
 0x44b   :  { %v4477_v57 = vpop.f32.mrf.mxu1  ;;  %15868 = vmatmul.mubr.msk.bf16.gmra.mxu1 %vm467_vm2, %v17480_v47  ;;  %v5718_v53 = vpop.f32.mrf.mxu0  ;;  %16116 = vmatmul.mubr.msk.bf16.gmra.mxu0 %vm467_vm2, %v17481_v39  ;;  %v17482_v47 = vld [vmem:[%s23251_s0 + $0x714] sm:$0xff]  }
 0x44c   :  { %v4843_v35 = vmax.f32 %v19123_v30, %v4477_v57  ;;  %v20221_v11 = vmax.f32 %v4841_v9, %v5718_v53  ;;  %15871 = vmatprep.mubr.msk.bf16.mxu1 %vm17772_vm1, %v23331_v15  ;;  %16119 = vmatprep.mubr.msk.bf16.mxu0 %vm17772_vm1, %v23331_v15  ;;  %v17483_v30 = vld [vmem:[%s23251_s0 + $0x8f0] sm:$0xff]  }
 0x44d   :  { %v15773_v63 = vpop.f32.mrf.mxu1  ;;  %v16021_v31 = vpop.f32.mrf.mxu0 }
 0x44f   :  { %v4480_v14 = vpop.f32.mrf.mxu1  ;;  %v5721_v37 = vpop.f32.mrf.mxu0 }
 0x450   :  { %v4844_v9 = vmax.f32 %v19136_v45, %v4480_v14  ;;  %v20234_v39 = vmax.f32 %v4842_v49, %v5721_v37 }
 0x451   :  { %v15774_v44 = vpop.f32.mrf.mxu1  ;;  %v16022_v4 = vpop.f32.mrf.mxu0 }
 0x453   :  { %v4485_v57 = vpop.f32.mrf.mxu1  ;;  %15872 = vmatmul.mubr.msk.bf16.gmra.mxu1 %vm467_vm2, %v17482_v47  ;;  %v5726_v53 = vpop.f32.mrf.mxu0  ;;  %16120 = vmatmul.mubr.msk.bf16.gmra.mxu0 %vm467_vm2, %v17483_v30  ;;  %v17484_v47 = vld [vmem:[%s23251_s0 + $0x71c] sm:$0xff]  }
 0x454   :  { %v4845_v63 = vmax.f32 %v19141_v54, %v4485_v57  ;;  %v20239_v31 = vmax.f32 %v4843_v35, %v5726_v53  ;;  %15875 = vmatprep.mubr.msk.bf16.mxu1 %vm17772_vm1, %v23331_v15  ;;  %16123 = vmatprep.mubr.msk.bf16.mxu0 %vm17772_vm1, %v23331_v15  ;;  %v17485_v54 = vld [vmem:[%s23251_s0 + $0x8f8] sm:$0xff]  }
 0x455   :  { %v15777_v45 = vpop.f32.mrf.mxu1  ;;  %v16025_v49 = vpop.f32.mrf.mxu0 }
 0x457   :  { %v4488_v14 = vpop.f32.mrf.mxu1  ;;  %v5729_v37 = vpop.f32.mrf.mxu0 }
 0x458   :  { %v4846_v35 = vmax.f32 %v19154_v48, %v4488_v14  ;;  %v20252_v30 = vmax.f32 %v4844_v9, %v5729_v37 }
 0x459   :  { %v15778_v44 = vpop.f32.mrf.mxu1  ;;  %v16026_v4 = vpop.f32.mrf.mxu0 }
 0x45b   :  { %v4493_v57 = vpop.f32.mrf.mxu1  ;;  %15876 = vmatmul.mubr.msk.bf16.gmra.mxu1 %vm467_vm2, %v17484_v47  ;;  %v5734_v53 = vpop.f32.mrf.mxu0  ;;  %16124 = vmatmul.mubr.msk.bf16.gmra.mxu0 %vm467_vm2, %v17485_v54  ;;  %v17486_v47 = vld [vmem:[%s23251_s0 + $0x724] sm:$0xff]  }
 0x45c   :  { %v4847_v45 = vmax.f32 %v19159_v28, %v4493_v57  ;;  %v20257_v49 = vmax.f32 %v4845_v63, %v5734_v53  ;;  %15879 = vmatprep.mubr.msk.bf16.mxu1 %vm17772_vm1, %v23331_v15  ;;  %16127 = vmatprep.mubr.msk.bf16.mxu0 %vm17772_vm1, %v23331_v15  ;;  %v17487_v28 = vld [vmem:[%s23251_s0 + $0x900] sm:$0xff]  }
 0x45d   :  { %v15781_v48 = vpop.f32.mrf.mxu1  ;;  %v16029_v9 = vpop.f32.mrf.mxu0 }
 0x45f   :  { %v4496_v14 = vpop.f32.mrf.mxu1  ;;  %v5737_v37 = vpop.f32.mrf.mxu0 }
 0x460   :  { %v4848_v63 = vmax.f32 %v19172_v8, %v4496_v14  ;;  %v20270_v54 = vmax.f32 %v4846_v35, %v5737_v37 }
 0x461   :  { %v15782_v44 = vpop.f32.mrf.mxu1  ;;  %v16030_v4 = vpop.f32.mrf.mxu0 }
 0x463   :  { %v4501_v57 = vpop.f32.mrf.mxu1  ;;  %15880 = vmatmul.mubr.msk.bf16.gmra.mxu1 %vm467_vm2, %v17486_v47  ;;  %v5742_v53 = vpop.f32.mrf.mxu0  ;;  %16128 = vmatmul.mubr.msk.bf16.gmra.mxu0 %vm467_vm2, %v17487_v28  ;;  %v17488_v47 = vld [vmem:[%s23251_s0 + $0x72c] sm:$0xff]  }
 0x464   :  { %v4849_v48 = vmax.f32 %v19177_v62, %v4501_v57  ;;  %v20275_v9 = vmax.f32 %v4847_v45, %v5742_v53  ;;  %15883 = vmatprep.mubr.msk.bf16.mxu1 %vm17772_vm1, %v23331_v15  ;;  %16131 = vmatprep.mubr.msk.bf16.mxu0 %vm17772_vm1, %v23331_v15  ;;  %v17489_v62 = vld [vmem:[%s23251_s0 + $0x908] sm:$0xff]  }
 0x465   :  { %v15785_v8 = vpop.f32.mrf.mxu1  ;;  %v16033_v35 = vpop.f32.mrf.mxu0 }
 0x466   :  { %23474 = vst [vmem:[#allocation65_spill] sm:$0xff] %v20275_v9  ;;  %v23476_v8 = vld [vmem:[#allocation74_spill] sm:$0xff] }
 0x467   :  { %v4504_v14 = vpop.f32.mrf.mxu1  ;;  %v5745_v37 = vpop.f32.mrf.mxu0 }
 0x468   :  { %v4850_v45 = vmax.f32 %v19190_v38, %v4504_v14  ;;  %v20288_v28 = vmax.f32 %v4848_v63, %v5745_v37 }
 0x469   :  { %v15786_v44 = vpop.f32.mrf.mxu1  ;;  %v16034_v4 = vpop.f32.mrf.mxu0 }
 0x46a   :  { %23475 = vst [vmem:[#allocation67_spill] sm:$0xff] %v20288_v28 }
 0x46b   :  { %v4509_v57 = vpop.f32.mrf.mxu1  ;;  %15884 = vmatmul.mubr.msk.bf16.gmra.mxu1 %vm467_vm2, %v17488_v47  ;;  %v5750_v53 = vpop.f32.mrf.mxu0  ;;  %16132 = vmatmul.mubr.msk.bf16.gmra.mxu0 %vm467_vm2, %v17489_v62  ;;  %v17490_v47 = vld [vmem:[%s23251_s0 + $0x734] sm:$0xff]  }
 0x46c   :  { %v4851_v35 = vmax.f32 %v23476_v8, %v4509_v57  ;;  %v20293_v9 = vmax.f32 %v4849_v48, %v5750_v53  ;;  %15887 = vmatprep.mubr.msk.bf16.mxu1 %vm17772_vm1, %v23331_v15  ;;  %16135 = vmatprep.mubr.msk.bf16.mxu0 %vm17772_vm1, %v23331_v15  ;;  %v17491_v62 = vld [vmem:[%s23251_s0 + $0x910] sm:$0xff]   ;;  %v23478_v48 = vld [vmem:[#allocation75_spill] sm:$0xff] }
 0x46d   :  { %v15789_v38 = vpop.f32.mrf.mxu1  ;;  %v16037_v63 = vpop.f32.mrf.mxu0 }
 0x46e   :  { %23477 = vst [vmem:[#allocation69_spill] sm:$0xff] %v20293_v9  ;;  %v23480_v63 = vld [vmem:[#allocation76_spill] sm:$0xff] }
 0x46f   :  { %v4512_v14 = vpop.f32.mrf.mxu1  ;;  %v5753_v37 = vpop.f32.mrf.mxu0 }
 0x470   :  { %v4852_v44 = vmax.f32 %v23478_v48, %v4512_v14  ;;  %v20306_v4 = vmax.f32 %v4850_v45, %v5753_v37 }
 0x471   :  { %v15790_v57 = vpop.f32.mrf.mxu1  ;;  %v16038_v53 = vpop.f32.mrf.mxu0 }
 0x472   :  { %23479 = vst [vmem:[#allocation73_spill] sm:$0xff] %v20306_v4 }
 0x473   :  { %v4517_v8 = vpop.f32.mrf.mxu1  ;;  %15888 = vmatmul.mubr.msk.bf16.gmra.mxu1 %vm467_vm2, %v17490_v47  ;;  %v5758_v38 = vpop.f32.mrf.mxu0  ;;  %16136 = vmatmul.mubr.msk.bf16.gmra.mxu0 %vm467_vm2, %v17491_v62  ;;  %v17492_v47 = vld [vmem:[%s23251_s0 + $0x73c] sm:$0xff]  }
 0x474   :  { %v4853_v9 = vmax.f32 %v23480_v63, %v4517_v8  ;;  %v20311_v28 = vmax.f32 %v4851_v35, %v5758_v38  ;;  %15891 = vmatprep.mubr.msk.bf16.mxu1 %vm17772_vm1, %v23331_v15  ;;  %16139 = vmatprep.mubr.msk.bf16.mxu0 %vm17772_vm1, %v23331_v15  ;;  %v17493_v62 = vld [vmem:[%s23251_s0 + $0x918] sm:$0xff]   ;;  %v23482_v35 = vld [vmem:[#allocation54_spill] sm:$0xff] }
 0x475   :  { %v15793_v45 = vpop.f32.mrf.mxu1  ;;  %v16041_v14 = vpop.f32.mrf.mxu0 }
 0x476   :  { %23481 = vst [vmem:[#allocation74_spill] sm:$0xff] %v20311_v28  ;;  %v23484_v14 = vld [vmem:[#allocation56_spill] sm:$0xff] }
 0x477   :  { %v4520_v37 = vpop.f32.mrf.mxu1  ;;  %v5761_v48 = vpop.f32.mrf.mxu0 }
 0x478   :  { %v4854_v57 = vmax.f32 %v23482_v35, %v4520_v37  ;;  %v20324_v53 = vmax.f32 %v4852_v44, %v5761_v48 }
 0x479   :  { %v15794_v8 = vpop.f32.mrf.mxu1  ;;  %v16042_v38 = vpop.f32.mrf.mxu0 }
 0x47a   :  { %23483 = vst [vmem:[#allocation75_spill] sm:$0xff] %v20324_v53 }
 0x47b   :  { %v4525_v63 = vpop.f32.mrf.mxu1  ;;  %15892 = vmatmul.mubr.msk.bf16.gmra.mxu1 %vm467_vm2, %v17492_v47  ;;  %v5766_v45 = vpop.f32.mrf.mxu0  ;;  %16140 = vmatmul.mubr.msk.bf16.gmra.mxu0 %vm467_vm2, %v17493_v62  ;;  %v17494_v47 = vld [vmem:[%s23251_s0 + $0x744] sm:$0xff]  }
 0x47c   :  { %v4855_v28 = vmax.f32 %v23484_v14, %v4525_v63  ;;  %v20329_v4 = vmax.f32 %v4853_v9, %v5766_v45  ;;  %15895 = vmatprep.mubr.msk.bf16.mxu1 %vm17772_vm1, %v23331_v15  ;;  %16143 = vmatprep.mubr.msk.bf16.mxu0 %vm17772_vm1, %v23331_v15  ;;  %v17495_v62 = vld [vmem:[%s23251_s0 + $0x920] sm:$0xff]  }
 0x47d   :  { %v15797_v44 = vpop.f32.mrf.mxu1  ;;  %v16045_v37 = vpop.f32.mrf.mxu0  ;;  %v23486_v9 = vld [vmem:[#allocation58_spill] sm:$0xff] }
 0x47e   :  { %23485 = vst [vmem:[#allocation76_spill] sm:$0xff] %v20329_v4  ;;  %v23488_v37 = vld [vmem:[#allocation60_spill] sm:$0xff] }
 0x47f   :  { %v4528_v48 = vpop.f32.mrf.mxu1  ;;  %v5769_v35 = vpop.f32.mrf.mxu0 }
 0x480   :  { %v4856_v8 = vmax.f32 %v23486_v9, %v4528_v48  ;;  %v20342_v38 = vmax.f32 %v4854_v57, %v5769_v35 }
 0x481   :  { %v15798_v63 = vpop.f32.mrf.mxu1  ;;  %v16046_v45 = vpop.f32.mrf.mxu0 }
 0x482   :  { %23487 = vst [vmem:[#allocation54_spill] sm:$0xff] %v20342_v38 }
 0x483   :  { %v4533_v14 = vpop.f32.mrf.mxu1  ;;  %15896 = vmatmul.mubr.msk.bf16.gmra.mxu1 %vm467_vm2, %v17494_v47  ;;  %v5774_v44 = vpop.f32.mrf.mxu0  ;;  %16144 = vmatmul.mubr.msk.bf16.gmra.mxu0 %vm467_vm2, %v17495_v62  ;;  %v17496_v47 = vld [vmem:[%s23251_s0 + $0x74c] sm:$0xff]  }
 0x484   :  { %v4857_v4 = vmax.f32 %v23488_v37, %v4533_v14  ;;  %v20347_v53 = vmax.f32 %v4855_v28, %v5774_v44  ;;  %15899 = vmatprep.mubr.msk.bf16.mxu1 %vm17772_vm1, %v23331_v15  ;;  %16147 = vmatprep.mubr.msk.bf16.mxu0 %vm17772_vm1, %v23331_v15  ;;  %v17497_v62 = vld [vmem:[%s23251_s0 + $0x928] sm:$0xff]   ;;  %v23490_v28 = vld [vmem:[#allocation62_spill] sm:$0xff] }
 0x485   :  { %v15801_v57 = vpop.f32.mrf.mxu1  ;;  %v16049_v48 = vpop.f32.mrf.mxu0 }
 0x486   :  { %23489 = vst [vmem:[#allocation56_spill] sm:$0xff] %v20347_v53  ;;  %v23492_v48 = vld [vmem:[#allocation64_spill] sm:$0xff] }
 0x487   :  { %v4536_v35 = vpop.f32.mrf.mxu1  ;;  %v5777_v9 = vpop.f32.mrf.mxu0 }
 0x488   :  { %v4858_v63 = vmax.f32 %v23490_v28, %v4536_v35  ;;  %v20360_v45 = vmax.f32 %v4856_v8, %v5777_v9 }
 0x489   :  { %v15802_v14 = vpop.f32.mrf.mxu1  ;;  %v16050_v44 = vpop.f32.mrf.mxu0 }
 0x48a   :  { %23491 = vst [vmem:[#allocation58_spill] sm:$0xff] %v20360_v45 }
 0x48b   :  { %v4541_v37 = vpop.f32.mrf.mxu1  ;;  %15900 = vmatmul.mubr.msk.bf16.gmra.mxu1 %vm467_vm2, %v17496_v47  ;;  %v5782_v57 = vpop.f32.mrf.mxu0  ;;  %16148 = vmatmul.mubr.msk.bf16.gmra.mxu0 %vm467_vm2, %v17497_v62  ;;  %v17498_v47 = vld [vmem:[%s23251_s0 + $0x754] sm:$0xff]  }
 0x48c   :  { %v4859_v53 = vmax.f32 %v23492_v48, %v4541_v37  ;;  %v20365_v38 = vmax.f32 %v4857_v4, %v5782_v57  ;;  %15903 = vmatprep.mubr.msk.bf16.mxu1 %vm17772_vm1, %v23331_v15  ;;  %16151 = vmatprep.mubr.msk.bf16.mxu0 %vm17772_vm1, %v23331_v15  ;;  %v17499_v62 = vld [vmem:[%s23251_s0 + $0x930] sm:$0xff]   ;;  %v23494_v4 = vld [vmem:[#allocation66_spill] sm:$0xff] }
 0x48d   :  { %v15805_v8 = vpop.f32.mrf.mxu1  ;;  %v16053_v35 = vpop.f32.mrf.mxu0 }
 0x48e   :  { %23493 = vst [vmem:[#allocation60_spill] sm:$0xff] %v20365_v38  ;;  %v23496_v35 = vld [vmem:[#allocation68_spill] sm:$0xff] }
 0x48f   :  { %v4544_v9 = vpop.f32.mrf.mxu1  ;;  %v5785_v28 = vpop.f32.mrf.mxu0 }
 0x490   :  { %v4860_v14 = vmax.f32 %v23494_v4, %v4544_v9  ;;  %v20378_v44 = vmax.f32 %v4858_v63, %v5785_v28 }
 0x491   :  { %v15806_v37 = vpop.f32.mrf.mxu1  ;;  %v16054_v57 = vpop.f32.mrf.mxu0 }
 0x492   :  { %23495 = vst [vmem:[#allocation62_spill] sm:$0xff] %v20378_v44 }
 0x493   :  { %v4549_v48 = vpop.f32.mrf.mxu1  ;;  %15904 = vmatmul.mubr.msk.bf16.gmra.mxu1 %vm467_vm2, %v17498_v47  ;;  %v5790_v8 = vpop.f32.mrf.mxu0  ;;  %16152 = vmatmul.mubr.msk.bf16.gmra.mxu0 %vm467_vm2, %v17499_v62  ;;  %v17500_v47 = vld [vmem:[%s23251_s0 + $0x75c] sm:$0xff]  }
 0x494   :  { %v4861_v38 = vmax.f32 %v23496_v35, %v4549_v48  ;;  %v20383_v45 = vmax.f32 %v4859_v53, %v5790_v8  ;;  %15907 = vmatprep.mubr.msk.bf16.mxu1 %vm17772_vm1, %v23331_v15  ;;  %16155 = vmatprep.mubr.msk.bf16.mxu0 %vm17772_vm1, %v23331_v15  ;;  %v17501_v62 = vld [vmem:[%s23251_s0 + $0x938] sm:$0xff]   ;;  %v23498_v53 = vld [vmem:[#allocation70_spill] sm:$0xff] }
 0x495   :  { %v15809_v63 = vpop.f32.mrf.mxu1  ;;  %v16057_v9 = vpop.f32.mrf.mxu0 }
 0x496   :  { %23497 = vst [vmem:[#allocation64_spill] sm:$0xff] %v20383_v45  ;;  %v23500_v9 = vld [vmem:[#allocation71_spill] sm:$0xff] }
 0x497   :  { %v4552_v28 = vpop.f32.mrf.mxu1  ;;  %v5793_v4 = vpop.f32.mrf.mxu0 }
 0x498   :  { %v4862_v37 = vmax.f32 %v23498_v53, %v4552_v28  ;;  %v20396_v57 = vmax.f32 %v4860_v14, %v5793_v4 }
 0x499   :  { %v15810_v48 = vpop.f32.mrf.mxu1  ;;  %v16058_v8 = vpop.f32.mrf.mxu0 }
 0x49a   :  { %23499 = vst [vmem:[#allocation66_spill] sm:$0xff] %v20396_v57 }
 0x49b   :  { %v4557_v35 = vpop.f32.mrf.mxu1  ;;  %15908 = vmatmul.mubr.msk.bf16.gmra.mxu1 %vm467_vm2, %v17500_v47  ;;  %v5798_v63 = vpop.f32.mrf.mxu0  ;;  %16156 = vmatmul.mubr.msk.bf16.gmra.mxu0 %vm467_vm2, %v17501_v62  ;;  %v17502_v47 = vld [vmem:[%s23251_s0 + $0x764] sm:$0xff]  }
 0x49c   :  { %v4863_v45 = vmax.f32 %v23500_v9, %v4557_v35  ;;  %v20401_v44 = vmax.f32 %v4861_v38, %v5798_v63  ;;  %15911 = vmatprep.mubr.msk.bf16.mxu1 %vm17772_vm1, %v23331_v15  ;;  %16159 = vmatprep.mubr.msk.bf16.mxu0 %vm17772_vm1, %v23331_v15  ;;  %v17503_v62 = vld [vmem:[%s23251_s0 + $0x940] sm:$0xff]   ;;  %v23502_v38 = vld [vmem:[#allocation72_spill] sm:$0xff] }
 0x49d   :  { %v15813_v14 = vpop.f32.mrf.mxu1  ;;  %v16061_v28 = vpop.f32.mrf.mxu0 }
 0x49e   :  { %23501 = vst [vmem:[#allocation68_spill] sm:$0xff] %v20401_v44  ;;  %v23504_v28 = vld [vmem:[#allocation3_spill] sm:$0xff] }
 0x49f   :  { %v4560_v4 = vpop.f32.mrf.mxu1  ;;  %v5801_v53 = vpop.f32.mrf.mxu0 }
 0x4a0   :  { %v4864_v48 = vmax.f32 %v23502_v38, %v4560_v4  ;;  %v20414_v8 = vmax.f32 %v4862_v37, %v5801_v53 }
 0x4a1   :  { %v15814_v35 = vpop.f32.mrf.mxu1  ;;  %v16062_v63 = vpop.f32.mrf.mxu0 }
 0x4a2   :  { %23503 = vst [vmem:[#allocation70_spill] sm:$0xff] %v20414_v8 }
 0x4a3   :  { %v4565_v9 = vpop.f32.mrf.mxu1  ;;  %15912 = vmatmul.mubr.msk.bf16.gmra.mxu1 %vm467_vm2, %v17502_v47  ;;  %v5806_v14 = vpop.f32.mrf.mxu0  ;;  %16160 = vmatmul.mubr.msk.bf16.gmra.mxu0 %vm467_vm2, %v17503_v62  ;;  %v17504_v47 = vld [vmem:[%s23251_s0 + $0x76c] sm:$0xff]  }
 0x4a4   :  { %v4865_v44 = vmax.f32 %v23504_v28, %v4565_v9  ;;  %v20419_v57 = vmax.f32 %v4863_v45, %v5806_v14  ;;  %15915 = vmatprep.mubr.msk.bf16.mxu1 %vm17772_vm1, %v23331_v15  ;;  %16163 = vmatprep.mubr.msk.bf16.mxu0 %vm17772_vm1, %v23331_v15  ;;  %v17505_v62 = vld [vmem:[%s23251_s0 + $0x948] sm:$0xff]   ;;  %v23506_v45 = vld [vmem:[#allocation4_spill] sm:$0xff] }
 0x4a5   :  { %v15817_v37 = vpop.f32.mrf.mxu1  ;;  %v16065_v4 = vpop.f32.mrf.mxu0 }
 0x4a6   :  { %23505 = vst [vmem:[#allocation71_spill] sm:$0xff] %v20419_v57  ;;  %v23508_v4 = vld [vmem:[#allocation5_spill] sm:$0xff] }
 0x4a7   :  { %v4568_v53 = vpop.f32.mrf.mxu1  ;;  %v5809_v38 = vpop.f32.mrf.mxu0 }
 0x4a8   :  { %v4866_v35 = vmax.f32 %v23506_v45, %v4568_v53  ;;  %v20432_v63 = vmax.f32 %v4864_v48, %v5809_v38 }
 0x4a9   :  { %v15818_v9 = vpop.f32.mrf.mxu1  ;;  %v16066_v14 = vpop.f32.mrf.mxu0 }
 0x4aa   :  { %23507 = vst [vmem:[#allocation72_spill] sm:$0xff] %v20432_v63 }
 0x4ab   :  { %v4573_v28 = vpop.f32.mrf.mxu1  ;;  %15916 = vmatmul.mubr.msk.bf16.gmra.mxu1 %vm467_vm2, %v17504_v47  ;;  %v5814_v37 = vpop.f32.mrf.mxu0  ;;  %16164 = vmatmul.mubr.msk.bf16.gmra.mxu0 %vm467_vm2, %v17505_v62  ;;  %v17506_v47 = vld [vmem:[%s23251_s0 + $0x774] sm:$0xff]  }
 0x4ac   :  { %v4867_v57 = vmax.f32 %v23508_v4, %v4573_v28  ;;  %v20437_v8 = vmax.f32 %v4865_v44, %v5814_v37  ;;  %15919 = vmatprep.mubr.msk.bf16.mxu1 %vm17772_vm1, %v23331_v15  ;;  %16167 = vmatprep.mubr.msk.bf16.mxu0 %vm17772_vm1, %v23331_v15  ;;  %v17507_v62 = vld [vmem:[%s23251_s0 + $0x950] sm:$0xff]   ;;  %v23510_v44 = vld [vmem:[#allocation6_spill] sm:$0xff] }
 0x4ad   :  { %v15821_v48 = vpop.f32.mrf.mxu1  ;;  %v16069_v53 = vpop.f32.mrf.mxu0 }
 0x4ae   :  { %23509 = vst [vmem:[#allocation3_spill] sm:$0xff] %v20437_v8  ;;  %v23512_v53 = vld [vmem:[#allocation7_spill] sm:$0xff] }
 0x4af   :  { %v4576_v38 = vpop.f32.mrf.mxu1  ;;  %v5817_v45 = vpop.f32.mrf.mxu0 }
 0x4b0   :  { %v4868_v9 = vmax.f32 %v23510_v44, %v4576_v38  ;;  %v20450_v14 = vmax.f32 %v4866_v35, %v5817_v45 }
 0x4b1   :  { %v15822_v28 = vpop.f32.mrf.mxu1  ;;  %v16070_v37 = vpop.f32.mrf.mxu0 }
 0x4b2   :  { %23511 = vst [vmem:[#allocation4_spill] sm:$0xff] %v20450_v14 }
 0x4b3   :  { %v4581_v4 = vpop.f32.mrf.mxu1  ;;  %15920 = vmatmul.mubr.msk.bf16.gmra.mxu1 %vm467_vm2, %v17506_v47  ;;  %v5822_v48 = vpop.f32.mrf.mxu0  ;;  %16168 = vmatmul.mubr.msk.bf16.gmra.mxu0 %vm467_vm2, %v17507_v62  ;;  %v17508_v47 = vld [vmem:[%s23251_s0 + $0x77c] sm:$0xff]  }
 0x4b4   :  { %v4869_v8 = vmax.f32 %v23512_v53, %v4581_v4  ;;  %v20455_v63 = vmax.f32 %v4867_v57, %v5822_v48  ;;  %15923 = vmatprep.mubr.msk.bf16.mxu1 %vm17772_vm1, %v23331_v15  ;;  %16171 = vmatprep.mubr.msk.bf16.mxu0 %vm17772_vm1, %v23331_v15  ;;  %v17509_v62 = vld [vmem:[%s23251_s0 + $0x958] sm:$0xff]   ;;  %v23514_v57 = vld [vmem:[#allocation8_spill] sm:$0xff] }
 0x4b5   :  { %v15825_v35 = vpop.f32.mrf.mxu1  ;;  %v16073_v38 = vpop.f32.mrf.mxu0 }
 0x4b6   :  { %23513 = vst [vmem:[#allocation5_spill] sm:$0xff] %v20455_v63  ;;  %v23516_v38 = vld [vmem:[#allocation9_spill] sm:$0xff] }
 0x4b7   :  { %v4584_v45 = vpop.f32.mrf.mxu1  ;;  %v5825_v44 = vpop.f32.mrf.mxu0 }
 0x4b8   :  { %v4870_v28 = vmax.f32 %v23514_v57, %v4584_v45  ;;  %v20468_v37 = vmax.f32 %v4868_v9, %v5825_v44 }
 0x4b9   :  { %v15826_v4 = vpop.f32.mrf.mxu1  ;;  %v16074_v48 = vpop.f32.mrf.mxu0 }
 0x4ba   :  { %23515 = vst [vmem:[#allocation6_spill] sm:$0xff] %v20468_v37 }
 0x4bb   :  { %v4589_v53 = vpop.f32.mrf.mxu1  ;;  %15924 = vmatmul.mubr.msk.bf16.gmra.mxu1 %vm467_vm2, %v17508_v47  ;;  %v5830_v35 = vpop.f32.mrf.mxu0  ;;  %16172 = vmatmul.mubr.msk.bf16.gmra.mxu0 %vm467_vm2, %v17509_v62  ;;  %v17510_v47 = vld [vmem:[%s23251_s0 + $0x784] sm:$0xff]  }
 0x4bc   :  { %v4871_v63 = vmax.f32 %v23516_v38, %v4589_v53  ;;  %v20473_v14 = vmax.f32 %v4869_v8, %v5830_v35  ;;  %15927 = vmatprep.mubr.msk.bf16.mxu1 %vm17772_vm1, %v23331_v15  ;;  %16175 = vmatprep.mubr.msk.bf16.mxu0 %vm17772_vm1, %v23331_v15  ;;  %v17511_v62 = vld [vmem:[%s23251_s0 + $0x960] sm:$0xff]  }
 0x4bd   :  { %v15829_v9 = vpop.f32.mrf.mxu1  ;;  %v16077_v45 = vpop.f32.mrf.mxu0  ;;  %v23518_v8 = vld [vmem:[#allocation10_spill] sm:$0xff] }
 0x4be   :  { %23517 = vst [vmem:[#allocation7_spill] sm:$0xff] %v20473_v14  ;;  %v23520_v45 = vld [vmem:[#allocation11_spill] sm:$0xff] }
 0x4bf   :  { %v4592_v44 = vpop.f32.mrf.mxu1  ;;  %v5833_v57 = vpop.f32.mrf.mxu0 }
 0x4c0   :  { %v4872_v4 = vmax.f32 %v23518_v8, %v4592_v44  ;;  %v20486_v48 = vmax.f32 %v4870_v28, %v5833_v57 }
 0x4c1   :  { %v15830_v53 = vpop.f32.mrf.mxu1  ;;  %v16078_v35 = vpop.f32.mrf.mxu0 }
 0x4c2   :  { %23519 = vst [vmem:[#allocation8_spill] sm:$0xff] %v20486_v48 }
 0x4c3   :  { %v4597_v38 = vpop.f32.mrf.mxu1  ;;  %15928 = vmatmul.mubr.msk.bf16.gmra.mxu1 %vm467_vm2, %v17510_v47  ;;  %v5838_v9 = vpop.f32.mrf.mxu0  ;;  %16176 = vmatmul.mubr.msk.bf16.gmra.mxu0 %vm467_vm2, %v17511_v62  ;;  %v17512_v47 = vld [vmem:[%s23251_s0 + $0x78c] ss:$0 sps:$4 sm:$0xff]  }
 0x4c4   :  { %v4873_v14 = vmax.f32 %v23520_v45, %v4597_v38  ;;  %v20491_v37 = vmax.f32 %v4871_v63, %v5838_v9  ;;  %15931 = vmatprep.mubr.msk.bf16.mxu1 %vm17772_vm1, %v23331_v15  ;;  %16179 = vmatprep.mubr.msk.bf16.mxu0 %vm17772_vm1, %v23331_v15  ;;  %v17513_v62 = vld [vmem:[%s23251_s0 + $0x968] sm:$0xff]   ;;  %v23522_v63 = vld [vmem:[#allocation12_spill] sm:$0xff] }
 0x4c5   :  { %v15833_v28 = vpop.f32.mrf.mxu1  ;;  %v16081_v44 = vpop.f32.mrf.mxu0 }
 0x4c6   :  { %23521 = vst [vmem:[#allocation9_spill] sm:$0xff] %v20491_v37  ;;  %v23524_v44 = vld [vmem:[#allocation13_spill] sm:$0xff] }
 0x4c7   :  { %v4600_v57 = vpop.f32.mrf.mxu1  ;;  %v5841_v8 = vpop.f32.mrf.mxu0 }
 0x4c8   :  { %v4874_v53 = vmax.f32 %v23522_v63, %v4600_v57  ;;  %v20504_v35 = vmax.f32 %v4872_v4, %v5841_v8 }
 0x4c9   :  { %v15834_v38 = vpop.f32.mrf.mxu1  ;;  %v16082_v9 = vpop.f32.mrf.mxu0 }
 0x4ca   :  { %23523 = vst [vmem:[#allocation10_spill] sm:$0xff] %v20504_v35 }
 0x4cb   :  { %v4605_v45 = vpop.f32.mrf.mxu1  ;;  %15932 = vmatmul.mubr.msk.bf16.gmra.mxu1 %vm467_vm2, %v17512_v47  ;;  %v5846_v28 = vpop.f32.mrf.mxu0  ;;  %16180 = vmatmul.mubr.msk.bf16.gmra.mxu0 %vm467_vm2, %v17513_v62  ;;  %v17514_v47 = vld [vmem:[%s23251_s0 + $0x970] ss:$0 sps:$4 sm:$0xff]   ;;  %v17515_v62 = vld [vmem:[%s23251_s0 + $0x974] sm:$0xff]  }
 0x4cc   :  { %v4875_v37 = vmax.f32 %v23524_v44, %v4605_v45  ;;  %v20509_v48 = vmax.f32 %v4873_v14, %v5846_v28  ;;  %16183 = vmatprep.mubr.msk.bf16.mxu0 %vm17772_vm1, %v23331_v15  ;;  %16195 = vmatprep.mubr.msk.bf16.mxu1 %vm17772_vm1, %v23331_v15  ;;  %v23526_v14 = vld [vmem:[#allocation14_spill] sm:$0xff] }
 0x4cd   :  { %v15837_v4 = vpop.f32.mrf.mxu1  ;;  %v16085_v57 = vpop.f32.mrf.mxu0 }
 0x4ce   :  { %23525 = vst [vmem:[#allocation11_spill] sm:$0xff] %v20509_v48  ;;  %v23528_v4 = vld [vmem:[#allocation15_spill] sm:$0xff] }
 0x4cf   :  { %v4608_v8 = vpop.f32.mrf.mxu1  ;;  %v5849_v63 = vpop.f32.mrf.mxu0 }
 0x4d0   :  { %v4876_v38 = vmax.f32 %v23526_v14, %v4608_v8  ;;  %v20522_v9 = vmax.f32 %v4874_v53, %v5849_v63  ;;  %v23530_v63 = vld [vmem:[#allocation2_spill] sm:$0xff] }
 0x4d1   :  { %v15838_v45 = vpop.f32.mrf.mxu1  ;;  %v16086_v28 = vpop.f32.mrf.mxu0 }
 0x4d2   :  { %23527 = vst [vmem:[#allocation12_spill] sm:$0xff] %v20522_v9 }
 0x4d3   :  { %v4613_v44 = vpop.f32.mrf.mxu1  ;;  %v5854_v48 = vpop.f32.mrf.mxu0  ;;  %16184 = vmatmul.mubr.msk.bf16.gmra.mxu0 %vm467_vm2, %v17514_v47  ;;  %16196 = vmatmul.mubr.msk.bf16.vlgmr.msra.gmra.mxu1 %vm467_vm2, %v17515_v62  ;;  %v17516_v62 = vld [vmem:[%s23251_s0 + $0x97c] sm:$0xff]  }
 0x4d4   :  { %v4877_v57 = vmax.f32 %v23528_v4, %v4613_v44  ;;  %v20527_v35 = vmax.f32 %v4875_v37, %v5854_v48  ;;  %16199 = vmatprep.mubr.msk.bf16.mxu1 %vm17772_vm1, %v23331_v15  ;;  %16447 = vmatprep.mubr.msk.bf16.mxu0 %vm17772_vm1, %v23331_v15  ;;  %v17517_v37 = vld [vmem:[%s23251_s0 + $0xb58] sm:$0xff]   ;;  %v17765_v4 = vld [vmem:[%s23250_s1 + $0x10] sm:$0xff]  }
 0x4d5   :  { %v15841_v53 = vpop.f32.mrf.mxu1  ;;  %v16089_v8 = vpop.f32.mrf.mxu0  ;;  %16692 = vmatpush3.bf16.msra.mxu1 %v23530_v63 }
 0x4d6   :  { %23529 = vst [vmem:[#allocation13_spill] sm:$0xff] %v20527_v35  ;;  %16693 = vmatprep.subr.bf16.mxu1 %v23331_v15  ;;  %v23532_v35 = vld [vmem:[#allocation16_spill] sm:$0xff] }
 0x4d7   :  { %v4616_v14 = vpop.f32.mrf.mxu1  ;;  %v5857_v47 = vpop.f32.mrf.mxu0 }
 0x4d8   :  { %v4878_v48 = vmax.f32 %v19454_v10, %v4616_v14  ;;  %v20542_v45 = vmax.f32 %v4876_v38, %v5857_v47  ;;  %v17766_v47 = vld [vmem:[%s23250_s1 + $0x8] sm:$0xff]  }
 0x4d9   :  { %v15842_v28 = vpop.f32.mrf.mxu1  ;;  %v16090_v44 = vpop.f32.mrf.mxu0  ;;  %16694 = vmatpush3.bf16.msra.mxu1 %v17765_v4 }
 0x4da   :  { %23531 = vst [vmem:[#allocation14_spill] sm:$0xff] %v20542_v45  ;;  %16695 = vmatprep.subr.bf16.mxu1 %v23331_v15  ;;  %v23536_v45 = vld [vmem:[#allocation18_spill] sm:$0xff] }
 0x4db   :  { %v4621_v53 = vpop.f32.mrf.mxu1  ;;  %v5862_v8 = vpop.f32.mrf.mxu0  ;;  %16200 = vmatmul.mubr.msk.bf16.gmra.mxu1 %vm467_vm2, %v17516_v62  ;;  %16448 = vmatmul.mubr.msk.bf16.vlgmr.msra.gmra.mxu0 %vm467_vm2, %v17517_v37  ;;  %v17519_v62 = vld [vmem:[%s23251_s0 + $0xb60] sm:$0xff]   ;;  %v23534_v37 = vld [vmem:[#allocation17_spill] sm:$0xff] }
 0x4dc   :  { %v4879_v9 = vmax.f32 %v23532_v35, %v4621_v53  ;;  %v20551_v10 = vmax.f32 %v4877_v57, %v5862_v8  ;;  %16944 = vmatpush3.bf16.msra.mxu0 %v23530_v63  ;;  %16203 = vmatprep.mubr.msk.bf16.mxu1 %vm17772_vm1, %v23331_v15  ;;  %v17518_v63 = vld [vmem:[%s23251_s0 + $0x984] sm:$0xff]  }
 0x4dd   :  { %v15845_v38 = vpop.f32.mrf.mxu1  ;;  %v16093_v14 = vpop.f32.mrf.mxu0  ;;  %16451 = vmatprep.mubr.msk.bf16.mxu0 %vm17772_vm1, %v23331_v15  ;;  %16945 = vmatprep.subr.bf16.mxu0 %v23331_v15 }
 0x4de   :  { %23533 = vst [vmem:[#allocation15_spill] sm:$0xff] %v20551_v10  ;;  %16696 = vmatpush3.bf16.msra.mxu1 %v17766_v47  ;;  %v17767_v38 = vld [vmem:[%s23250_s1] sm:$0xff]  }
 0x4df   :  { %v4624_v35 = vpop.f32.mrf.mxu1  ;;  %v5865_v57 = vpop.f32.mrf.mxu0  ;;  %16697 = vmatprep.subr.bf16.mxu1 %v23331_v15 }
 0x4e0   :  { %v4880_v28 = vmax.f32 %v23534_v37, %v4624_v35  ;;  %v20570_v44 = vmax.f32 %v4878_v48, %v5865_v57  ;;  %16946 = vmatpush3.bf16.msra.mxu0 %v17765_v4 }
 0x4e1   :  { %v15846_v53 = vpop.f32.mrf.mxu1  ;;  %v16094_v8 = vpop.f32.mrf.mxu0  ;;  %16947 = vmatprep.subr.bf16.mxu0 %v23331_v15 }
 0x4e2   :  { %23535 = vst [vmem:[#allocation2_spill] sm:$0xff] %v20570_v44  ;;  %16698 = vmatpush3.bf16.msra.mxu1 %v17767_v38 }
 0x4e3   :  { %v4629_v14 = vpop.f32.mrf.mxu1  ;;  %v5870_v10 = vpop.f32.mrf.mxu0  ;;  %16204 = vmatmul.mubr.msk.bf16.gmra.mxu1 %vm467_vm2, %v17518_v63  ;;  %16452 = vmatmul.mubr.msk.bf16.gmra.mxu0 %vm467_vm2, %v17519_v62  ;;  %v17520_v63 = vld [vmem:[%s23251_s0 + $0x98c] sm:$0xff]  }
 0x4e4   :  { %v4881_v35 = vmax.f32 %v23536_v45, %v4629_v14  ;;  %v20579_v48 = vmax.f32 %v4879_v9, %v5870_v10  ;;  %16207 = vmatprep.mubr.msk.bf16.mxu1 %vm17772_vm1, %v23331_v15  ;;  %16455 = vmatprep.mubr.msk.bf16.mxu0 %vm17772_vm1, %v23331_v15  ;;  %v17521_v9 = vld [vmem:[%s23251_s0 + $0xb68] sm:$0xff]  }
 0x4e5   :  { %v15849_v4 = vpop.f32.mrf.mxu1  ;;  %v16097_v57 = vpop.f32.mrf.mxu0  ;;  %16948 = vmatpush3.bf16.msra.mxu0 %v17766_v47  ;;  %v23538_v45 = vld [vmem:[#allocation19_spill] sm:$0xff] }
 0x4e6   :  { %23537 = vst [vmem:[#allocation16_spill] sm:$0xff] %v20579_v48  ;;  %16949 = vmatprep.subr.bf16.mxu0 %v23331_v15  ;;  %v23539_v57 = vld [vmem:[#allocation20_spill] sm:$0xff] }
 0x4e7   :  { %v4632_v37 = vpop.f32.mrf.mxu1  ;;  %v5873_v53 = vpop.f32.mrf.mxu0 }
 0x4e8   :  { %v4882_v10 = vmax.f32 %v23538_v45, %v4632_v37  ;;  %v20593_v62 = vmax.f32 %v4880_v28, %v5873_v53 }
 0x4e9   :  { %v15850_v8 = vpop.f32.mrf.mxu1  ;;  %v16098_v14 = vpop.f32.mrf.mxu0  ;;  %16950 = vmatpush3.bf16.msra.mxu0 %v17767_v38 }
 0x4eb   :  { %v4637_v47 = vpop.f32.mrf.mxu1  ;;  %v5878_v4 = vpop.f32.mrf.mxu0  ;;  %16208 = vmatmul.mubr.msk.bf16.gmra.mxu1 %vm467_vm2, %v17520_v63  ;;  %16456 = vmatmul.mubr.msk.bf16.gmra.mxu0 %vm467_vm2, %v17521_v9  ;;  %v17522_v63 = vld [vmem:[%s23251_s0 + $0x994] sm:$0xff]  }
 0x4ec   :  { %v4883_v48 = vmax.f32 %v23539_v57, %v4637_v47  ;;  %v20598_v44 = vmax.f32 %v4881_v35, %v5878_v4  ;;  %16211 = vmatprep.mubr.msk.bf16.mxu1 %vm17772_vm1, %v23331_v15  ;;  %16459 = vmatprep.mubr.msk.bf16.mxu0 %vm17772_vm1, %v23331_v15  ;;  %v17523_v9 = vld [vmem:[%s23251_s0 + $0xb70] sm:$0xff]   ;;  %v23541_v35 = vld [vmem:[#allocation21_spill] sm:$0xff] }
 0x4ed   :  { %v15853_v28 = vpop.f32.mrf.mxu1  ;;  %v16101_v37 = vpop.f32.mrf.mxu0 }
 0x4ee   :  { %23540 = vst [vmem:[#allocation17_spill] sm:$0xff] %v20598_v44  ;;  %v23543_v28 = vld [vmem:[#allocation22_spill] sm:$0xff] }
 0x4ef   :  { %v4640_v53 = vpop.f32.mrf.mxu1  ;;  %v5881_v38 = vpop.f32.mrf.mxu0 }
 0x4f0   :  { %v4884_v45 = vmax.f32 %v23541_v35, %v4640_v53  ;;  %v20611_v8 = vmax.f32 %v4882_v10, %v5881_v38 }
 0x4f1   :  { %v15854_v14 = vpop.f32.mrf.mxu1  ;;  %v16102_v47 = vpop.f32.mrf.mxu0 }
 0x4f2   :  { %23542 = vst [vmem:[#allocation18_spill] sm:$0xff] %v20611_v8 }
 0x4f3   :  { %v4645_v4 = vpop.f32.mrf.mxu1  ;;  %v5886_v57 = vpop.f32.mrf.mxu0  ;;  %16212 = vmatmul.mubr.msk.bf16.gmra.mxu1 %vm467_vm2, %v17522_v63  ;;  %16460 = vmatmul.mubr.msk.bf16.gmra.mxu0 %vm467_vm2, %v17523_v9  ;;  %v17524_v63 = vld [vmem:[%s23251_s0 + $0x99c] sm:$0xff]  }
 0x4f4   :  { %v4885_v37 = vmax.f32 %v23543_v28, %v4645_v4  ;;  %v20616_v44 = vmax.f32 %v4883_v48, %v5886_v57  ;;  %16215 = vmatprep.mubr.msk.bf16.mxu1 %vm17772_vm1, %v23331_v15  ;;  %16463 = vmatprep.mubr.msk.bf16.mxu0 %vm17772_vm1, %v23331_v15  ;;  %v17525_v9 = vld [vmem:[%s23251_s0 + $0xb78] sm:$0xff]   ;;  %v23545_v48 = vld [vmem:[#allocation23_spill] sm:$0xff] }
 0x4f5   :  { %v15857_v10 = vpop.f32.mrf.mxu1  ;;  %v16105_v53 = vpop.f32.mrf.mxu0 }
 0x4f6   :  { %23544 = vst [vmem:[#allocation19_spill] sm:$0xff] %v20616_v44  ;;  %v23547_v10 = vld [vmem:[#allocation24_spill] sm:$0xff] }
 0x4f7   :  { %v4648_v38 = vpop.f32.mrf.mxu1  ;;  %v5889_v35 = vpop.f32.mrf.mxu0 }
 0x4f8   :  { %v4886_v14 = vmax.f32 %v23545_v48, %v4648_v38  ;;  %v20629_v47 = vmax.f32 %v4884_v45, %v5889_v35 }
 0x4f9   :  { %v15858_v4 = vpop.f32.mrf.mxu1  ;;  %v16106_v57 = vpop.f32.mrf.mxu0 }
 0x4fa   :  { %23546 = vst [vmem:[#allocation20_spill] sm:$0xff] %v20629_v47 }
 0x4fb   :  { %v4653_v28 = vpop.f32.mrf.mxu1  ;;  %v5894_v44 = vpop.f32.mrf.mxu0  ;;  %16216 = vmatmul.mubr.msk.bf16.gmra.mxu1 %vm467_vm2, %v17524_v63  ;;  %16464 = vmatmul.mubr.msk.bf16.gmra.mxu0 %vm467_vm2, %v17525_v9  ;;  %v17526_v63 = vld [vmem:[%s23251_s0 + $0x9a4] sm:$0xff]  }
 0x4fc   :  { %v4887_v53 = vmax.f32 %v23547_v10, %v4653_v28  ;;  %v20634_v8 = vmax.f32 %v4885_v37, %v5894_v44  ;;  %16219 = vmatprep.mubr.msk.bf16.mxu1 %vm17772_vm1, %v23331_v15  ;;  %16467 = vmatprep.mubr.msk.bf16.mxu0 %vm17772_vm1, %v23331_v15  ;;  %v17527_v9 = vld [vmem:[%s23251_s0 + $0xb80] sm:$0xff]   ;;  %v23549_v44 = vld [vmem:[#allocation25_spill] sm:$0xff] }
 0x4fd   :  { %v15861_v45 = vpop.f32.mrf.mxu1  ;;  %v16109_v38 = vpop.f32.mrf.mxu0 }
 0x4fe   :  { %23548 = vst [vmem:[#allocation21_spill] sm:$0xff] %v20634_v8  ;;  %v23551_v45 = vld [vmem:[#allocation26_spill] sm:$0xff] }
 0x4ff   :  { %v4656_v35 = vpop.f32.mrf.mxu1  ;;  %v5897_v48 = vpop.f32.mrf.mxu0 }
 0x500   :  { %v4888_v37 = vmax.f32 %v23549_v44, %v4656_v35  ;;  %v20647_v4 = vmax.f32 %v4886_v14, %v5897_v48 }
 0x501   :  { %v15862_v57 = vpop.f32.mrf.mxu1  ;;  %v16110_v28 = vpop.f32.mrf.mxu0 }
 0x502   :  { %23550 = vst [vmem:[#allocation22_spill] sm:$0xff] %v20647_v4 }
 0x503   :  { %v4661_v10 = vpop.f32.mrf.mxu1  ;;  %v5902_v8 = vpop.f32.mrf.mxu0  ;;  %16220 = vmatmul.mubr.msk.bf16.gmra.mxu1 %vm467_vm2, %v17526_v63  ;;  %16468 = vmatmul.mubr.msk.bf16.gmra.mxu0 %vm467_vm2, %v17527_v9  ;;  %v17528_v63 = vld [vmem:[%s23251_s0 + $0x9ac] sm:$0xff]  }
 0x504   :  { %v4889_v38 = vmax.f32 %v23551_v45, %v4661_v10  ;;  %v20652_v47 = vmax.f32 %v4887_v53, %v5902_v8  ;;  %16223 = vmatprep.mubr.msk.bf16.mxu1 %vm17772_vm1, %v23331_v15  ;;  %16471 = vmatprep.mubr.msk.bf16.mxu0 %vm17772_vm1, %v23331_v15  ;;  %v17529_v9 = vld [vmem:[%s23251_s0 + $0xb88] sm:$0xff]  }
 0x505   :  { %v15865_v14 = vpop.f32.mrf.mxu1  ;;  %v16113_v35 = vpop.f32.mrf.mxu0  ;;  %v23553_v8 = vld [vmem:[#allocation27_spill] sm:$0xff] }
 0x506   :  { %23552 = vst [vmem:[#allocation23_spill] sm:$0xff] %v20652_v47  ;;  %v23555_v14 = vld [vmem:[#allocation28_spill] sm:$0xff] }
 0x507   :  { %v4664_v48 = vpop.f32.mrf.mxu1  ;;  %v5905_v44 = vpop.f32.mrf.mxu0 }
 0x508   :  { %v4890_v53 = vmax.f32 %v23553_v8, %v4664_v48  ;;  %v20665_v57 = vmax.f32 %v4888_v37, %v5905_v44 }
 0x509   :  { %v15866_v28 = vpop.f32.mrf.mxu1  ;;  %v16114_v10 = vpop.f32.mrf.mxu0 }
 0x50a   :  { %23554 = vst [vmem:[#allocation24_spill] sm:$0xff] %v20665_v57 }
 0x50b   :  { %v4669_v45 = vpop.f32.mrf.mxu1  ;;  %v5910_v47 = vpop.f32.mrf.mxu0  ;;  %16224 = vmatmul.mubr.msk.bf16.gmra.mxu1 %vm467_vm2, %v17528_v63  ;;  %16472 = vmatmul.mubr.msk.bf16.gmra.mxu0 %vm467_vm2, %v17529_v9  ;;  %v17530_v63 = vld [vmem:[%s23251_s0 + $0x9b4] sm:$0xff]  }
 0x50c   :  { %v4891_v35 = vmax.f32 %v23555_v14, %v4669_v45  ;;  %v20670_v4 = vmax.f32 %v4889_v38, %v5910_v47  ;;  %16227 = vmatprep.mubr.msk.bf16.mxu1 %vm17772_vm1, %v23331_v15  ;;  %16475 = vmatprep.mubr.msk.bf16.mxu0 %vm17772_vm1, %v23331_v15  ;;  %v17531_v9 = vld [vmem:[%s23251_s0 + $0xb90] sm:$0xff]   ;;  %v23557_v47 = vld [vmem:[#allocation29_spill] sm:$0xff] }
 0x50d   :  { %v15869_v37 = vpop.f32.mrf.mxu1  ;;  %v16117_v48 = vpop.f32.mrf.mxu0 }
 0x50e   :  { %23556 = vst [vmem:[#allocation25_spill] sm:$0xff] %v20670_v4  ;;  %v23559_v37 = vld [vmem:[#allocation30_spill] sm:$0xff] }
 0x50f   :  { %v4672_v44 = vpop.f32.mrf.mxu1  ;;  %v5913_v8 = vpop.f32.mrf.mxu0 }
 0x510   :  { %v4892_v38 = vmax.f32 %v23557_v47, %v4672_v44  ;;  %v20683_v28 = vmax.f32 %v4890_v53, %v5913_v8 }
 0x511   :  { %v15870_v10 = vpop.f32.mrf.mxu1  ;;  %v16118_v45 = vpop.f32.mrf.mxu0 }
 0x512   :  { %23558 = vst [vmem:[#allocation26_spill] sm:$0xff] %v20683_v28 }
 0x513   :  { %v4677_v14 = vpop.f32.mrf.mxu1  ;;  %v5918_v4 = vpop.f32.mrf.mxu0  ;;  %16228 = vmatmul.mubr.msk.bf16.gmra.mxu1 %vm467_vm2, %v17530_v63  ;;  %16476 = vmatmul.mubr.msk.bf16.gmra.mxu0 %vm467_vm2, %v17531_v9  ;;  %v17532_v63 = vld [vmem:[%s23251_s0 + $0x9bc] sm:$0xff]  }
 0x514   :  { %v4893_v48 = vmax.f32 %v23559_v37, %v4677_v14  ;;  %v20688_v57 = vmax.f32 %v4891_v35, %v5918_v4  ;;  %16231 = vmatprep.mubr.msk.bf16.mxu1 %vm17772_vm1, %v23331_v15  ;;  %16479 = vmatprep.mubr.msk.bf16.mxu0 %vm17772_vm1, %v23331_v15  ;;  %v17533_v9 = vld [vmem:[%s23251_s0 + $0xb98] sm:$0xff]   ;;  %v23561_v4 = vld [vmem:[#allocation31_spill] sm:$0xff] }
 0x515   :  { %v15873_v53 = vpop.f32.mrf.mxu1  ;;  %v16121_v44 = vpop.f32.mrf.mxu0 }
 0x516   :  { %23560 = vst [vmem:[#allocation27_spill] sm:$0xff] %v20688_v57  ;;  %v23563_v53 = vld [vmem:[#allocation32_spill] sm:$0xff] }
 0x517   :  { %v4680_v8 = vpop.f32.mrf.mxu1  ;;  %v5921_v47 = vpop.f32.mrf.mxu0 }
 0x518   :  { %v4894_v35 = vmax.f32 %v23561_v4, %v4680_v8  ;;  %v20701_v10 = vmax.f32 %v4892_v38, %v5921_v47 }
 0x519   :  { %v15874_v45 = vpop.f32.mrf.mxu1  ;;  %v16122_v14 = vpop.f32.mrf.mxu0 }
 0x51a   :  { %23562 = vst [vmem:[#allocation28_spill] sm:$0xff] %v20701_v10 }
 0x51b   :  { %v4685_v37 = vpop.f32.mrf.mxu1  ;;  %v5926_v57 = vpop.f32.mrf.mxu0  ;;  %16232 = vmatmul.mubr.msk.bf16.gmra.mxu1 %vm467_vm2, %v17532_v63  ;;  %16480 = vmatmul.mubr.msk.bf16.gmra.mxu0 %vm467_vm2, %v17533_v9  ;;  %v17534_v63 = vld [vmem:[%s23251_s0 + $0x9c4] sm:$0xff]  }
 0x51c   :  { %v4895_v44 = vmax.f32 %v23563_v53, %v4685_v37  ;;  %v20706_v28 = vmax.f32 %v4893_v48, %v5926_v57  ;;  %16235 = vmatprep.mubr.msk.bf16.mxu1 %vm17772_vm1, %v23331_v15  ;;  %16483 = vmatprep.mubr.msk.bf16.mxu0 %vm17772_vm1, %v23331_v15  ;;  %v17535_v9 = vld [vmem:[%s23251_s0 + $0xba0] sm:$0xff]   ;;  %v23565_v57 = vld [vmem:[#allocation33_spill] sm:$0xff] }
 0x51d   :  { %v15877_v38 = vpop.f32.mrf.mxu1  ;;  %v16125_v8 = vpop.f32.mrf.mxu0 }
 0x51e   :  { %23564 = vst [vmem:[#allocation29_spill] sm:$0xff] %v20706_v28  ;;  %v23567_v38 = vld [vmem:[#allocation34_spill] sm:$0xff] }
 0x51f   :  { %v4688_v47 = vpop.f32.mrf.mxu1  ;;  %v5929_v4 = vpop.f32.mrf.mxu0 }
 0x520   :  { %v4896_v48 = vmax.f32 %v23565_v57, %v4688_v47  ;;  %v20719_v45 = vmax.f32 %v4894_v35, %v5929_v4 }
 0x521   :  { %v15878_v14 = vpop.f32.mrf.mxu1  ;;  %v16126_v37 = vpop.f32.mrf.mxu0 }
 0x522   :  { %23566 = vst [vmem:[#allocation30_spill] sm:$0xff] %v20719_v45 }
 0x523   :  { %v4693_v53 = vpop.f32.mrf.mxu1  ;;  %v5934_v28 = vpop.f32.mrf.mxu0  ;;  %16236 = vmatmul.mubr.msk.bf16.gmra.mxu1 %vm467_vm2, %v17534_v63  ;;  %16484 = vmatmul.mubr.msk.bf16.gmra.mxu0 %vm467_vm2, %v17535_v9  ;;  %v17536_v63 = vld [vmem:[%s23251_s0 + $0x9cc] sm:$0xff]  }
 0x524   :  { %v4897_v8 = vmax.f32 %v23567_v38, %v4693_v53  ;;  %v20724_v10 = vmax.f32 %v4895_v44, %v5934_v28  ;;  %16239 = vmatprep.mubr.msk.bf16.mxu1 %vm17772_vm1, %v23331_v15  ;;  %16487 = vmatprep.mubr.msk.bf16.mxu0 %vm17772_vm1, %v23331_v15  ;;  %v17537_v9 = vld [vmem:[%s23251_s0 + $0xba8] sm:$0xff]  }
 0x525   :  { %v15881_v35 = vpop.f32.mrf.mxu1  ;;  %v16129_v47 = vpop.f32.mrf.mxu0  ;;  %v23569_v28 = vld [vmem:[#allocation35_spill] sm:$0xff] }
 0x526   :  { %23568 = vst [vmem:[#allocation31_spill] sm:$0xff] %v20724_v10  ;;  %v23571_v35 = vld [vmem:[#allocation36_spill] sm:$0xff] }
 0x527   :  { %v4696_v4 = vpop.f32.mrf.mxu1  ;;  %v5937_v57 = vpop.f32.mrf.mxu0 }
 0x528   :  { %v4898_v44 = vmax.f32 %v23569_v28, %v4696_v4  ;;  %v20737_v14 = vmax.f32 %v4896_v48, %v5937_v57 }
 0x529   :  { %v15882_v37 = vpop.f32.mrf.mxu1  ;;  %v16130_v53 = vpop.f32.mrf.mxu0 }
 0x52a   :  { %23570 = vst [vmem:[#allocation32_spill] sm:$0xff] %v20737_v14 }
 0x52b   :  { %v4701_v38 = vpop.f32.mrf.mxu1  ;;  %v5942_v10 = vpop.f32.mrf.mxu0  ;;  %16240 = vmatmul.mubr.msk.bf16.gmra.mxu1 %vm467_vm2, %v17536_v63  ;;  %16488 = vmatmul.mubr.msk.bf16.gmra.mxu0 %vm467_vm2, %v17537_v9  ;;  %v17538_v63 = vld [vmem:[%s23251_s0 + $0x9d4] sm:$0xff]  }
 0x52c   :  { %v4899_v47 = vmax.f32 %v23571_v35, %v4701_v38  ;;  %v20742_v45 = vmax.f32 %v4897_v8, %v5942_v10  ;;  %16243 = vmatprep.mubr.msk.bf16.mxu1 %vm17772_vm1, %v23331_v15  ;;  %16491 = vmatprep.mubr.msk.bf16.mxu0 %vm17772_vm1, %v23331_v15  ;;  %v17539_v9 = vld [vmem:[%s23251_s0 + $0xbb0] sm:$0xff]   ;;  %v23573_v10 = vld [vmem:[#allocation37_spill] sm:$0xff] }
 0x52d   :  { %v15885_v48 = vpop.f32.mrf.mxu1  ;;  %v16133_v4 = vpop.f32.mrf.mxu0 }
 0x52e   :  { %23572 = vst [vmem:[#allocation33_spill] sm:$0xff] %v20742_v45  ;;  %v23575_v48 = vld [vmem:[#allocation38_spill] sm:$0xff] }
 0x52f   :  { %v4704_v57 = vpop.f32.mrf.mxu1  ;;  %v5945_v28 = vpop.f32.mrf.mxu0 }
 0x530   :  { %v4900_v8 = vmax.f32 %v23573_v10, %v4704_v57  ;;  %v20755_v37 = vmax.f32 %v4898_v44, %v5945_v28 }
 0x531   :  { %v15886_v53 = vpop.f32.mrf.mxu1  ;;  %v16134_v38 = vpop.f32.mrf.mxu0 }
 0x532   :  { %23574 = vst [vmem:[#allocation34_spill] sm:$0xff] %v20755_v37 }
 0x533   :  { %v4709_v35 = vpop.f32.mrf.mxu1  ;;  %v5950_v45 = vpop.f32.mrf.mxu0  ;;  %16244 = vmatmul.mubr.msk.bf16.gmra.mxu1 %vm467_vm2, %v17538_v63  ;;  %16492 = vmatmul.mubr.msk.bf16.gmra.mxu0 %vm467_vm2, %v17539_v9  ;;  %v17540_v63 = vld [vmem:[%s23251_s0 + $0x9dc] sm:$0xff]  }
 0x534   :  { %v4901_v4 = vmax.f32 %v23575_v48, %v4709_v35  ;;  %v20760_v14 = vmax.f32 %v4899_v47, %v5950_v45  ;;  %16247 = vmatprep.mubr.msk.bf16.mxu1 %vm17772_vm1, %v23331_v15  ;;  %16495 = vmatprep.mubr.msk.bf16.mxu0 %vm17772_vm1, %v23331_v15  ;;  %v17541_v9 = vld [vmem:[%s23251_s0 + $0xbb8] sm:$0xff]   ;;  %v23577_v45 = vld [vmem:[#allocation39_spill] sm:$0xff] }
 0x535   :  { %v15889_v44 = vpop.f32.mrf.mxu1  ;;  %v16137_v57 = vpop.f32.mrf.mxu0 }
 0x536   :  { %23576 = vst [vmem:[#allocation35_spill] sm:$0xff] %v20760_v14  ;;  %v23579_v44 = vld [vmem:[#allocation40_spill] sm:$0xff] }
 0x537   :  { %v4712_v28 = vpop.f32.mrf.mxu1  ;;  %v5953_v10 = vpop.f32.mrf.mxu0 }
 0x538   :  { %v4902_v47 = vmax.f32 %v23577_v45, %v4712_v28  ;;  %v20773_v53 = vmax.f32 %v4900_v8, %v5953_v10 }
 0x539   :  { %v15890_v38 = vpop.f32.mrf.mxu1  ;;  %v16138_v35 = vpop.f32.mrf.mxu0 }
 0x53a   :  { %23578 = vst [vmem:[#allocation36_spill] sm:$0xff] %v20773_v53 }
 0x53b   :  { %v4717_v48 = vpop.f32.mrf.mxu1  ;;  %v5958_v14 = vpop.f32.mrf.mxu0  ;;  %16248 = vmatmul.mubr.msk.bf16.gmra.mxu1 %vm467_vm2, %v17540_v63  ;;  %16496 = vmatmul.mubr.msk.bf16.gmra.mxu0 %vm467_vm2, %v17541_v9  ;;  %v17542_v63 = vld [vmem:[%s23251_s0 + $0x9e4] sm:$0xff]  }
 0x53c   :  { %v4903_v57 = vmax.f32 %v23579_v44, %v4717_v48  ;;  %v20778_v37 = vmax.f32 %v4901_v4, %v5958_v14  ;;  %16251 = vmatprep.mubr.msk.bf16.mxu1 %vm17772_vm1, %v23331_v15  ;;  %16499 = vmatprep.mubr.msk.bf16.mxu0 %vm17772_vm1, %v23331_v15  ;;  %v17543_v9 = vld [vmem:[%s23251_s0 + $0xbc0] sm:$0xff]   ;;  %v23581_v14 = vld [vmem:[#allocation41_spill] sm:$0xff] }
 0x53d   :  { %v15893_v8 = vpop.f32.mrf.mxu1  ;;  %v16141_v28 = vpop.f32.mrf.mxu0 }
 0x53e   :  { %23580 = vst [vmem:[#allocation37_spill] sm:$0xff] %v20778_v37  ;;  %v23583_v8 = vld [vmem:[#allocation42_spill] sm:$0xff] }
 0x53f   :  { %v4720_v10 = vpop.f32.mrf.mxu1  ;;  %v5961_v45 = vpop.f32.mrf.mxu0 }
 0x540   :  { %v4904_v4 = vmax.f32 %v23581_v14, %v4720_v10  ;;  %v20791_v38 = vmax.f32 %v4902_v47, %v5961_v45 }
 0x541   :  { %v15894_v35 = vpop.f32.mrf.mxu1  ;;  %v16142_v48 = vpop.f32.mrf.mxu0 }
 0x542   :  { %23582 = vst [vmem:[#allocation38_spill] sm:$0xff] %v20791_v38 }
 0x543   :  { %v4725_v44 = vpop.f32.mrf.mxu1  ;;  %v5966_v37 = vpop.f32.mrf.mxu0  ;;  %16252 = vmatmul.mubr.msk.bf16.gmra.mxu1 %vm467_vm2, %v17542_v63  ;;  %16500 = vmatmul.mubr.msk.bf16.gmra.mxu0 %vm467_vm2, %v17543_v9  ;;  %v17544_v63 = vld [vmem:[%s23251_s0 + $0x9ec] sm:$0xff]  }
 0x544   :  { %v4905_v28 = vmax.f32 %v23583_v8, %v4725_v44  ;;  %v20796_v53 = vmax.f32 %v4903_v57, %v5966_v37  ;;  %16255 = vmatprep.mubr.msk.bf16.mxu1 %vm17772_vm1, %v23331_v15  ;;  %16503 = vmatprep.mubr.msk.bf16.mxu0 %vm17772_vm1, %v23331_v15  ;;  %v17545_v9 = vld [vmem:[%s23251_s0 + $0xbc8] sm:$0xff]  }
 0x545   :  { %v15897_v47 = vpop.f32.mrf.mxu1  ;;  %v16145_v10 = vpop.f32.mrf.mxu0  ;;  %v23585_v37 = vld [vmem:[#allocation43_spill] sm:$0xff] }
 0x546   :  { %23584 = vst [vmem:[#allocation39_spill] sm:$0xff] %v20796_v53  ;;  %v23587_v47 = vld [vmem:[#allocation44_spill] sm:$0xff] }
 0x547   :  { %v4728_v45 = vpop.f32.mrf.mxu1  ;;  %v5969_v14 = vpop.f32.mrf.mxu0 }
 0x548   :  { %v4906_v57 = vmax.f32 %v23585_v37, %v4728_v45  ;;  %v20809_v35 = vmax.f32 %v4904_v4, %v5969_v14 }
 0x549   :  { %v15898_v48 = vpop.f32.mrf.mxu1  ;;  %v16146_v44 = vpop.f32.mrf.mxu0 }
 0x54a   :  { %23586 = vst [vmem:[#allocation40_spill] sm:$0xff] %v20809_v35 }
 0x54b   :  { %v4733_v8 = vpop.f32.mrf.mxu1  ;;  %v5974_v53 = vpop.f32.mrf.mxu0  ;;  %16256 = vmatmul.mubr.msk.bf16.gmra.mxu1 %vm467_vm2, %v17544_v63  ;;  %16504 = vmatmul.mubr.msk.bf16.gmra.mxu0 %vm467_vm2, %v17545_v9  ;;  %v17546_v63 = vld [vmem:[%s23251_s0 + $0x9f4] sm:$0xff]  }
 0x54c   :  { %v4907_v10 = vmax.f32 %v23587_v47, %v4733_v8  ;;  %v20814_v38 = vmax.f32 %v4905_v28, %v5974_v53  ;;  %16259 = vmatprep.mubr.msk.bf16.mxu1 %vm17772_vm1, %v23331_v15  ;;  %16507 = vmatprep.mubr.msk.bf16.mxu0 %vm17772_vm1, %v23331_v15  ;;  %v17547_v9 = vld [vmem:[%s23251_s0 + $0xbd0] sm:$0xff]   ;;  %v23589_v53 = vld [vmem:[#allocation45_spill] sm:$0xff] }
 0x54d   :  { %v15901_v4 = vpop.f32.mrf.mxu1  ;;  %v16149_v45 = vpop.f32.mrf.mxu0 }
 0x54e   :  { %23588 = vst [vmem:[#allocation41_spill] sm:$0xff] %v20814_v38  ;;  %v23591_v4 = vld [vmem:[#allocation46_spill] sm:$0xff] }
 0x54f   :  { %v4736_v14 = vpop.f32.mrf.mxu1  ;;  %v5977_v37 = vpop.f32.mrf.mxu0 }
 0x550   :  { %v4908_v28 = vmax.f32 %v23589_v53, %v4736_v14  ;;  %v20827_v48 = vmax.f32 %v4906_v57, %v5977_v37 }
 0x551   :  { %v15902_v44 = vpop.f32.mrf.mxu1  ;;  %v16150_v8 = vpop.f32.mrf.mxu0 }
 0x552   :  { %23590 = vst [vmem:[#allocation42_spill] sm:$0xff] %v20827_v48 }
 0x553   :  { %v4741_v47 = vpop.f32.mrf.mxu1  ;;  %v5982_v38 = vpop.f32.mrf.mxu0  ;;  %16260 = vmatmul.mubr.msk.bf16.gmra.mxu1 %vm467_vm2, %v17546_v63  ;;  %16508 = vmatmul.mubr.msk.bf16.gmra.mxu0 %vm467_vm2, %v17547_v9  ;;  %v17548_v63 = vld [vmem:[%s23251_s0 + $0x9fc] sm:$0xff]  }
 0x554   :  { %v4909_v45 = vmax.f32 %v23591_v4, %v4741_v47  ;;  %v20832_v35 = vmax.f32 %v4907_v10, %v5982_v38  ;;  %16263 = vmatprep.mubr.msk.bf16.mxu1 %vm17772_vm1, %v23331_v15  ;;  %16511 = vmatprep.mubr.msk.bf16.mxu0 %vm17772_vm1, %v23331_v15  ;;  %v17549_v9 = vld [vmem:[%s23251_s0 + $0xbd8] sm:$0xff]   ;;  %v23593_v38 = vld [vmem:[#allocation47_spill] sm:$0xff] }
 0x555   :  { %v15905_v57 = vpop.f32.mrf.mxu1  ;;  %v16153_v14 = vpop.f32.mrf.mxu0 }
 0x556   :  { %23592 = vst [vmem:[#allocation43_spill] sm:$0xff] %v20832_v35  ;;  %v23595_v57 = vld [vmem:[#allocation48_spill] sm:$0xff] }
 0x557   :  { %v4744_v37 = vpop.f32.mrf.mxu1  ;;  %v5985_v53 = vpop.f32.mrf.mxu0 }
 0x558   :  { %v4910_v10 = vmax.f32 %v23593_v38, %v4744_v37  ;;  %v20845_v44 = vmax.f32 %v4908_v28, %v5985_v53 }
 0x559   :  { %v15906_v8 = vpop.f32.mrf.mxu1  ;;  %v16154_v47 = vpop.f32.mrf.mxu0 }
 0x55a   :  { %23594 = vst [vmem:[#allocation44_spill] sm:$0xff] %v20845_v44 }
 0x55b   :  { %v4749_v4 = vpop.f32.mrf.mxu1  ;;  %v5990_v35 = vpop.f32.mrf.mxu0  ;;  %16264 = vmatmul.mubr.msk.bf16.gmra.mxu1 %vm467_vm2, %v17548_v63  ;;  %16512 = vmatmul.mubr.msk.bf16.gmra.mxu0 %vm467_vm2, %v17549_v9  ;;  %v17550_v63 = vld [vmem:[%s23251_s0 + $0xa04] sm:$0xff]  }
 0x55c   :  { %v4911_v14 = vmax.f32 %v23595_v57, %v4749_v4  ;;  %v20850_v48 = vmax.f32 %v4909_v45, %v5990_v35  ;;  %16267 = vmatprep.mubr.msk.bf16.mxu1 %vm17772_vm1, %v23331_v15  ;;  %16515 = vmatprep.mubr.msk.bf16.mxu0 %vm17772_vm1, %v23331_v15  ;;  %v17551_v9 = vld [vmem:[%s23251_s0 + $0xbe0] sm:$0xff]   ;;  %v23597_v35 = vld [vmem:[#allocation49_spill] sm:$0xff] }
 0x55d   :  { %v15909_v28 = vpop.f32.mrf.mxu1  ;;  %v16157_v37 = vpop.f32.mrf.mxu0 }
 0x55e   :  { %23596 = vst [vmem:[#allocation45_spill] sm:$0xff] %v20850_v48  ;;  %v23599_v28 = vld [vmem:[#allocation50_spill] sm:$0xff] }
 0x55f   :  { %v4752_v53 = vpop.f32.mrf.mxu1  ;;  %v5993_v38 = vpop.f32.mrf.mxu0 }
 0x560   :  { %v4912_v45 = vmax.f32 %v23597_v35, %v4752_v53  ;;  %v20863_v8 = vmax.f32 %v4910_v10, %v5993_v38 }
 0x561   :  { %v15910_v47 = vpop.f32.mrf.mxu1  ;;  %v16158_v4 = vpop.f32.mrf.mxu0 }
 0x562   :  { %23598 = vst [vmem:[#allocation46_spill] sm:$0xff] %v20863_v8 }
 0x563   :  { %v4757_v57 = vpop.f32.mrf.mxu1  ;;  %v5998_v48 = vpop.f32.mrf.mxu0  ;;  %16268 = vmatmul.mubr.msk.bf16.gmra.mxu1 %vm467_vm2, %v17550_v63  ;;  %16516 = vmatmul.mubr.msk.bf16.gmra.mxu0 %vm467_vm2, %v17551_v9  ;;  %v17552_v63 = vld [vmem:[%s23251_s0 + $0xa0c] sm:$0xff]  }
 0x564   :  { %v4913_v37 = vmax.f32 %v23599_v28, %v4757_v57  ;;  %v20868_v44 = vmax.f32 %v4911_v14, %v5998_v48  ;;  %16271 = vmatprep.mubr.msk.bf16.mxu1 %vm17772_vm1, %v23331_v15  ;;  %16519 = vmatprep.mubr.msk.bf16.mxu0 %vm17772_vm1, %v23331_v15  ;;  %v17553_v9 = vld [vmem:[%s23251_s0 + $0xbe8] sm:$0xff]  }
 0x565   :  { %v15913_v10 = vpop.f32.mrf.mxu1  ;;  %v16161_v53 = vpop.f32.mrf.mxu0  ;;  %v23601_v48 = vld [vmem:[#allocation51_spill] sm:$0xff] }
 0x566   :  { %23600 = vst [vmem:[#allocation47_spill] sm:$0xff] %v20868_v44  ;;  %v23603_v10 = vld [vmem:[#allocation52_spill] sm:$0xff] }
 0x567   :  { %v4760_v38 = vpop.f32.mrf.mxu1  ;;  %v6001_v35 = vpop.f32.mrf.mxu0 }
 0x568   :  { %v4914_v14 = vmax.f32 %v23601_v48, %v4760_v38  ;;  %v20881_v47 = vmax.f32 %v4912_v45, %v6001_v35 }
 0x569   :  { %v15914_v4 = vpop.f32.mrf.mxu1  ;;  %v16162_v57 = vpop.f32.mrf.mxu0 }
 0x56a   :  { %23602 = vst [vmem:[#allocation48_spill] sm:$0xff] %v20881_v47 }
 0x56b   :  { %v4765_v28 = vpop.f32.mrf.mxu1  ;;  %v6006_v44 = vpop.f32.mrf.mxu0  ;;  %16272 = vmatmul.mubr.msk.bf16.gmra.mxu1 %vm467_vm2, %v17552_v63  ;;  %16520 = vmatmul.mubr.msk.bf16.gmra.mxu0 %vm467_vm2, %v17553_v9  ;;  %v17554_v63 = vld [vmem:[%s23251_s0 + $0xa14] sm:$0xff]  }
 0x56c   :  { %v4915_v53 = vmax.f32 %v23603_v10, %v4765_v28  ;;  %v20886_v8 = vmax.f32 %v4913_v37, %v6006_v44  ;;  %16275 = vmatprep.mubr.msk.bf16.mxu1 %vm17772_vm1, %v23331_v15  ;;  %16523 = vmatprep.mubr.msk.bf16.mxu0 %vm17772_vm1, %v23331_v15  ;;  %v17555_v9 = vld [vmem:[%s23251_s0 + $0xbf0] sm:$0xff]   ;;  %v23605_v44 = vld [vmem:[#allocation53_spill] sm:$0xff] }
 0x56d   :  { %v15917_v45 = vpop.f32.mrf.mxu1  ;;  %v16165_v38 = vpop.f32.mrf.mxu0 }
 0x56e   :  { %23604 = vst [vmem:[#allocation49_spill] sm:$0xff] %v20886_v8  ;;  %v23607_v45 = vld [vmem:[#allocation55_spill] sm:$0xff] }
 0x56f   :  { %v4768_v35 = vpop.f32.mrf.mxu1  ;;  %v6009_v48 = vpop.f32.mrf.mxu0 }
 0x570   :  { %v4916_v37 = vmax.f32 %v23605_v44, %v4768_v35  ;;  %v20899_v4 = vmax.f32 %v4914_v14, %v6009_v48 }
 0x571   :  { %v15918_v57 = vpop.f32.mrf.mxu1  ;;  %v16166_v28 = vpop.f32.mrf.mxu0 }
 0x572   :  { %23606 = vst [vmem:[#allocation50_spill] sm:$0xff] %v20899_v4 }
 0x573   :  { %v4773_v10 = vpop.f32.mrf.mxu1  ;;  %v6014_v8 = vpop.f32.mrf.mxu0  ;;  %16276 = vmatmul.mubr.msk.bf16.gmra.mxu1 %vm467_vm2, %v17554_v63  ;;  %16524 = vmatmul.mubr.msk.bf16.gmra.mxu0 %vm467_vm2, %v17555_v9  ;;  %v17556_v63 = vld [vmem:[%s23251_s0 + $0xa1c] sm:$0xff]  }
 0x574   :  { %v4917_v38 = vmax.f32 %v23607_v45, %v4773_v10  ;;  %v20904_v47 = vmax.f32 %v4915_v53, %v6014_v8  ;;  %16279 = vmatprep.mubr.msk.bf16.mxu1 %vm17772_vm1, %v23331_v15  ;;  %16527 = vmatprep.mubr.msk.bf16.mxu0 %vm17772_vm1, %v23331_v15  ;;  %v17557_v9 = vld [vmem:[%s23251_s0 + $0xbf8] sm:$0xff]  }
 0x575   :  { %v15921_v14 = vpop.f32.mrf.mxu1  ;;  %v16169_v35 = vpop.f32.mrf.mxu0  ;;  %v23609_v8 = vld [vmem:[#allocation57_spill] sm:$0xff] }
 0x576   :  { %23608 = vst [vmem:[#allocation51_spill] sm:$0xff] %v20904_v47  ;;  %v23611_v14 = vld [vmem:[#allocation59_spill] sm:$0xff] }
 0x577   :  { %v4776_v48 = vpop.f32.mrf.mxu1  ;;  %v6017_v44 = vpop.f32.mrf.mxu0 }
 0x578   :  { %v4918_v53 = vmax.f32 %v23609_v8, %v4776_v48  ;;  %v20917_v57 = vmax.f32 %v4916_v37, %v6017_v44 }
 0x579   :  { %v15922_v28 = vpop.f32.mrf.mxu1  ;;  %v16170_v10 = vpop.f32.mrf.mxu0 }
 0x57a   :  { %23610 = vst [vmem:[#allocation52_spill] sm:$0xff] %v20917_v57 }
 0x57b   :  { %v4781_v45 = vpop.f32.mrf.mxu1  ;;  %v6022_v47 = vpop.f32.mrf.mxu0  ;;  %16280 = vmatmul.mubr.msk.bf16.gmra.mxu1 %vm467_vm2, %v17556_v63  ;;  %16528 = vmatmul.mubr.msk.bf16.gmra.mxu0 %vm467_vm2, %v17557_v9  ;;  %v17558_v63 = vld [vmem:[%s23251_s0 + $0xa24] sm:$0xff]  }
 0x57c   :  { %v4919_v35 = vmax.f32 %v23611_v14, %v4781_v45  ;;  %v20922_v4 = vmax.f32 %v4917_v38, %v6022_v47  ;;  %16283 = vmatprep.mubr.msk.bf16.mxu1 %vm17772_vm1, %v23331_v15  ;;  %16531 = vmatprep.mubr.msk.bf16.mxu0 %vm17772_vm1, %v23331_v15  ;;  %v17559_v9 = vld [vmem:[%s23251_s0 + $0xc00] sm:$0xff]   ;;  %v23613_v47 = vld [vmem:[#allocation61_spill] sm:$0xff] }
 0x57d   :  { %v15925_v37 = vpop.f32.mrf.mxu1  ;;  %v16173_v48 = vpop.f32.mrf.mxu0 }
 0x57e   :  { %23612 = vst [vmem:[#allocation53_spill] sm:$0xff] %v20922_v4  ;;  %v23614_v37 = vld [vmem:[#allocation63_spill] sm:$0xff] }
 0x57f   :  { %v4784_v44 = vpop.f32.mrf.mxu1  ;;  %v6025_v8 = vpop.f32.mrf.mxu0 }
 0x580   :  { %v4920_v38 = vmax.f32 %v23613_v47, %v4784_v44  ;;  %v20935_v28 = vmax.f32 %v4918_v53, %v6025_v8 }
 0x581   :  { %v15926_v10 = vpop.f32.mrf.mxu1  ;;  %v16174_v45 = vpop.f32.mrf.mxu0 }
 0x583   :  { %v4789_v14 = vpop.f32.mrf.mxu1  ;;  %v6030_v4 = vpop.f32.mrf.mxu0  ;;  %16284 = vmatmul.mubr.msk.bf16.gmra.mxu1 %vm467_vm2, %v17558_v63  ;;  %16532 = vmatmul.mubr.msk.bf16.gmra.mxu0 %vm467_vm2, %v17559_v9  ;;  %v17560_v63 = vld [vmem:[%s23251_s0 + $0xa2c] sm:$0xff]  }
 0x584   :  { %v4921_v48 = vmax.f32 %v23614_v37, %v4789_v14  ;;  %v20940_v57 = vmax.f32 %v4919_v35, %v6030_v4  ;;  %16287 = vmatprep.mubr.msk.bf16.mxu1 %vm17772_vm1, %v23331_v15  ;;  %16535 = vmatprep.mubr.msk.bf16.mxu0 %vm17772_vm1, %v23331_v15  ;;  %v17561_v9 = vld [vmem:[%s23251_s0 + $0xc08] sm:$0xff]  }
 0x585   :  { %v15929_v53 = vpop.f32.mrf.mxu1  ;;  %v16177_v44 = vpop.f32.mrf.mxu0 }
 0x587   :  { %v4792_v8 = vpop.f32.mrf.mxu1  ;;  %v6033_v47 = vpop.f32.mrf.mxu0 }
 0x588   :  { %v4922_v4 = vmax.f32 %v19857_v34, %v4792_v8  ;;  %v20953_v35 = vmax.f32 %v4920_v38, %v6033_v47 }
 0x589   :  { %v15930_v10 = vpop.f32.mrf.mxu1  ;;  %v16178_v45 = vpop.f32.mrf.mxu0 }
 0x58b   :  { %v4797_v14 = vpop.f32.mrf.mxu1  ;;  %v6038_v37 = vpop.f32.mrf.mxu0  ;;  %16288 = vmatmul.mubr.msk.bf16.gmra.mxu1 %vm467_vm2, %v17560_v63  ;;  %16536 = vmatmul.mubr.msk.bf16.gmra.mxu0 %vm467_vm2, %v17561_v9  ;;  %v17562_v63 = vld [vmem:[%s23251_s0 + $0xa34] sm:$0xff]  }
 0x58c   :  { %v4923_v53 = vmax.f32 %v19862_v5, %v4797_v14  ;;  %v20958_v44 = vmax.f32 %v4921_v48, %v6038_v37  ;;  %16291 = vmatprep.mubr.msk.bf16.mxu1 %vm17772_vm1, %v23331_v15  ;;  %16539 = vmatprep.mubr.msk.bf16.mxu0 %vm17772_vm1, %v23331_v15  ;;  %v17563_v5 = vld [vmem:[%s23251_s0 + $0xc10] sm:$0xff]  }
 0x58d   :  { %v15933_v34 = vpop.f32.mrf.mxu1  ;;  %v16181_v38 = vpop.f32.mrf.mxu0 }
 0x58f   :  { %v4800_v8 = vpop.f32.mrf.mxu1  ;;  %v6041_v47 = vpop.f32.mrf.mxu0 }
 0x590   :  { %v20970_v48 = vmax.f32 %v4922_v4, %v6041_v47 }
 0x591   :  { %v15934_v9 = vpop.f32.mrf.mxu1  ;;  %v16182_v10 = vpop.f32.mrf.mxu0 }
 0x593   :  { %v6046_v45 = vpop.f32.mrf.mxu0  ;;  %v6815_v14 = vpop.f32.mrf.mxu1  ;;  %16292 = vmatmul.mubr.msk.bf16.gmra.mxu1 %vm467_vm2, %v17562_v63  ;;  %16540 = vmatmul.mubr.msk.bf16.gmra.mxu0 %vm467_vm2, %v17563_v5  ;;  %v17564_v63 = vld [vmem:[%s23251_s0 + $0xa3c] sm:$0xff]  }
 0x594   :  { %v20974_v37 = vmax.f32 %v4923_v53, %v6046_v45  ;;  %v7301_v34 = vmax.f32 %v19879_v50, %v6815_v14  ;;  %16295 = vmatprep.mubr.msk.bf16.mxu1 %vm17772_vm1, %v23331_v15  ;;  %16543 = vmatprep.mubr.msk.bf16.mxu0 %vm17772_vm1, %v23331_v15  ;;  %v17565_v53 = vld [vmem:[%s23251_s0 + $0xc18] sm:$0xff]  }
 0x595   :  { %v16185_v4 = vpop.f32.mrf.mxu0  ;;  %v16197_v38 = vpop.f32.mrf.mxu1 }
 0x597   :  { %v6049_v8 = vpop.f32.mrf.mxu0  ;;  %v6818_v47 = vpop.f32.mrf.mxu1 }
 0x598   :  { %v7302_v50 = vmax.f32 %v19892_v43, %v6818_v47 }
 0x599   :  { %v16186_v5 = vpop.f32.mrf.mxu0  ;;  %v16198_v9 = vpop.f32.mrf.mxu1 }
 0x59b   :  { %v6823_v10 = vpop.f32.mrf.mxu1  ;;  %16296 = vmatmul.mubr.msk.bf16.gmra.mxu1 %vm467_vm2, %v17564_v63  ;;  %v8064_v45 = vpop.f32.mrf.mxu0  ;;  %16544 = vmatmul.mubr.msk.bf16.gmra.mxu0 %vm467_vm2, %v17565_v53  ;;  %v17566_v63 = vld [vmem:[%s23251_s0 + $0xa44] sm:$0xff]  }
 0x59c   :  { %v7303_v14 = vmax.f32 %v19897_v40, %v6823_v10  ;;  %v20991_v4 = vmax.f32 %v7301_v34, %v8064_v45  ;;  %16299 = vmatprep.mubr.msk.bf16.mxu1 %vm17772_vm1, %v23331_v15  ;;  %16547 = vmatprep.mubr.msk.bf16.mxu0 %vm17772_vm1, %v23331_v15  ;;  %v17567_v40 = vld [vmem:[%s23251_s0 + $0xc20] sm:$0xff]  }
 0x59d   :  { %v16201_v38 = vpop.f32.mrf.mxu1  ;;  %v16449_v43 = vpop.f32.mrf.mxu0 }
 0x59f   :  { %v6826_v8 = vpop.f32.mrf.mxu1  ;;  %v8067_v47 = vpop.f32.mrf.mxu0 }
 0x5a0   :  { %v7304_v34 = vmax.f32 %v19910_v27, %v6826_v8  ;;  %v21004_v53 = vmax.f32 %v7302_v50, %v8067_v47 }
 0x5a1   :  { %v16202_v5 = vpop.f32.mrf.mxu1  ;;  %v16450_v9 = vpop.f32.mrf.mxu0 }
 0x5a3   :  { %v6831_v10 = vpop.f32.mrf.mxu1  ;;  %16300 = vmatmul.mubr.msk.bf16.gmra.mxu1 %vm467_vm2, %v17566_v63  ;;  %v8072_v45 = vpop.f32.mrf.mxu0  ;;  %16548 = vmatmul.mubr.msk.bf16.gmra.mxu0 %vm467_vm2, %v17567_v40  ;;  %v17568_v63 = vld [vmem:[%s23251_s0 + $0xa4c] sm:$0xff]  }
 0x5a4   :  { %v7305_v38 = vmax.f32 %v19915_v60, %v6831_v10  ;;  %v21009_v43 = vmax.f32 %v7303_v14, %v8072_v45  ;;  %16303 = vmatprep.mubr.msk.bf16.mxu1 %vm17772_vm1, %v23331_v15  ;;  %16551 = vmatprep.mubr.msk.bf16.mxu0 %vm17772_vm1, %v23331_v15  ;;  %v17569_v60 = vld [vmem:[%s23251_s0 + $0xc28] sm:$0xff]  }
 0x5a5   :  { %v16205_v27 = vpop.f32.mrf.mxu1  ;;  %v16453_v50 = vpop.f32.mrf.mxu0 }
 0x5a7   :  { %v6834_v8 = vpop.f32.mrf.mxu1  ;;  %v8075_v47 = vpop.f32.mrf.mxu0 }
 0x5a8   :  { %v7306_v14 = vmax.f32 %v19928_v7, %v6834_v8  ;;  %v21022_v40 = vmax.f32 %v7304_v34, %v8075_v47 }
 0x5a9   :  { %v16206_v5 = vpop.f32.mrf.mxu1  ;;  %v16454_v9 = vpop.f32.mrf.mxu0 }
 0x5ab   :  { %v6839_v10 = vpop.f32.mrf.mxu1  ;;  %16304 = vmatmul.mubr.msk.bf16.gmra.mxu1 %vm467_vm2, %v17568_v63  ;;  %v8080_v45 = vpop.f32.mrf.mxu0  ;;  %16552 = vmatmul.mubr.msk.bf16.gmra.mxu0 %vm467_vm2, %v17569_v60  ;;  %v17570_v63 = vld [vmem:[%s23251_s0 + $0xa54] sm:$0xff]  }
 0x5ac   :  { %v7307_v27 = vmax.f32 %v19933_v33, %v6839_v10  ;;  %v21027_v50 = vmax.f32 %v7305_v38, %v8080_v45  ;;  %16307 = vmatprep.mubr.msk.bf16.mxu1 %vm17772_vm1, %v23331_v15  ;;  %16555 = vmatprep.mubr.msk.bf16.mxu0 %vm17772_vm1, %v23331_v15  ;;  %v17571_v33 = vld [vmem:[%s23251_s0 + $0xc30] sm:$0xff]  }
 0x5ad   :  { %v16209_v7 = vpop.f32.mrf.mxu1  ;;  %v16457_v34 = vpop.f32.mrf.mxu0 }
 0x5af   :  { %v6842_v8 = vpop.f32.mrf.mxu1  ;;  %v8083_v47 = vpop.f32.mrf.mxu0 }
 0x5b0   :  { %v7308_v38 = vmax.f32 %v19946_v55, %v6842_v8  ;;  %v21040_v60 = vmax.f32 %v7306_v14, %v8083_v47 }
 0x5b1   :  { %v16210_v5 = vpop.f32.mrf.mxu1  ;;  %v16458_v9 = vpop.f32.mrf.mxu0 }
 0x5b3   :  { %v6847_v10 = vpop.f32.mrf.mxu1  ;;  %16308 = vmatmul.mubr.msk.bf16.gmra.mxu1 %vm467_vm2, %v17570_v63  ;;  %v8088_v45 = vpop.f32.mrf.mxu0  ;;  %16556 = vmatmul.mubr.msk.bf16.gmra.mxu0 %vm467_vm2, %v17571_v33  ;;  %v17572_v63 = vld [vmem:[%s23251_s0 + $0xa5c] sm:$0xff]  }
 0x5b4   :  { %v7309_v7 = vmax.f32 %v19951_v23, %v6847_v10  ;;  %v21045_v34 = vmax.f32 %v7307_v27, %v8088_v45  ;;  %16311 = vmatprep.mubr.msk.bf16.mxu1 %vm17772_vm1, %v23331_v15  ;;  %16559 = vmatprep.mubr.msk.bf16.mxu0 %vm17772_vm1, %v23331_v15  ;;  %v17573_v23 = vld [vmem:[%s23251_s0 + $0xc38] sm:$0xff]  }
 0x5b5   :  { %v16213_v55 = vpop.f32.mrf.mxu1  ;;  %v16461_v14 = vpop.f32.mrf.mxu0 }
 0x5b7   :  { %v6850_v8 = vpop.f32.mrf.mxu1  ;;  %v8091_v47 = vpop.f32.mrf.mxu0 }
 0x5b8   :  { %v7310_v27 = vmax.f32 %v19964_v2, %v6850_v8  ;;  %v21058_v33 = vmax.f32 %v7308_v38, %v8091_v47 }
 0x5b9   :  { %v16214_v5 = vpop.f32.mrf.mxu1  ;;  %v16462_v9 = vpop.f32.mrf.mxu0 }
 0x5bb   :  { %v6855_v10 = vpop.f32.mrf.mxu1  ;;  %16312 = vmatmul.mubr.msk.bf16.gmra.mxu1 %vm467_vm2, %v17572_v63  ;;  %v8096_v45 = vpop.f32.mrf.mxu0  ;;  %16560 = vmatmul.mubr.msk.bf16.gmra.mxu0 %vm467_vm2, %v17573_v23  ;;  %v17574_v63 = vld [vmem:[%s23251_s0 + $0xa64] sm:$0xff]  }
 0x5bc   :  { %v7311_v55 = vmax.f32 %v19969_v25, %v6855_v10  ;;  %v21063_v14 = vmax.f32 %v7309_v7, %v8096_v45  ;;  %16315 = vmatprep.mubr.msk.bf16.mxu1 %vm17772_vm1, %v23331_v15  ;;  %16563 = vmatprep.mubr.msk.bf16.mxu0 %vm17772_vm1, %v23331_v15  ;;  %v17575_v25 = vld [vmem:[%s23251_s0 + $0xc40] sm:$0xff]  }
 0x5bd   :  { %v16217_v2 = vpop.f32.mrf.mxu1  ;;  %v16465_v38 = vpop.f32.mrf.mxu0 }
 0x5bf   :  { %v6858_v8 = vpop.f32.mrf.mxu1  ;;  %v8099_v47 = vpop.f32.mrf.mxu0 }
 0x5c0   :  { %v7312_v7 = vmax.f32 %v19982_v0, %v6858_v8  ;;  %v21076_v23 = vmax.f32 %v7310_v27, %v8099_v47 }
 0x5c1   :  { %v16218_v5 = vpop.f32.mrf.mxu1  ;;  %v16466_v9 = vpop.f32.mrf.mxu0 }
 0x5c3   :  { %v6863_v10 = vpop.f32.mrf.mxu1  ;;  %16316 = vmatmul.mubr.msk.bf16.gmra.mxu1 %vm467_vm2, %v17574_v63  ;;  %v8104_v45 = vpop.f32.mrf.mxu0  ;;  %16564 = vmatmul.mubr.msk.bf16.gmra.mxu0 %vm467_vm2, %v17575_v25  ;;  %v17576_v63 = vld [vmem:[%s23251_s0 + $0xa6c] sm:$0xff]  }
 0x5c4   :  { %v7313_v2 = vmax.f32 %v19987_v19, %v6863_v10  ;;  %v21081_v38 = vmax.f32 %v7311_v55, %v8104_v45  ;;  %16319 = vmatprep.mubr.msk.bf16.mxu1 %vm17772_vm1, %v23331_v15  ;;  %16567 = vmatprep.mubr.msk.bf16.mxu0 %vm17772_vm1, %v23331_v15  ;;  %v17577_v19 = vld [vmem:[%s23251_s0 + $0xc48] sm:$0xff]  }
 0x5c5   :  { %v16221_v0 = vpop.f32.mrf.mxu1  ;;  %v16469_v27 = vpop.f32.mrf.mxu0 }
 0x5c7   :  { %v6866_v8 = vpop.f32.mrf.mxu1  ;;  %v8107_v47 = vpop.f32.mrf.mxu0 }
 0x5c8   :  { %v7314_v55 = vmax.f32 %v20000_v1, %v6866_v8  ;;  %v21094_v25 = vmax.f32 %v7312_v7, %v8107_v47 }
 0x5c9   :  { %v16222_v5 = vpop.f32.mrf.mxu1  ;;  %v16470_v9 = vpop.f32.mrf.mxu0 }
 0x5cb   :  { %v6871_v10 = vpop.f32.mrf.mxu1  ;;  %16320 = vmatmul.mubr.msk.bf16.gmra.mxu1 %vm467_vm2, %v17576_v63  ;;  %v8112_v45 = vpop.f32.mrf.mxu0  ;;  %16568 = vmatmul.mubr.msk.bf16.gmra.mxu0 %vm467_vm2, %v17577_v19  ;;  %v17578_v63 = vld [vmem:[%s23251_s0 + $0xa74] sm:$0xff]  }
 0x5cc   :  { %v7315_v0 = vmax.f32 %v20005_v20, %v6871_v10  ;;  %v21099_v27 = vmax.f32 %v7313_v2, %v8112_v45  ;;  %16323 = vmatprep.mubr.msk.bf16.mxu1 %vm17772_vm1, %v23331_v15  ;;  %16571 = vmatprep.mubr.msk.bf16.mxu0 %vm17772_vm1, %v23331_v15  ;;  %v17579_v20 = vld [vmem:[%s23251_s0 + $0xc50] sm:$0xff]  }
 0x5cd   :  { %v16225_v1 = vpop.f32.mrf.mxu1  ;;  %v16473_v7 = vpop.f32.mrf.mxu0 }
 0x5cf   :  { %v6874_v8 = vpop.f32.mrf.mxu1  ;;  %v8115_v47 = vpop.f32.mrf.mxu0 }
 0x5d0   :  { %v7316_v2 = vmax.f32 %v20018_v12, %v6874_v8  ;;  %v21112_v19 = vmax.f32 %v7314_v55, %v8115_v47 }
 0x5d1   :  { %v16226_v5 = vpop.f32.mrf.mxu1  ;;  %v16474_v9 = vpop.f32.mrf.mxu0 }
 0x5d3   :  { %v6879_v10 = vpop.f32.mrf.mxu1  ;;  %16324 = vmatmul.mubr.msk.bf16.gmra.mxu1 %vm467_vm2, %v17578_v63  ;;  %v8120_v45 = vpop.f32.mrf.mxu0  ;;  %16572 = vmatmul.mubr.msk.bf16.gmra.mxu0 %vm467_vm2, %v17579_v20  ;;  %v17580_v63 = vld [vmem:[%s23251_s0 + $0xa7c] sm:$0xff]  }
 0x5d4   :  { %v7317_v1 = vmax.f32 %v20023_v13, %v6879_v10  ;;  %v21117_v7 = vmax.f32 %v7315_v0, %v8120_v45  ;;  %16327 = vmatprep.mubr.msk.bf16.mxu1 %vm17772_vm1, %v23331_v15  ;;  %16575 = vmatprep.mubr.msk.bf16.mxu0 %vm17772_vm1, %v23331_v15  ;;  %v17581_v13 = vld [vmem:[%s23251_s0 + $0xc58] sm:$0xff]  }
 0x5d5   :  { %v16229_v12 = vpop.f32.mrf.mxu1  ;;  %v16477_v55 = vpop.f32.mrf.mxu0 }
 0x5d7   :  { %v6882_v8 = vpop.f32.mrf.mxu1  ;;  %v8123_v47 = vpop.f32.mrf.mxu0 }
 0x5d8   :  { %v7318_v0 = vmax.f32 %v20036_v22, %v6882_v8  ;;  %v21130_v20 = vmax.f32 %v7316_v2, %v8123_v47 }
 0x5d9   :  { %v16230_v5 = vpop.f32.mrf.mxu1  ;;  %v16478_v9 = vpop.f32.mrf.mxu0 }
 0x5db   :  { %v6887_v10 = vpop.f32.mrf.mxu1  ;;  %16328 = vmatmul.mubr.msk.bf16.gmra.mxu1 %vm467_vm2, %v17580_v63  ;;  %v8128_v45 = vpop.f32.mrf.mxu0  ;;  %16576 = vmatmul.mubr.msk.bf16.gmra.mxu0 %vm467_vm2, %v17581_v13  ;;  %v17582_v63 = vld [vmem:[%s23251_s0 + $0xa84] sm:$0xff]  }
 0x5dc   :  { %v7319_v12 = vmax.f32 %v20041_v17, %v6887_v10  ;;  %v21135_v55 = vmax.f32 %v7317_v1, %v8128_v45  ;;  %16331 = vmatprep.mubr.msk.bf16.mxu1 %vm17772_vm1, %v23331_v15  ;;  %16579 = vmatprep.mubr.msk.bf16.mxu0 %vm17772_vm1, %v23331_v15  ;;  %v17583_v17 = vld [vmem:[%s23251_s0 + $0xc60] sm:$0xff]  }
 0x5dd   :  { %v16233_v22 = vpop.f32.mrf.mxu1  ;;  %v16481_v2 = vpop.f32.mrf.mxu0 }
 0x5df   :  { %v6890_v8 = vpop.f32.mrf.mxu1  ;;  %v8131_v47 = vpop.f32.mrf.mxu0 }
 0x5e0   :  { %v7320_v1 = vmax.f32 %v20054_v32, %v6890_v8  ;;  %v21148_v13 = vmax.f32 %v7318_v0, %v8131_v47 }
 0x5e1   :  { %v16234_v5 = vpop.f32.mrf.mxu1  ;;  %v16482_v9 = vpop.f32.mrf.mxu0 }
 0x5e3   :  { %v6895_v10 = vpop.f32.mrf.mxu1  ;;  %16332 = vmatmul.mubr.msk.bf16.gmra.mxu1 %vm467_vm2, %v17582_v63  ;;  %v8136_v45 = vpop.f32.mrf.mxu0  ;;  %16580 = vmatmul.mubr.msk.bf16.gmra.mxu0 %vm467_vm2, %v17583_v17  ;;  %v17584_v63 = vld [vmem:[%s23251_s0 + $0xa8c] sm:$0xff]  }
 0x5e4   :  { %v7321_v22 = vmax.f32 %v20059_v59, %v6895_v10  ;;  %v21153_v2 = vmax.f32 %v7319_v12, %v8136_v45  ;;  %16335 = vmatprep.mubr.msk.bf16.mxu1 %vm17772_vm1, %v23331_v15  ;;  %16583 = vmatprep.mubr.msk.bf16.mxu0 %vm17772_vm1, %v23331_v15  ;;  %v17585_v59 = vld [vmem:[%s23251_s0 + $0xc68] sm:$0xff]  }
 0x5e5   :  { %v16237_v32 = vpop.f32.mrf.mxu1  ;;  %v16485_v0 = vpop.f32.mrf.mxu0 }
 0x5e7   :  { %v6898_v8 = vpop.f32.mrf.mxu1  ;;  %v8139_v47 = vpop.f32.mrf.mxu0 }
 0x5e8   :  { %v7322_v12 = vmax.f32 %v20072_v42, %v6898_v8  ;;  %v21166_v17 = vmax.f32 %v7320_v1, %v8139_v47 }
 0x5e9   :  { %v16238_v5 = vpop.f32.mrf.mxu1  ;;  %v16486_v9 = vpop.f32.mrf.mxu0 }
 0x5eb   :  { %v6903_v10 = vpop.f32.mrf.mxu1  ;;  %16336 = vmatmul.mubr.msk.bf16.gmra.mxu1 %vm467_vm2, %v17584_v63  ;;  %v8144_v45 = vpop.f32.mrf.mxu0  ;;  %16584 = vmatmul.mubr.msk.bf16.gmra.mxu0 %vm467_vm2, %v17585_v59  ;;  %v17586_v63 = vld [vmem:[%s23251_s0 + $0xa94] sm:$0xff]  }
 0x5ec   :  { %v7323_v32 = vmax.f32 %v20077_v58, %v6903_v10  ;;  %v21171_v0 = vmax.f32 %v7321_v22, %v8144_v45  ;;  %16339 = vmatprep.mubr.msk.bf16.mxu1 %vm17772_vm1, %v23331_v15  ;;  %16587 = vmatprep.mubr.msk.bf16.mxu0 %vm17772_vm1, %v23331_v15  ;;  %v17587_v58 = vld [vmem:[%s23251_s0 + $0xc70] sm:$0xff]  }
 0x5ed   :  { %v16241_v42 = vpop.f32.mrf.mxu1  ;;  %v16489_v1 = vpop.f32.mrf.mxu0 }
 0x5ef   :  { %v6906_v8 = vpop.f32.mrf.mxu1  ;;  %v8147_v47 = vpop.f32.mrf.mxu0 }
 0x5f0   :  { %v7324_v22 = vmax.f32 %v20090_v52, %v6906_v8  ;;  %v21184_v59 = vmax.f32 %v7322_v12, %v8147_v47 }
 0x5f1   :  { %v16242_v5 = vpop.f32.mrf.mxu1  ;;  %v16490_v9 = vpop.f32.mrf.mxu0 }
 0x5f3   :  { %v6911_v10 = vpop.f32.mrf.mxu1  ;;  %16340 = vmatmul.mubr.msk.bf16.gmra.mxu1 %vm467_vm2, %v17586_v63  ;;  %v8152_v45 = vpop.f32.mrf.mxu0  ;;  %16588 = vmatmul.mubr.msk.bf16.gmra.mxu0 %vm467_vm2, %v17587_v58  ;;  %v17588_v63 = vld [vmem:[%s23251_s0 + $0xa9c] sm:$0xff]  }
 0x5f4   :  { %v7325_v42 = vmax.f32 %v20095_v18, %v6911_v10  ;;  %v21189_v1 = vmax.f32 %v7323_v32, %v8152_v45  ;;  %16343 = vmatprep.mubr.msk.bf16.mxu1 %vm17772_vm1, %v23331_v15  ;;  %16591 = vmatprep.mubr.msk.bf16.mxu0 %vm17772_vm1, %v23331_v15  ;;  %v17589_v18 = vld [vmem:[%s23251_s0 + $0xc78] sm:$0xff]  }
 0x5f5   :  { %v16245_v52 = vpop.f32.mrf.mxu1  ;;  %v16493_v12 = vpop.f32.mrf.mxu0 }
 0x5f7   :  { %v6914_v8 = vpop.f32.mrf.mxu1  ;;  %v8155_v47 = vpop.f32.mrf.mxu0 }
 0x5f8   :  { %v7326_v32 = vmax.f32 %v20108_v3, %v6914_v8  ;;  %v21202_v58 = vmax.f32 %v7324_v22, %v8155_v47 }
 0x5f9   :  { %v16246_v5 = vpop.f32.mrf.mxu1  ;;  %v16494_v9 = vpop.f32.mrf.mxu0 }
 0x5fb   :  { %v6919_v10 = vpop.f32.mrf.mxu1  ;;  %16344 = vmatmul.mubr.msk.bf16.gmra.mxu1 %vm467_vm2, %v17588_v63  ;;  %v8160_v45 = vpop.f32.mrf.mxu0  ;;  %16592 = vmatmul.mubr.msk.bf16.gmra.mxu0 %vm467_vm2, %v17589_v18  ;;  %v17590_v63 = vld [vmem:[%s23251_s0 + $0xaa4] sm:$0xff]  }
 0x5fc   :  { %v7327_v52 = vmax.f32 %v20113_v6, %v6919_v10  ;;  %v21207_v12 = vmax.f32 %v7325_v42, %v8160_v45  ;;  %16347 = vmatprep.mubr.msk.bf16.mxu1 %vm17772_vm1, %v23331_v15  ;;  %16595 = vmatprep.mubr.msk.bf16.mxu0 %vm17772_vm1, %v23331_v15  ;;  %v17591_v6 = vld [vmem:[%s23251_s0 + $0xc80] sm:$0xff]  }
 0x5fd   :  { %v16249_v3 = vpop.f32.mrf.mxu1  ;;  %v16497_v22 = vpop.f32.mrf.mxu0 }
 0x5ff   :  { %v6922_v8 = vpop.f32.mrf.mxu1  ;;  %v8163_v47 = vpop.f32.mrf.mxu0 }
 0x600   :  { %v7328_v42 = vmax.f32 %v20126_v24, %v6922_v8  ;;  %v21220_v18 = vmax.f32 %v7326_v32, %v8163_v47 }
 0x601   :  { %v16250_v5 = vpop.f32.mrf.mxu1  ;;  %v16498_v9 = vpop.f32.mrf.mxu0 }
 0x603   :  { %v6927_v10 = vpop.f32.mrf.mxu1  ;;  %16348 = vmatmul.mubr.msk.bf16.gmra.mxu1 %vm467_vm2, %v17590_v63  ;;  %v8168_v45 = vpop.f32.mrf.mxu0  ;;  %16596 = vmatmul.mubr.msk.bf16.gmra.mxu0 %vm467_vm2, %v17591_v6  ;;  %v17592_v63 = vld [vmem:[%s23251_s0 + $0xaac] sm:$0xff]  }
 0x604   :  { %v7329_v3 = vmax.f32 %v20131_v16, %v6927_v10  ;;  %v21225_v22 = vmax.f32 %v7327_v52, %v8168_v45  ;;  %16351 = vmatprep.mubr.msk.bf16.mxu1 %vm17772_vm1, %v23331_v15  ;;  %16599 = vmatprep.mubr.msk.bf16.mxu0 %vm17772_vm1, %v23331_v15  ;;  %v17593_v16 = vld [vmem:[%s23251_s0 + $0xc88] sm:$0xff]  }
 0x605   :  { %v16253_v24 = vpop.f32.mrf.mxu1  ;;  %v16501_v32 = vpop.f32.mrf.mxu0 }
 0x607   :  { %v6930_v8 = vpop.f32.mrf.mxu1  ;;  %v8171_v47 = vpop.f32.mrf.mxu0 }
 0x608   :  { %v7330_v52 = vmax.f32 %v20144_v41, %v6930_v8  ;;  %v21238_v6 = vmax.f32 %v7328_v42, %v8171_v47 }
 0x609   :  { %v16254_v5 = vpop.f32.mrf.mxu1  ;;  %v16502_v9 = vpop.f32.mrf.mxu0 }
 0x60b   :  { %v6935_v10 = vpop.f32.mrf.mxu1  ;;  %16352 = vmatmul.mubr.msk.bf16.gmra.mxu1 %vm467_vm2, %v17592_v63  ;;  %v8176_v45 = vpop.f32.mrf.mxu0  ;;  %16600 = vmatmul.mubr.msk.bf16.gmra.mxu0 %vm467_vm2, %v17593_v16  ;;  %v17594_v63 = vld [vmem:[%s23251_s0 + $0xab4] sm:$0xff]  }
 0x60c   :  { %v7331_v24 = vmax.f32 %v20149_v26, %v6935_v10  ;;  %v21243_v32 = vmax.f32 %v7329_v3, %v8176_v45  ;;  %16355 = vmatprep.mubr.msk.bf16.mxu1 %vm17772_vm1, %v23331_v15  ;;  %16603 = vmatprep.mubr.msk.bf16.mxu0 %vm17772_vm1, %v23331_v15  ;;  %v17595_v26 = vld [vmem:[%s23251_s0 + $0xc90] sm:$0xff]  }
 0x60d   :  { %v16257_v41 = vpop.f32.mrf.mxu1  ;;  %v16505_v42 = vpop.f32.mrf.mxu0 }
 0x60f   :  { %v6938_v8 = vpop.f32.mrf.mxu1  ;;  %v8179_v47 = vpop.f32.mrf.mxu0 }
 0x610   :  { %v7332_v3 = vmax.f32 %v20162_v61, %v6938_v8  ;;  %v21256_v16 = vmax.f32 %v7330_v52, %v8179_v47 }
 0x611   :  { %v16258_v5 = vpop.f32.mrf.mxu1  ;;  %v16506_v9 = vpop.f32.mrf.mxu0 }
 0x613   :  { %v6943_v10 = vpop.f32.mrf.mxu1  ;;  %16356 = vmatmul.mubr.msk.bf16.gmra.mxu1 %vm467_vm2, %v17594_v63  ;;  %v8184_v45 = vpop.f32.mrf.mxu0  ;;  %16604 = vmatmul.mubr.msk.bf16.gmra.mxu0 %vm467_vm2, %v17595_v26  ;;  %v17596_v63 = vld [vmem:[%s23251_s0 + $0xabc] sm:$0xff]  }
 0x614   :  { %v7333_v41 = vmax.f32 %v20167_v36, %v6943_v10  ;;  %v21261_v42 = vmax.f32 %v7331_v24, %v8184_v45  ;;  %16359 = vmatprep.mubr.msk.bf16.mxu1 %vm17772_vm1, %v23331_v15  ;;  %16607 = vmatprep.mubr.msk.bf16.mxu0 %vm17772_vm1, %v23331_v15  ;;  %v17597_v36 = vld [vmem:[%s23251_s0 + $0xc98] sm:$0xff]  }
 0x615   :  { %v16261_v61 = vpop.f32.mrf.mxu1  ;;  %v16509_v52 = vpop.f32.mrf.mxu0 }
 0x617   :  { %v6946_v8 = vpop.f32.mrf.mxu1  ;;  %v8187_v47 = vpop.f32.mrf.mxu0 }
 0x618   :  { %v7334_v24 = vmax.f32 %v20180_v21, %v6946_v8  ;;  %v21274_v26 = vmax.f32 %v7332_v3, %v8187_v47 }
 0x619   :  { %v16262_v5 = vpop.f32.mrf.mxu1  ;;  %v16510_v9 = vpop.f32.mrf.mxu0 }
 0x61b   :  { %v6951_v10 = vpop.f32.mrf.mxu1  ;;  %16360 = vmatmul.mubr.msk.bf16.gmra.mxu1 %vm467_vm2, %v17596_v63  ;;  %v8192_v45 = vpop.f32.mrf.mxu0  ;;  %16608 = vmatmul.mubr.msk.bf16.gmra.mxu0 %vm467_vm2, %v17597_v36  ;;  %v17598_v63 = vld [vmem:[%s23251_s0 + $0xac4] sm:$0xff]  }
 0x61c   :  { %v7335_v61 = vmax.f32 %v20185_v46, %v6951_v10  ;;  %v21279_v52 = vmax.f32 %v7333_v41, %v8192_v45  ;;  %16363 = vmatprep.mubr.msk.bf16.mxu1 %vm17772_vm1, %v23331_v15  ;;  %16611 = vmatprep.mubr.msk.bf16.mxu0 %vm17772_vm1, %v23331_v15  ;;  %v17599_v46 = vld [vmem:[%s23251_s0 + $0xca0] sm:$0xff]  }
 0x61d   :  { %v16265_v21 = vpop.f32.mrf.mxu1  ;;  %v16513_v3 = vpop.f32.mrf.mxu0 }
 0x61f   :  { %v6954_v8 = vpop.f32.mrf.mxu1  ;;  %v8195_v47 = vpop.f32.mrf.mxu0 }
 0x620   :  { %v7336_v41 = vmax.f32 %v20198_v51, %v6954_v8  ;;  %v21292_v36 = vmax.f32 %v7334_v24, %v8195_v47 }
 0x621   :  { %v16266_v5 = vpop.f32.mrf.mxu1  ;;  %v16514_v9 = vpop.f32.mrf.mxu0 }
 0x623   :  { %v6959_v10 = vpop.f32.mrf.mxu1  ;;  %16364 = vmatmul.mubr.msk.bf16.gmra.mxu1 %vm467_vm2, %v17598_v63  ;;  %v8200_v45 = vpop.f32.mrf.mxu0  ;;  %16612 = vmatmul.mubr.msk.bf16.gmra.mxu0 %vm467_vm2, %v17599_v46  ;;  %v17600_v63 = vld [vmem:[%s23251_s0 + $0xacc] sm:$0xff]  }
 0x624   :  { %v7337_v21 = vmax.f32 %v20203_v56, %v6959_v10  ;;  %v21297_v3 = vmax.f32 %v7335_v61, %v8200_v45  ;;  %16367 = vmatprep.mubr.msk.bf16.mxu1 %vm17772_vm1, %v23331_v15  ;;  %16615 = vmatprep.mubr.msk.bf16.mxu0 %vm17772_vm1, %v23331_v15  ;;  %v17601_v56 = vld [vmem:[%s23251_s0 + $0xca8] sm:$0xff]  }
 0x625   :  { %v16269_v51 = vpop.f32.mrf.mxu1  ;;  %v16517_v24 = vpop.f32.mrf.mxu0 }
 0x627   :  { %v6962_v8 = vpop.f32.mrf.mxu1  ;;  %v8203_v47 = vpop.f32.mrf.mxu0 }
 0x628   :  { %v7338_v61 = vmax.f32 %v20216_v29, %v6962_v8  ;;  %v21310_v46 = vmax.f32 %v7336_v41, %v8203_v47 }
 0x629   :  { %v16270_v5 = vpop.f32.mrf.mxu1  ;;  %v16518_v9 = vpop.f32.mrf.mxu0 }
 0x62b   :  { %v6967_v10 = vpop.f32.mrf.mxu1  ;;  %16368 = vmatmul.mubr.msk.bf16.gmra.mxu1 %vm467_vm2, %v17600_v63  ;;  %v8208_v45 = vpop.f32.mrf.mxu0  ;;  %16616 = vmatmul.mubr.msk.bf16.gmra.mxu0 %vm467_vm2, %v17601_v56  ;;  %v17602_v63 = vld [vmem:[%s23251_s0 + $0xad4] sm:$0xff]  }
 0x62c   :  { %v7339_v51 = vmax.f32 %v20221_v11, %v6967_v10  ;;  %v21315_v24 = vmax.f32 %v7337_v21, %v8208_v45  ;;  %16371 = vmatprep.mubr.msk.bf16.mxu1 %vm17772_vm1, %v23331_v15  ;;  %16619 = vmatprep.mubr.msk.bf16.mxu0 %vm17772_vm1, %v23331_v15  ;;  %v17603_v11 = vld [vmem:[%s23251_s0 + $0xcb0] sm:$0xff]  }
 0x62d   :  { %v16273_v29 = vpop.f32.mrf.mxu1  ;;  %v16521_v41 = vpop.f32.mrf.mxu0 }
 0x62f   :  { %v6970_v8 = vpop.f32.mrf.mxu1  ;;  %v8211_v47 = vpop.f32.mrf.mxu0 }
 0x630   :  { %v7340_v21 = vmax.f32 %v20234_v39, %v6970_v8  ;;  %v21328_v56 = vmax.f32 %v7338_v61, %v8211_v47 }
 0x631   :  { %v16274_v5 = vpop.f32.mrf.mxu1  ;;  %v16522_v9 = vpop.f32.mrf.mxu0 }
 0x633   :  { %v6975_v10 = vpop.f32.mrf.mxu1  ;;  %16372 = vmatmul.mubr.msk.bf16.gmra.mxu1 %vm467_vm2, %v17602_v63  ;;  %v8216_v45 = vpop.f32.mrf.mxu0  ;;  %16620 = vmatmul.mubr.msk.bf16.gmra.mxu0 %vm467_vm2, %v17603_v11  ;;  %v17604_v63 = vld [vmem:[%s23251_s0 + $0xadc] sm:$0xff]  }
 0x634   :  { %v7341_v29 = vmax.f32 %v20239_v31, %v6975_v10  ;;  %v21333_v41 = vmax.f32 %v7339_v51, %v8216_v45  ;;  %16375 = vmatprep.mubr.msk.bf16.mxu1 %vm17772_vm1, %v23331_v15  ;;  %16623 = vmatprep.mubr.msk.bf16.mxu0 %vm17772_vm1, %v23331_v15  ;;  %v17605_v31 = vld [vmem:[%s23251_s0 + $0xcb8] sm:$0xff]  }
 0x635   :  { %v16277_v39 = vpop.f32.mrf.mxu1  ;;  %v16525_v61 = vpop.f32.mrf.mxu0 }
 0x637   :  { %v6978_v8 = vpop.f32.mrf.mxu1  ;;  %v8219_v47 = vpop.f32.mrf.mxu0 }
 0x638   :  { %v7342_v51 = vmax.f32 %v20252_v30, %v6978_v8  ;;  %v21346_v11 = vmax.f32 %v7340_v21, %v8219_v47 }
 0x639   :  { %v16278_v5 = vpop.f32.mrf.mxu1  ;;  %v16526_v9 = vpop.f32.mrf.mxu0 }
 0x63b   :  { %v6983_v10 = vpop.f32.mrf.mxu1  ;;  %16376 = vmatmul.mubr.msk.bf16.gmra.mxu1 %vm467_vm2, %v17604_v63  ;;  %v8224_v45 = vpop.f32.mrf.mxu0  ;;  %16624 = vmatmul.mubr.msk.bf16.gmra.mxu0 %vm467_vm2, %v17605_v31  ;;  %v17606_v63 = vld [vmem:[%s23251_s0 + $0xae4] sm:$0xff]  }
 0x63c   :  { %v7343_v39 = vmax.f32 %v20257_v49, %v6983_v10  ;;  %v21351_v61 = vmax.f32 %v7341_v29, %v8224_v45  ;;  %16379 = vmatprep.mubr.msk.bf16.mxu1 %vm17772_vm1, %v23331_v15  ;;  %16627 = vmatprep.mubr.msk.bf16.mxu0 %vm17772_vm1, %v23331_v15  ;;  %v17607_v49 = vld [vmem:[%s23251_s0 + $0xcc0] sm:$0xff]  }
 0x63d   :  { %v16281_v30 = vpop.f32.mrf.mxu1  ;;  %v16529_v21 = vpop.f32.mrf.mxu0 }
 0x63e   :  { %23615 = vst [vmem:[#allocation55_spill] sm:$0xff] %v21351_v61  ;;  %v23617_v30 = vld [vmem:[#allocation65_spill] sm:$0xff] }
 0x63f   :  { %v6986_v8 = vpop.f32.mrf.mxu1  ;;  %v8227_v47 = vpop.f32.mrf.mxu0 }
 0x640   :  { %v7344_v29 = vmax.f32 %v20270_v54, %v6986_v8  ;;  %v21364_v31 = vmax.f32 %v7342_v51, %v8227_v47 }
 0x641   :  { %v16282_v5 = vpop.f32.mrf.mxu1  ;;  %v16530_v9 = vpop.f32.mrf.mxu0 }
 0x642   :  { %23616 = vst [vmem:[#allocation57_spill] sm:$0xff] %v21364_v31 }
 0x643   :  { %v6991_v10 = vpop.f32.mrf.mxu1  ;;  %16380 = vmatmul.mubr.msk.bf16.gmra.mxu1 %vm467_vm2, %v17606_v63  ;;  %v8232_v45 = vpop.f32.mrf.mxu0  ;;  %16628 = vmatmul.mubr.msk.bf16.gmra.mxu0 %vm467_vm2, %v17607_v49  ;;  %v17608_v63 = vld [vmem:[%s23251_s0 + $0xaec] sm:$0xff]  }
 0x644   :  { %v7345_v21 = vmax.f32 %v23617_v30, %v6991_v10  ;;  %v21369_v61 = vmax.f32 %v7343_v39, %v8232_v45  ;;  %16383 = vmatprep.mubr.msk.bf16.mxu1 %vm17772_vm1, %v23331_v15  ;;  %16631 = vmatprep.mubr.msk.bf16.mxu0 %vm17772_vm1, %v23331_v15  ;;  %v17609_v49 = vld [vmem:[%s23251_s0 + $0xcc8] sm:$0xff]  }
 0x645   :  { %v16285_v54 = vpop.f32.mrf.mxu1  ;;  %v16533_v51 = vpop.f32.mrf.mxu0  ;;  %v23619_v39 = vld [vmem:[#allocation67_spill] sm:$0xff] }
 0x646   :  { %23618 = vst [vmem:[#allocation59_spill] sm:$0xff] %v21369_v61  ;;  %v23621_v51 = vld [vmem:[#allocation69_spill] sm:$0xff] }
 0x647   :  { %v6994_v8 = vpop.f32.mrf.mxu1  ;;  %v8235_v47 = vpop.f32.mrf.mxu0 }
 0x648   :  { %v7346_v5 = vmax.f32 %v23619_v39, %v6994_v8  ;;  %v21382_v9 = vmax.f32 %v7344_v29, %v8235_v47 }
 0x649   :  { %v16286_v10 = vpop.f32.mrf.mxu1  ;;  %v16534_v45 = vpop.f32.mrf.mxu0 }
 0x64a   :  { %23620 = vst [vmem:[#allocation61_spill] sm:$0xff] %v21382_v9 }
 0x64b   :  { %v6999_v30 = vpop.f32.mrf.mxu1  ;;  %16384 = vmatmul.mubr.msk.bf16.gmra.mxu1 %vm467_vm2, %v17608_v63  ;;  %v8240_v54 = vpop.f32.mrf.mxu0  ;;  %16632 = vmatmul.mubr.msk.bf16.gmra.mxu0 %vm467_vm2, %v17609_v49  ;;  %v17610_v63 = vld [vmem:[%s23251_s0 + $0xaf4] sm:$0xff]  }
 0x64c   :  { %v7347_v61 = vmax.f32 %v23621_v51, %v6999_v30  ;;  %v21387_v31 = vmax.f32 %v7345_v21, %v8240_v54  ;;  %16387 = vmatprep.mubr.msk.bf16.mxu1 %vm17772_vm1, %v23331_v15  ;;  %16635 = vmatprep.mubr.msk.bf16.mxu0 %vm17772_vm1, %v23331_v15  ;;  %v17611_v49 = vld [vmem:[%s23251_s0 + $0xcd0] sm:$0xff]   ;;  %v23623_v21 = vld [vmem:[#allocation73_spill] sm:$0xff] }
 0x64d   :  { %v16289_v29 = vpop.f32.mrf.mxu1  ;;  %v16537_v8 = vpop.f32.mrf.mxu0 }
 0x64e   :  { %23622 = vst [vmem:[#allocation63_spill] sm:$0xff] %v21387_v31  ;;  %v23625_v8 = vld [vmem:[#allocation74_spill] sm:$0xff] }
 0x64f   :  { %v7002_v47 = vpop.f32.mrf.mxu1  ;;  %v8243_v39 = vpop.f32.mrf.mxu0 }
 0x650   :  { %v7348_v10 = vmax.f32 %v23623_v21, %v7002_v47  ;;  %v21400_v45 = vmax.f32 %v7346_v5, %v8243_v39 }
 0x651   :  { %v16290_v30 = vpop.f32.mrf.mxu1  ;;  %v16538_v54 = vpop.f32.mrf.mxu0 }
 0x652   :  { %23624 = vst [vmem:[#allocation65_spill] sm:$0xff] %v21400_v45 }
 0x653   :  { %v7007_v51 = vpop.f32.mrf.mxu1  ;;  %16388 = vmatmul.mubr.msk.bf16.gmra.mxu1 %vm467_vm2, %v17610_v63  ;;  %v8248_v29 = vpop.f32.mrf.mxu0  ;;  %16636 = vmatmul.mubr.msk.bf16.gmra.mxu0 %vm467_vm2, %v17611_v49  ;;  %v17612_v63 = vld [vmem:[%s23251_s0 + $0xafc] sm:$0xff]  }
 0x654   :  { %v7349_v31 = vmax.f32 %v23625_v8, %v7007_v51  ;;  %v21405_v9 = vmax.f32 %v7347_v61, %v8248_v29  ;;  %16391 = vmatprep.mubr.msk.bf16.mxu1 %vm17772_vm1, %v23331_v15  ;;  %16639 = vmatprep.mubr.msk.bf16.mxu0 %vm17772_vm1, %v23331_v15  ;;  %v17613_v49 = vld [vmem:[%s23251_s0 + $0xcd8] sm:$0xff]   ;;  %v23627_v61 = vld [vmem:[#allocation75_spill] sm:$0xff] }
 0x655   :  { %v16293_v5 = vpop.f32.mrf.mxu1  ;;  %v16541_v47 = vpop.f32.mrf.mxu0 }
 0x656   :  { %23626 = vst [vmem:[#allocation67_spill] sm:$0xff] %v21405_v9  ;;  %v23629_v47 = vld [vmem:[#allocation76_spill] sm:$0xff] }
 0x657   :  { %v7010_v39 = vpop.f32.mrf.mxu1  ;;  %v8251_v21 = vpop.f32.mrf.mxu0 }
 0x658   :  { %v7350_v30 = vmax.f32 %v23627_v61, %v7010_v39  ;;  %v21418_v54 = vmax.f32 %v7348_v10, %v8251_v21 }
 0x659   :  { %v16294_v51 = vpop.f32.mrf.mxu1  ;;  %v16542_v29 = vpop.f32.mrf.mxu0 }
 0x65a   :  { %23628 = vst [vmem:[#allocation69_spill] sm:$0xff] %v21418_v54 }
 0x65b   :  { %v7015_v8 = vpop.f32.mrf.mxu1  ;;  %16392 = vmatmul.mubr.msk.bf16.gmra.mxu1 %vm467_vm2, %v17612_v63  ;;  %v8256_v5 = vpop.f32.mrf.mxu0  ;;  %16640 = vmatmul.mubr.msk.bf16.gmra.mxu0 %vm467_vm2, %v17613_v49  ;;  %v17614_v63 = vld [vmem:[%s23251_s0 + $0xb04] sm:$0xff]  }
 0x65c   :  { %v7351_v9 = vmax.f32 %v23629_v47, %v7015_v8  ;;  %v21423_v45 = vmax.f32 %v7349_v31, %v8256_v5  ;;  %16395 = vmatprep.mubr.msk.bf16.mxu1 %vm17772_vm1, %v23331_v15  ;;  %16643 = vmatprep.mubr.msk.bf16.mxu0 %vm17772_vm1, %v23331_v15  ;;  %v17615_v49 = vld [vmem:[%s23251_s0 + $0xce0] sm:$0xff]  }
 0x65d   :  { %v16297_v10 = vpop.f32.mrf.mxu1  ;;  %v16545_v39 = vpop.f32.mrf.mxu0  ;;  %v23631_v31 = vld [vmem:[#allocation54_spill] sm:$0xff] }
 0x65e   :  { %23630 = vst [vmem:[#allocation73_spill] sm:$0xff] %v21423_v45  ;;  %v23633_v39 = vld [vmem:[#allocation56_spill] sm:$0xff] }
 0x65f   :  { %v7018_v21 = vpop.f32.mrf.mxu1  ;;  %v8259_v61 = vpop.f32.mrf.mxu0 }
 0x660   :  { %v7352_v51 = vmax.f32 %v23631_v31, %v7018_v21  ;;  %v21436_v29 = vmax.f32 %v7350_v30, %v8259_v61 }
 0x661   :  { %v16298_v8 = vpop.f32.mrf.mxu1  ;;  %v16546_v5 = vpop.f32.mrf.mxu0 }
 0x662   :  { %23632 = vst [vmem:[#allocation74_spill] sm:$0xff] %v21436_v29 }
 0x663   :  { %v7023_v47 = vpop.f32.mrf.mxu1  ;;  %16396 = vmatmul.mubr.msk.bf16.gmra.mxu1 %vm467_vm2, %v17614_v63  ;;  %v8264_v10 = vpop.f32.mrf.mxu0  ;;  %16644 = vmatmul.mubr.msk.bf16.gmra.mxu0 %vm467_vm2, %v17615_v49  ;;  %v17616_v63 = vld [vmem:[%s23251_s0 + $0xb0c] sm:$0xff]  }
 0x664   :  { %v7353_v45 = vmax.f32 %v23633_v39, %v7023_v47  ;;  %v21441_v54 = vmax.f32 %v7351_v9, %v8264_v10  ;;  %16399 = vmatprep.mubr.msk.bf16.mxu1 %vm17772_vm1, %v23331_v15  ;;  %16647 = vmatprep.mubr.msk.bf16.mxu0 %vm17772_vm1, %v23331_v15  ;;  %v17617_v49 = vld [vmem:[%s23251_s0 + $0xce8] sm:$0xff]   ;;  %v23635_v9 = vld [vmem:[#allocation58_spill] sm:$0xff] }
 0x665   :  { %v16301_v30 = vpop.f32.mrf.mxu1  ;;  %v16549_v21 = vpop.f32.mrf.mxu0 }
 0x666   :  { %23634 = vst [vmem:[#allocation75_spill] sm:$0xff] %v21441_v54  ;;  %v23637_v21 = vld [vmem:[#allocation60_spill] sm:$0xff] }
 0x667   :  { %v7026_v61 = vpop.f32.mrf.mxu1  ;;  %v8267_v31 = vpop.f32.mrf.mxu0 }
 0x668   :  { %v7354_v8 = vmax.f32 %v23635_v9, %v7026_v61  ;;  %v21454_v5 = vmax.f32 %v7352_v51, %v8267_v31 }
 0x669   :  { %v16302_v47 = vpop.f32.mrf.mxu1  ;;  %v16550_v10 = vpop.f32.mrf.mxu0 }
 0x66a   :  { %23636 = vst [vmem:[#allocation76_spill] sm:$0xff] %v21454_v5 }
 0x66b   :  { %v7031_v39 = vpop.f32.mrf.mxu1  ;;  %16400 = vmatmul.mubr.msk.bf16.gmra.mxu1 %vm467_vm2, %v17616_v63  ;;  %v8272_v30 = vpop.f32.mrf.mxu0  ;;  %16648 = vmatmul.mubr.msk.bf16.gmra.mxu0 %vm467_vm2, %v17617_v49  ;;  %v17618_v63 = vld [vmem:[%s23251_s0 + $0xb14] sm:$0xff]  }
 0x66c   :  { %v7355_v54 = vmax.f32 %v23637_v21, %v7031_v39  ;;  %v21459_v29 = vmax.f32 %v7353_v45, %v8272_v30  ;;  %16403 = vmatprep.mubr.msk.bf16.mxu1 %vm17772_vm1, %v23331_v15  ;;  %16651 = vmatprep.mubr.msk.bf16.mxu0 %vm17772_vm1, %v23331_v15  ;;  %v17619_v49 = vld [vmem:[%s23251_s0 + $0xcf0] sm:$0xff]   ;;  %v23639_v45 = vld [vmem:[#allocation62_spill] sm:$0xff] }
 0x66d   :  { %v16305_v51 = vpop.f32.mrf.mxu1  ;;  %v16553_v61 = vpop.f32.mrf.mxu0 }
 0x66e   :  { %23638 = vst [vmem:[#allocation54_spill] sm:$0xff] %v21459_v29  ;;  %v23641_v61 = vld [vmem:[#allocation64_spill] sm:$0xff] }
 0x66f   :  { %v7034_v31 = vpop.f32.mrf.mxu1  ;;  %v8275_v9 = vpop.f32.mrf.mxu0 }
 0x670   :  { %v7356_v47 = vmax.f32 %v23639_v45, %v7034_v31  ;;  %v21472_v10 = vmax.f32 %v7354_v8, %v8275_v9 }
 0x671   :  { %v16306_v39 = vpop.f32.mrf.mxu1  ;;  %v16554_v30 = vpop.f32.mrf.mxu0 }
 0x672   :  { %23640 = vst [vmem:[#allocation56_spill] sm:$0xff] %v21472_v10 }
 0x673   :  { %v7039_v21 = vpop.f32.mrf.mxu1  ;;  %16404 = vmatmul.mubr.msk.bf16.gmra.mxu1 %vm467_vm2, %v17618_v63  ;;  %v8280_v51 = vpop.f32.mrf.mxu0  ;;  %16652 = vmatmul.mubr.msk.bf16.gmra.mxu0 %vm467_vm2, %v17619_v49  ;;  %v17620_v63 = vld [vmem:[%s23251_s0 + $0xb1c] sm:$0xff]  }
 0x674   :  { %v7357_v29 = vmax.f32 %v23641_v61, %v7039_v21  ;;  %v21477_v5 = vmax.f32 %v7355_v54, %v8280_v51  ;;  %16407 = vmatprep.mubr.msk.bf16.mxu1 %vm17772_vm1, %v23331_v15  ;;  %16655 = vmatprep.mubr.msk.bf16.mxu0 %vm17772_vm1, %v23331_v15  ;;  %v17621_v49 = vld [vmem:[%s23251_s0 + $0xcf8] sm:$0xff]   ;;  %v23643_v54 = vld [vmem:[#allocation66_spill] sm:$0xff] }
 0x675   :  { %v16309_v8 = vpop.f32.mrf.mxu1  ;;  %v16557_v31 = vpop.f32.mrf.mxu0 }
 0x676   :  { %23642 = vst [vmem:[#allocation58_spill] sm:$0xff] %v21477_v5  ;;  %v23645_v31 = vld [vmem:[#allocation68_spill] sm:$0xff] }
 0x677   :  { %v7042_v9 = vpop.f32.mrf.mxu1  ;;  %v8283_v45 = vpop.f32.mrf.mxu0 }
 0x678   :  { %v7358_v39 = vmax.f32 %v23643_v54, %v7042_v9  ;;  %v21490_v30 = vmax.f32 %v7356_v47, %v8283_v45 }
 0x679   :  { %v16310_v21 = vpop.f32.mrf.mxu1  ;;  %v16558_v51 = vpop.f32.mrf.mxu0 }
 0x67a   :  { %23644 = vst [vmem:[#allocation60_spill] sm:$0xff] %v21490_v30 }
 0x67b   :  { %v7047_v61 = vpop.f32.mrf.mxu1  ;;  %16408 = vmatmul.mubr.msk.bf16.gmra.mxu1 %vm467_vm2, %v17620_v63  ;;  %v8288_v8 = vpop.f32.mrf.mxu0  ;;  %16656 = vmatmul.mubr.msk.bf16.gmra.mxu0 %vm467_vm2, %v17621_v49  ;;  %v17622_v63 = vld [vmem:[%s23251_s0 + $0xb24] sm:$0xff]  }
 0x67c   :  { %v7359_v5 = vmax.f32 %v23645_v31, %v7047_v61  ;;  %v21495_v10 = vmax.f32 %v7357_v29, %v8288_v8  ;;  %16411 = vmatprep.mubr.msk.bf16.mxu1 %vm17772_vm1, %v23331_v15  ;;  %16659 = vmatprep.mubr.msk.bf16.mxu0 %vm17772_vm1, %v23331_v15  ;;  %v17623_v49 = vld [vmem:[%s23251_s0 + $0xd00] sm:$0xff]  }
 0x67d   :  { %v16313_v47 = vpop.f32.mrf.mxu1  ;;  %v16561_v9 = vpop.f32.mrf.mxu0  ;;  %v23647_v29 = vld [vmem:[#allocation70_spill] sm:$0xff] }
 0x67e   :  { %23646 = vst [vmem:[#allocation62_spill] sm:$0xff] %v21495_v10  ;;  %v23649_v9 = vld [vmem:[#allocation71_spill] sm:$0xff] }
 0x67f   :  { %v7050_v45 = vpop.f32.mrf.mxu1  ;;  %v8291_v54 = vpop.f32.mrf.mxu0 }
 0x680   :  { %v7360_v21 = vmax.f32 %v23647_v29, %v7050_v45  ;;  %v21508_v51 = vmax.f32 %v7358_v39, %v8291_v54 }
 0x681   :  { %v16314_v61 = vpop.f32.mrf.mxu1  ;;  %v16562_v8 = vpop.f32.mrf.mxu0 }
 0x682   :  { %23648 = vst [vmem:[#allocation64_spill] sm:$0xff] %v21508_v51 }
 0x683   :  { %v7055_v31 = vpop.f32.mrf.mxu1  ;;  %16412 = vmatmul.mubr.msk.bf16.gmra.mxu1 %vm467_vm2, %v17622_v63  ;;  %v8296_v47 = vpop.f32.mrf.mxu0  ;;  %16660 = vmatmul.mubr.msk.bf16.gmra.mxu0 %vm467_vm2, %v17623_v49  ;;  %v17624_v63 = vld [vmem:[%s23251_s0 + $0xb2c] sm:$0xff]  }
 0x684   :  { %v7361_v10 = vmax.f32 %v23649_v9, %v7055_v31  ;;  %v21513_v30 = vmax.f32 %v7359_v5, %v8296_v47  ;;  %16415 = vmatprep.mubr.msk.bf16.mxu1 %vm17772_vm1, %v23331_v15  ;;  %16663 = vmatprep.mubr.msk.bf16.mxu0 %vm17772_vm1, %v23331_v15  ;;  %v17625_v49 = vld [vmem:[%s23251_s0 + $0xd08] sm:$0xff]   ;;  %v23651_v5 = vld [vmem:[#allocation72_spill] sm:$0xff] }
 0x685   :  { %v16317_v39 = vpop.f32.mrf.mxu1  ;;  %v16565_v45 = vpop.f32.mrf.mxu0 }
 0x686   :  { %23650 = vst [vmem:[#allocation66_spill] sm:$0xff] %v21513_v30  ;;  %v23653_v45 = vld [vmem:[#allocation3_spill] sm:$0xff] }
 0x687   :  { %v7058_v54 = vpop.f32.mrf.mxu1  ;;  %v8299_v29 = vpop.f32.mrf.mxu0 }
 0x688   :  { %v7362_v61 = vmax.f32 %v23651_v5, %v7058_v54  ;;  %v21526_v8 = vmax.f32 %v7360_v21, %v8299_v29 }
 0x689   :  { %v16318_v31 = vpop.f32.mrf.mxu1  ;;  %v16566_v47 = vpop.f32.mrf.mxu0 }
 0x68a   :  { %23652 = vst [vmem:[#allocation68_spill] sm:$0xff] %v21526_v8 }
 0x68b   :  { %v7063_v9 = vpop.f32.mrf.mxu1  ;;  %16416 = vmatmul.mubr.msk.bf16.gmra.mxu1 %vm467_vm2, %v17624_v63  ;;  %v8304_v39 = vpop.f32.mrf.mxu0  ;;  %16664 = vmatmul.mubr.msk.bf16.gmra.mxu0 %vm467_vm2, %v17625_v49  ;;  %v17626_v63 = vld [vmem:[%s23251_s0 + $0xb34] sm:$0xff]  }
 0x68c   :  { %v7363_v30 = vmax.f32 %v23653_v45, %v7063_v9  ;;  %v21531_v51 = vmax.f32 %v7361_v10, %v8304_v39  ;;  %16419 = vmatprep.mubr.msk.bf16.mxu1 %vm17772_vm1, %v23331_v15  ;;  %16667 = vmatprep.mubr.msk.bf16.mxu0 %vm17772_vm1, %v23331_v15  ;;  %v17627_v49 = vld [vmem:[%s23251_s0 + $0xd10] sm:$0xff]  }
 0x68d   :  { %v16321_v21 = vpop.f32.mrf.mxu1  ;;  %v16569_v54 = vpop.f32.mrf.mxu0  ;;  %v23655_v10 = vld [vmem:[#allocation4_spill] sm:$0xff] }
 0x68e   :  { %23654 = vst [vmem:[#allocation70_spill] sm:$0xff] %v21531_v51  ;;  %v23657_v54 = vld [vmem:[#allocation5_spill] sm:$0xff] }
 0x68f   :  { %v7066_v29 = vpop.f32.mrf.mxu1  ;;  %v8307_v5 = vpop.f32.mrf.mxu0 }
 0x690   :  { %v7364_v31 = vmax.f32 %v23655_v10, %v7066_v29  ;;  %v21544_v47 = vmax.f32 %v7362_v61, %v8307_v5 }
 0x691   :  { %v16322_v9 = vpop.f32.mrf.mxu1  ;;  %v16570_v39 = vpop.f32.mrf.mxu0 }
 0x692   :  { %23656 = vst [vmem:[#allocation71_spill] sm:$0xff] %v21544_v47 }
 0x693   :  { %v7071_v45 = vpop.f32.mrf.mxu1  ;;  %16420 = vmatmul.mubr.msk.bf16.gmra.mxu1 %vm467_vm2, %v17626_v63  ;;  %v8312_v21 = vpop.f32.mrf.mxu0  ;;  %16668 = vmatmul.mubr.msk.bf16.gmra.mxu0 %vm467_vm2, %v17627_v49  ;;  %v17628_v63 = vld [vmem:[%s23251_s0 + $0xb3c] sm:$0xff]  }
 0x694   :  { %v7365_v51 = vmax.f32 %v23657_v54, %v7071_v45  ;;  %v21549_v8 = vmax.f32 %v7363_v30, %v8312_v21  ;;  %16423 = vmatprep.mubr.msk.bf16.mxu1 %vm17772_vm1, %v23331_v15  ;;  %16671 = vmatprep.mubr.msk.bf16.mxu0 %vm17772_vm1, %v23331_v15  ;;  %v17629_v49 = vld [vmem:[%s23251_s0 + $0xd18] sm:$0xff]   ;;  %v23659_v30 = vld [vmem:[#allocation6_spill] sm:$0xff] }
 0x695   :  { %v16325_v61 = vpop.f32.mrf.mxu1  ;;  %v16573_v29 = vpop.f32.mrf.mxu0 }
 0x696   :  { %23658 = vst [vmem:[#allocation72_spill] sm:$0xff] %v21549_v8  ;;  %v23661_v29 = vld [vmem:[#allocation7_spill] sm:$0xff] }
 0x697   :  { %v7074_v5 = vpop.f32.mrf.mxu1  ;;  %v8315_v10 = vpop.f32.mrf.mxu0 }
 0x698   :  { %v7366_v9 = vmax.f32 %v23659_v30, %v7074_v5  ;;  %v21562_v39 = vmax.f32 %v7364_v31, %v8315_v10 }
 0x699   :  { %v16326_v45 = vpop.f32.mrf.mxu1  ;;  %v16574_v21 = vpop.f32.mrf.mxu0 }
 0x69a   :  { %23660 = vst [vmem:[#allocation3_spill] sm:$0xff] %v21562_v39 }
 0x69b   :  { %v7079_v54 = vpop.f32.mrf.mxu1  ;;  %16424 = vmatmul.mubr.msk.bf16.gmra.mxu1 %vm467_vm2, %v17628_v63  ;;  %v8320_v61 = vpop.f32.mrf.mxu0  ;;  %16672 = vmatmul.mubr.msk.bf16.gmra.mxu0 %vm467_vm2, %v17629_v49  ;;  %v17630_v63 = vld [vmem:[%s23251_s0 + $0xb44] sm:$0xff]  }
 0x69c   :  { %v7367_v8 = vmax.f32 %v23661_v29, %v7079_v54  ;;  %v21567_v47 = vmax.f32 %v7365_v51, %v8320_v61  ;;  %16427 = vmatprep.mubr.msk.bf16.mxu1 %vm17772_vm1, %v23331_v15  ;;  %16675 = vmatprep.mubr.msk.bf16.mxu0 %vm17772_vm1, %v23331_v15  ;;  %v17631_v49 = vld [vmem:[%s23251_s0 + $0xd20] sm:$0xff]   ;;  %v23663_v51 = vld [vmem:[#allocation8_spill] sm:$0xff] }
 0x69d   :  { %v16329_v31 = vpop.f32.mrf.mxu1  ;;  %v16577_v5 = vpop.f32.mrf.mxu0 }
 0x69e   :  { %23662 = vst [vmem:[#allocation4_spill] sm:$0xff] %v21567_v47  ;;  %v23665_v5 = vld [vmem:[#allocation9_spill] sm:$0xff] }
 0x69f   :  { %v7082_v10 = vpop.f32.mrf.mxu1  ;;  %v8323_v30 = vpop.f32.mrf.mxu0 }
 0x6a0   :  { %v7368_v45 = vmax.f32 %v23663_v51, %v7082_v10  ;;  %v21580_v21 = vmax.f32 %v7366_v9, %v8323_v30 }
 0x6a1   :  { %v16330_v54 = vpop.f32.mrf.mxu1  ;;  %v16578_v61 = vpop.f32.mrf.mxu0 }
 0x6a2   :  { %23664 = vst [vmem:[#allocation5_spill] sm:$0xff] %v21580_v21 }
 0x6a3   :  { %v7087_v29 = vpop.f32.mrf.mxu1  ;;  %16428 = vmatmul.mubr.msk.bf16.gmra.mxu1 %vm467_vm2, %v17630_v63  ;;  %v8328_v31 = vpop.f32.mrf.mxu0  ;;  %16676 = vmatmul.mubr.msk.bf16.gmra.mxu0 %vm467_vm2, %v17631_v49  ;;  %v17632_v63 = vld [vmem:[%s23251_s0 + $0xb4c] sm:$0xff]  }
 0x6a4   :  { %v7369_v47 = vmax.f32 %v23665_v5, %v7087_v29  ;;  %v21585_v39 = vmax.f32 %v7367_v8, %v8328_v31  ;;  %16431 = vmatprep.mubr.msk.bf16.mxu1 %vm17772_vm1, %v23331_v15  ;;  %16679 = vmatprep.mubr.msk.bf16.mxu0 %vm17772_vm1, %v23331_v15  ;;  %v17633_v49 = vld [vmem:[%s23251_s0 + $0xd28] sm:$0xff]   ;;  %v23667_v8 = vld [vmem:[#allocation10_spill] sm:$0xff] }
 0x6a5   :  { %v16333_v9 = vpop.f32.mrf.mxu1  ;;  %v16581_v10 = vpop.f32.mrf.mxu0 }
 0x6a6   :  { %23666 = vst [vmem:[#allocation6_spill] sm:$0xff] %v21585_v39  ;;  %v23669_v10 = vld [vmem:[#allocation11_spill] sm:$0xff] }
 0x6a7   :  { %v7090_v30 = vpop.f32.mrf.mxu1  ;;  %v8331_v51 = vpop.f32.mrf.mxu0 }
 0x6a8   :  { %v7370_v54 = vmax.f32 %v23667_v8, %v7090_v30  ;;  %v21598_v61 = vmax.f32 %v7368_v45, %v8331_v51 }
 0x6a9   :  { %v16334_v29 = vpop.f32.mrf.mxu1  ;;  %v16582_v31 = vpop.f32.mrf.mxu0 }
 0x6aa   :  { %23668 = vst [vmem:[#allocation7_spill] sm:$0xff] %v21598_v61 }
 0x6ab   :  { %v7095_v5 = vpop.f32.mrf.mxu1  ;;  %16432 = vmatmul.mubr.msk.bf16.gmra.mxu1 %vm467_vm2, %v17632_v63  ;;  %v8336_v9 = vpop.f32.mrf.mxu0  ;;  %16680 = vmatmul.mubr.msk.bf16.gmra.mxu0 %vm467_vm2, %v17633_v49  ;;  %v17634_v63 = vld [vmem:[%s23251_s0 + $0xb54] ss:$0 sps:$4 sm:$0xff]  }
 0x6ac   :  { %v7371_v39 = vmax.f32 %v23669_v10, %v7095_v5  ;;  %v21603_v21 = vmax.f32 %v7369_v47, %v8336_v9  ;;  %16435 = vmatprep.mubr.msk.bf16.mxu1 %vm17772_vm1, %v23331_v15  ;;  %16683 = vmatprep.mubr.msk.bf16.mxu0 %vm17772_vm1, %v23331_v15  ;;  %v17635_v49 = vld [vmem:[%s23251_s0 + $0xd30] sm:$0xff]  }
 0x6ad   :  { %v16337_v45 = vpop.f32.mrf.mxu1  ;;  %v16585_v30 = vpop.f32.mrf.mxu0  ;;  %v23671_v47 = vld [vmem:[#allocation12_spill] sm:$0xff] }
 0x6ae   :  { %23670 = vst [vmem:[#allocation8_spill] sm:$0xff] %v21603_v21  ;;  %v23673_v30 = vld [vmem:[#allocation13_spill] sm:$0xff] }
 0x6af   :  { %v7098_v51 = vpop.f32.mrf.mxu1  ;;  %v8339_v8 = vpop.f32.mrf.mxu0 }
 0x6b0   :  { %v7372_v29 = vmax.f32 %v23671_v47, %v7098_v51  ;;  %v21616_v31 = vmax.f32 %v7370_v54, %v8339_v8 }
 0x6b1   :  { %v16338_v5 = vpop.f32.mrf.mxu1  ;;  %v16586_v9 = vpop.f32.mrf.mxu0 }
 0x6b2   :  { %23672 = vst [vmem:[#allocation9_spill] sm:$0xff] %v21616_v31 }
 0x6b3   :  { %v7103_v10 = vpop.f32.mrf.mxu1  ;;  %16436 = vmatmul.mubr.msk.bf16.gmra.mxu1 %vm467_vm2, %v17634_v63  ;;  %v8344_v45 = vpop.f32.mrf.mxu0  ;;  %16684 = vmatmul.mubr.msk.bf16.gmra.mxu0 %vm467_vm2, %v17635_v49  ;;  %v17636_v63 = vld [vmem:[%s23251_s0 + $0xd38] ss:$0 sps:$4 sm:$0xff]   ;;  %v17637_v49 = vld [vmem:[%s23251_s0 + $0xd3c] sm:$0xff]  }
 0x6b4   :  { %v7373_v21 = vmax.f32 %v23673_v30, %v7103_v10  ;;  %v21621_v61 = vmax.f32 %v7371_v39, %v8344_v45  ;;  %16687 = vmatprep.mubr.msk.bf16.mxu0 %vm17772_vm1, %v23331_v15  ;;  %16699 = vmatprep.mubr.msk.bf16.mxu1 %vm17772_vm1, %v23331_v15  ;;  %v23675_v39 = vld [vmem:[#allocation14_spill] sm:$0xff] }
 0x6b5   :  { %v16341_v54 = vpop.f32.mrf.mxu1  ;;  %v16589_v51 = vpop.f32.mrf.mxu0 }
 0x6b6   :  { %23674 = vst [vmem:[#allocation10_spill] sm:$0xff] %v21621_v61  ;;  %v23677_v54 = vld [vmem:[#allocation15_spill] sm:$0xff] }
 0x6b7   :  { %v7106_v8 = vpop.f32.mrf.mxu1  ;;  %v8347_v47 = vpop.f32.mrf.mxu0 }
 0x6b8   :  { %v7374_v5 = vmax.f32 %v23675_v39, %v7106_v8  ;;  %v21634_v9 = vmax.f32 %v7372_v29, %v8347_v47 }
 0x6b9   :  { %v16342_v10 = vpop.f32.mrf.mxu1  ;;  %v16590_v45 = vpop.f32.mrf.mxu0 }
 0x6ba   :  { %23676 = vst [vmem:[#allocation11_spill] sm:$0xff] %v21634_v9 }
 0x6bb   :  { %v7111_v30 = vpop.f32.mrf.mxu1  ;;  %v8352_v61 = vpop.f32.mrf.mxu0  ;;  %16688 = vmatmul.mubr.msk.bf16.gmra.mxu0 %vm467_vm2, %v17636_v63  ;;  %16700 = vmatmul.mubr.msk.bf16.vlgmr.msra.gmra.mxu1 %vm467_vm2, %v17637_v49  ;;  %v17638_v63 = vld [vmem:[%s23251_s0 + $0xd44] sm:$0xff]  }
 0x6bc   :  { %v7375_v51 = vmax.f32 %v23677_v54, %v7111_v30  ;;  %v21639_v31 = vmax.f32 %v7373_v21, %v8352_v61  ;;  %16703 = vmatprep.mubr.msk.bf16.mxu1 %vm17772_vm1, %v23331_v15  ;;  %16951 = vmatprep.mubr.msk.bf16.mxu0 %vm17772_vm1, %v23331_v15  ;;  %v17639_v49 = vld [vmem:[%s23251_s0 + $0xf20] sm:$0xff]  }
 0x6bd   :  { %v16345_v29 = vpop.f32.mrf.mxu1  ;;  %v16593_v8 = vpop.f32.mrf.mxu0  ;;  %v23679_v21 = vld [vmem:[#allocation2_spill] sm:$0xff] }
 0x6be   :  { %23678 = vst [vmem:[#allocation12_spill] sm:$0xff] %v21639_v31  ;;  %v23680_v29 = vld [vmem:[#allocation16_spill] sm:$0xff] }
 0x6bf   :  { %v7114_v47 = vpop.f32.mrf.mxu1  ;;  %v8355_v39 = vpop.f32.mrf.mxu0 }
 0x6c0   :  { %v7376_v61 = vmax.f32 %v23679_v21, %v7114_v47  ;;  %v21652_v10 = vmax.f32 %v7374_v5, %v8355_v39 }
 0x6c1   :  { %v16346_v45 = vpop.f32.mrf.mxu1  ;;  %v16594_v30 = vpop.f32.mrf.mxu0 }
 0x6c3   :  { %v7119_v54 = vpop.f32.mrf.mxu1  ;;  %v8360_v31 = vpop.f32.mrf.mxu0  ;;  %16704 = vmatmul.mubr.msk.bf16.gmra.mxu1 %vm467_vm2, %v17638_v63  ;;  %16952 = vmatmul.mubr.msk.bf16.vlgmr.msra.gmra.mxu0 %vm467_vm2, %v17639_v49  ;;  %v17640_v63 = vld [vmem:[%s23251_s0 + $0xd4c] sm:$0xff]  }
 0x6c4   :  { %v7377_v8 = vmax.f32 %v23680_v29, %v7119_v54  ;;  %v21657_v9 = vmax.f32 %v7375_v51, %v8360_v31  ;;  %16707 = vmatprep.mubr.msk.bf16.mxu1 %vm17772_vm1, %v23331_v15  ;;  %16955 = vmatprep.mubr.msk.bf16.mxu0 %vm17772_vm1, %v23331_v15  ;;  %v17641_v49 = vld [vmem:[%s23251_s0 + $0xf28] sm:$0xff]  }
 0x6c5   :  { %v16349_v5 = vpop.f32.mrf.mxu1  ;;  %v16597_v47 = vpop.f32.mrf.mxu0 }
 0x6c6   :  { %23681 = vst [vmem:[#allocation13_spill] sm:$0xff] %v21657_v9  ;;  %v23683_v5 = vld [vmem:[#allocation17_spill] sm:$0xff] }
 0x6c7   :  { %v7122_v39 = vpop.f32.mrf.mxu1  ;;  %v8363_v21 = vpop.f32.mrf.mxu0 }
 0x6c8   :  { %v7378_v31 = vmax.f32 %v20593_v62, %v7122_v39  ;;  %v21670_v51 = vmax.f32 %v7376_v61, %v8363_v21 }
 0x6c9   :  { %v16350_v45 = vpop.f32.mrf.mxu1  ;;  %v16598_v30 = vpop.f32.mrf.mxu0 }
 0x6ca   :  { %23682 = vst [vmem:[#allocation14_spill] sm:$0xff] %v21670_v51 }
 0x6cb   :  { %v7127_v54 = vpop.f32.mrf.mxu1  ;;  %v8368_v29 = vpop.f32.mrf.mxu0  ;;  %16708 = vmatmul.mubr.msk.bf16.gmra.mxu1 %vm467_vm2, %v17640_v63  ;;  %16956 = vmatmul.mubr.msk.bf16.gmra.mxu0 %vm467_vm2, %v17641_v49  ;;  %v17642_v63 = vld [vmem:[%s23251_s0 + $0xd54] sm:$0xff]  }
 0x6cc   :  { %v7379_v47 = vmax.f32 %v23683_v5, %v7127_v54  ;;  %v21675_v9 = vmax.f32 %v7377_v8, %v8368_v29  ;;  %16711 = vmatprep.mubr.msk.bf16.mxu1 %vm17772_vm1, %v23331_v15  ;;  %16959 = vmatprep.mubr.msk.bf16.mxu0 %vm17772_vm1, %v23331_v15  ;;  %v17643_v49 = vld [vmem:[%s23251_s0 + $0xf30] sm:$0xff]   ;;  %v23685_v8 = vld [vmem:[#allocation18_spill] sm:$0xff] }
 0x6cd   :  { %v16353_v62 = vpop.f32.mrf.mxu1  ;;  %v16601_v61 = vpop.f32.mrf.mxu0 }
 0x6ce   :  { %23684 = vst [vmem:[#allocation15_spill] sm:$0xff] %v21675_v9  ;;  %v23687_v62 = vld [vmem:[#allocation19_spill] sm:$0xff] }
 0x6cf   :  { %v7130_v39 = vpop.f32.mrf.mxu1  ;;  %v8371_v21 = vpop.f32.mrf.mxu0 }
 0x6d0   :  { %v7380_v45 = vmax.f32 %v23685_v8, %v7130_v39  ;;  %v21688_v30 = vmax.f32 %v7378_v31, %v8371_v21 }
 0x6d1   :  { %v16354_v54 = vpop.f32.mrf.mxu1  ;;  %v16602_v29 = vpop.f32.mrf.mxu0 }
 0x6d2   :  { %23686 = vst [vmem:[#allocation2_spill] sm:$0xff] %v21688_v30 }
 0x6d3   :  { %v7135_v5 = vpop.f32.mrf.mxu1  ;;  %v8376_v9 = vpop.f32.mrf.mxu0  ;;  %16712 = vmatmul.mubr.msk.bf16.gmra.mxu1 %vm467_vm2, %v17642_v63  ;;  %16960 = vmatmul.mubr.msk.bf16.gmra.mxu0 %vm467_vm2, %v17643_v49  ;;  %v17644_v63 = vld [vmem:[%s23251_s0 + $0xd5c] sm:$0xff]  }
 0x6d4   :  { %v7381_v61 = vmax.f32 %v23687_v62, %v7135_v5  ;;  %v21693_v51 = vmax.f32 %v7379_v47, %v8376_v9  ;;  %16715 = vmatprep.mubr.msk.bf16.mxu1 %vm17772_vm1, %v23331_v15  ;;  %16963 = vmatprep.mubr.msk.bf16.mxu0 %vm17772_vm1, %v23331_v15  ;;  %v17645_v49 = vld [vmem:[%s23251_s0 + $0xf38] sm:$0xff]   ;;  %v23689_v9 = vld [vmem:[#allocation20_spill] sm:$0xff] }
 0x6d5   :  { %v16357_v31 = vpop.f32.mrf.mxu1  ;;  %v16605_v39 = vpop.f32.mrf.mxu0 }
 0x6d6   :  { %23688 = vst [vmem:[#allocation16_spill] sm:$0xff] %v21693_v51  ;;  %v23691_v31 = vld [vmem:[#allocation21_spill] sm:$0xff] }
 0x6d7   :  { %v7138_v21 = vpop.f32.mrf.mxu1  ;;  %v8379_v8 = vpop.f32.mrf.mxu0 }
 0x6d8   :  { %v7382_v47 = vmax.f32 %v23689_v9, %v7138_v21  ;;  %v21706_v54 = vmax.f32 %v7380_v45, %v8379_v8 }
 0x6d9   :  { %v16358_v29 = vpop.f32.mrf.mxu1  ;;  %v16606_v5 = vpop.f32.mrf.mxu0 }
 0x6da   :  { %23690 = vst [vmem:[#allocation17_spill] sm:$0xff] %v21706_v54 }
 0x6db   :  { %v7143_v62 = vpop.f32.mrf.mxu1  ;;  %v8384_v51 = vpop.f32.mrf.mxu0  ;;  %16716 = vmatmul.mubr.msk.bf16.gmra.mxu1 %vm467_vm2, %v17644_v63  ;;  %16964 = vmatmul.mubr.msk.bf16.gmra.mxu0 %vm467_vm2, %v17645_v49  ;;  %v17646_v63 = vld [vmem:[%s23251_s0 + $0xd64] sm:$0xff]  }
 0x6dc   :  { %v7383_v39 = vmax.f32 %v23691_v31, %v7143_v62  ;;  %v21711_v30 = vmax.f32 %v7381_v61, %v8384_v51  ;;  %16719 = vmatprep.mubr.msk.bf16.mxu1 %vm17772_vm1, %v23331_v15  ;;  %16967 = vmatprep.mubr.msk.bf16.mxu0 %vm17772_vm1, %v23331_v15  ;;  %v17647_v49 = vld [vmem:[%s23251_s0 + $0xf40] sm:$0xff]  }
 0x6dd   :  { %v16361_v45 = vpop.f32.mrf.mxu1  ;;  %v16609_v21 = vpop.f32.mrf.mxu0  ;;  %v23693_v51 = vld [vmem:[#allocation22_spill] sm:$0xff] }
 0x6de   :  { %23692 = vst [vmem:[#allocation18_spill] sm:$0xff] %v21711_v30  ;;  %v23695_v45 = vld [vmem:[#allocation23_spill] sm:$0xff] }
 0x6df   :  { %v7146_v8 = vpop.f32.mrf.mxu1  ;;  %v8387_v9 = vpop.f32.mrf.mxu0 }
 0x6e0   :  { %v7384_v61 = vmax.f32 %v23693_v51, %v7146_v8  ;;  %v21724_v29 = vmax.f32 %v7382_v47, %v8387_v9 }
 0x6e1   :  { %v16362_v5 = vpop.f32.mrf.mxu1  ;;  %v16610_v62 = vpop.f32.mrf.mxu0 }
 0x6e2   :  { %23694 = vst [vmem:[#allocation19_spill] sm:$0xff] %v21724_v29 }
 0x6e3   :  { %v7151_v31 = vpop.f32.mrf.mxu1  ;;  %v8392_v30 = vpop.f32.mrf.mxu0  ;;  %16720 = vmatmul.mubr.msk.bf16.gmra.mxu1 %vm467_vm2, %v17646_v63  ;;  %16968 = vmatmul.mubr.msk.bf16.gmra.mxu0 %vm467_vm2, %v17647_v49  ;;  %v17648_v63 = vld [vmem:[%s23251_s0 + $0xd6c] sm:$0xff]  }
 0x6e4   :  { %v7385_v21 = vmax.f32 %v23695_v45, %v7151_v31  ;;  %v21729_v54 = vmax.f32 %v7383_v39, %v8392_v30  ;;  %16723 = vmatprep.mubr.msk.bf16.mxu1 %vm17772_vm1, %v23331_v15  ;;  %16971 = vmatprep.mubr.msk.bf16.mxu0 %vm17772_vm1, %v23331_v15  ;;  %v17649_v49 = vld [vmem:[%s23251_s0 + $0xf48] sm:$0xff]   ;;  %v23697_v30 = vld [vmem:[#allocation24_spill] sm:$0xff] }
 0x6e5   :  { %v16365_v47 = vpop.f32.mrf.mxu1  ;;  %v16613_v8 = vpop.f32.mrf.mxu0 }
 0x6e6   :  { %23696 = vst [vmem:[#allocation20_spill] sm:$0xff] %v21729_v54  ;;  %v23699_v47 = vld [vmem:[#allocation25_spill] sm:$0xff] }
 0x6e7   :  { %v7154_v9 = vpop.f32.mrf.mxu1  ;;  %v8395_v51 = vpop.f32.mrf.mxu0 }
 0x6e8   :  { %v7386_v39 = vmax.f32 %v23697_v30, %v7154_v9  ;;  %v21742_v5 = vmax.f32 %v7384_v61, %v8395_v51 }
 0x6e9   :  { %v16366_v62 = vpop.f32.mrf.mxu1  ;;  %v16614_v31 = vpop.f32.mrf.mxu0 }
 0x6ea   :  { %23698 = vst [vmem:[#allocation21_spill] sm:$0xff] %v21742_v5 }
 0x6eb   :  { %v7159_v45 = vpop.f32.mrf.mxu1  ;;  %v8400_v54 = vpop.f32.mrf.mxu0  ;;  %16724 = vmatmul.mubr.msk.bf16.gmra.mxu1 %vm467_vm2, %v17648_v63  ;;  %16972 = vmatmul.mubr.msk.bf16.gmra.mxu0 %vm467_vm2, %v17649_v49  ;;  %v17650_v63 = vld [vmem:[%s23251_s0 + $0xd74] sm:$0xff]  }
 0x6ec   :  { %v7387_v8 = vmax.f32 %v23699_v47, %v7159_v45  ;;  %v21747_v29 = vmax.f32 %v7385_v21, %v8400_v54  ;;  %16727 = vmatprep.mubr.msk.bf16.mxu1 %vm17772_vm1, %v23331_v15  ;;  %16975 = vmatprep.mubr.msk.bf16.mxu0 %vm17772_vm1, %v23331_v15  ;;  %v17651_v49 = vld [vmem:[%s23251_s0 + $0xf50] sm:$0xff]   ;;  %v23701_v54 = vld [vmem:[#allocation26_spill] sm:$0xff] }
 0x6ed   :  { %v16369_v61 = vpop.f32.mrf.mxu1  ;;  %v16617_v9 = vpop.f32.mrf.mxu0 }
 0x6ee   :  { %23700 = vst [vmem:[#allocation22_spill] sm:$0xff] %v21747_v29  ;;  %v23703_v61 = vld [vmem:[#allocation27_spill] sm:$0xff] }
 0x6ef   :  { %v7162_v51 = vpop.f32.mrf.mxu1  ;;  %v8403_v30 = vpop.f32.mrf.mxu0 }
 0x6f0   :  { %v7388_v21 = vmax.f32 %v23701_v54, %v7162_v51  ;;  %v21760_v62 = vmax.f32 %v7386_v39, %v8403_v30 }
 0x6f1   :  { %v16370_v31 = vpop.f32.mrf.mxu1  ;;  %v16618_v45 = vpop.f32.mrf.mxu0 }
 0x6f2   :  { %23702 = vst [vmem:[#allocation23_spill] sm:$0xff] %v21760_v62 }
 0x6f3   :  { %v7167_v47 = vpop.f32.mrf.mxu1  ;;  %v8408_v29 = vpop.f32.mrf.mxu0  ;;  %16728 = vmatmul.mubr.msk.bf16.gmra.mxu1 %vm467_vm2, %v17650_v63  ;;  %16976 = vmatmul.mubr.msk.bf16.gmra.mxu0 %vm467_vm2, %v17651_v49  ;;  %v17652_v63 = vld [vmem:[%s23251_s0 + $0xd7c] sm:$0xff]  }
 0x6f4   :  { %v7389_v9 = vmax.f32 %v23703_v61, %v7167_v47  ;;  %v21765_v5 = vmax.f32 %v7387_v8, %v8408_v29  ;;  %16731 = vmatprep.mubr.msk.bf16.mxu1 %vm17772_vm1, %v23331_v15  ;;  %16979 = vmatprep.mubr.msk.bf16.mxu0 %vm17772_vm1, %v23331_v15  ;;  %v17653_v49 = vld [vmem:[%s23251_s0 + $0xf58] sm:$0xff]   ;;  %v23705_v29 = vld [vmem:[#allocation28_spill] sm:$0xff] }
 0x6f5   :  { %v16373_v39 = vpop.f32.mrf.mxu1  ;;  %v16621_v51 = vpop.f32.mrf.mxu0 }
 0x6f6   :  { %23704 = vst [vmem:[#allocation24_spill] sm:$0xff] %v21765_v5  ;;  %v23707_v39 = vld [vmem:[#allocation29_spill] sm:$0xff] }
 0x6f7   :  { %v7170_v30 = vpop.f32.mrf.mxu1  ;;  %v8411_v54 = vpop.f32.mrf.mxu0 }
 0x6f8   :  { %v7390_v8 = vmax.f32 %v23705_v29, %v7170_v30  ;;  %v21778_v31 = vmax.f32 %v7388_v21, %v8411_v54 }
 0x6f9   :  { %v16374_v45 = vpop.f32.mrf.mxu1  ;;  %v16622_v47 = vpop.f32.mrf.mxu0 }
 0x6fa   :  { %23706 = vst [vmem:[#allocation25_spill] sm:$0xff] %v21778_v31 }
 0x6fb   :  { %v7175_v61 = vpop.f32.mrf.mxu1  ;;  %v8416_v5 = vpop.f32.mrf.mxu0  ;;  %16732 = vmatmul.mubr.msk.bf16.gmra.mxu1 %vm467_vm2, %v17652_v63  ;;  %16980 = vmatmul.mubr.msk.bf16.gmra.mxu0 %vm467_vm2, %v17653_v49  ;;  %v17654_v63 = vld [vmem:[%s23251_s0 + $0xd84] sm:$0xff]  }
 0x6fc   :  { %v7391_v51 = vmax.f32 %v23707_v39, %v7175_v61  ;;  %v21783_v62 = vmax.f32 %v7389_v9, %v8416_v5  ;;  %16735 = vmatprep.mubr.msk.bf16.mxu1 %vm17772_vm1, %v23331_v15  ;;  %16983 = vmatprep.mubr.msk.bf16.mxu0 %vm17772_vm1, %v23331_v15  ;;  %v17655_v49 = vld [vmem:[%s23251_s0 + $0xf60] sm:$0xff]  }
 0x6fd   :  { %v16377_v21 = vpop.f32.mrf.mxu1  ;;  %v16625_v30 = vpop.f32.mrf.mxu0  ;;  %v23709_v5 = vld [vmem:[#allocation30_spill] sm:$0xff] }
 0x6fe   :  { %23708 = vst [vmem:[#allocation26_spill] sm:$0xff] %v21783_v62  ;;  %v23711_v21 = vld [vmem:[#allocation31_spill] sm:$0xff] }
 0x6ff   :  { %v7178_v54 = vpop.f32.mrf.mxu1  ;;  %v8419_v29 = vpop.f32.mrf.mxu0 }
 0x700   :  { %v7392_v9 = vmax.f32 %v23709_v5, %v7178_v54  ;;  %v21796_v45 = vmax.f32 %v7390_v8, %v8419_v29 }
 0x701   :  { %v16378_v47 = vpop.f32.mrf.mxu1  ;;  %v16626_v61 = vpop.f32.mrf.mxu0 }
 0x702   :  { %23710 = vst [vmem:[#allocation27_spill] sm:$0xff] %v21796_v45 }
 0x703   :  { %v7183_v39 = vpop.f32.mrf.mxu1  ;;  %v8424_v62 = vpop.f32.mrf.mxu0  ;;  %16736 = vmatmul.mubr.msk.bf16.gmra.mxu1 %vm467_vm2, %v17654_v63  ;;  %16984 = vmatmul.mubr.msk.bf16.gmra.mxu0 %vm467_vm2, %v17655_v49  ;;  %v17656_v63 = vld [vmem:[%s23251_s0 + $0xd8c] sm:$0xff]  }
 0x704   :  { %v7393_v30 = vmax.f32 %v23711_v21, %v7183_v39  ;;  %v21801_v31 = vmax.f32 %v7391_v51, %v8424_v62  ;;  %16739 = vmatprep.mubr.msk.bf16.mxu1 %vm17772_vm1, %v23331_v15  ;;  %16987 = vmatprep.mubr.msk.bf16.mxu0 %vm17772_vm1, %v23331_v15  ;;  %v17657_v49 = vld [vmem:[%s23251_s0 + $0xf68] sm:$0xff]   ;;  %v23713_v62 = vld [vmem:[#allocation32_spill] sm:$0xff] }
 0x705   :  { %v16381_v8 = vpop.f32.mrf.mxu1  ;;  %v16629_v54 = vpop.f32.mrf.mxu0 }
 0x706   :  { %23712 = vst [vmem:[#allocation28_spill] sm:$0xff] %v21801_v31  ;;  %v23715_v8 = vld [vmem:[#allocation33_spill] sm:$0xff] }
 0x707   :  { %v7186_v29 = vpop.f32.mrf.mxu1  ;;  %v8427_v5 = vpop.f32.mrf.mxu0 }
 0x708   :  { %v7394_v51 = vmax.f32 %v23713_v62, %v7186_v29  ;;  %v21814_v47 = vmax.f32 %v7392_v9, %v8427_v5 }
 0x709   :  { %v16382_v61 = vpop.f32.mrf.mxu1  ;;  %v16630_v39 = vpop.f32.mrf.mxu0 }
 0x70a   :  { %23714 = vst [vmem:[#allocation29_spill] sm:$0xff] %v21814_v47 }
 0x70b   :  { %v7191_v21 = vpop.f32.mrf.mxu1  ;;  %v8432_v31 = vpop.f32.mrf.mxu0  ;;  %16740 = vmatmul.mubr.msk.bf16.gmra.mxu1 %vm467_vm2, %v17656_v63  ;;  %16988 = vmatmul.mubr.msk.bf16.gmra.mxu0 %vm467_vm2, %v17657_v49  ;;  %v17658_v63 = vld [vmem:[%s23251_s0 + $0xd94] sm:$0xff]  }
 0x70c   :  { %v7395_v54 = vmax.f32 %v23715_v8, %v7191_v21  ;;  %v21819_v45 = vmax.f32 %v7393_v30, %v8432_v31  ;;  %16743 = vmatprep.mubr.msk.bf16.mxu1 %vm17772_vm1, %v23331_v15  ;;  %16991 = vmatprep.mubr.msk.bf16.mxu0 %vm17772_vm1, %v23331_v15  ;;  %v17659_v49 = vld [vmem:[%s23251_s0 + $0xf70] sm:$0xff]   ;;  %v23717_v31 = vld [vmem:[#allocation34_spill] sm:$0xff] }
 0x70d   :  { %v16385_v9 = vpop.f32.mrf.mxu1  ;;  %v16633_v29 = vpop.f32.mrf.mxu0 }
 0x70e   :  { %23716 = vst [vmem:[#allocation30_spill] sm:$0xff] %v21819_v45  ;;  %v23719_v9 = vld [vmem:[#allocation35_spill] sm:$0xff] }
 0x70f   :  { %v7194_v5 = vpop.f32.mrf.mxu1  ;;  %v8435_v62 = vpop.f32.mrf.mxu0 }
 0x710   :  { %v7396_v30 = vmax.f32 %v23717_v31, %v7194_v5  ;;  %v21832_v61 = vmax.f32 %v7394_v51, %v8435_v62 }
 0x711   :  { %v16386_v39 = vpop.f32.mrf.mxu1  ;;  %v16634_v21 = vpop.f32.mrf.mxu0 }
 0x712   :  { %23718 = vst [vmem:[#allocation31_spill] sm:$0xff] %v21832_v61 }
 0x713   :  { %v7199_v8 = vpop.f32.mrf.mxu1  ;;  %v8440_v45 = vpop.f32.mrf.mxu0  ;;  %16744 = vmatmul.mubr.msk.bf16.gmra.mxu1 %vm467_vm2, %v17658_v63  ;;  %16992 = vmatmul.mubr.msk.bf16.gmra.mxu0 %vm467_vm2, %v17659_v49  ;;  %v17660_v63 = vld [vmem:[%s23251_s0 + $0xd9c] sm:$0xff]  }
 0x714   :  { %v7397_v29 = vmax.f32 %v23719_v9, %v7199_v8  ;;  %v21837_v47 = vmax.f32 %v7395_v54, %v8440_v45  ;;  %16747 = vmatprep.mubr.msk.bf16.mxu1 %vm17772_vm1, %v23331_v15  ;;  %16995 = vmatprep.mubr.msk.bf16.mxu0 %vm17772_vm1, %v23331_v15  ;;  %v17661_v49 = vld [vmem:[%s23251_s0 + $0xf78] sm:$0xff]   ;;  %v23721_v45 = vld [vmem:[#allocation36_spill] sm:$0xff] }
 0x715   :  { %v16389_v51 = vpop.f32.mrf.mxu1  ;;  %v16637_v5 = vpop.f32.mrf.mxu0 }
 0x716   :  { %23720 = vst [vmem:[#allocation32_spill] sm:$0xff] %v21837_v47  ;;  %v23723_v51 = vld [vmem:[#allocation37_spill] sm:$0xff] }
 0x717   :  { %v7202_v62 = vpop.f32.mrf.mxu1  ;;  %v8443_v31 = vpop.f32.mrf.mxu0 }
 0x718   :  { %v7398_v54 = vmax.f32 %v23721_v45, %v7202_v62  ;;  %v21850_v39 = vmax.f32 %v7396_v30, %v8443_v31 }
 0x719   :  { %v16390_v21 = vpop.f32.mrf.mxu1  ;;  %v16638_v8 = vpop.f32.mrf.mxu0 }
 0x71a   :  { %23722 = vst [vmem:[#allocation33_spill] sm:$0xff] %v21850_v39 }
 0x71b   :  { %v7207_v9 = vpop.f32.mrf.mxu1  ;;  %v8448_v47 = vpop.f32.mrf.mxu0  ;;  %16748 = vmatmul.mubr.msk.bf16.gmra.mxu1 %vm467_vm2, %v17660_v63  ;;  %16996 = vmatmul.mubr.msk.bf16.gmra.mxu0 %vm467_vm2, %v17661_v49  ;;  %v17662_v63 = vld [vmem:[%s23251_s0 + $0xda4] sm:$0xff]  }
 0x71c   :  { %v7399_v5 = vmax.f32 %v23723_v51, %v7207_v9  ;;  %v21855_v61 = vmax.f32 %v7397_v29, %v8448_v47  ;;  %16751 = vmatprep.mubr.msk.bf16.mxu1 %vm17772_vm1, %v23331_v15  ;;  %16999 = vmatprep.mubr.msk.bf16.mxu0 %vm17772_vm1, %v23331_v15  ;;  %v17663_v49 = vld [vmem:[%s23251_s0 + $0xf80] sm:$0xff]  }
 0x71d   :  { %v16393_v30 = vpop.f32.mrf.mxu1  ;;  %v16641_v62 = vpop.f32.mrf.mxu0  ;;  %v23725_v47 = vld [vmem:[#allocation38_spill] sm:$0xff] }
 0x71e   :  { %23724 = vst [vmem:[#allocation34_spill] sm:$0xff] %v21855_v61  ;;  %v23727_v30 = vld [vmem:[#allocation39_spill] sm:$0xff] }
 0x71f   :  { %v7210_v31 = vpop.f32.mrf.mxu1  ;;  %v8451_v45 = vpop.f32.mrf.mxu0 }
 0x720   :  { %v7400_v29 = vmax.f32 %v23725_v47, %v7210_v31  ;;  %v21868_v21 = vmax.f32 %v7398_v54, %v8451_v45 }
 0x721   :  { %v16394_v8 = vpop.f32.mrf.mxu1  ;;  %v16642_v9 = vpop.f32.mrf.mxu0 }
 0x722   :  { %23726 = vst [vmem:[#allocation35_spill] sm:$0xff] %v21868_v21 }
 0x723   :  { %v7215_v51 = vpop.f32.mrf.mxu1  ;;  %v8456_v61 = vpop.f32.mrf.mxu0  ;;  %16752 = vmatmul.mubr.msk.bf16.gmra.mxu1 %vm467_vm2, %v17662_v63  ;;  %17000 = vmatmul.mubr.msk.bf16.gmra.mxu0 %vm467_vm2, %v17663_v49  ;;  %v17664_v63 = vld [vmem:[%s23251_s0 + $0xdac] sm:$0xff]  }
 0x724   :  { %v7401_v62 = vmax.f32 %v23727_v30, %v7215_v51  ;;  %v21873_v39 = vmax.f32 %v7399_v5, %v8456_v61  ;;  %16755 = vmatprep.mubr.msk.bf16.mxu1 %vm17772_vm1, %v23331_v15  ;;  %17003 = vmatprep.mubr.msk.bf16.mxu0 %vm17772_vm1, %v23331_v15  ;;  %v17665_v49 = vld [vmem:[%s23251_s0 + $0xf88] sm:$0xff]   ;;  %v23729_v61 = vld [vmem:[#allocation40_spill] sm:$0xff] }
 0x725   :  { %v16397_v54 = vpop.f32.mrf.mxu1  ;;  %v16645_v31 = vpop.f32.mrf.mxu0 }
 0x726   :  { %23728 = vst [vmem:[#allocation36_spill] sm:$0xff] %v21873_v39  ;;  %v23731_v54 = vld [vmem:[#allocation41_spill] sm:$0xff] }
 0x727   :  { %v7218_v45 = vpop.f32.mrf.mxu1  ;;  %v8459_v47 = vpop.f32.mrf.mxu0 }
 0x728   :  { %v7402_v5 = vmax.f32 %v23729_v61, %v7218_v45  ;;  %v21886_v8 = vmax.f32 %v7400_v29, %v8459_v47 }
 0x729   :  { %v16398_v9 = vpop.f32.mrf.mxu1  ;;  %v16646_v51 = vpop.f32.mrf.mxu0 }
 0x72a   :  { %23730 = vst [vmem:[#allocation37_spill] sm:$0xff] %v21886_v8 }
 0x72b   :  { %v7223_v30 = vpop.f32.mrf.mxu1  ;;  %v8464_v39 = vpop.f32.mrf.mxu0  ;;  %16756 = vmatmul.mubr.msk.bf16.gmra.mxu1 %vm467_vm2, %v17664_v63  ;;  %17004 = vmatmul.mubr.msk.bf16.gmra.mxu0 %vm467_vm2, %v17665_v49  ;;  %v17666_v63 = vld [vmem:[%s23251_s0 + $0xdb4] sm:$0xff]  }
 0x72c   :  { %v7403_v31 = vmax.f32 %v23731_v54, %v7223_v30  ;;  %v21891_v21 = vmax.f32 %v7401_v62, %v8464_v39  ;;  %16759 = vmatprep.mubr.msk.bf16.mxu1 %vm17772_vm1, %v23331_v15  ;;  %17007 = vmatprep.mubr.msk.bf16.mxu0 %vm17772_vm1, %v23331_v15  ;;  %v17667_v49 = vld [vmem:[%s23251_s0 + $0xf90] sm:$0xff]   ;;  %v23733_v39 = vld [vmem:[#allocation42_spill] sm:$0xff] }
 0x72d   :  { %v16401_v29 = vpop.f32.mrf.mxu1  ;;  %v16649_v45 = vpop.f32.mrf.mxu0 }
 0x72e   :  { %23732 = vst [vmem:[#allocation38_spill] sm:$0xff] %v21891_v21  ;;  %v23735_v29 = vld [vmem:[#allocation43_spill] sm:$0xff] }
 0x72f   :  { %v7226_v47 = vpop.f32.mrf.mxu1  ;;  %v8467_v61 = vpop.f32.mrf.mxu0 }
 0x730   :  { %v7404_v62 = vmax.f32 %v23733_v39, %v7226_v47  ;;  %v21904_v9 = vmax.f32 %v7402_v5, %v8467_v61 }
 0x731   :  { %v16402_v51 = vpop.f32.mrf.mxu1  ;;  %v16650_v30 = vpop.f32.mrf.mxu0 }
 0x732   :  { %23734 = vst [vmem:[#allocation39_spill] sm:$0xff] %v21904_v9 }
 0x733   :  { %v7231_v54 = vpop.f32.mrf.mxu1  ;;  %v8472_v21 = vpop.f32.mrf.mxu0  ;;  %16760 = vmatmul.mubr.msk.bf16.gmra.mxu1 %vm467_vm2, %v17666_v63  ;;  %17008 = vmatmul.mubr.msk.bf16.gmra.mxu0 %vm467_vm2, %v17667_v49  ;;  %v17668_v63 = vld [vmem:[%s23251_s0 + $0xdbc] sm:$0xff]  }
 0x734   :  { %v7405_v45 = vmax.f32 %v23735_v29, %v7231_v54  ;;  %v21909_v8 = vmax.f32 %v7403_v31, %v8472_v21  ;;  %16763 = vmatprep.mubr.msk.bf16.mxu1 %vm17772_vm1, %v23331_v15  ;;  %17011 = vmatprep.mubr.msk.bf16.mxu0 %vm17772_vm1, %v23331_v15  ;;  %v17669_v49 = vld [vmem:[%s23251_s0 + $0xf98] sm:$0xff]   ;;  %v23737_v21 = vld [vmem:[#allocation44_spill] sm:$0xff] }
 0x735   :  { %v16405_v5 = vpop.f32.mrf.mxu1  ;;  %v16653_v47 = vpop.f32.mrf.mxu0 }
 0x736   :  { %23736 = vst [vmem:[#allocation40_spill] sm:$0xff] %v21909_v8  ;;  %v23739_v5 = vld [vmem:[#allocation45_spill] sm:$0xff] }
 0x737   :  { %v7234_v61 = vpop.f32.mrf.mxu1  ;;  %v8475_v39 = vpop.f32.mrf.mxu0 }
 0x738   :  { %v7406_v31 = vmax.f32 %v23737_v21, %v7234_v61  ;;  %v21922_v51 = vmax.f32 %v7404_v62, %v8475_v39 }
 0x739   :  { %v16406_v30 = vpop.f32.mrf.mxu1  ;;  %v16654_v54 = vpop.f32.mrf.mxu0 }
 0x73a   :  { %23738 = vst [vmem:[#allocation41_spill] sm:$0xff] %v21922_v51 }
 0x73b   :  { %v7239_v29 = vpop.f32.mrf.mxu1  ;;  %v8480_v8 = vpop.f32.mrf.mxu0  ;;  %16764 = vmatmul.mubr.msk.bf16.gmra.mxu1 %vm467_vm2, %v17668_v63  ;;  %17012 = vmatmul.mubr.msk.bf16.gmra.mxu0 %vm467_vm2, %v17669_v49  ;;  %v17670_v63 = vld [vmem:[%s23251_s0 + $0xdc4] sm:$0xff]  }
 0x73c   :  { %v7407_v47 = vmax.f32 %v23739_v5, %v7239_v29  ;;  %v21927_v9 = vmax.f32 %v7405_v45, %v8480_v8  ;;  %16767 = vmatprep.mubr.msk.bf16.mxu1 %vm17772_vm1, %v23331_v15  ;;  %17015 = vmatprep.mubr.msk.bf16.mxu0 %vm17772_vm1, %v23331_v15  ;;  %v17671_v49 = vld [vmem:[%s23251_s0 + $0xfa0] sm:$0xff]  }
 0x73d   :  { %v16409_v62 = vpop.f32.mrf.mxu1  ;;  %v16657_v61 = vpop.f32.mrf.mxu0  ;;  %v23741_v8 = vld [vmem:[#allocation46_spill] sm:$0xff] }
 0x73e   :  { %23740 = vst [vmem:[#allocation42_spill] sm:$0xff] %v21927_v9  ;;  %v23743_v62 = vld [vmem:[#allocation47_spill] sm:$0xff] }
 0x73f   :  { %v7242_v39 = vpop.f32.mrf.mxu1  ;;  %v8483_v21 = vpop.f32.mrf.mxu0 }
 0x740   :  { %v7408_v45 = vmax.f32 %v23741_v8, %v7242_v39  ;;  %v21940_v30 = vmax.f32 %v7406_v31, %v8483_v21 }
 0x741   :  { %v16410_v54 = vpop.f32.mrf.mxu1  ;;  %v16658_v29 = vpop.f32.mrf.mxu0 }
 0x742   :  { %23742 = vst [vmem:[#allocation43_spill] sm:$0xff] %v21940_v30 }
 0x743   :  { %v7247_v5 = vpop.f32.mrf.mxu1  ;;  %v8488_v9 = vpop.f32.mrf.mxu0  ;;  %16768 = vmatmul.mubr.msk.bf16.gmra.mxu1 %vm467_vm2, %v17670_v63  ;;  %17016 = vmatmul.mubr.msk.bf16.gmra.mxu0 %vm467_vm2, %v17671_v49  ;;  %v17672_v63 = vld [vmem:[%s23251_s0 + $0xdcc] sm:$0xff]  }
 0x744   :  { %v7409_v61 = vmax.f32 %v23743_v62, %v7247_v5  ;;  %v21945_v51 = vmax.f32 %v7407_v47, %v8488_v9  ;;  %16771 = vmatprep.mubr.msk.bf16.mxu1 %vm17772_vm1, %v23331_v15  ;;  %17019 = vmatprep.mubr.msk.bf16.mxu0 %vm17772_vm1, %v23331_v15  ;;  %v17673_v49 = vld [vmem:[%s23251_s0 + $0xfa8] sm:$0xff]   ;;  %v23745_v9 = vld [vmem:[#allocation48_spill] sm:$0xff] }
 0x745   :  { %v16413_v31 = vpop.f32.mrf.mxu1  ;;  %v16661_v39 = vpop.f32.mrf.mxu0 }
 0x746   :  { %23744 = vst [vmem:[#allocation44_spill] sm:$0xff] %v21945_v51  ;;  %v23747_v31 = vld [vmem:[#allocation49_spill] sm:$0xff] }
 0x747   :  { %v7250_v21 = vpop.f32.mrf.mxu1  ;;  %v8491_v8 = vpop.f32.mrf.mxu0 }
 0x748   :  { %v7410_v47 = vmax.f32 %v23745_v9, %v7250_v21  ;;  %v21958_v54 = vmax.f32 %v7408_v45, %v8491_v8 }
 0x749   :  { %v16414_v29 = vpop.f32.mrf.mxu1  ;;  %v16662_v5 = vpop.f32.mrf.mxu0 }
 0x74a   :  { %23746 = vst [vmem:[#allocation45_spill] sm:$0xff] %v21958_v54 }
 0x74b   :  { %v7255_v62 = vpop.f32.mrf.mxu1  ;;  %v8496_v51 = vpop.f32.mrf.mxu0  ;;  %16772 = vmatmul.mubr.msk.bf16.gmra.mxu1 %vm467_vm2, %v17672_v63  ;;  %17020 = vmatmul.mubr.msk.bf16.gmra.mxu0 %vm467_vm2, %v17673_v49  ;;  %v17674_v63 = vld [vmem:[%s23251_s0 + $0xdd4] sm:$0xff]  }
 0x74c   :  { %v7411_v39 = vmax.f32 %v23747_v31, %v7255_v62  ;;  %v21963_v30 = vmax.f32 %v7409_v61, %v8496_v51  ;;  %16775 = vmatprep.mubr.msk.bf16.mxu1 %vm17772_vm1, %v23331_v15  ;;  %17023 = vmatprep.mubr.msk.bf16.mxu0 %vm17772_vm1, %v23331_v15  ;;  %v17675_v49 = vld [vmem:[%s23251_s0 + $0xfb0] sm:$0xff]   ;;  %v23749_v51 = vld [vmem:[#allocation50_spill] sm:$0xff] }
 0x74d   :  { %v16417_v45 = vpop.f32.mrf.mxu1  ;;  %v16665_v21 = vpop.f32.mrf.mxu0 }
 0x74e   :  { %23748 = vst [vmem:[#allocation46_spill] sm:$0xff] %v21963_v30  ;;  %v23751_v45 = vld [vmem:[#allocation51_spill] sm:$0xff] }
 0x74f   :  { %v7258_v8 = vpop.f32.mrf.mxu1  ;;  %v8499_v9 = vpop.f32.mrf.mxu0 }
 0x750   :  { %v7412_v61 = vmax.f32 %v23749_v51, %v7258_v8  ;;  %v21976_v29 = vmax.f32 %v7410_v47, %v8499_v9 }
 0x751   :  { %v16418_v5 = vpop.f32.mrf.mxu1  ;;  %v16666_v62 = vpop.f32.mrf.mxu0 }
 0x752   :  { %23750 = vst [vmem:[#allocation47_spill] sm:$0xff] %v21976_v29 }
 0x753   :  { %v7263_v31 = vpop.f32.mrf.mxu1  ;;  %v8504_v30 = vpop.f32.mrf.mxu0  ;;  %16776 = vmatmul.mubr.msk.bf16.gmra.mxu1 %vm467_vm2, %v17674_v63  ;;  %17024 = vmatmul.mubr.msk.bf16.gmra.mxu0 %vm467_vm2, %v17675_v49  ;;  %v17676_v63 = vld [vmem:[%s23251_s0 + $0xddc] sm:$0xff]  }
 0x754   :  { %v7413_v21 = vmax.f32 %v23751_v45, %v7263_v31  ;;  %v21981_v54 = vmax.f32 %v7411_v39, %v8504_v30  ;;  %16779 = vmatprep.mubr.msk.bf16.mxu1 %vm17772_vm1, %v23331_v15  ;;  %17027 = vmatprep.mubr.msk.bf16.mxu0 %vm17772_vm1, %v23331_v15  ;;  %v17677_v49 = vld [vmem:[%s23251_s0 + $0xfb8] sm:$0xff]   ;;  %v23753_v30 = vld [vmem:[#allocation52_spill] sm:$0xff] }
 0x755   :  { %v16421_v47 = vpop.f32.mrf.mxu1  ;;  %v16669_v8 = vpop.f32.mrf.mxu0 }
 0x756   :  { %23752 = vst [vmem:[#allocation48_spill] sm:$0xff] %v21981_v54  ;;  %v23754_v47 = vld [vmem:[#allocation53_spill] sm:$0xff] }
 0x757   :  { %v7266_v9 = vpop.f32.mrf.mxu1  ;;  %v8507_v51 = vpop.f32.mrf.mxu0 }
 0x758   :  { %v7414_v39 = vmax.f32 %v23753_v30, %v7266_v9  ;;  %v21994_v5 = vmax.f32 %v7412_v61, %v8507_v51 }
 0x759   :  { %v16422_v62 = vpop.f32.mrf.mxu1  ;;  %v16670_v31 = vpop.f32.mrf.mxu0 }
 0x75b   :  { %v7271_v45 = vpop.f32.mrf.mxu1  ;;  %v8512_v54 = vpop.f32.mrf.mxu0  ;;  %16780 = vmatmul.mubr.msk.bf16.gmra.mxu1 %vm467_vm2, %v17676_v63  ;;  %17028 = vmatmul.mubr.msk.bf16.gmra.mxu0 %vm467_vm2, %v17677_v49  ;;  %v17678_v63 = vld [vmem:[%s23251_s0 + $0xde4] sm:$0xff]  }
 0x75c   :  { %v7415_v8 = vmax.f32 %v23754_v47, %v7271_v45  ;;  %v21999_v29 = vmax.f32 %v7413_v21, %v8512_v54  ;;  %16783 = vmatprep.mubr.msk.bf16.mxu1 %vm17772_vm1, %v23331_v15  ;;  %17031 = vmatprep.mubr.msk.bf16.mxu0 %vm17772_vm1, %v23331_v15  ;;  %v17679_v49 = vld [vmem:[%s23251_s0 + $0xfc0] sm:$0xff]  }
 0x75d   :  { %v16425_v61 = vpop.f32.mrf.mxu1  ;;  %v16673_v9 = vpop.f32.mrf.mxu0 }
 0x75f   :  { %v7274_v51 = vpop.f32.mrf.mxu1  ;;  %v8515_v30 = vpop.f32.mrf.mxu0 }
 0x760   :  { %v7416_v54 = vmax.f32 %v20935_v28, %v7274_v51  ;;  %v22012_v21 = vmax.f32 %v7414_v39, %v8515_v30 }
 0x761   :  { %v16426_v62 = vpop.f32.mrf.mxu1  ;;  %v16674_v31 = vpop.f32.mrf.mxu0 }
 0x763   :  { %v7279_v45 = vpop.f32.mrf.mxu1  ;;  %v8520_v47 = vpop.f32.mrf.mxu0  ;;  %16784 = vmatmul.mubr.msk.bf16.gmra.mxu1 %vm467_vm2, %v17678_v63  ;;  %17032 = vmatmul.mubr.msk.bf16.gmra.mxu0 %vm467_vm2, %v17679_v49  ;;  %v17680_v63 = vld [vmem:[%s23251_s0 + $0xdec] sm:$0xff]  }
 0x764   :  { %v7417_v61 = vmax.f32 %v20940_v57, %v7279_v45  ;;  %v22017_v9 = vmax.f32 %v7415_v8, %v8520_v47  ;;  %16787 = vmatprep.mubr.msk.bf16.mxu1 %vm17772_vm1, %v23331_v15  ;;  %17035 = vmatprep.mubr.msk.bf16.mxu0 %vm17772_vm1, %v23331_v15  ;;  %v17681_v57 = vld [vmem:[%s23251_s0 + $0xfc8] sm:$0xff]  }
 0x765   :  { %v16429_v28 = vpop.f32.mrf.mxu1  ;;  %v16677_v39 = vpop.f32.mrf.mxu0 }
 0x767   :  { %v7282_v51 = vpop.f32.mrf.mxu1  ;;  %v8523_v30 = vpop.f32.mrf.mxu0 }
 0x768   :  { %v7418_v8 = vmax.f32 %v20953_v35, %v7282_v51  ;;  %v22030_v49 = vmax.f32 %v7416_v54, %v8523_v30 }
 0x769   :  { %v16430_v62 = vpop.f32.mrf.mxu1  ;;  %v16678_v31 = vpop.f32.mrf.mxu0 }
 0x76b   :  { %v7287_v45 = vpop.f32.mrf.mxu1  ;;  %v8528_v47 = vpop.f32.mrf.mxu0  ;;  %16788 = vmatmul.mubr.msk.bf16.gmra.mxu1 %vm467_vm2, %v17680_v63  ;;  %17036 = vmatmul.mubr.msk.bf16.gmra.mxu0 %vm467_vm2, %v17681_v57  ;;  %v17682_v63 = vld [vmem:[%s23251_s0 + $0xdf4] sm:$0xff]  }
 0x76c   :  { %v7419_v28 = vmax.f32 %v20958_v44, %v7287_v45  ;;  %v22035_v39 = vmax.f32 %v7417_v61, %v8528_v47  ;;  %16791 = vmatprep.mubr.msk.bf16.mxu1 %vm17772_vm1, %v23331_v15  ;;  %17039 = vmatprep.mubr.msk.bf16.mxu0 %vm17772_vm1, %v23331_v15  ;;  %v17683_v44 = vld [vmem:[%s23251_s0 + $0xfd0] sm:$0xff]  }
 0x76d   :  { %v16433_v35 = vpop.f32.mrf.mxu1  ;;  %v16681_v54 = vpop.f32.mrf.mxu0 }
 0x76f   :  { %v7290_v51 = vpop.f32.mrf.mxu1  ;;  %v8531_v30 = vpop.f32.mrf.mxu0 }
 0x770   :  { %v7420_v61 = vmax.f32 %v20970_v48, %v7290_v51  ;;  %v22048_v57 = vmax.f32 %v7418_v8, %v8531_v30 }
 0x771   :  { %v16434_v62 = vpop.f32.mrf.mxu1  ;;  %v16682_v31 = vpop.f32.mrf.mxu0 }
 0x773   :  { %v7295_v45 = vpop.f32.mrf.mxu1  ;;  %v8536_v47 = vpop.f32.mrf.mxu0  ;;  %16792 = vmatmul.mubr.msk.bf16.gmra.mxu1 %vm467_vm2, %v17682_v63  ;;  %17040 = vmatmul.mubr.msk.bf16.gmra.mxu0 %vm467_vm2, %v17683_v44  ;;  %v17684_v63 = vld [vmem:[%s23251_s0 + $0xdfc] sm:$0xff]  }
 0x774   :  { %v7421_v35 = vmax.f32 %v20974_v37, %v7295_v45  ;;  %v22053_v54 = vmax.f32 %v7419_v28, %v8536_v47  ;;  %16795 = vmatprep.mubr.msk.bf16.mxu1 %vm17772_vm1, %v23331_v15  ;;  %17043 = vmatprep.mubr.msk.bf16.mxu0 %vm17772_vm1, %v23331_v15  ;;  %v17685_v37 = vld [vmem:[%s23251_s0 + $0xfd8] sm:$0xff]  }
 0x775   :  { %v16437_v48 = vpop.f32.mrf.mxu1  ;;  %v16685_v8 = vpop.f32.mrf.mxu0 }
 0x776   :  { %23755 = vst [vmem:[#allocation49_spill] sm:$0xff] %v22053_v54 }
 0x777   :  { %v7298_v51 = vpop.f32.mrf.mxu1  ;;  %v8539_v30 = vpop.f32.mrf.mxu0 }
 0x778   :  { %v22065_v28 = vmax.f32 %v7420_v61, %v8539_v30  ;;  %v17686_v30 = vld [vmem:[%s23251_s0 + $0xe04] sm:$0xff]  }
 0x779   :  { %v16438_v44 = vpop.f32.mrf.mxu1  ;;  %v16686_v62 = vpop.f32.mrf.mxu0 }
 0x77a   :  { %23756 = vst [vmem:[#allocation50_spill] sm:$0xff] %v22065_v28 }
 0x77b   :  { %v8544_v31 = vpop.f32.mrf.mxu0  ;;  %v9313_v45 = vpop.f32.mrf.mxu1  ;;  %16796 = vmatmul.mubr.msk.bf16.gmra.mxu1 %vm467_vm2, %v17684_v63  ;;  %17044 = vmatmul.mubr.msk.bf16.gmra.mxu0 %vm467_vm2, %v17685_v37  ;;  %v17687_v63 = vld [vmem:[%s23251_s0 + $0xfe0] sm:$0xff]  }
 0x77c   :  { %v22069_v47 = vmax.f32 %v7421_v35, %v8544_v31  ;;  %16799 = vmatprep.mubr.msk.bf16.mxu1 %vm17772_vm1, %v23331_v15  ;;  %17047 = vmatprep.mubr.msk.bf16.mxu0 %vm17772_vm1, %v23331_v15  ;;  %v9799_v44 = vmax.f32 %v20991_v4, %v9313_v45 }
 0x77d   :  { %v16689_v48 = vpop.f32.mrf.mxu0  ;;  %v16701_v8 = vpop.f32.mrf.mxu1 }
 0x77e   :  { %23757 = vst [vmem:[#allocation51_spill] sm:$0xff] %v22069_v47  ;;  %v22086_v48 = vld [vmem:[%s23252_s2] ss:$0 sm:$0xff]  ;;  %v17688_v47 = vld [vmem:[%s23251_s0 + $0xe0c] sm:$0xff]  }
 0x77f   :  { %v8547_v61 = vpop.f32.mrf.mxu0  ;;  %v9316_v51 = vpop.f32.mrf.mxu1 }
 0x780   :  { %v9800_v45 = vmax.f32 %v21004_v53, %v9316_v51 }
 0x781   :  { %v16690_v35 = vpop.f32.mrf.mxu0  ;;  %v16702_v37 = vpop.f32.mrf.mxu1 }
 0x783   :  { %v9321_v62 = vpop.f32.mrf.mxu1  ;;  %16800 = vmatmul.mubr.msk.bf16.gmra.mxu1 %vm467_vm2, %v17686_v30  ;;  %v10562_v31 = vpop.f32.mrf.mxu0  ;;  %17048 = vmatmul.mubr.msk.bf16.gmra.mxu0 %vm467_vm2, %v17687_v63  ;;  %v17689_v63 = vld [vmem:[%s23251_s0 + $0xfe8] sm:$0xff]  }
 0x784   :  { %v11048_v8 = vmax.f32 %v9799_v44, %v10562_v31  ;;  %16803 = vmatprep.mubr.msk.bf16.mxu1 %vm17772_vm1, %v23331_v15  ;;  %17051 = vmatprep.mubr.msk.bf16.mxu0 %vm17772_vm1, %v23331_v15 }
 0x785   :  { %v16705_v61 = vpop.f32.mrf.mxu1  ;;  %v16953_v4 = vpop.f32.mrf.mxu0 }
 0x786   :  { %v11176_v30 = vadd.f32 %v22086_v48, %v11048_v8  ;;  %v9801_v4 = vmax.f32 %v21009_v43, %v9321_v62 }
 0x787   :  { %v9324_v35 = vpop.f32.mrf.mxu1  ;;  %v10565_v37 = vpop.f32.mrf.mxu0 }
 0x788   :  { %v11297_v44 = vmax.f32 %v11176_v30, 0.0  ;;  %v11049_v31 = vmax.f32 %v9800_v45, %v10565_v37 }
 0x789   :  { %v16706_v28 = vpop.f32.mrf.mxu1  ;;  %v16954_v61 = vpop.f32.mrf.mxu0 }
 0x78a   :  { %v14221_v53 = vpack.c.bf16 %v11297_v44, %v11297_v44  ;;  %v11177_v51 = vadd.f32 %v22086_v48, %v11049_v31  ;;  %v17690_v31 = vld [vmem:[%s23251_s0 + $0xe14] sm:$0xff]  }
 0x78b   :  { %v9329_v8 = vpop.f32.mrf.mxu1  ;;  %16804 = vmatmul.mubr.msk.bf16.gmra.mxu1 %vm467_vm2, %v17688_v47  ;;  %v10570_v54 = vpop.f32.mrf.mxu0  ;;  %17052 = vmatmul.mubr.msk.bf16.gmra.mxu0 %vm467_vm2, %v17689_v63  ;;  %v9802_v47 = vmax.f32 %v21022_v40, %v9324_v35 }
 0x78c   :  { %11904 = vst.msk [vmem:[%s23253_s3] sm:$0xf] %vm11903_vm3, %v14221_v53  ;;  %v11298_v45 = vmax.f32 %v11177_v51, 0.0  ;;  %v11050_v30 = vmax.f32 %v9801_v4, %v10570_v54  ;;  %16807 = vmatprep.mubr.msk.bf16.mxu1 %vm17772_vm1, %v23331_v15  ;;  %17055 = vmatprep.mubr.msk.bf16.mxu0 %vm17772_vm1, %v23331_v15  ;;  %v17691_v54 = vld [vmem:[%s23251_s0 + $0xff0] sm:$0xff]   ;;  %v9803_v53 = vmax.f32 %v21027_v50, %v9329_v8 }
 0x78d   :  { %v16709_v43 = vpop.f32.mrf.mxu1  ;;  %v16957_v28 = vpop.f32.mrf.mxu0 }
 0x78e   :  { %v14222_v62 = vpack.c.bf16 %v11298_v45, %v11298_v45  ;;  %v11178_v37 = vadd.f32 %v22086_v48, %v11050_v30 }
 0x78f   :  { %v9332_v63 = vpop.f32.mrf.mxu1  ;;  %v10573_v44 = vpop.f32.mrf.mxu0 }
 0x790   :  { %11905 = vst.msk [vmem:[%s23253_s3 + $0x4] sm:$0xf] %vm11903_vm3, %v14222_v62  ;;  %v11299_v61 = vmax.f32 %v11178_v37, 0.0  ;;  %v11051_v40 = vmax.f32 %v9802_v47, %v10573_v44  ;;  %v9804_v62 = vmax.f32 %v21040_v60, %v9332_v63 }
 0x791   :  { %v16710_v35 = vpop.f32.mrf.mxu1  ;;  %v16958_v4 = vpop.f32.mrf.mxu0 }
 0x792   :  { %v14223_v51 = vpack.c.bf16 %v11299_v61, %v11299_v61  ;;  %v11179_v45 = vadd.f32 %v22086_v48, %v11051_v40  ;;  %v17692_v61 = vld [vmem:[%s23251_s0 + $0xe1c] sm:$0xff]  }
 0x793   :  { %v9337_v30 = vpop.f32.mrf.mxu1  ;;  %16808 = vmatmul.mubr.msk.bf16.gmra.mxu1 %vm467_vm2, %v17690_v31  ;;  %v10578_v43 = vpop.f32.mrf.mxu0  ;;  %17056 = vmatmul.mubr.msk.bf16.gmra.mxu0 %vm467_vm2, %v17691_v54  ;;  %v17693_v40 = vld [vmem:[%s23251_s0 + $0xff8] sm:$0xff]  }
 0x794   :  { %11906 = vst.msk [vmem:[%s23253_s3 + $0x8] sm:$0xf] %vm11903_vm3, %v14223_v51  ;;  %v11300_v28 = vmax.f32 %v11179_v45, 0.0  ;;  %v11052_v47 = vmax.f32 %v9803_v53, %v10578_v43  ;;  %16811 = vmatprep.mubr.msk.bf16.mxu1 %vm17772_vm1, %v23331_v15  ;;  %17059 = vmatprep.mubr.msk.bf16.mxu0 %vm17772_vm1, %v23331_v15  ;;  %v9805_v53 = vmax.f32 %v21045_v34, %v9337_v30 }
 0x795   :  { %v16713_v50 = vpop.f32.mrf.mxu1  ;;  %v16961_v8 = vpop.f32.mrf.mxu0 }
 0x796   :  { %v14224_v37 = vpack.c.bf16 %v11300_v28, %v11300_v28  ;;  %v11180_v44 = vadd.f32 %v22086_v48, %v11052_v47 }
 0x797   :  { %v9340_v31 = vpop.f32.mrf.mxu1  ;;  %v10581_v54 = vpop.f32.mrf.mxu0 }
 0x798   :  { %11907 = vst.msk [vmem:[%s23253_s3 + $0xc] sm:$0xf] %vm11903_vm3, %v14224_v37  ;;  %v11301_v35 = vmax.f32 %v11180_v44, 0.0  ;;  %v11053_v60 = vmax.f32 %v9804_v62, %v10581_v54  ;;  %v9806_v8 = vmax.f32 %v21058_v33, %v9340_v31 }
 0x799   :  { %v16714_v63 = vpop.f32.mrf.mxu1  ;;  %v16962_v4 = vpop.f32.mrf.mxu0 }
 0x79a   :  { %v14225_v51 = vpack.c.bf16 %v11301_v35, %v11301_v35  ;;  %v11181_v45 = vadd.f32 %v22086_v48, %v11053_v60 }
 0x79b   :  { %v9345_v43 = vpop.f32.mrf.mxu1  ;;  %16812 = vmatmul.mubr.msk.bf16.gmra.mxu1 %vm467_vm2, %v17692_v61  ;;  %v10586_v28 = vpop.f32.mrf.mxu0  ;;  %17060 = vmatmul.mubr.msk.bf16.gmra.mxu0 %vm467_vm2, %v17693_v40  ;;  %v17694_v61 = vld [vmem:[%s23251_s0 + $0xe24] sm:$0xff]  }
 0x79c   :  { %11908 = vst.msk [vmem:[%s23253_s3 + $0x10] sm:$0xf] %vm11903_vm3, %v14225_v51  ;;  %v11302_v47 = vmax.f32 %v11181_v45, 0.0  ;;  %v11054_v50 = vmax.f32 %v9805_v53, %v10586_v28  ;;  %16815 = vmatprep.mubr.msk.bf16.mxu1 %vm17772_vm1, %v23331_v15  ;;  %17063 = vmatprep.mubr.msk.bf16.mxu0 %vm17772_vm1, %v23331_v15  ;;  %v17695_v40 = vld [vmem:[%s23251_s0 + $0x1000] sm:$0xff]   ;;  %v9807_v63 = vmax.f32 %v21063_v14, %v9345_v43 }
 0x79d   :  { %v16717_v34 = vpop.f32.mrf.mxu1  ;;  %v16965_v30 = vpop.f32.mrf.mxu0 }
 0x79e   :  { %v14226_v62 = vpack.c.bf16 %v11302_v47, %v11302_v47  ;;  %v11182_v37 = vadd.f32 %v22086_v48, %v11054_v50 }
 0x79f   :  { %v9348_v44 = vpop.f32.mrf.mxu1  ;;  %v10589_v54 = vpop.f32.mrf.mxu0 }
 0x7a0   :  { %11909 = vst.msk [vmem:[%s23253_s3 + $0x14] sm:$0xf] %vm11903_vm3, %v14226_v62  ;;  %v11303_v35 = vmax.f32 %v11182_v37, 0.0  ;;  %v11055_v33 = vmax.f32 %v9806_v8, %v10589_v54  ;;  %v9808_v50 = vmax.f32 %v21076_v23, %v9348_v44  ;;  %v17696_v37 = vld [vmem:[%s23251_s0 + $0xe2c] sm:$0xff]  }
 0x7a1   :  { %v16718_v31 = vpop.f32.mrf.mxu1  ;;  %v16966_v60 = vpop.f32.mrf.mxu0  ;;  %v17697_v54 = vld [vmem:[%s23251_s0 + $0x1008] sm:$0xff]  }
 0x7a2   :  { %v14227_v4 = vpack.c.bf16 %v11303_v35, %v11303_v35  ;;  %v11183_v53 = vadd.f32 %v22086_v48, %v11055_v33 }
 0x7a3   :  { %v9353_v51 = vpop.f32.mrf.mxu1  ;;  %16816 = vmatmul.mubr.msk.bf16.gmra.mxu1 %vm467_vm2, %v17694_v61  ;;  %v10594_v45 = vpop.f32.mrf.mxu0  ;;  %17064 = vmatmul.mubr.msk.bf16.gmra.mxu0 %vm467_vm2, %v17695_v40 }
 0x7a4   :  { %11910 = vst.msk [vmem:[%s23253_s3 + $0x18] sm:$0xf] %vm11903_vm3, %v14227_v4  ;;  %v11304_v28 = vmax.f32 %v11183_v53, 0.0  ;;  %v11056_v47 = vmax.f32 %v9807_v63, %v10594_v45  ;;  %16819 = vmatprep.mubr.msk.bf16.mxu1 %vm17772_vm1, %v23331_v15  ;;  %17067 = vmatprep.mubr.msk.bf16.mxu0 %vm17772_vm1, %v23331_v15  ;;  %v9809_v35 = vmax.f32 %v21081_v38, %v9353_v51 }
 0x7a5   :  { %v16721_v14 = vpop.f32.mrf.mxu1  ;;  %v16969_v43 = vpop.f32.mrf.mxu0 }
 0x7a6   :  { %v14228_v34 = vpack.c.bf16 %v11304_v28, %v11304_v28  ;;  %v11184_v30 = vadd.f32 %v22086_v48, %v11056_v47 }
 0x7a7   :  { %v9356_v8 = vpop.f32.mrf.mxu1  ;;  %v10597_v62 = vpop.f32.mrf.mxu0 }
 0x7a8   :  { %11911 = vst.msk [vmem:[%s23253_s3 + $0x1c] sm:$0xf] %vm11903_vm3, %v14228_v34  ;;  %v11305_v61 = vmax.f32 %v11184_v30, 0.0  ;;  %v11057_v23 = vmax.f32 %v9808_v50, %v10597_v62  ;;  %v9810_v45 = vmax.f32 %v21094_v25, %v9356_v8  ;;  %v17698_v50 = vld [vmem:[%s23251_s0 + $0xe34] sm:$0xff]  }
 0x7a9   :  { %v16722_v44 = vpop.f32.mrf.mxu1  ;;  %v16970_v40 = vpop.f32.mrf.mxu0  ;;  %v17699_v34 = vld [vmem:[%s23251_s0 + $0x1010] sm:$0xff]  }
 0x7aa   :  { %v14229_v33 = vpack.c.bf16 %v11305_v61, %v11305_v61  ;;  %v11185_v31 = vadd.f32 %v22086_v48, %v11057_v23 }
 0x7ab   :  { %v9361_v60 = vpop.f32.mrf.mxu1  ;;  %16820 = vmatmul.mubr.msk.bf16.gmra.mxu1 %vm467_vm2, %v17696_v37  ;;  %v10602_v63 = vpop.f32.mrf.mxu0  ;;  %17068 = vmatmul.mubr.msk.bf16.gmra.mxu0 %vm467_vm2, %v17697_v54 }
 0x7ac   :  { %11912 = vst.msk [vmem:[%s23253_s3 + $0x20] sm:$0xf] %vm11903_vm3, %v14229_v33  ;;  %v11306_v4 = vmax.f32 %v11185_v31, 0.0  ;;  %v11058_v53 = vmax.f32 %v9809_v35, %v10602_v63  ;;  %16823 = vmatprep.mubr.msk.bf16.mxu1 %vm17772_vm1, %v23331_v15  ;;  %17071 = vmatprep.mubr.msk.bf16.mxu0 %vm17772_vm1, %v23331_v15  ;;  %v9811_v37 = vmax.f32 %v21099_v27, %v9361_v60 }
 0x7ad   :  { %v16725_v38 = vpop.f32.mrf.mxu1  ;;  %v16973_v51 = vpop.f32.mrf.mxu0 }
 0x7ae   :  { %v14230_v28 = vpack.c.bf16 %v11306_v4, %v11306_v4  ;;  %v11186_v47 = vadd.f32 %v22086_v48, %v11058_v53  ;;  %v17700_v38 = vld [vmem:[%s23251_s0 + $0xe3c] sm:$0xff]  }
 0x7af   :  { %v9364_v14 = vpop.f32.mrf.mxu1  ;;  %v10605_v43 = vpop.f32.mrf.mxu0  ;;  %v17701_v51 = vld [vmem:[%s23251_s0 + $0x1018] sm:$0xff]  }
 0x7b0   :  { %11913 = vst.msk [vmem:[%s23253_s3 + $0x24] sm:$0xf] %vm11903_vm3, %v14230_v28  ;;  %v11307_v30 = vmax.f32 %v11186_v47, 0.0  ;;  %v11059_v25 = vmax.f32 %v9810_v45, %v10605_v43  ;;  %v9812_v31 = vmax.f32 %v21112_v19, %v9364_v14 }
 0x7b1   :  { %v16726_v8 = vpop.f32.mrf.mxu1  ;;  %v16974_v62 = vpop.f32.mrf.mxu0 }
 0x7b2   :  { %v14231_v54 = vpack.c.bf16 %v11307_v30, %v11307_v30  ;;  %v11187_v61 = vadd.f32 %v22086_v48, %v11059_v25 }
 0x7b3   :  { %v9369_v23 = vpop.f32.mrf.mxu1  ;;  %16824 = vmatmul.mubr.msk.bf16.gmra.mxu1 %vm467_vm2, %v17698_v50  ;;  %v10610_v44 = vpop.f32.mrf.mxu0  ;;  %17072 = vmatmul.mubr.msk.bf16.gmra.mxu0 %vm467_vm2, %v17699_v34 }
 0x7b4   :  { %11914 = vst.msk [vmem:[%s23253_s3 + $0x28] sm:$0xf] %vm11903_vm3, %v14231_v54  ;;  %v11308_v40 = vmax.f32 %v11187_v61, 0.0  ;;  %v11060_v35 = vmax.f32 %v9811_v37, %v10610_v44  ;;  %16827 = vmatprep.mubr.msk.bf16.mxu1 %vm17772_vm1, %v23331_v15  ;;  %17075 = vmatprep.mubr.msk.bf16.mxu0 %vm17772_vm1, %v23331_v15  ;;  %v9813_v14 = vmax.f32 %v21117_v7, %v9369_v23 }
 0x7b5   :  { %v16729_v27 = vpop.f32.mrf.mxu1  ;;  %v16977_v33 = vpop.f32.mrf.mxu0 }
 0x7b6   :  { %v14232_v60 = vpack.c.bf16 %v11308_v40, %v11308_v40  ;;  %v11188_v63 = vadd.f32 %v22086_v48, %v11060_v35  ;;  %v17702_v40 = vld [vmem:[%s23251_s0 + $0xe44] sm:$0xff]  }
 0x7b7   :  { %v9372_v4 = vpop.f32.mrf.mxu1  ;;  %v10613_v53 = vpop.f32.mrf.mxu0  ;;  %v17703_v35 = vld [vmem:[%s23251_s0 + $0x1020] sm:$0xff]  }
 0x7b8   :  { %11915 = vst.msk [vmem:[%s23253_s3 + $0x2c] sm:$0xf] %vm11903_vm3, %v14232_v60  ;;  %v11309_v45 = vmax.f32 %v11188_v63, 0.0  ;;  %v11061_v19 = vmax.f32 %v9812_v31, %v10613_v53  ;;  %v9814_v37 = vmax.f32 %v21130_v20, %v9372_v4 }
 0x7b9   :  { %v16730_v28 = vpop.f32.mrf.mxu1  ;;  %v16978_v47 = vpop.f32.mrf.mxu0 }
 0x7ba   :  { %v14233_v43 = vpack.c.bf16 %v11309_v45, %v11309_v45  ;;  %v11189_v50 = vadd.f32 %v22086_v48, %v11061_v19 }
 0x7bb   :  { %v9377_v34 = vpop.f32.mrf.mxu1  ;;  %16828 = vmatmul.mubr.msk.bf16.gmra.mxu1 %vm467_vm2, %v17700_v38  ;;  %v10618_v30 = vpop.f32.mrf.mxu0  ;;  %17076 = vmatmul.mubr.msk.bf16.gmra.mxu0 %vm467_vm2, %v17701_v51 }
 0x7bc   :  { %11916 = vst.msk [vmem:[%s23253_s3 + $0x30] sm:$0xf] %vm11903_vm3, %v14233_v43  ;;  %v11310_v25 = vmax.f32 %v11189_v50, 0.0  ;;  %v11062_v8 = vmax.f32 %v9813_v14, %v10618_v30  ;;  %16831 = vmatprep.mubr.msk.bf16.mxu1 %vm17772_vm1, %v23331_v15  ;;  %17079 = vmatprep.mubr.msk.bf16.mxu0 %vm17772_vm1, %v23331_v15  ;;  %v9815_v60 = vmax.f32 %v21135_v55, %v9377_v34  ;;  %v17704_v34 = vld [vmem:[%s23251_s0 + $0xe4c] sm:$0xff]  }
 0x7bd   :  { %v16733_v7 = vpop.f32.mrf.mxu1  ;;  %v16981_v62 = vpop.f32.mrf.mxu0  ;;  %v17705_v30 = vld [vmem:[%s23251_s0 + $0x1028] sm:$0xff]  }
 0x7be   :  { %v14234_v54 = vpack.c.bf16 %v11310_v25, %v11310_v25  ;;  %v11190_v61 = vadd.f32 %v22086_v48, %v11062_v8 }
 0x7bf   :  { %v9380_v23 = vpop.f32.mrf.mxu1  ;;  %v10621_v44 = vpop.f32.mrf.mxu0 }
 0x7c0   :  { %11917 = vst.msk [vmem:[%s23253_s3 + $0x34] sm:$0xf] %vm11903_vm3, %v14234_v54  ;;  %v11311_v27 = vmax.f32 %v11190_v61, 0.0  ;;  %v11063_v20 = vmax.f32 %v9814_v37, %v10621_v44  ;;  %v9816_v28 = vmax.f32 %v21148_v13, %v9380_v23 }
 0x7c1   :  { %v16734_v33 = vpop.f32.mrf.mxu1  ;;  %v16982_v31 = vpop.f32.mrf.mxu0 }
 0x7c2   :  { %v14235_v63 = vpack.c.bf16 %v11311_v27, %v11311_v27  ;;  %v11191_v4 = vadd.f32 %v22086_v48, %v11063_v20 }
 0x7c3   :  { %v9385_v53 = vpop.f32.mrf.mxu1  ;;  %16832 = vmatmul.mubr.msk.bf16.gmra.mxu1 %vm467_vm2, %v17702_v40  ;;  %v10626_v38 = vpop.f32.mrf.mxu0  ;;  %17080 = vmatmul.mubr.msk.bf16.gmra.mxu0 %vm467_vm2, %v17703_v35 }
 0x7c4   :  { %11918 = vst.msk [vmem:[%s23253_s3 + $0x38] sm:$0xf] %vm11903_vm3, %v14235_v63  ;;  %v11312_v51 = vmax.f32 %v11191_v4, 0.0  ;;  %v11064_v45 = vmax.f32 %v9815_v60, %v10626_v38  ;;  %16835 = vmatprep.mubr.msk.bf16.mxu1 %vm17772_vm1, %v23331_v15  ;;  %17083 = vmatprep.mubr.msk.bf16.mxu0 %vm17772_vm1, %v23331_v15  ;;  %v9817_v62 = vmax.f32 %v21153_v2, %v9385_v53  ;;  %v17706_v63 = vld [vmem:[%s23251_s0 + $0xe54] sm:$0xff]  }
 0x7c5   :  { %v16737_v55 = vpop.f32.mrf.mxu1  ;;  %v16985_v19 = vpop.f32.mrf.mxu0  ;;  %v17707_v4 = vld [vmem:[%s23251_s0 + $0x1030] sm:$0xff]  }
 0x7c6   :  { %v14236_v47 = vpack.c.bf16 %v11312_v51, %v11312_v51  ;;  %v11192_v14 = vadd.f32 %v22086_v48, %v11064_v45 }
 0x7c7   :  { %v9388_v43 = vpop.f32.mrf.mxu1  ;;  %v10629_v50 = vpop.f32.mrf.mxu0 }
 0x7c8   :  { %11919 = vst.msk [vmem:[%s23253_s3 + $0x3c] sm:$0xf] %vm11903_vm3, %v14236_v47  ;;  %v11313_v25 = vmax.f32 %v11192_v14, 0.0  ;;  %v11065_v13 = vmax.f32 %v9816_v28, %v10629_v50  ;;  %v9818_v27 = vmax.f32 %v21166_v17, %v9388_v43 }
 0x7c9   :  { %v16738_v8 = vpop.f32.mrf.mxu1  ;;  %v16986_v7 = vpop.f32.mrf.mxu0 }
 0x7ca   :  { %v14237_v37 = vpack.c.bf16 %v11313_v25, %v11313_v25  ;;  %v11193_v54 = vadd.f32 %v22086_v48, %v11065_v13  ;;  %v17708_v7 = vld [vmem:[%s23251_s0 + $0xe5c] sm:$0xff]  }
 0x7cb   :  { %v9393_v61 = vpop.f32.mrf.mxu1  ;;  %16836 = vmatmul.mubr.msk.bf16.gmra.mxu1 %vm467_vm2, %v17704_v34  ;;  %v10634_v23 = vpop.f32.mrf.mxu0  ;;  %17084 = vmatmul.mubr.msk.bf16.gmra.mxu0 %vm467_vm2, %v17705_v30 }
 0x7cc   :  { %11920 = vst.msk [vmem:[%s23253_s3 + $0x40] sm:$0xf] %vm11903_vm3, %v14237_v37  ;;  %v11314_v44 = vmax.f32 %v11193_v54, 0.0  ;;  %v11066_v40 = vmax.f32 %v9817_v62, %v10634_v23  ;;  %16839 = vmatprep.mubr.msk.bf16.mxu1 %vm17772_vm1, %v23331_v15  ;;  %17087 = vmatprep.mubr.msk.bf16.mxu0 %vm17772_vm1, %v23331_v15  ;;  %v9819_v45 = vmax.f32 %v21171_v0, %v9393_v61  ;;  %v17709_v62 = vld [vmem:[%s23251_s0 + $0x1038] sm:$0xff]  }
 0x7cd   :  { %v16741_v2 = vpop.f32.mrf.mxu1  ;;  %v16989_v35 = vpop.f32.mrf.mxu0 }
 0x7ce   :  { %v14238_v20 = vpack.c.bf16 %v11314_v44, %v11314_v44  ;;  %v11194_v33 = vadd.f32 %v22086_v48, %v11066_v40 }
 0x7cf   :  { %v9396_v31 = vpop.f32.mrf.mxu1  ;;  %v10637_v60 = vpop.f32.mrf.mxu0 }
 0x7d0   :  { %11921 = vst.msk [vmem:[%s23253_s3 + $0x44] sm:$0xf] %vm11903_vm3, %v14238_v20  ;;  %v11315_v53 = vmax.f32 %v11194_v33, 0.0  ;;  %v11067_v17 = vmax.f32 %v9818_v27, %v10637_v60  ;;  %v9820_v34 = vmax.f32 %v21184_v59, %v9396_v31 }
 0x7d1   :  { %v16742_v38 = vpop.f32.mrf.mxu1  ;;  %v16990_v51 = vpop.f32.mrf.mxu0 }
 0x7d2   :  { %v14239_v55 = vpack.c.bf16 %v11315_v53, %v11315_v53  ;;  %v11195_v19 = vadd.f32 %v22086_v48, %v11067_v17  ;;  %v17710_v17 = vld [vmem:[%s23251_s0 + $0xe64] sm:$0xff]  }
 0x7d3   :  { %v9401_v28 = vpop.f32.mrf.mxu1  ;;  %16840 = vmatmul.mubr.msk.bf16.gmra.mxu1 %vm467_vm2, %v17706_v63  ;;  %v10642_v47 = vpop.f32.mrf.mxu0  ;;  %17088 = vmatmul.mubr.msk.bf16.gmra.mxu0 %vm467_vm2, %v17707_v4  ;;  %v17711_v38 = vld [vmem:[%s23251_s0 + $0x1040] sm:$0xff]  }
 0x7d4   :  { %11922 = vst.msk [vmem:[%s23253_s3 + $0x48] sm:$0xf] %vm11903_vm3, %v14239_v55  ;;  %v11316_v14 = vmax.f32 %v11195_v19, 0.0  ;;  %v11068_v43 = vmax.f32 %v9819_v45, %v10642_v47  ;;  %16843 = vmatprep.mubr.msk.bf16.mxu1 %vm17772_vm1, %v23331_v15  ;;  %17091 = vmatprep.mubr.msk.bf16.mxu0 %vm17772_vm1, %v23331_v15  ;;  %v9821_v23 = vmax.f32 %v21189_v1, %v9401_v28 }
 0x7d5   :  { %v16745_v0 = vpop.f32.mrf.mxu1  ;;  %v16993_v50 = vpop.f32.mrf.mxu0 }
 0x7d6   :  { %v14240_v30 = vpack.c.bf16 %v11316_v14, %v11316_v14  ;;  %v11196_v25 = vadd.f32 %v22086_v48, %v11068_v43 }
 0x7d7   :  { %v9404_v13 = vpop.f32.mrf.mxu1  ;;  %v10645_v8 = vpop.f32.mrf.mxu0 }
 0x7d8   :  { %11923 = vst.msk [vmem:[%s23253_s3 + $0x4c] sm:$0xf] %vm11903_vm3, %v14240_v30  ;;  %v11317_v37 = vmax.f32 %v11196_v25, 0.0  ;;  %v11069_v59 = vmax.f32 %v9820_v34, %v10645_v8  ;;  %v9822_v31 = vmax.f32 %v21202_v58, %v9404_v13 }
 0x7d9   :  { %v16746_v54 = vpop.f32.mrf.mxu1  ;;  %v16994_v61 = vpop.f32.mrf.mxu0 }
 0x7da   :  { %v14241_v44 = vpack.c.bf16 %v11317_v37, %v11317_v37  ;;  %v11197_v40 = vadd.f32 %v22086_v48, %v11069_v59  ;;  %v17713_v37 = vld [vmem:[%s23251_s0 + $0x1048] sm:$0xff]  }
 0x7db   :  { %v9409_v2 = vpop.f32.mrf.mxu1  ;;  %16844 = vmatmul.mubr.msk.bf16.gmra.mxu1 %vm467_vm2, %v17708_v7  ;;  %v10650_v35 = vpop.f32.mrf.mxu0  ;;  %17092 = vmatmul.mubr.msk.bf16.gmra.mxu0 %vm467_vm2, %v17709_v62  ;;  %v17712_v62 = vld [vmem:[%s23251_s0 + $0xe6c] sm:$0xff]  }
 0x7dc   :  { %11924 = vst.msk [vmem:[%s23253_s3 + $0x50] sm:$0xf] %vm11903_vm3, %v14241_v44  ;;  %v11318_v27 = vmax.f32 %v11197_v40, 0.0  ;;  %v11070_v20 = vmax.f32 %v9821_v23, %v10650_v35  ;;  %16847 = vmatprep.mubr.msk.bf16.mxu1 %vm17772_vm1, %v23331_v15  ;;  %17095 = vmatprep.mubr.msk.bf16.mxu0 %vm17772_vm1, %v23331_v15  ;;  %v9823_v19 = vmax.f32 %v21207_v12, %v9409_v2 }
 0x7dd   :  { %v16749_v1 = vpop.f32.mrf.mxu1  ;;  %v16997_v33 = vpop.f32.mrf.mxu0 }
 0x7de   :  { %v14242_v60 = vpack.c.bf16 %v11318_v27, %v11318_v27  ;;  %v11198_v63 = vadd.f32 %v22086_v48, %v11070_v20 }
 0x7df   :  { %v9412_v4 = vpop.f32.mrf.mxu1  ;;  %v10653_v53 = vpop.f32.mrf.mxu0 }
 0x7e0   :  { %11925 = vst.msk [vmem:[%s23253_s3 + $0x54] sm:$0xf] %vm11903_vm3, %v14242_v60  ;;  %v11319_v51 = vmax.f32 %v11198_v63, 0.0  ;;  %v11071_v58 = vmax.f32 %v9822_v31, %v10653_v53  ;;  %v9824_v30 = vmax.f32 %v21220_v18, %v9412_v4  ;;  %v17714_v53 = vld [vmem:[%s23251_s0 + $0xe74] sm:$0xff]  }
 0x7e1   :  { %v16750_v45 = vpop.f32.mrf.mxu1  ;;  %v16998_v55 = vpop.f32.mrf.mxu0 }
 0x7e2   :  { %v14243_v28 = vpack.c.bf16 %v11319_v51, %v11319_v51  ;;  %v11199_v47 = vadd.f32 %v22086_v48, %v11071_v58 }
 0x7e3   :  { %v9417_v14 = vpop.f32.mrf.mxu1  ;;  %16848 = vmatmul.mubr.msk.bf16.gmra.mxu1 %vm467_vm2, %v17710_v17  ;;  %v10658_v43 = vpop.f32.mrf.mxu0  ;;  %17096 = vmatmul.mubr.msk.bf16.gmra.mxu0 %vm467_vm2, %v17711_v38  ;;  %v17715_v17 = vld [vmem:[%s23251_s0 + $0x1050] sm:$0xff]  }
 0x7e4   :  { %11926 = vst.msk [vmem:[%s23253_s3 + $0x58] sm:$0xf] %vm11903_vm3, %v14243_v28  ;;  %v11320_v0 = vmax.f32 %v11199_v47, 0.0  ;;  %v11072_v50 = vmax.f32 %v9823_v19, %v10658_v43  ;;  %16851 = vmatprep.mubr.msk.bf16.mxu1 %vm17772_vm1, %v23331_v15  ;;  %17099 = vmatprep.mubr.msk.bf16.mxu0 %vm17772_vm1, %v23331_v15  ;;  %v9825_v23 = vmax.f32 %v21225_v22, %v9417_v14 }
 0x7e5   :  { %v16753_v12 = vpop.f32.mrf.mxu1  ;;  %v17001_v34 = vpop.f32.mrf.mxu0 }
 0x7e6   :  { %v14244_v25 = vpack.c.bf16 %v11320_v0, %v11320_v0  ;;  %v11200_v13 = vadd.f32 %v22086_v48, %v11072_v50 }
 0x7e7   :  { %v9420_v8 = vpop.f32.mrf.mxu1  ;;  %v10661_v7 = vpop.f32.mrf.mxu0 }
 0x7e8   :  { %11927 = vst.msk [vmem:[%s23253_s3 + $0x5c] sm:$0xf] %vm11903_vm3, %v14244_v25  ;;  %v11321_v59 = vmax.f32 %v11200_v13, 0.0  ;;  %v11073_v18 = vmax.f32 %v9824_v30, %v10661_v7  ;;  %v9826_v33 = vmax.f32 %v21238_v6, %v9420_v8  ;;  %v17716_v13 = vld [vmem:[%s23251_s0 + $0xe7c] sm:$0xff]  }
 0x7e9   :  { %v16754_v54 = vpop.f32.mrf.mxu1  ;;  %v17002_v61 = vpop.f32.mrf.mxu0  ;;  %v17717_v8 = vld [vmem:[%s23251_s0 + $0x1058] sm:$0xff]  }
 0x7ea   :  { %v14245_v44 = vpack.c.bf16 %v11321_v59, %v11321_v59  ;;  %v11201_v40 = vadd.f32 %v22086_v48, %v11073_v18 }
 0x7eb   :  { %v9425_v2 = vpop.f32.mrf.mxu1  ;;  %16852 = vmatmul.mubr.msk.bf16.gmra.mxu1 %vm467_vm2, %v17712_v62  ;;  %v10666_v35 = vpop.f32.mrf.mxu0  ;;  %17100 = vmatmul.mubr.msk.bf16.gmra.mxu0 %vm467_vm2, %v17713_v37 }
 0x7ec   :  { %11928 = vst.msk [vmem:[%s23253_s3 + $0x60] sm:$0xf] %vm11903_vm3, %v14245_v44  ;;  %v11322_v27 = vmax.f32 %v11201_v40, 0.0  ;;  %v11074_v20 = vmax.f32 %v9825_v23, %v10666_v35  ;;  %16855 = vmatprep.mubr.msk.bf16.mxu1 %vm17772_vm1, %v23331_v15  ;;  %17103 = vmatprep.mubr.msk.bf16.mxu0 %vm17772_vm1, %v23331_v15  ;;  %v9827_v45 = vmax.f32 %v21243_v32, %v9425_v2 }
 0x7ed   :  { %v16757_v22 = vpop.f32.mrf.mxu1  ;;  %v17005_v1 = vpop.f32.mrf.mxu0 }
 0x7ee   :  { %v14246_v31 = vpack.c.bf16 %v11322_v27, %v11322_v27  ;;  %v11202_v60 = vadd.f32 %v22086_v48, %v11074_v20 }
 0x7ef   :  { %v9428_v63 = vpop.f32.mrf.mxu1  ;;  %v10669_v4 = vpop.f32.mrf.mxu0 }
 0x7f0   :  { %11929 = vst.msk [vmem:[%s23253_s3 + $0x64] sm:$0xf] %vm11903_vm3, %v14246_v31  ;;  %v11323_v38 = vmax.f32 %v11202_v60, 0.0  ;;  %v11075_v6 = vmax.f32 %v9826_v33, %v10669_v4  ;;  %v9828_v50 = vmax.f32 %v21256_v16, %v9428_v63  ;;  %v17718_v33 = vld [vmem:[%s23251_s0 + $0xe84] sm:$0xff]  }
 0x7f1   :  { %v16758_v51 = vpop.f32.mrf.mxu1  ;;  %v17006_v58 = vpop.f32.mrf.mxu0  ;;  %v17719_v31 = vld [vmem:[%s23251_s0 + $0x1060] sm:$0xff]  }
 0x7f2   :  { %v14247_v55 = vpack.c.bf16 %v11323_v38, %v11323_v38  ;;  %v11203_v19 = vadd.f32 %v22086_v48, %v11075_v6 }
 0x7f3   :  { %v9433_v28 = vpop.f32.mrf.mxu1  ;;  %16856 = vmatmul.mubr.msk.bf16.gmra.mxu1 %vm467_vm2, %v17714_v53  ;;  %v10674_v47 = vpop.f32.mrf.mxu0  ;;  %17104 = vmatmul.mubr.msk.bf16.gmra.mxu0 %vm467_vm2, %v17715_v17 }
 0x7f4   :  { %11930 = vst.msk [vmem:[%s23253_s3 + $0x68] sm:$0xf] %vm11903_vm3, %v14247_v55  ;;  %v11324_v14 = vmax.f32 %v11203_v19, 0.0  ;;  %v11076_v43 = vmax.f32 %v9827_v45, %v10674_v47  ;;  %16859 = vmatprep.mubr.msk.bf16.mxu1 %vm17772_vm1, %v23331_v15  ;;  %17107 = vmatprep.mubr.msk.bf16.mxu0 %vm17772_vm1, %v23331_v15  ;;  %v9829_v59 = vmax.f32 %v21261_v42, %v9433_v28 }
 0x7f5   :  { %v16761_v32 = vpop.f32.mrf.mxu1  ;;  %v17009_v0 = vpop.f32.mrf.mxu0 }
 0x7f6   :  { %v14248_v12 = vpack.c.bf16 %v11324_v14, %v11324_v14  ;;  %v11204_v34 = vadd.f32 %v22086_v48, %v11076_v43  ;;  %v17720_v32 = vld [vmem:[%s23251_s0 + $0xe8c] sm:$0xff]  }
 0x7f7   :  { %v9436_v30 = vpop.f32.mrf.mxu1  ;;  %v10677_v25 = vpop.f32.mrf.mxu0  ;;  %v17721_v0 = vld [vmem:[%s23251_s0 + $0x1068] sm:$0xff]  }
 0x7f8   :  { %11931 = vst.msk [vmem:[%s23253_s3 + $0x6c] sm:$0xf] %vm11903_vm3, %v14248_v12  ;;  %v11325_v7 = vmax.f32 %v11204_v34, 0.0  ;;  %v11077_v16 = vmax.f32 %v9828_v50, %v10677_v25  ;;  %v9830_v35 = vmax.f32 %v21274_v26, %v9436_v30 }
 0x7f9   :  { %v16762_v62 = vpop.f32.mrf.mxu1  ;;  %v17010_v37 = vpop.f32.mrf.mxu0 }
 0x7fa   :  { %v14249_v18 = vpack.c.bf16 %v11325_v7, %v11325_v7  ;;  %v11205_v54 = vadd.f32 %v22086_v48, %v11077_v16 }
 0x7fb   :  { %v9441_v61 = vpop.f32.mrf.mxu1  ;;  %16860 = vmatmul.mubr.msk.bf16.gmra.mxu1 %vm467_vm2, %v17716_v13  ;;  %v10682_v23 = vpop.f32.mrf.mxu0  ;;  %17108 = vmatmul.mubr.msk.bf16.gmra.mxu0 %vm467_vm2, %v17717_v8 }
 0x7fc   :  { %11932 = vst.msk [vmem:[%s23253_s3 + $0x70] sm:$0xf] %vm11903_vm3, %v14249_v18  ;;  %v11326_v44 = vmax.f32 %v11205_v54, 0.0  ;;  %v11078_v40 = vmax.f32 %v9829_v59, %v10682_v23  ;;  %16863 = vmatprep.mubr.msk.bf16.mxu1 %vm17772_vm1, %v23331_v15  ;;  %17111 = vmatprep.mubr.msk.bf16.mxu0 %vm17772_vm1, %v23331_v15  ;;  %v9831_v53 = vmax.f32 %v21279_v52, %v9441_v61 }
 0x7fd   :  { %v16765_v42 = vpop.f32.mrf.mxu1  ;;  %v17013_v2 = vpop.f32.mrf.mxu0 }
 0x7fe   :  { %v14250_v27 = vpack.c.bf16 %v11326_v44, %v11326_v44  ;;  %v11206_v20 = vadd.f32 %v22086_v48, %v11078_v40  ;;  %v17722_v44 = vld [vmem:[%s23251_s0 + $0xe94] sm:$0xff]  }
 0x7ff   :  { %v9444_v22 = vpop.f32.mrf.mxu1  ;;  %v10685_v1 = vpop.f32.mrf.mxu0  ;;  %v17723_v40 = vld [vmem:[%s23251_s0 + $0x1070] sm:$0xff]  }
 0x800   :  { %11933 = vst.msk [vmem:[%s23253_s3 + $0x74] sm:$0xf] %vm11903_vm3, %v14250_v27  ;;  %v11327_v60 = vmax.f32 %v11206_v20, 0.0  ;;  %v11079_v26 = vmax.f32 %v9830_v35, %v10685_v1  ;;  %v9832_v19 = vmax.f32 %v21292_v36, %v9444_v22 }
 0x801   :  { %v16766_v63 = vpop.f32.mrf.mxu1  ;;  %v17014_v4 = vpop.f32.mrf.mxu0 }
 0x802   :  { %v14251_v17 = vpack.c.bf16 %v11327_v60, %v11327_v60  ;;  %v11207_v38 = vadd.f32 %v22086_v48, %v11079_v26 }
 0x803   :  { %v9449_v6 = vpop.f32.mrf.mxu1  ;;  %16864 = vmatmul.mubr.msk.bf16.gmra.mxu1 %vm467_vm2, %v17718_v33  ;;  %v10690_v51 = vpop.f32.mrf.mxu0  ;;  %17112 = vmatmul.mubr.msk.bf16.gmra.mxu0 %vm467_vm2, %v17719_v31 }
 0x804   :  { %11934 = vst.msk [vmem:[%s23253_s3 + $0x78] sm:$0xf] %vm11903_vm3, %v14251_v17  ;;  %v11328_v58 = vmax.f32 %v11207_v38, 0.0  ;;  %v11080_v45 = vmax.f32 %v9831_v53, %v10690_v51  ;;  %16867 = vmatprep.mubr.msk.bf16.mxu1 %vm17772_vm1, %v23331_v15  ;;  %17115 = vmatprep.mubr.msk.bf16.mxu0 %vm17772_vm1, %v23331_v15  ;;  %v9833_v30 = vmax.f32 %v21297_v3, %v9449_v6  ;;  %v17724_v6 = vld [vmem:[%s23251_s0 + $0xe9c] sm:$0xff]  }
 0x805   :  { %v16769_v52 = vpop.f32.mrf.mxu1  ;;  %v17017_v55 = vpop.f32.mrf.mxu0  ;;  %v17725_v51 = vld [vmem:[%s23251_s0 + $0x1078] sm:$0xff]  }
 0x806   :  { %v14252_v28 = vpack.c.bf16 %v11328_v58, %v11328_v58  ;;  %v11208_v47 = vadd.f32 %v22086_v48, %v11080_v45 }
 0x807   :  { %v9452_v14 = vpop.f32.mrf.mxu1  ;;  %v10693_v43 = vpop.f32.mrf.mxu0 }
 0x808   :  { %11935 = vst.msk [vmem:[%s23253_s3 + $0x7c] sm:$0xf] %vm11903_vm3, %v14252_v28  ;;  %v11329_v50 = vmax.f32 %v11208_v47, 0.0  ;;  %v11081_v36 = vmax.f32 %v9832_v19, %v10693_v43  ;;  %v9834_v59 = vmax.f32 %v21310_v46, %v9452_v14 }
 0x809   :  { %v16770_v12 = vpop.f32.mrf.mxu1  ;;  %v17018_v34 = vpop.f32.mrf.mxu0 }
 0x80a   :  { %v14253_v25 = vpack.c.bf16 %v11329_v50, %v11329_v50  ;;  %v11209_v13 = vadd.f32 %v22086_v48, %v11081_v36 }
 0x80b   :  { %v9457_v8 = vpop.f32.mrf.mxu1  ;;  %16868 = vmatmul.mubr.msk.bf16.gmra.mxu1 %vm467_vm2, %v17720_v32  ;;  %v10698_v7 = vpop.f32.mrf.mxu0  ;;  %17116 = vmatmul.mubr.msk.bf16.gmra.mxu0 %vm467_vm2, %v17721_v0 }
 0x80c   :  { %11936 = vst.msk [vmem:[%s23253_s3 + $0x80] sm:$0xf] %vm11903_vm3, %v14253_v25  ;;  %v11330_v16 = vmax.f32 %v11209_v13, 0.0  ;;  %v11082_v62 = vmax.f32 %v9833_v30, %v10698_v7  ;;  %16871 = vmatprep.mubr.msk.bf16.mxu1 %vm17772_vm1, %v23331_v15  ;;  %17119 = vmatprep.mubr.msk.bf16.mxu0 %vm17772_vm1, %v23331_v15  ;;  %v9835_v27 = vmax.f32 %v21315_v24, %v9457_v8  ;;  %v17726_v25 = vld [vmem:[%s23251_s0 + $0xea4] sm:$0xff]  }
 0x80d   :  { %v16773_v3 = vpop.f32.mrf.mxu1  ;;  %v17021_v37 = vpop.f32.mrf.mxu0  ;;  %v17727_v13 = vld [vmem:[%s23251_s0 + $0x1080] sm:$0xff]  }
 0x80e   :  { %v14254_v18 = vpack.c.bf16 %v11330_v16, %v11330_v16  ;;  %v11210_v54 = vadd.f32 %v22086_v48, %v11082_v62  ;;  %v22561_v37 = vld [vmem:[%s23252_s2] ss:$0 sm:$0xff] }
 0x80f   :  { %v9460_v61 = vpop.f32.mrf.mxu1  ;;  %v10701_v23 = vpop.f32.mrf.mxu0 }
 0x810   :  { %11937 = vst.msk [vmem:[%s23253_s3 + $0x84] sm:$0xf] %vm11903_vm3, %v14254_v18  ;;  %v11331_v42 = vmax.f32 %v11210_v54, 0.0  ;;  %v11083_v46 = vmax.f32 %v9834_v59, %v10701_v23  ;;  %v9836_v63 = vmax.f32 %v21328_v56, %v9460_v61 }
 0x811   :  { %v16774_v2 = vpop.f32.mrf.mxu1  ;;  %v17022_v35 = vpop.f32.mrf.mxu0 }
 0x812   :  { %v14255_v20 = vpack.c.bf16 %v11331_v42, %v11331_v42  ;;  %v11211_v22 = vadd.f32 %v22086_v48, %v11083_v46  ;;  %v23759_v42 = vld [vmem:[#allocation57_spill] sm:$0xff] }
 0x813   :  { %v9465_v1 = vpop.f32.mrf.mxu1  ;;  %16872 = vmatmul.mubr.msk.bf16.gmra.mxu1 %vm467_vm2, %v17722_v44  ;;  %v10706_v33 = vpop.f32.mrf.mxu0  ;;  %17120 = vmatmul.mubr.msk.bf16.gmra.mxu0 %vm467_vm2, %v17723_v40 }
 0x814   :  { %11938 = vst.msk [vmem:[%s23253_s3 + $0x88] sm:$0xf] %vm11903_vm3, %v14255_v20  ;;  %v11332_v31 = vmax.f32 %v11211_v22, 0.0  ;;  %v11084_v60 = vmax.f32 %v9835_v27, %v10706_v33  ;;  %16875 = vmatprep.mubr.msk.bf16.mxu1 %vm17772_vm1, %v23331_v15  ;;  %17123 = vmatprep.mubr.msk.bf16.mxu0 %vm17772_vm1, %v23331_v15  ;;  %v9837_v55 = vmax.f32 %v21333_v41, %v9465_v1  ;;  %v17728_v22 = vld [vmem:[%s23251_s0 + $0xeac] sm:$0xff]  }
 0x815   :  { %v16777_v24 = vpop.f32.mrf.mxu1  ;;  %v17025_v26 = vpop.f32.mrf.mxu0  ;;  %v17729_v1 = vld [vmem:[%s23251_s0 + $0x1088] sm:$0xff]  }
 0x816   :  { %v14256_v4 = vpack.c.bf16 %v11332_v31, %v11332_v31  ;;  %v11212_v53 = vadd.f32 %v22086_v48, %v11084_v60  ;;  %v23760_v26 = vld [vmem:[#allocation59_spill] sm:$0xff] }
 0x817   :  { %v9468_v17 = vpop.f32.mrf.mxu1  ;;  %v10709_v38 = vpop.f32.mrf.mxu0 }
 0x818   :  { %11939 = vst.msk [vmem:[%s23253_s3 + $0x8c] sm:$0xf] %vm11903_vm3, %v14256_v4  ;;  %v11333_v58 = vmax.f32 %v11212_v53, 0.0  ;;  %v11085_v56 = vmax.f32 %v9836_v63, %v10709_v38  ;;  %v9838_v50 = vmax.f32 %v21346_v11, %v9468_v17 }
 0x819   :  { %v16778_v45 = vpop.f32.mrf.mxu1  ;;  %v17026_v52 = vpop.f32.mrf.mxu0 }
 0x81a   :  { %v14257_v19 = vpack.c.bf16 %v11333_v58, %v11333_v58  ;;  %v11213_v28 = vadd.f32 %v22086_v48, %v11085_v56  ;;  %v23761_v45 = vld [vmem:[#allocation61_spill] sm:$0xff] }
 0x81b   :  { %v9473_v47 = vpop.f32.mrf.mxu1  ;;  %16876 = vmatmul.mubr.msk.bf16.gmra.mxu1 %vm467_vm2, %v17724_v6  ;;  %v10714_v14 = vpop.f32.mrf.mxu0  ;;  %17124 = vmatmul.mubr.msk.bf16.gmra.mxu0 %vm467_vm2, %v17725_v51 }
 0x81c   :  { %11940 = vst.msk [vmem:[%s23253_s3 + $0x90] sm:$0xf] %vm11903_vm3, %v14257_v19  ;;  %v11334_v43 = vmax.f32 %v11213_v28, 0.0  ;;  %v11086_v32 = vmax.f32 %v9837_v55, %v10714_v14  ;;  %16879 = vmatprep.mubr.msk.bf16.mxu1 %vm17772_vm1, %v23331_v15  ;;  %17127 = vmatprep.mubr.msk.bf16.mxu0 %vm17772_vm1, %v23331_v15  ;;  %v17730_v14 = vld [vmem:[%s23251_s0 + $0xeb4] sm:$0xff]  }
 0x81d   :  { %v16781_v41 = vpop.f32.mrf.mxu1  ;;  %v17029_v0 = vpop.f32.mrf.mxu0 }
 0x81e   :  { %v14258_v36 = vpack.c.bf16 %v11334_v43, %v11334_v43  ;;  %v11214_v12 = vadd.f32 %v22086_v48, %v11086_v32  ;;  %v23758_v48 = vld [vmem:[#allocation55_spill] sm:$0xff]  ;;  %v17731_v43 = vld [vmem:[%s23251_s0 + $0x1090] sm:$0xff]  }
 0x81f   :  { %v9476_v34 = vpop.f32.mrf.mxu1  ;;  %v10717_v30 = vpop.f32.mrf.mxu0  ;;  %v9839_v62 = vmax.f32 %v23758_v48, %v9473_v47  ;;  %v23763_v48 = vld [vmem:[#allocation65_spill] sm:$0xff] }
 0x820   :  { %11941 = vst.msk [vmem:[%s23253_s3 + $0x94] sm:$0xf] %vm11903_vm3, %v14258_v36  ;;  %v11335_v8 = vmax.f32 %v11214_v12, 0.0  ;;  %v11087_v11 = vmax.f32 %v9838_v50, %v10717_v30  ;;  %v9840_v46 = vmax.f32 %v23759_v42, %v9476_v34  ;;  %v23762_v36 = vld [vmem:[#allocation63_spill] sm:$0xff] }
 0x821   :  { %v16782_v7 = vpop.f32.mrf.mxu1  ;;  %v17030_v16 = vpop.f32.mrf.mxu0 }
 0x822   :  { %v14259_v3 = vpack.c.bf16 %v11335_v8, %v11335_v8  ;;  %v11215_v59 = vadd.f32 %v22561_v37, %v11087_v11 }
 0x823   :  { %v9481_v18 = vpop.f32.mrf.mxu1  ;;  %16880 = vmatmul.mubr.msk.bf16.gmra.mxu1 %vm467_vm2, %v17726_v25  ;;  %v10722_v54 = vpop.f32.mrf.mxu0  ;;  %17128 = vmatmul.mubr.msk.bf16.gmra.mxu0 %vm467_vm2, %v17727_v13 }
 0x824   :  { %11942 = vst.msk [vmem:[%s23253_s3 + $0x98] sm:$0xf] %vm11903_vm3, %v14259_v3  ;;  %v11336_v61 = vmax.f32 %v11215_v59, 0.0  ;;  %v11088_v23 = vmax.f32 %v9839_v62, %v10722_v54  ;;  %16883 = vmatprep.mubr.msk.bf16.mxu1 %vm17772_vm1, %v23331_v15  ;;  %17131 = vmatprep.mubr.msk.bf16.mxu0 %vm17772_vm1, %v23331_v15  ;;  %v9841_v63 = vmax.f32 %v23760_v26, %v9481_v18  ;;  %v23765_v26 = vld [vmem:[#allocation69_spill] sm:$0xff] }
 0x825   :  { %v16785_v44 = vpop.f32.mrf.mxu1  ;;  %v17033_v40 = vpop.f32.mrf.mxu0 }
 0x826   :  { %v14260_v2 = vpack.c.bf16 %v11336_v61, %v11336_v61  ;;  %v11216_v35 = vadd.f32 %v22561_v37, %v11088_v23  ;;  %v17732_v61 = vld [vmem:[%s23251_s0 + $0xebc] sm:$0xff]  }
 0x827   :  { %v9484_v27 = vpop.f32.mrf.mxu1  ;;  %v10725_v20 = vpop.f32.mrf.mxu0  ;;  %v17733_v23 = vld [vmem:[%s23251_s0 + $0x1098] sm:$0xff]  }
 0x828   :  { %11943 = vst.msk [vmem:[%s23253_s3 + $0x9c] sm:$0xf] %vm11903_vm3, %v14260_v2  ;;  %v11337_v33 = vmax.f32 %v11216_v35, 0.0  ;;  %v11089_v31 = vmax.f32 %v9840_v46, %v10725_v20  ;;  %v9842_v52 = vmax.f32 %v23761_v45, %v9484_v27  ;;  %v23764_v2 = vld [vmem:[#allocation67_spill] sm:$0xff] }
 0x829   :  { %v16786_v60 = vpop.f32.mrf.mxu1  ;;  %v17034_v24 = vpop.f32.mrf.mxu0 }
 0x82a   :  { %v14261_v4 = vpack.c.bf16 %v11337_v33, %v11337_v33  ;;  %v11217_v53 = vadd.f32 %v22561_v37, %v11089_v31 }
 0x82b   :  { %v9489_v17 = vpop.f32.mrf.mxu1  ;;  %16884 = vmatmul.mubr.msk.bf16.gmra.mxu1 %vm467_vm2, %v17728_v22  ;;  %v10730_v38 = vpop.f32.mrf.mxu0  ;;  %17132 = vmatmul.mubr.msk.bf16.gmra.mxu0 %vm467_vm2, %v17729_v1 }
 0x82c   :  { %11944 = vst.msk [vmem:[%s23253_s3 + $0xa0] sm:$0xf] %vm11903_vm3, %v14261_v4  ;;  %v11338_v6 = vmax.f32 %v11217_v53, 0.0  ;;  %v11090_v51 = vmax.f32 %v9841_v63, %v10730_v38  ;;  %16887 = vmatprep.mubr.msk.bf16.mxu1 %vm17772_vm1, %v23331_v15  ;;  %17135 = vmatprep.mubr.msk.bf16.mxu0 %vm17772_vm1, %v23331_v15  ;;  %v9843_v12 = vmax.f32 %v23762_v36, %v9489_v17  ;;  %v23767_v36 = vld [vmem:[#allocation74_spill] sm:$0xff] }
 0x82d   :  { %v16789_v58 = vpop.f32.mrf.mxu1  ;;  %v17037_v56 = vpop.f32.mrf.mxu0 }
 0x82e   :  { %v14262_v55 = vpack.c.bf16 %v11338_v6, %v11338_v6  ;;  %v11218_v19 = vadd.f32 %v22561_v37, %v11090_v51  ;;  %v17734_v6 = vld [vmem:[%s23251_s0 + $0xec4] sm:$0xff]  }
 0x82f   :  { %v9492_v28 = vpop.f32.mrf.mxu1  ;;  %v10733_v47 = vpop.f32.mrf.mxu0  ;;  %v17735_v51 = vld [vmem:[%s23251_s0 + $0x10a0] sm:$0xff]  }
 0x830   :  { %11945 = vst.msk [vmem:[%s23253_s3 + $0xa4] sm:$0xf] %vm11903_vm3, %v14262_v55  ;;  %v11339_v32 = vmax.f32 %v11218_v19, 0.0  ;;  %v11091_v41 = vmax.f32 %v9842_v52, %v10733_v47  ;;  %v9844_v62 = vmax.f32 %v23763_v48, %v9492_v28  ;;  %v23766_v55 = vld [vmem:[#allocation73_spill] sm:$0xff] }
 0x831   :  { %v16790_v0 = vpop.f32.mrf.mxu1  ;;  %v17038_v50 = vpop.f32.mrf.mxu0 }
 0x832   :  { %v14263_v34 = vpack.c.bf16 %v11339_v32, %v11339_v32  ;;  %v11219_v30 = vadd.f32 %v22561_v37, %v11091_v41 }
 0x833   :  { %v9497_v25 = vpop.f32.mrf.mxu1  ;;  %16888 = vmatmul.mubr.msk.bf16.gmra.mxu1 %vm467_vm2, %v17730_v14  ;;  %v10738_v13 = vpop.f32.mrf.mxu0  ;;  %17136 = vmatmul.mubr.msk.bf16.gmra.mxu0 %vm467_vm2, %v17731_v43 }
 0x834   :  { %11946 = vst.msk [vmem:[%s23253_s3 + $0xa8] sm:$0xf] %vm11903_vm3, %v14263_v34  ;;  %v11340_v8 = vmax.f32 %v11219_v30, 0.0  ;;  %v11092_v11 = vmax.f32 %v9843_v12, %v10738_v13  ;;  %16891 = vmatprep.mubr.msk.bf16.mxu1 %vm17772_vm1, %v23331_v15  ;;  %17139 = vmatprep.mubr.msk.bf16.mxu0 %vm17772_vm1, %v23331_v15  ;;  %v9845_v35 = vmax.f32 %v23764_v2, %v9497_v25  ;;  %v23769_v2 = vld [vmem:[#allocation76_spill] sm:$0xff] }
 0x835   :  { %v16793_v7 = vpop.f32.mrf.mxu1  ;;  %v17041_v16 = vpop.f32.mrf.mxu0 }
 0x836   :  { %v14264_v3 = vpack.c.bf16 %v11340_v8, %v11340_v8  ;;  %v11220_v59 = vadd.f32 %v22561_v37, %v11092_v11  ;;  %v17736_v8 = vld [vmem:[%s23251_s0 + $0xecc] sm:$0xff]  }
 0x837   :  { %v9500_v18 = vpop.f32.mrf.mxu1  ;;  %v10741_v54 = vpop.f32.mrf.mxu0  ;;  %v17737_v11 = vld [vmem:[%s23251_s0 + $0x10a8] sm:$0xff]  }
 0x838   :  { %11947 = vst.msk [vmem:[%s23253_s3 + $0xac] sm:$0xf] %vm11903_vm3, %v14264_v3  ;;  %v11341_v44 = vmax.f32 %v11220_v59, 0.0  ;;  %v11093_v40 = vmax.f32 %v9844_v62, %v10741_v54  ;;  %v9846_v63 = vmax.f32 %v23765_v26, %v9500_v18  ;;  %v23768_v3 = vld [vmem:[#allocation75_spill] sm:$0xff] }
 0x839   :  { %v16794_v42 = vpop.f32.mrf.mxu1  ;;  %v17042_v46 = vpop.f32.mrf.mxu0 }
 0x83a   :  { %v14265_v27 = vpack.c.bf16 %v11341_v44, %v11341_v44  ;;  %v11221_v20 = vadd.f32 %v22561_v37, %v11093_v40 }
 0x83b   :  { %v9505_v22 = vpop.f32.mrf.mxu1  ;;  %16892 = vmatmul.mubr.msk.bf16.gmra.mxu1 %vm467_vm2, %v17732_v61  ;;  %v10746_v1 = vpop.f32.mrf.mxu0  ;;  %17140 = vmatmul.mubr.msk.bf16.gmra.mxu0 %vm467_vm2, %v17733_v23 }
 0x83c   :  { %11948 = vst.msk [vmem:[%s23253_s3 + $0xb0] sm:$0xf] %vm11903_vm3, %v14265_v27  ;;  %v11342_v33 = vmax.f32 %v11221_v20, 0.0  ;;  %v11094_v31 = vmax.f32 %v9845_v35, %v10746_v1  ;;  %16895 = vmatprep.mubr.msk.bf16.mxu1 %vm17772_vm1, %v23331_v15  ;;  %17143 = vmatprep.mubr.msk.bf16.mxu0 %vm17772_vm1, %v23331_v15  ;;  %v9847_v19 = vmax.f32 %v23766_v55, %v9505_v22  ;;  %v23771_v55 = vld [vmem:[#allocation56_spill] sm:$0xff] }
 0x83d   :  { %v16797_v60 = vpop.f32.mrf.mxu1  ;;  %v17045_v24 = vpop.f32.mrf.mxu0 }
 0x83e   :  { %v14266_v4 = vpack.c.bf16 %v11342_v33, %v11342_v33  ;;  %v11222_v53 = vadd.f32 %v22561_v37, %v11094_v31  ;;  %v17738_v33 = vld [vmem:[%s23251_s0 + $0xed4] sm:$0xff]  }
 0x83f   :  { %v9508_v17 = vpop.f32.mrf.mxu1  ;;  %v10749_v38 = vpop.f32.mrf.mxu0  ;;  %v17739_v31 = vld [vmem:[%s23251_s0 + $0x10b0] sm:$0xff]  }
 0x840   :  { %11949 = vst.msk [vmem:[%s23253_s3 + $0xb4] sm:$0xf] %vm11903_vm3, %v14266_v4  ;;  %v11343_v58 = vmax.f32 %v11222_v53, 0.0  ;;  %v11095_v56 = vmax.f32 %v9846_v63, %v10749_v38  ;;  %v9848_v12 = vmax.f32 %v23767_v36, %v9508_v17  ;;  %v23770_v4 = vld [vmem:[#allocation54_spill] sm:$0xff] }
 0x841   :  { %v16798_v45 = vpop.f32.mrf.mxu1  ;;  %v17046_v52 = vpop.f32.mrf.mxu0 }
 0x842   :  { %v14267_v28 = vpack.c.bf16 %v11343_v58, %v11343_v58  ;;  %v11223_v47 = vadd.f32 %v22561_v37, %v11095_v56 }
 0x843   :  { %v9513_v14 = vpop.f32.mrf.mxu1  ;;  %16896 = vmatmul.mubr.msk.bf16.gmra.mxu1 %vm467_vm2, %v17734_v6  ;;  %v10754_v43 = vpop.f32.mrf.mxu0  ;;  %17144 = vmatmul.mubr.msk.bf16.gmra.mxu0 %vm467_vm2, %v17735_v51 }
 0x844   :  { %11950 = vst.msk [vmem:[%s23253_s3 + $0xb8] sm:$0xf] %vm11903_vm3, %v14267_v28  ;;  %v11344_v32 = vmax.f32 %v11223_v47, 0.0  ;;  %v11096_v41 = vmax.f32 %v9847_v19, %v10754_v43  ;;  %16899 = vmatprep.mubr.msk.bf16.mxu1 %vm17772_vm1, %v23331_v15  ;;  %17147 = vmatprep.mubr.msk.bf16.mxu0 %vm17772_vm1, %v23331_v15  ;;  %v9849_v59 = vmax.f32 %v23768_v3, %v9513_v14  ;;  %v23773_v3 = vld [vmem:[#allocation60_spill] sm:$0xff] }
 0x845   :  { %v16801_v0 = vpop.f32.mrf.mxu1  ;;  %v17049_v50 = vpop.f32.mrf.mxu0 }
 0x846   :  { %v14268_v34 = vpack.c.bf16 %v11344_v32, %v11344_v32  ;;  %v11224_v30 = vadd.f32 %v22561_v37, %v11096_v41  ;;  %v17740_v32 = vld [vmem:[%s23251_s0 + $0xedc] sm:$0xff]  }
 0x847   :  { %v9516_v25 = vpop.f32.mrf.mxu1  ;;  %v10757_v13 = vpop.f32.mrf.mxu0  ;;  %v17741_v41 = vld [vmem:[%s23251_s0 + $0x10b8] sm:$0xff]  }
 0x848   :  { %11951 = vst.msk [vmem:[%s23253_s3 + $0xbc] sm:$0xf] %vm11903_vm3, %v14268_v34  ;;  %v11345_v7 = vmax.f32 %v11224_v30, 0.0  ;;  %v11097_v16 = vmax.f32 %v9848_v12, %v10757_v13  ;;  %v9850_v35 = vmax.f32 %v23769_v2, %v9516_v25  ;;  %v23772_v34 = vld [vmem:[#allocation58_spill] sm:$0xff] }
 0x849   :  { %v16802_v48 = vpop.f32.mrf.mxu1  ;;  %v17050_v62 = vpop.f32.mrf.mxu0 }
 0x84a   :  { %v14269_v18 = vpack.c.bf16 %v11345_v7, %v11345_v7  ;;  %v11225_v54 = vadd.f32 %v22561_v37, %v11097_v16 }
 0x84b   :  { %v9521_v61 = vpop.f32.mrf.mxu1  ;;  %16900 = vmatmul.mubr.msk.bf16.gmra.mxu1 %vm467_vm2, %v17736_v8  ;;  %v10762_v23 = vpop.f32.mrf.mxu0  ;;  %17148 = vmatmul.mubr.msk.bf16.gmra.mxu0 %vm467_vm2, %v17737_v11 }
 0x84c   :  { %11952 = vst.msk [vmem:[%s23253_s3 + $0xc0] sm:$0xf] %vm11903_vm3, %v14269_v18  ;;  %v11346_v44 = vmax.f32 %v11225_v54, 0.0  ;;  %v11098_v40 = vmax.f32 %v9849_v59, %v10762_v23  ;;  %16903 = vmatprep.mubr.msk.bf16.mxu1 %vm17772_vm1, %v23331_v15  ;;  %17151 = vmatprep.mubr.msk.bf16.mxu0 %vm17772_vm1, %v23331_v15  ;;  %v9851_v53 = vmax.f32 %v23770_v4, %v9521_v61  ;;  %v23775_v4 = vld [vmem:[#allocation64_spill] sm:$0xff] }
 0x84d   :  { %v16805_v42 = vpop.f32.mrf.mxu1  ;;  %v17053_v46 = vpop.f32.mrf.mxu0 }
 0x84e   :  { %v14270_v27 = vpack.c.bf16 %v11346_v44, %v11346_v44  ;;  %v11226_v20 = vadd.f32 %v22561_v37, %v11098_v40  ;;  %v17742_v44 = vld [vmem:[%s23251_s0 + $0xee4] sm:$0xff]  }
 0x84f   :  { %v9524_v22 = vpop.f32.mrf.mxu1  ;;  %v10765_v1 = vpop.f32.mrf.mxu0  ;;  %v17743_v40 = vld [vmem:[%s23251_s0 + $0x10c0] sm:$0xff]  }
 0x850   :  { %11953 = vst.msk [vmem:[%s23253_s3 + $0xc4] sm:$0xf] %vm11903_vm3, %v14270_v27  ;;  %v11347_v60 = vmax.f32 %v11226_v20, 0.0  ;;  %v11099_v24 = vmax.f32 %v9850_v35, %v10765_v1  ;;  %v9852_v19 = vmax.f32 %v23771_v55, %v9524_v22  ;;  %v23774_v27 = vld [vmem:[#allocation62_spill] sm:$0xff] }
 0x851   :  { %v16806_v26 = vpop.f32.mrf.mxu1  ;;  %v17054_v63 = vpop.f32.mrf.mxu0 }
 0x852   :  { %v14271_v17 = vpack.c.bf16 %v11347_v60, %v11347_v60  ;;  %v11227_v38 = vadd.f32 %v22561_v37, %v11099_v24 }
 0x853   :  { %v9529_v6 = vpop.f32.mrf.mxu1  ;;  %16904 = vmatmul.mubr.msk.bf16.gmra.mxu1 %vm467_vm2, %v17738_v33  ;;  %v10770_v51 = vpop.f32.mrf.mxu0  ;;  %17152 = vmatmul.mubr.msk.bf16.gmra.mxu0 %vm467_vm2, %v17739_v31 }
 0x854   :  { %11954 = vst.msk [vmem:[%s23253_s3 + $0xc8] sm:$0xf] %vm11903_vm3, %v14271_v17  ;;  %v11348_v58 = vmax.f32 %v11227_v38, 0.0  ;;  %v11100_v56 = vmax.f32 %v9851_v53, %v10770_v51  ;;  %16907 = vmatprep.mubr.msk.bf16.mxu1 %vm17772_vm1, %v23331_v15  ;;  %17155 = vmatprep.mubr.msk.bf16.mxu0 %vm17772_vm1, %v23331_v15  ;;  %v9853_v30 = vmax.f32 %v23772_v34, %v9529_v6  ;;  %v23777_v34 = vld [vmem:[#allocation68_spill] sm:$0xff] }
 0x855   :  { %v16809_v45 = vpop.f32.mrf.mxu1  ;;  %v17057_v52 = vpop.f32.mrf.mxu0 }
 0x856   :  { %v14272_v28 = vpack.c.bf16 %v11348_v58, %v11348_v58  ;;  %v11228_v47 = vadd.f32 %v22561_v37, %v11100_v56  ;;  %v17744_v58 = vld [vmem:[%s23251_s0 + $0xeec] sm:$0xff]  }
 0x857   :  { %v9532_v14 = vpop.f32.mrf.mxu1  ;;  %v10773_v43 = vpop.f32.mrf.mxu0  ;;  %v17745_v56 = vld [vmem:[%s23251_s0 + $0x10c8] sm:$0xff]  }
 0x858   :  { %11955 = vst.msk [vmem:[%s23253_s3 + $0xcc] sm:$0xf] %vm11903_vm3, %v14272_v28  ;;  %v11349_v0 = vmax.f32 %v11228_v47, 0.0  ;;  %v11101_v50 = vmax.f32 %v9852_v19, %v10773_v43  ;;  %v9854_v59 = vmax.f32 %v23773_v3, %v9532_v14  ;;  %v23776_v28 = vld [vmem:[#allocation66_spill] sm:$0xff] }
 0x859   :  { %v16810_v36 = vpop.f32.mrf.mxu1  ;;  %v17058_v12 = vpop.f32.mrf.mxu0 }
 0x85a   :  { %v14273_v25 = vpack.c.bf16 %v11349_v0, %v11349_v0  ;;  %v11229_v13 = vadd.f32 %v22561_v37, %v11101_v50 }
 0x85b   :  { %v9537_v8 = vpop.f32.mrf.mxu1  ;;  %16908 = vmatmul.mubr.msk.bf16.gmra.mxu1 %vm467_vm2, %v17740_v32  ;;  %v10778_v11 = vpop.f32.mrf.mxu0  ;;  %17156 = vmatmul.mubr.msk.bf16.gmra.mxu0 %vm467_vm2, %v17741_v41 }
 0x85c   :  { %11956 = vst.msk [vmem:[%s23253_s3 + $0xd0] sm:$0xf] %vm11903_vm3, %v14273_v25  ;;  %v11350_v7 = vmax.f32 %v11229_v13, 0.0  ;;  %v11102_v16 = vmax.f32 %v9853_v30, %v10778_v11  ;;  %16911 = vmatprep.mubr.msk.bf16.mxu1 %vm17772_vm1, %v23331_v15  ;;  %17159 = vmatprep.mubr.msk.bf16.mxu0 %vm17772_vm1, %v23331_v15  ;;  %v9855_v20 = vmax.f32 %v23774_v27, %v9537_v8  ;;  %v23779_v27 = vld [vmem:[#allocation71_spill] sm:$0xff] }
 0x85d   :  { %v16813_v48 = vpop.f32.mrf.mxu1  ;;  %v17061_v62 = vpop.f32.mrf.mxu0 }
 0x85e   :  { %v14274_v18 = vpack.c.bf16 %v11350_v7, %v11350_v7  ;;  %v11230_v54 = vadd.f32 %v22561_v37, %v11102_v16  ;;  %v17746_v7 = vld [vmem:[%s23251_s0 + $0xef4] sm:$0xff]  }
 0x85f   :  { %v9540_v61 = vpop.f32.mrf.mxu1  ;;  %v10781_v23 = vpop.f32.mrf.mxu0  ;;  %v17747_v16 = vld [vmem:[%s23251_s0 + $0x10d0] sm:$0xff]  }
 0x860   :  { %11957 = vst.msk [vmem:[%s23253_s3 + $0xd4] sm:$0xf] %vm11903_vm3, %v14274_v18  ;;  %v11351_v42 = vmax.f32 %v11230_v54, 0.0  ;;  %v11103_v46 = vmax.f32 %v9854_v59, %v10781_v23  ;;  %v9856_v53 = vmax.f32 %v23775_v4, %v9540_v61  ;;  %v23778_v18 = vld [vmem:[#allocation70_spill] sm:$0xff] }
 0x861   :  { %v16814_v2 = vpop.f32.mrf.mxu1  ;;  %v17062_v35 = vpop.f32.mrf.mxu0 }
 0x862   :  { %v14275_v22 = vpack.c.bf16 %v11351_v42, %v11351_v42  ;;  %v11231_v1 = vadd.f32 %v22561_v37, %v11103_v46 }
 0x863   :  { %v9545_v33 = vpop.f32.mrf.mxu1  ;;  %16912 = vmatmul.mubr.msk.bf16.gmra.mxu1 %vm467_vm2, %v17742_v44  ;;  %v10786_v31 = vpop.f32.mrf.mxu0  ;;  %17160 = vmatmul.mubr.msk.bf16.gmra.mxu0 %vm467_vm2, %v17743_v40 }
 0x864   :  { %11958 = vst.msk [vmem:[%s23253_s3 + $0xd8] sm:$0xf] %vm11903_vm3, %v14275_v22  ;;  %v11352_v60 = vmax.f32 %v11231_v1, 0.0  ;;  %v11104_v24 = vmax.f32 %v9855_v20, %v10786_v31  ;;  %16915 = vmatprep.mubr.msk.bf16.mxu1 %vm17772_vm1, %v23331_v15  ;;  %17163 = vmatprep.mubr.msk.bf16.mxu0 %vm17772_vm1, %v23331_v15  ;;  %v9857_v47 = vmax.f32 %v23776_v28, %v9545_v33  ;;  %v23781_v28 = vld [vmem:[#allocation3_spill] sm:$0xff] }
 0x865   :  { %v16817_v26 = vpop.f32.mrf.mxu1  ;;  %v17065_v63 = vpop.f32.mrf.mxu0 }
 0x866   :  { %v14276_v17 = vpack.c.bf16 %v11352_v60, %v11352_v60  ;;  %v11232_v38 = vadd.f32 %v22561_v37, %v11104_v24  ;;  %v17748_v60 = vld [vmem:[%s23251_s0 + $0xefc] sm:$0xff]  }
 0x867   :  { %v9548_v6 = vpop.f32.mrf.mxu1  ;;  %v10789_v51 = vpop.f32.mrf.mxu0  ;;  %v17749_v24 = vld [vmem:[%s23251_s0 + $0x10d8] sm:$0xff]  }
 0x868   :  { %11959 = vst.msk [vmem:[%s23253_s3 + $0xdc] sm:$0xf] %vm11903_vm3, %v14276_v17  ;;  %v11353_v45 = vmax.f32 %v11232_v38, 0.0  ;;  %v11105_v52 = vmax.f32 %v9856_v53, %v10789_v51  ;;  %v9858_v30 = vmax.f32 %v23777_v34, %v9548_v6  ;;  %v23780_v17 = vld [vmem:[#allocation72_spill] sm:$0xff] }
 0x869   :  { %v16818_v55 = vpop.f32.mrf.mxu1  ;;  %v17066_v19 = vpop.f32.mrf.mxu0 }
 0x86a   :  { %v14277_v14 = vpack.c.bf16 %v11353_v45, %v11353_v45  ;;  %v11233_v43 = vadd.f32 %v22561_v37, %v11105_v52 }
 0x86b   :  { %v9553_v32 = vpop.f32.mrf.mxu1  ;;  %16916 = vmatmul.mubr.msk.bf16.gmra.mxu1 %vm467_vm2, %v17744_v58  ;;  %v10794_v41 = vpop.f32.mrf.mxu0  ;;  %17164 = vmatmul.mubr.msk.bf16.gmra.mxu0 %vm467_vm2, %v17745_v56 }
 0x86c   :  { %11960 = vst.msk [vmem:[%s23253_s3 + $0xe0] sm:$0xf] %vm11903_vm3, %v14277_v14  ;;  %v11354_v0 = vmax.f32 %v11233_v43, 0.0  ;;  %v11106_v50 = vmax.f32 %v9857_v47, %v10794_v41  ;;  %16919 = vmatprep.mubr.msk.bf16.mxu1 %vm17772_vm1, %v23331_v15  ;;  %17167 = vmatprep.mubr.msk.bf16.mxu0 %vm17772_vm1, %v23331_v15  ;;  %v9859_v54 = vmax.f32 %v23778_v18, %v9553_v32  ;;  %v23783_v18 = vld [vmem:[#allocation5_spill] sm:$0xff] }
 0x86d   :  { %v16821_v36 = vpop.f32.mrf.mxu1  ;;  %v17069_v12 = vpop.f32.mrf.mxu0 }
 0x86e   :  { %v14278_v25 = vpack.c.bf16 %v11354_v0, %v11354_v0  ;;  %v11234_v13 = vadd.f32 %v22561_v37, %v11106_v50  ;;  %v17750_v0 = vld [vmem:[%s23251_s0 + $0xf04] sm:$0xff]  }
 0x86f   :  { %v9556_v8 = vpop.f32.mrf.mxu1  ;;  %v10797_v11 = vpop.f32.mrf.mxu0  ;;  %v17751_v50 = vld [vmem:[%s23251_s0 + $0x10e0] sm:$0xff]  }
 0x870   :  { %11961 = vst.msk [vmem:[%s23253_s3 + $0xe4] sm:$0xf] %vm11903_vm3, %v14278_v25  ;;  %v11355_v48 = vmax.f32 %v11234_v13, 0.0  ;;  %v11107_v62 = vmax.f32 %v9858_v30, %v10797_v11  ;;  %v9860_v20 = vmax.f32 %v23779_v27, %v9556_v8  ;;  %v23782_v25 = vld [vmem:[#allocation4_spill] sm:$0xff] }
 0x871   :  { %v16822_v3 = vpop.f32.mrf.mxu1  ;;  %v17070_v59 = vpop.f32.mrf.mxu0 }
 0x872   :  { %v14279_v61 = vpack.c.bf16 %v11355_v48, %v11355_v48  ;;  %v11235_v23 = vadd.f32 %v22561_v37, %v11107_v62 }
 0x873   :  { %v9561_v44 = vpop.f32.mrf.mxu1  ;;  %16920 = vmatmul.mubr.msk.bf16.gmra.mxu1 %vm467_vm2, %v17746_v7  ;;  %v10802_v40 = vpop.f32.mrf.mxu0  ;;  %17168 = vmatmul.mubr.msk.bf16.gmra.mxu0 %vm467_vm2, %v17747_v16 }
 0x874   :  { %11962 = vst.msk [vmem:[%s23253_s3 + $0xe8] sm:$0xf] %vm11903_vm3, %v14279_v61  ;;  %v11356_v42 = vmax.f32 %v11235_v23, 0.0  ;;  %v11108_v46 = vmax.f32 %v9859_v54, %v10802_v40  ;;  %16923 = vmatprep.mubr.msk.bf16.mxu1 %vm17772_vm1, %v23331_v15  ;;  %17171 = vmatprep.mubr.msk.bf16.mxu0 %vm17772_vm1, %v23331_v15  ;;  %v9861_v38 = vmax.f32 %v23780_v17, %v9561_v44  ;;  %v23785_v17 = vld [vmem:[#allocation7_spill] sm:$0xff] }
 0x875   :  { %v16825_v2 = vpop.f32.mrf.mxu1  ;;  %v17073_v35 = vpop.f32.mrf.mxu0 }
 0x876   :  { %v14280_v22 = vpack.c.bf16 %v11356_v42, %v11356_v42  ;;  %v11236_v1 = vadd.f32 %v22561_v37, %v11108_v46  ;;  %v17752_v42 = vld [vmem:[%s23251_s0 + $0xf0c] sm:$0xff]  }
 0x877   :  { %v9564_v33 = vpop.f32.mrf.mxu1  ;;  %v10805_v31 = vpop.f32.mrf.mxu0  ;;  %v17753_v46 = vld [vmem:[%s23251_s0 + $0x10e8] sm:$0xff]  }
 0x878   :  { %11963 = vst.msk [vmem:[%s23253_s3 + $0xec] sm:$0xf] %vm11903_vm3, %v14280_v22  ;;  %v11357_v26 = vmax.f32 %v11236_v1, 0.0  ;;  %v11109_v63 = vmax.f32 %v9860_v20, %v10805_v31  ;;  %v9862_v47 = vmax.f32 %v23781_v28, %v9564_v33  ;;  %v23784_v22 = vld [vmem:[#allocation6_spill] sm:$0xff] }
 0x879   :  { %v16826_v4 = vpop.f32.mrf.mxu1  ;;  %v17074_v53 = vpop.f32.mrf.mxu0 }
 0x87a   :  { %v14281_v6 = vpack.c.bf16 %v11357_v26, %v11357_v26  ;;  %v11237_v51 = vadd.f32 %v22561_v37, %v11109_v63 }
 0x87b   :  { %v9569_v58 = vpop.f32.mrf.mxu1  ;;  %16924 = vmatmul.mubr.msk.bf16.gmra.mxu1 %vm467_vm2, %v17748_v60  ;;  %v10810_v56 = vpop.f32.mrf.mxu0  ;;  %17172 = vmatmul.mubr.msk.bf16.gmra.mxu0 %vm467_vm2, %v17749_v24 }
 0x87c   :  { %11964 = vst.msk [vmem:[%s23253_s3 + $0xf0] sm:$0xf] %vm11903_vm3, %v14281_v6  ;;  %v11358_v45 = vmax.f32 %v11237_v51, 0.0  ;;  %v11110_v52 = vmax.f32 %v9861_v38, %v10810_v56  ;;  %16927 = vmatprep.mubr.msk.bf16.mxu1 %vm17772_vm1, %v23331_v15  ;;  %17175 = vmatprep.mubr.msk.bf16.mxu0 %vm17772_vm1, %v23331_v15  ;;  %v9863_v13 = vmax.f32 %v23782_v25, %v9569_v58  ;;  %v23787_v25 = vld [vmem:[#allocation9_spill] sm:$0xff] }
 0x87d   :  { %v16829_v55 = vpop.f32.mrf.mxu1  ;;  %v17077_v19 = vpop.f32.mrf.mxu0 }
 0x87e   :  { %v14282_v14 = vpack.c.bf16 %v11358_v45, %v11358_v45  ;;  %v11238_v43 = vadd.f32 %v22561_v37, %v11110_v52  ;;  %v17754_v45 = vld [vmem:[%s23251_s0 + $0xf14] sm:$0xff]  }
 0x87f   :  { %v9572_v32 = vpop.f32.mrf.mxu1  ;;  %v10813_v41 = vpop.f32.mrf.mxu0  ;;  %v17755_v52 = vld [vmem:[%s23251_s0 + $0x10f0] sm:$0xff]  }
 0x880   :  { %11965 = vst.msk [vmem:[%s23253_s3 + $0xf4] sm:$0xf] %vm11903_vm3, %v14282_v14  ;;  %v11359_v36 = vmax.f32 %v11238_v43, 0.0  ;;  %v11111_v12 = vmax.f32 %v9862_v47, %v10813_v41  ;;  %v9864_v54 = vmax.f32 %v23783_v18, %v9572_v32  ;;  %v23786_v14 = vld [vmem:[#allocation8_spill] sm:$0xff] }
 0x881   :  { %v16830_v34 = vpop.f32.mrf.mxu1  ;;  %v17078_v30 = vpop.f32.mrf.mxu0 }
 0x882   :  { %v14283_v8 = vpack.c.bf16 %v11359_v36, %v11359_v36  ;;  %v11239_v11 = vadd.f32 %v22561_v37, %v11111_v12 }
 0x883   :  { %v9577_v7 = vpop.f32.mrf.mxu1  ;;  %16928 = vmatmul.mubr.msk.bf16.gmra.mxu1 %vm467_vm2, %v17750_v0  ;;  %v10818_v16 = vpop.f32.mrf.mxu0  ;;  %17176 = vmatmul.mubr.msk.bf16.gmra.mxu0 %vm467_vm2, %v17751_v50 }
 0x884   :  { %11966 = vst.msk [vmem:[%s23253_s3 + $0xf8] sm:$0xf] %vm11903_vm3, %v14283_v8  ;;  %v11360_v48 = vmax.f32 %v11239_v11, 0.0  ;;  %v11112_v62 = vmax.f32 %v9863_v13, %v10818_v16  ;;  %16931 = vmatprep.mubr.msk.bf16.mxu1 %vm17772_vm1, %v23331_v15  ;;  %17179 = vmatprep.mubr.msk.bf16.mxu0 %vm17772_vm1, %v23331_v15  ;;  %v9865_v1 = vmax.f32 %v23784_v22, %v9577_v7  ;;  %v23789_v22 = vld [vmem:[#allocation11_spill] sm:$0xff] }
 0x885   :  { %v16833_v3 = vpop.f32.mrf.mxu1  ;;  %v17081_v59 = vpop.f32.mrf.mxu0 }
 0x886   :  { %v14284_v61 = vpack.c.bf16 %v11360_v48, %v11360_v48  ;;  %v11240_v23 = vadd.f32 %v22561_v37, %v11112_v62  ;;  %v17756_v48 = vld [vmem:[%s23251_s0 + $0xf1c] ss:$0 sps:$4 sm:$0xff]  }
 0x887   :  { %v9580_v44 = vpop.f32.mrf.mxu1  ;;  %v10821_v40 = vpop.f32.mrf.mxu0  ;;  %v17757_v62 = vld [vmem:[%s23251_s0 + $0x10f8] sm:$0xff]  }
 0x888   :  { %11967 = vst.msk [vmem:[%s23253_s3 + $0xfc] sm:$0xf] %vm11903_vm3, %v14284_v61  ;;  %v11361_v2 = vmax.f32 %v11240_v23, 0.0  ;;  %v11113_v35 = vmax.f32 %v9864_v54, %v10821_v40  ;;  %v9866_v38 = vmax.f32 %v23785_v17, %v9580_v44  ;;  %v23788_v61 = vld [vmem:[#allocation10_spill] sm:$0xff]  ;;  %v23790_v17 = vld [vmem:[#allocation12_spill] sm:$0xff] }
 0x889   :  { %v16834_v27 = vpop.f32.mrf.mxu1  ;;  %v17082_v20 = vpop.f32.mrf.mxu0 }
 0x88a   :  { %v14285_v33 = vpack.c.bf16 %v11361_v2, %v11361_v2  ;;  %v11241_v31 = vadd.f32 %v22561_v37, %v11113_v35 }
 0x88b   :  { %v9585_v60 = vpop.f32.mrf.mxu1  ;;  %16932 = vmatmul.mubr.msk.bf16.gmra.mxu1 %vm467_vm2, %v17752_v42  ;;  %v10826_v24 = vpop.f32.mrf.mxu0  ;;  %17180 = vmatmul.mubr.msk.bf16.gmra.mxu0 %vm467_vm2, %v17753_v46 }
 0x88c   :  { %11968 = vst.msk [vmem:[%s23253_s3 + $0x100] sm:$0xf] %vm11903_vm3, %v14285_v33  ;;  %v11362_v26 = vmax.f32 %v11241_v31, 0.0  ;;  %v11114_v63 = vmax.f32 %v9865_v1, %v10826_v24  ;;  %16935 = vmatprep.mubr.msk.bf16.mxu1 %vm17772_vm1, %v23331_v15  ;;  %17183 = vmatprep.mubr.msk.bf16.mxu0 %vm17772_vm1, %v23331_v15  ;;  %v9867_v43 = vmax.f32 %v23786_v14, %v9585_v60 }
 0x88d   :  { %v16837_v4 = vpop.f32.mrf.mxu1  ;;  %v17085_v53 = vpop.f32.mrf.mxu0 }
 0x88e   :  { %v14286_v6 = vpack.c.bf16 %v11362_v26, %v11362_v26  ;;  %v11242_v51 = vadd.f32 %v22561_v37, %v11114_v63  ;;  %v17758_v26 = vld [vmem:[%s23251_s0 + $0x1100] ss:$0 sps:$4 sm:$0xff]  }
 0x88f   :  { %v9588_v58 = vpop.f32.mrf.mxu1  ;;  %v10829_v56 = vpop.f32.mrf.mxu0 }
 0x890   :  { %11969 = vst.msk [vmem:[%s23253_s3 + $0x104] sm:$0xf] %vm11903_vm3, %v14286_v6  ;;  %v11363_v55 = vmax.f32 %v11242_v51, 0.0  ;;  %v11115_v19 = vmax.f32 %v9866_v38, %v10829_v56  ;;  %v9868_v13 = vmax.f32 %v23787_v25, %v9588_v58 }
 0x891   :  { %v16838_v28 = vpop.f32.mrf.mxu1  ;;  %v17086_v47 = vpop.f32.mrf.mxu0 }
 0x892   :  { %v14287_v32 = vpack.c.bf16 %v11363_v55, %v11363_v55  ;;  %v11243_v41 = vadd.f32 %v22561_v37, %v11115_v19 }
 0x893   :  { %v9593_v0 = vpop.f32.mrf.mxu1  ;;  %16936 = vmatmul.mubr.msk.bf16.gmra.mxu1 %vm467_vm2, %v17754_v45  ;;  %v10834_v50 = vpop.f32.mrf.mxu0  ;;  %17184 = vmatmul.mubr.msk.bf16.gmra.mxu0 %vm467_vm2, %v17755_v52 }
 0x894   :  { %11970 = vst.msk [vmem:[%s23253_s3 + $0x108] sm:$0xf] %vm11903_vm3, %v14287_v32  ;;  %v11364_v36 = vmax.f32 %v11243_v41, 0.0  ;;  %v11116_v12 = vmax.f32 %v9867_v43, %v10834_v50  ;;  %16939 = vmatprep.mubr.msk.bf16.mxu1 %vm17772_vm1, %v23331_v15  ;;  %17187 = vmatprep.mubr.msk.bf16.mxu0 %vm17772_vm1, %v23331_v15  ;;  %v9869_v23 = vmax.f32 %v23788_v61, %v9593_v0 }
 0x895   :  { %v16841_v34 = vpop.f32.mrf.mxu1  ;;  %v17089_v30 = vpop.f32.mrf.mxu0 }
 0x896   :  { %v14288_v8 = vpack.c.bf16 %v11364_v36, %v11364_v36  ;;  %v11244_v11 = vadd.f32 %v22561_v37, %v11116_v12  ;;  %v23791_v12 = vld [vmem:[#allocation13_spill] sm:$0xff] }
 0x897   :  { %v9596_v7 = vpop.f32.mrf.mxu1  ;;  %v10837_v16 = vpop.f32.mrf.mxu0 }
 0x898   :  { %11971 = vst.msk [vmem:[%s23253_s3 + $0x10c] sm:$0xf] %vm11903_vm3, %v14288_v8  ;;  %v11365_v3 = vmax.f32 %v11244_v11, 0.0  ;;  %v11117_v59 = vmax.f32 %v9868_v13, %v10837_v16  ;;  %v9870_v1 = vmax.f32 %v23789_v22, %v9596_v7 }
 0x899   :  { %v16842_v18 = vpop.f32.mrf.mxu1  ;;  %v17090_v54 = vpop.f32.mrf.mxu0 }
 0x89a   :  { %v14289_v44 = vpack.c.bf16 %v11365_v3, %v11365_v3  ;;  %v11245_v40 = vadd.f32 %v22561_v37, %v11117_v59 }
 0x89b   :  { %v9601_v42 = vpop.f32.mrf.mxu1  ;;  %16940 = vmatmul.mubr.msk.bf16.gmra.mxu1 %vm467_vm2, %v17756_v48  ;;  %v10842_v46 = vpop.f32.mrf.mxu0  ;;  %17188 = vmatmul.mubr.msk.bf16.gmra.mxu0 %vm467_vm2, %v17757_v62  ;;  %v23792_v48 = vld [vmem:[#allocation14_spill] sm:$0xff] }
 0x89c   :  { %11972 = vst.msk [vmem:[%s23253_s3 + $0x110] sm:$0xf] %vm11903_vm3, %v14289_v44  ;;  %v11366_v2 = vmax.f32 %v11245_v40, 0.0  ;;  %v11118_v35 = vmax.f32 %v9869_v23, %v10842_v46  ;;  %17191 = vmatprep.mubr.msk.bf16.mxu0 %vm17772_vm1, %v23331_v15  ;;  %v9871_v38 = vmax.f32 %v23790_v17, %v9601_v42  ;;  %v23793_v42 = vld [vmem:[#allocation15_spill] sm:$0xff] }
 0x89d   :  { %v16845_v27 = vpop.f32.mrf.mxu1  ;;  %v17093_v20 = vpop.f32.mrf.mxu0 }
 0x89e   :  { %v14290_v33 = vpack.c.bf16 %v11366_v2, %v11366_v2  ;;  %v11246_v31 = vadd.f32 %v22561_v37, %v11118_v35 }
 0x89f   :  { %v9604_v60 = vpop.f32.mrf.mxu1  ;;  %v10845_v24 = vpop.f32.mrf.mxu0 }
 0x8a0   :  { %11973 = vst.msk [vmem:[%s23253_s3 + $0x114] sm:$0xf] %vm11903_vm3, %v14290_v33  ;;  %v11367_v63 = vmax.f32 %v11246_v31, 0.0  ;;  %v11119_v15 = vmax.f32 %v9870_v1, %v10845_v24  ;;  %v9872_v28 = vmax.f32 %v21652_v10, %v9604_v60  ;;  %v23794_v60 = vld [vmem:[#allocation2_spill] sm:$0xff] }
 0x8a1   :  { %v16846_v4 = vpop.f32.mrf.mxu1  ;;  %v17094_v53 = vpop.f32.mrf.mxu0 }
 0x8a2   :  { %v14291_v6 = vpack.c.bf16 %v11367_v63, %v11367_v63  ;;  %v11247_v51 = vadd.f32 %v22561_v37, %v11119_v15 }
 0x8a3   :  { %v9609_v58 = vpop.f32.mrf.mxu1  ;;  %v10850_v56 = vpop.f32.mrf.mxu0  ;;  %17192 = vmatmul.mubr.msk.bf16.gmra.mxu0 %vm467_vm2, %v17758_v26 }
 0x8a4   :  { %11974 = vst.msk [vmem:[%s23253_s3 + $0x118] sm:$0xf] %vm11903_vm3, %v14291_v6  ;;  %v11368_v45 = vmax.f32 %v11247_v51, 0.0  ;;  %v11120_v52 = vmax.f32 %v9871_v38, %v10850_v56  ;;  %v9873_v34 = vmax.f32 %v23791_v12, %v9609_v58  ;;  %v23795_v51 = vld [vmem:[#allocation16_spill] sm:$0xff] }
 0x8a5   :  { %v16849_v55 = vpop.f32.mrf.mxu1  ;;  %v17097_v19 = vpop.f32.mrf.mxu0 }
 0x8a6   :  { %v14292_v47 = vpack.c.bf16 %v11368_v45, %v11368_v45  ;;  %v11248_v14 = vadd.f32 %v22561_v37, %v11120_v52 }
 0x8a7   :  { %v9612_v43 = vpop.f32.mrf.mxu1  ;;  %v10853_v32 = vpop.f32.mrf.mxu0 }
 0x8a8   :  { %11975 = vst.msk [vmem:[%s23253_s3 + $0x11c] sm:$0xf] %vm11903_vm3, %v14292_v47  ;;  %v11369_v41 = vmax.f32 %v11248_v14, 0.0  ;;  %v11121_v0 = vmax.f32 %v9872_v28, %v10853_v32  ;;  %v9874_v62 = vmax.f32 %v23792_v48, %v9612_v43  ;;  %v23796_v43 = vld [vmem:[#allocation17_spill] sm:$0xff] }
 0x8a9   :  { %v16850_v50 = vpop.f32.mrf.mxu1  ;;  %v17098_v36 = vpop.f32.mrf.mxu0 }
 0x8aa   :  { %v14293_v30 = vpack.c.bf16 %v11369_v41, %v11369_v41  ;;  %v11249_v25 = vadd.f32 %v22561_v37, %v11121_v0 }
 0x8ab   :  { %v9617_v10 = vpop.f32.mrf.mxu1  ;;  %v10858_v13 = vpop.f32.mrf.mxu0 }
 0x8ac   :  { %11976 = vst.msk [vmem:[%s23253_s3 + $0x120] sm:$0xf] %vm11903_vm3, %v14293_v30  ;;  %v11370_v8 = vmax.f32 %v11249_v25, 0.0  ;;  %v11122_v11 = vmax.f32 %v9873_v34, %v10858_v13  ;;  %v9875_v46 = vmax.f32 %v23793_v42, %v9617_v10  ;;  %v23797_v10 = vld [vmem:[#allocation18_spill] sm:$0xff] }
 0x8ad   :  { %v16853_v7 = vpop.f32.mrf.mxu1  ;;  %v17101_v16 = vpop.f32.mrf.mxu0 }
 0x8ae   :  { %v14294_v3 = vpack.c.bf16 %v11370_v8, %v11370_v8  ;;  %v11250_v59 = vadd.f32 %v22561_v37, %v11122_v11 }
 0x8af   :  { %v9620_v18 = vpop.f32.mrf.mxu1  ;;  %v10861_v54 = vpop.f32.mrf.mxu0 }
 0x8b0   :  { %11977 = vst.msk [vmem:[%s23253_s3 + $0x124] sm:$0xf] %vm11903_vm3, %v14294_v3  ;;  %v11371_v61 = vmax.f32 %v11250_v59, 0.0  ;;  %v11123_v23 = vmax.f32 %v9874_v62, %v10861_v54  ;;  %v9876_v24 = vmax.f32 %v23794_v60, %v9620_v18  ;;  %v23798_v18 = vld [vmem:[#allocation19_spill] sm:$0xff] }
 0x8b1   :  { %v16854_v44 = vpop.f32.mrf.mxu1  ;;  %v17102_v40 = vpop.f32.mrf.mxu0 }
 0x8b2   :  { %v14295_v2 = vpack.c.bf16 %v11371_v61, %v11371_v61  ;;  %v11251_v35 = vadd.f32 %v22561_v37, %v11123_v23 }
 0x8b3   :  { %v9625_v27 = vpop.f32.mrf.mxu1  ;;  %v10866_v20 = vpop.f32.mrf.mxu0 }
 0x8b4   :  { %11978 = vst.msk [vmem:[%s23253_s3 + $0x128] sm:$0xf] %vm11903_vm3, %v14295_v2  ;;  %v11372_v22 = vmax.f32 %v11251_v35, 0.0  ;;  %v11124_v1 = vmax.f32 %v9875_v46, %v10866_v20  ;;  %v9877_v58 = vmax.f32 %v23795_v51, %v9625_v27  ;;  %v23799_v27 = vld [vmem:[#allocation20_spill] sm:$0xff] }
 0x8b5   :  { %v16857_v33 = vpop.f32.mrf.mxu1  ;;  %v17105_v31 = vpop.f32.mrf.mxu0 }
 0x8b6   :  { %v14296_v26 = vpack.c.bf16 %v11372_v22, %v11372_v22  ;;  %v11252_v63 = vadd.f32 %v22561_v37, %v11124_v1  ;;  %v23006_v1 = vld [vmem:[%s23252_s2] ss:$0 sm:$0xff] }
 0x8b7   :  { %v9628_v15 = vpop.f32.mrf.mxu1  ;;  %v10869_v4 = vpop.f32.mrf.mxu0 }
 0x8b8   :  { %11979 = vst.msk [vmem:[%s23253_s3 + $0x12c] sm:$0xf] %vm11903_vm3, %v14296_v26  ;;  %v11373_v53 = vmax.f32 %v11252_v63, 0.0  ;;  %v11125_v17 = vmax.f32 %v9876_v24, %v10869_v4  ;;  %v9878_v32 = vmax.f32 %v23796_v43, %v9628_v15  ;;  %v23800_v15 = vld [vmem:[#allocation21_spill] sm:$0xff] }
 0x8b9   :  { %v16858_v38 = vpop.f32.mrf.mxu1  ;;  %v17106_v6 = vpop.f32.mrf.mxu0 }
 0x8ba   :  { %v14297_v56 = vpack.c.bf16 %v11373_v53, %v11373_v53  ;;  %v11253_v45 = vadd.f32 %v22561_v37, %v11125_v17 }
 0x8bb   :  { %v9633_v52 = vpop.f32.mrf.mxu1  ;;  %v10874_v55 = vpop.f32.mrf.mxu0 }
 0x8bc   :  { %11980 = vst.msk [vmem:[%s23253_s3 + $0x130] sm:$0xf] %vm11903_vm3, %v14297_v56  ;;  %v11374_v19 = vmax.f32 %v11253_v45, 0.0  ;;  %v11126_v28 = vmax.f32 %v9877_v58, %v10874_v55  ;;  %v9879_v13 = vmax.f32 %v23797_v10, %v9633_v52  ;;  %v23801_v52 = vld [vmem:[#allocation22_spill] sm:$0xff] }
 0x8bd   :  { %v16861_v47 = vpop.f32.mrf.mxu1  ;;  %v17109_v14 = vpop.f32.mrf.mxu0 }
 0x8be   :  { %v14298_v41 = vpack.c.bf16 %v11374_v19, %v11374_v19  ;;  %v11254_v0 = vadd.f32 %v22561_v37, %v11126_v28 }
 0x8bf   :  { %v9636_v50 = vpop.f32.mrf.mxu1  ;;  %v10877_v36 = vpop.f32.mrf.mxu0 }
 0x8c0   :  { %11981 = vst.msk [vmem:[%s23253_s3 + $0x134] sm:$0xf] %vm11903_vm3, %v14298_v41  ;;  %v11375_v12 = vmax.f32 %v11254_v0, 0.0  ;;  %v11127_v34 = vmax.f32 %v9878_v32, %v10877_v36  ;;  %v9880_v54 = vmax.f32 %v23798_v18, %v9636_v50  ;;  %v23802_v50 = vld [vmem:[#allocation23_spill] sm:$0xff] }
 0x8c1   :  { %v16862_v30 = vpop.f32.mrf.mxu1  ;;  %v17110_v25 = vpop.f32.mrf.mxu0 }
 0x8c2   :  { %v14299_v8 = vpack.c.bf16 %v11375_v12, %v11375_v12  ;;  %v11255_v11 = vadd.f32 %v22561_v37, %v11127_v34 }
 0x8c3   :  { %v9641_v7 = vpop.f32.mrf.mxu1  ;;  %v10882_v16 = vpop.f32.mrf.mxu0 }
 0x8c4   :  { %11982 = vst.msk [vmem:[%s23253_s3 + $0x138] sm:$0xf] %vm11903_vm3, %v14299_v8  ;;  %v11376_v48 = vmax.f32 %v11255_v11, 0.0  ;;  %v11128_v62 = vmax.f32 %v9879_v13, %v10882_v16  ;;  %v9881_v20 = vmax.f32 %v23799_v27, %v9641_v7  ;;  %v23803_v7 = vld [vmem:[#allocation24_spill] sm:$0xff] }
 0x8c5   :  { %v16865_v3 = vpop.f32.mrf.mxu1  ;;  %v17113_v59 = vpop.f32.mrf.mxu0 }
 0x8c6   :  { %v14300_v61 = vpack.c.bf16 %v11376_v48, %v11376_v48  ;;  %v11256_v23 = vadd.f32 %v22561_v37, %v11128_v62 }
 0x8c7   :  { %v9644_v44 = vpop.f32.mrf.mxu1  ;;  %v10885_v40 = vpop.f32.mrf.mxu0 }
 0x8c8   :  { %11983 = vst.msk [vmem:[%s23253_s3 + $0x13c] sm:$0xf] %vm11903_vm3, %v14300_v61  ;;  %v11377_v42 = vmax.f32 %v11256_v23, 0.0  ;;  %v11129_v46 = vmax.f32 %v9880_v54, %v10885_v40  ;;  %v9882_v4 = vmax.f32 %v23800_v15, %v9644_v44  ;;  %v23804_v44 = vld [vmem:[#allocation25_spill] sm:$0xff] }
 0x8c9   :  { %v16866_v2 = vpop.f32.mrf.mxu1  ;;  %v17114_v35 = vpop.f32.mrf.mxu0 }
 0x8ca   :  { %v14301_v22 = vpack.c.bf16 %v11377_v42, %v11377_v42  ;;  %v11257_v37 = vadd.f32 %v23006_v1, %v11129_v46 }
 0x8cb   :  { %v9649_v33 = vpop.f32.mrf.mxu1  ;;  %v10890_v31 = vpop.f32.mrf.mxu0 }
 0x8cc   :  { %11984 = vst.msk [vmem:[%s23253_s3 + $0x140] sm:$0xf] %vm11903_vm3, %v14301_v22  ;;  %v11378_v60 = vmax.f32 %v11257_v37, 0.0  ;;  %v11130_v24 = vmax.f32 %v9881_v20, %v10890_v31  ;;  %v9883_v55 = vmax.f32 %v23801_v52, %v9649_v33  ;;  %v23805_v33 = vld [vmem:[#allocation26_spill] sm:$0xff] }
 0x8cd   :  { %v16869_v26 = vpop.f32.mrf.mxu1  ;;  %v17117_v63 = vpop.f32.mrf.mxu0 }
 0x8ce   :  { %v14302_v53 = vpack.c.bf16 %v11378_v60, %v11378_v60  ;;  %v11258_v17 = vadd.f32 %v23006_v1, %v11130_v24 }
 0x8cf   :  { %v9652_v38 = vpop.f32.mrf.mxu1  ;;  %v10893_v6 = vpop.f32.mrf.mxu0 }
 0x8d0   :  { %11985 = vst.msk [vmem:[%s23253_s3 + $0x144] sm:$0xf] %vm11903_vm3, %v14302_v53  ;;  %v11379_v51 = vmax.f32 %v11258_v17, 0.0  ;;  %v11131_v58 = vmax.f32 %v9882_v4, %v10893_v6  ;;  %v9884_v36 = vmax.f32 %v23802_v50, %v9652_v38  ;;  %v23806_v38 = vld [vmem:[#allocation27_spill] sm:$0xff] }
 0x8d1   :  { %v16870_v56 = vpop.f32.mrf.mxu1  ;;  %v17118_v45 = vpop.f32.mrf.mxu0 }
 0x8d2   :  { %v14303_v19 = vpack.c.bf16 %v11379_v51, %v11379_v51  ;;  %v11259_v28 = vadd.f32 %v23006_v1, %v11131_v58 }
 0x8d3   :  { %v9657_v47 = vpop.f32.mrf.mxu1  ;;  %v10898_v14 = vpop.f32.mrf.mxu0 }
 0x8d4   :  { %11986 = vst.msk [vmem:[%s23253_s3 + $0x148] sm:$0xf] %vm11903_vm3, %v14303_v19  ;;  %v11380_v43 = vmax.f32 %v11259_v28, 0.0  ;;  %v11132_v32 = vmax.f32 %v9883_v55, %v10898_v14  ;;  %v9885_v16 = vmax.f32 %v23803_v7, %v9657_v47  ;;  %v23807_v47 = vld [vmem:[#allocation28_spill] sm:$0xff] }
 0x8d5   :  { %v16873_v41 = vpop.f32.mrf.mxu1  ;;  %v17121_v0 = vpop.f32.mrf.mxu0 }
 0x8d6   :  { %v14304_v12 = vpack.c.bf16 %v11380_v43, %v11380_v43  ;;  %v11260_v34 = vadd.f32 %v23006_v1, %v11132_v32 }
 0x8d7   :  { %v9660_v30 = vpop.f32.mrf.mxu1  ;;  %v10901_v25 = vpop.f32.mrf.mxu0 }
 0x8d8   :  { %11987 = vst.msk [vmem:[%s23253_s3 + $0x14c] sm:$0xf] %vm11903_vm3, %v14304_v12  ;;  %v11381_v10 = vmax.f32 %v11260_v34, 0.0  ;;  %v11133_v13 = vmax.f32 %v9884_v36, %v10901_v25  ;;  %v9886_v40 = vmax.f32 %v23804_v44, %v9660_v30  ;;  %v23808_v30 = vld [vmem:[#allocation29_spill] sm:$0xff] }
 0x8d9   :  { %v16874_v8 = vpop.f32.mrf.mxu1  ;;  %v17122_v11 = vpop.f32.mrf.mxu0 }
 0x8da   :  { %v14305_v48 = vpack.c.bf16 %v11381_v10, %v11381_v10  ;;  %v11261_v62 = vadd.f32 %v23006_v1, %v11133_v13 }
 0x8db   :  { %v9665_v3 = vpop.f32.mrf.mxu1  ;;  %v10906_v59 = vpop.f32.mrf.mxu0 }
 0x8dc   :  { %11988 = vst.msk [vmem:[%s23253_s3 + $0x150] sm:$0xf] %vm11903_vm3, %v14305_v48  ;;  %v11382_v18 = vmax.f32 %v11261_v62, 0.0  ;;  %v11134_v54 = vmax.f32 %v9885_v16, %v10906_v59  ;;  %v9887_v31 = vmax.f32 %v23805_v33, %v9665_v3  ;;  %v23809_v3 = vld [vmem:[#allocation30_spill] sm:$0xff] }
 0x8dd   :  { %v16877_v61 = vpop.f32.mrf.mxu1  ;;  %v17125_v23 = vpop.f32.mrf.mxu0 }
 0x8de   :  { %v14306_v42 = vpack.c.bf16 %v11382_v18, %v11382_v18  ;;  %v11262_v46 = vadd.f32 %v23006_v1, %v11134_v54 }
 0x8df   :  { %v9668_v2 = vpop.f32.mrf.mxu1  ;;  %v10909_v35 = vpop.f32.mrf.mxu0 }
 0x8e0   :  { %11989 = vst.msk [vmem:[%s23253_s3 + $0x154] sm:$0xf] %vm11903_vm3, %v14306_v42  ;;  %v11383_v27 = vmax.f32 %v11262_v46, 0.0  ;;  %v11135_v20 = vmax.f32 %v9886_v40, %v10909_v35  ;;  %v9888_v6 = vmax.f32 %v23806_v38, %v9668_v2  ;;  %v23810_v2 = vld [vmem:[#allocation31_spill] sm:$0xff] }
 0x8e1   :  { %v16878_v22 = vpop.f32.mrf.mxu1  ;;  %v17126_v37 = vpop.f32.mrf.mxu0 }
 0x8e2   :  { %v14307_v60 = vpack.c.bf16 %v11383_v27, %v11383_v27  ;;  %v11263_v24 = vadd.f32 %v23006_v1, %v11135_v20 }
 0x8e3   :  { %v9673_v26 = vpop.f32.mrf.mxu1  ;;  %v10914_v63 = vpop.f32.mrf.mxu0 }
 0x8e4   :  { %11990 = vst.msk [vmem:[%s23253_s3 + $0x158] sm:$0xf] %vm11903_vm3, %v14307_v60  ;;  %v11384_v15 = vmax.f32 %v11263_v24, 0.0  ;;  %v11136_v4 = vmax.f32 %v9887_v31, %v10914_v63  ;;  %v9889_v14 = vmax.f32 %v23807_v47, %v9673_v26  ;;  %v23811_v26 = vld [vmem:[#allocation32_spill] sm:$0xff] }
 0x8e5   :  { %v16881_v53 = vpop.f32.mrf.mxu1  ;;  %v17129_v17 = vpop.f32.mrf.mxu0 }
 0x8e6   :  { %v14308_v51 = vpack.c.bf16 %v11384_v15, %v11384_v15  ;;  %v11264_v58 = vadd.f32 %v23006_v1, %v11136_v4 }
 0x8e7   :  { %v9676_v56 = vpop.f32.mrf.mxu1  ;;  %v10917_v45 = vpop.f32.mrf.mxu0 }
 0x8e8   :  { %11991 = vst.msk [vmem:[%s23253_s3 + $0x15c] sm:$0xf] %vm11903_vm3, %v14308_v51  ;;  %v11385_v52 = vmax.f32 %v11264_v58, 0.0  ;;  %v11137_v55 = vmax.f32 %v9888_v6, %v10917_v45  ;;  %v9890_v25 = vmax.f32 %v23808_v30, %v9676_v56  ;;  %v23812_v56 = vld [vmem:[#allocation33_spill] sm:$0xff] }
 0x8e9   :  { %v16882_v19 = vpop.f32.mrf.mxu1  ;;  %v17130_v28 = vpop.f32.mrf.mxu0 }
 0x8ea   :  { %v14309_v43 = vpack.c.bf16 %v11385_v52, %v11385_v52  ;;  %v11265_v32 = vadd.f32 %v23006_v1, %v11137_v55 }
 0x8eb   :  { %v9681_v41 = vpop.f32.mrf.mxu1  ;;  %v10922_v0 = vpop.f32.mrf.mxu0 }
 0x8ec   :  { %11992 = vst.msk [vmem:[%s23253_s3 + $0x160] sm:$0xf] %vm11903_vm3, %v14309_v43  ;;  %v11386_v50 = vmax.f32 %v11265_v32, 0.0  ;;  %v11138_v36 = vmax.f32 %v9889_v14, %v10922_v0  ;;  %v9891_v59 = vmax.f32 %v23809_v3, %v9681_v41  ;;  %v23813_v41 = vld [vmem:[#allocation34_spill] sm:$0xff] }
 0x8ed   :  { %v16885_v12 = vpop.f32.mrf.mxu1  ;;  %v17133_v34 = vpop.f32.mrf.mxu0 }
 0x8ee   :  { %v14310_v10 = vpack.c.bf16 %v11386_v50, %v11386_v50  ;;  %v11266_v13 = vadd.f32 %v23006_v1, %v11138_v36 }
 0x8ef   :  { %v9684_v8 = vpop.f32.mrf.mxu1  ;;  %v10925_v11 = vpop.f32.mrf.mxu0 }
 0x8f0   :  { %11993 = vst.msk [vmem:[%s23253_s3 + $0x164] sm:$0xf] %vm11903_vm3, %v14310_v10  ;;  %v11387_v7 = vmax.f32 %v11266_v13, 0.0  ;;  %v11139_v16 = vmax.f32 %v9890_v25, %v10925_v11  ;;  %v9892_v35 = vmax.f32 %v23810_v2, %v9684_v8  ;;  %v23814_v8 = vld [vmem:[#allocation35_spill] sm:$0xff] }
 0x8f1   :  { %v16886_v48 = vpop.f32.mrf.mxu1  ;;  %v17134_v62 = vpop.f32.mrf.mxu0 }
 0x8f2   :  { %v14311_v18 = vpack.c.bf16 %v11387_v7, %v11387_v7  ;;  %v11267_v54 = vadd.f32 %v23006_v1, %v11139_v16 }
 0x8f3   :  { %v9689_v61 = vpop.f32.mrf.mxu1  ;;  %v10930_v23 = vpop.f32.mrf.mxu0 }
 0x8f4   :  { %11994 = vst.msk [vmem:[%s23253_s3 + $0x168] sm:$0xf] %vm11903_vm3, %v14311_v18  ;;  %v11388_v44 = vmax.f32 %v11267_v54, 0.0  ;;  %v11140_v40 = vmax.f32 %v9891_v59, %v10930_v23  ;;  %v9893_v63 = vmax.f32 %v23811_v26, %v9689_v61  ;;  %v23815_v61 = vld [vmem:[#allocation36_spill] sm:$0xff] }
 0x8f5   :  { %v16889_v42 = vpop.f32.mrf.mxu1  ;;  %v17137_v46 = vpop.f32.mrf.mxu0 }
 0x8f6   :  { %v14312_v27 = vpack.c.bf16 %v11388_v44, %v11388_v44  ;;  %v11268_v20 = vadd.f32 %v23006_v1, %v11140_v40 }
 0x8f7   :  { %v9692_v22 = vpop.f32.mrf.mxu1  ;;  %v10933_v37 = vpop.f32.mrf.mxu0 }
 0x8f8   :  { %11995 = vst.msk [vmem:[%s23253_s3 + $0x16c] sm:$0xf] %vm11903_vm3, %v14312_v27  ;;  %v11389_v33 = vmax.f32 %v11268_v20, 0.0  ;;  %v11141_v31 = vmax.f32 %v9892_v35, %v10933_v37  ;;  %v9894_v45 = vmax.f32 %v23812_v56, %v9692_v22  ;;  %v23816_v22 = vld [vmem:[#allocation37_spill] sm:$0xff] }
 0x8f9   :  { %v16890_v60 = vpop.f32.mrf.mxu1  ;;  %v17138_v24 = vpop.f32.mrf.mxu0 }
 0x8fa   :  { %v14313_v15 = vpack.c.bf16 %v11389_v33, %v11389_v33  ;;  %v11269_v4 = vadd.f32 %v23006_v1, %v11141_v31 }
 0x8fb   :  { %v9697_v53 = vpop.f32.mrf.mxu1  ;;  %v10938_v17 = vpop.f32.mrf.mxu0 }
 0x8fc   :  { %11996 = vst.msk [vmem:[%s23253_s3 + $0x170] sm:$0xf] %vm11903_vm3, %v14313_v15  ;;  %v11390_v38 = vmax.f32 %v11269_v4, 0.0  ;;  %v11142_v6 = vmax.f32 %v9893_v63, %v10938_v17  ;;  %v9895_v0 = vmax.f32 %v23813_v41, %v9697_v53  ;;  %v23817_v53 = vld [vmem:[#allocation38_spill] sm:$0xff] }
 0x8fd   :  { %v16893_v51 = vpop.f32.mrf.mxu1  ;;  %v17141_v58 = vpop.f32.mrf.mxu0 }
 0x8fe   :  { %v14314_v52 = vpack.c.bf16 %v11390_v38, %v11390_v38  ;;  %v11270_v55 = vadd.f32 %v23006_v1, %v11142_v6 }
 0x8ff   :  { %v9700_v19 = vpop.f32.mrf.mxu1  ;;  %v10941_v28 = vpop.f32.mrf.mxu0 }
 0x900   :  { %11997 = vst.msk [vmem:[%s23253_s3 + $0x174] sm:$0xf] %vm11903_vm3, %v14314_v52  ;;  %v11391_v47 = vmax.f32 %v11270_v55, 0.0  ;;  %v11143_v14 = vmax.f32 %v9894_v45, %v10941_v28  ;;  %v9896_v11 = vmax.f32 %v23814_v8, %v9700_v19  ;;  %v23818_v19 = vld [vmem:[#allocation39_spill] sm:$0xff] }
 0x901   :  { %v16894_v43 = vpop.f32.mrf.mxu1  ;;  %v17142_v32 = vpop.f32.mrf.mxu0 }
 0x902   :  { %v14315_v50 = vpack.c.bf16 %v11391_v47, %v11391_v47  ;;  %v11271_v36 = vadd.f32 %v23006_v1, %v11143_v14 }
 0x903   :  { %v9705_v12 = vpop.f32.mrf.mxu1  ;;  %v10946_v34 = vpop.f32.mrf.mxu0 }
 0x904   :  { %11998 = vst.msk [vmem:[%s23253_s3 + $0x178] sm:$0xf] %vm11903_vm3, %v14315_v50  ;;  %v11392_v30 = vmax.f32 %v11271_v36, 0.0  ;;  %v11144_v25 = vmax.f32 %v9895_v0, %v10946_v34  ;;  %v9897_v23 = vmax.f32 %v23815_v61, %v9705_v12  ;;  %v23819_v12 = vld [vmem:[#allocation40_spill] sm:$0xff] }
 0x905   :  { %v16897_v10 = vpop.f32.mrf.mxu1  ;;  %v17145_v13 = vpop.f32.mrf.mxu0 }
 0x906   :  { %v14316_v7 = vpack.c.bf16 %v11392_v30, %v11392_v30  ;;  %v11272_v16 = vadd.f32 %v23006_v1, %v11144_v25 }
 0x907   :  { %v9708_v48 = vpop.f32.mrf.mxu1  ;;  %v10949_v62 = vpop.f32.mrf.mxu0 }
 0x908   :  { %11999 = vst.msk [vmem:[%s23253_s3 + $0x17c] sm:$0xf] %vm11903_vm3, %v14316_v7  ;;  %v11393_v3 = vmax.f32 %v11272_v16, 0.0  ;;  %v11145_v59 = vmax.f32 %v9896_v11, %v10949_v62  ;;  %v9898_v37 = vmax.f32 %v23816_v22, %v9708_v48  ;;  %v23820_v48 = vld [vmem:[#allocation41_spill] sm:$0xff] }
 0x909   :  { %v16898_v18 = vpop.f32.mrf.mxu1  ;;  %v17146_v54 = vpop.f32.mrf.mxu0 }
 0x90a   :  { %v14317_v44 = vpack.c.bf16 %v11393_v3, %v11393_v3  ;;  %v11273_v40 = vadd.f32 %v23006_v1, %v11145_v59 }
 0x90b   :  { %v9713_v42 = vpop.f32.mrf.mxu1  ;;  %v10954_v46 = vpop.f32.mrf.mxu0 }
 0x90c   :  { %12000 = vst.msk [vmem:[%s23253_s3 + $0x180] sm:$0xf] %vm11903_vm3, %v14317_v44  ;;  %v11394_v2 = vmax.f32 %v11273_v40, 0.0  ;;  %v11146_v35 = vmax.f32 %v9897_v23, %v10954_v46  ;;  %v9899_v17 = vmax.f32 %v23817_v53, %v9713_v42  ;;  %v23821_v42 = vld [vmem:[#allocation42_spill] sm:$0xff] }
 0x90d   :  { %v16901_v27 = vpop.f32.mrf.mxu1  ;;  %v17149_v20 = vpop.f32.mrf.mxu0 }
 0x90e   :  { %v14318_v33 = vpack.c.bf16 %v11394_v2, %v11394_v2  ;;  %v11274_v31 = vadd.f32 %v23006_v1, %v11146_v35 }
 0x90f   :  { %v9716_v60 = vpop.f32.mrf.mxu1  ;;  %v10957_v24 = vpop.f32.mrf.mxu0 }
 0x910   :  { %12001 = vst.msk [vmem:[%s23253_s3 + $0x184] sm:$0xf] %vm11903_vm3, %v14318_v33  ;;  %v11395_v26 = vmax.f32 %v11274_v31, 0.0  ;;  %v11147_v63 = vmax.f32 %v9898_v37, %v10957_v24  ;;  %v9900_v28 = vmax.f32 %v23818_v19, %v9716_v60  ;;  %v23822_v60 = vld [vmem:[#allocation43_spill] sm:$0xff] }
 0x911   :  { %v16902_v15 = vpop.f32.mrf.mxu1  ;;  %v17150_v4 = vpop.f32.mrf.mxu0 }
 0x912   :  { %v14319_v38 = vpack.c.bf16 %v11395_v26, %v11395_v26  ;;  %v11275_v6 = vadd.f32 %v23006_v1, %v11147_v63 }
 0x913   :  { %v9721_v51 = vpop.f32.mrf.mxu1  ;;  %v10962_v58 = vpop.f32.mrf.mxu0 }
 0x914   :  { %12002 = vst.msk [vmem:[%s23253_s3 + $0x188] sm:$0xf] %vm11903_vm3, %v14319_v38  ;;  %v11396_v56 = vmax.f32 %v11275_v6, 0.0  ;;  %v11148_v45 = vmax.f32 %v9899_v17, %v10962_v58  ;;  %v9901_v34 = vmax.f32 %v23819_v12, %v9721_v51  ;;  %v23823_v51 = vld [vmem:[#allocation44_spill] sm:$0xff] }
 0x915   :  { %v16905_v52 = vpop.f32.mrf.mxu1  ;;  %v17153_v55 = vpop.f32.mrf.mxu0 }
 0x916   :  { %v14320_v47 = vpack.c.bf16 %v11396_v56, %v11396_v56  ;;  %v11276_v14 = vadd.f32 %v23006_v1, %v11148_v45 }
 0x917   :  { %v9724_v43 = vpop.f32.mrf.mxu1  ;;  %v10965_v32 = vpop.f32.mrf.mxu0 }
 0x918   :  { %12003 = vst.msk [vmem:[%s23253_s3 + $0x18c] sm:$0xf] %vm11903_vm3, %v14320_v47  ;;  %v11397_v41 = vmax.f32 %v11276_v14, 0.0  ;;  %v11149_v0 = vmax.f32 %v9900_v28, %v10965_v32  ;;  %v9902_v62 = vmax.f32 %v23820_v48, %v9724_v43  ;;  %v23824_v43 = vld [vmem:[#allocation45_spill] sm:$0xff] }
 0x919   :  { %v16906_v50 = vpop.f32.mrf.mxu1  ;;  %v17154_v36 = vpop.f32.mrf.mxu0 }
 0x91a   :  { %v14321_v30 = vpack.c.bf16 %v11397_v41, %v11397_v41  ;;  %v11277_v25 = vadd.f32 %v23006_v1, %v11149_v0 }
 0x91b   :  { %v9729_v10 = vpop.f32.mrf.mxu1  ;;  %v10970_v13 = vpop.f32.mrf.mxu0 }
 0x91c   :  { %12004 = vst.msk [vmem:[%s23253_s3 + $0x190] sm:$0xf] %vm11903_vm3, %v14321_v30  ;;  %v11398_v8 = vmax.f32 %v11277_v25, 0.0  ;;  %v11150_v11 = vmax.f32 %v9901_v34, %v10970_v13  ;;  %v9903_v46 = vmax.f32 %v23821_v42, %v9729_v10  ;;  %v23825_v10 = vld [vmem:[#allocation46_spill] sm:$0xff] }
 0x91d   :  { %v16909_v7 = vpop.f32.mrf.mxu1  ;;  %v17157_v16 = vpop.f32.mrf.mxu0 }
 0x91e   :  { %v14322_v3 = vpack.c.bf16 %v11398_v8, %v11398_v8  ;;  %v11278_v59 = vadd.f32 %v23006_v1, %v11150_v11 }
 0x91f   :  { %v9732_v18 = vpop.f32.mrf.mxu1  ;;  %v10973_v54 = vpop.f32.mrf.mxu0 }
 0x920   :  { %12005 = vst.msk [vmem:[%s23253_s3 + $0x194] sm:$0xf] %vm11903_vm3, %v14322_v3  ;;  %v11399_v61 = vmax.f32 %v11278_v59, 0.0  ;;  %v11151_v23 = vmax.f32 %v9902_v62, %v10973_v54  ;;  %v9904_v24 = vmax.f32 %v23822_v60, %v9732_v18  ;;  %v23826_v18 = vld [vmem:[#allocation47_spill] sm:$0xff] }
 0x921   :  { %v16910_v44 = vpop.f32.mrf.mxu1  ;;  %v17158_v40 = vpop.f32.mrf.mxu0 }
 0x922   :  { %v14323_v2 = vpack.c.bf16 %v11399_v61, %v11399_v61  ;;  %v11279_v35 = vadd.f32 %v23006_v1, %v11151_v23 }
 0x923   :  { %v9737_v27 = vpop.f32.mrf.mxu1  ;;  %v10978_v20 = vpop.f32.mrf.mxu0 }
 0x924   :  { %12006 = vst.msk [vmem:[%s23253_s3 + $0x198] sm:$0xf] %vm11903_vm3, %v14323_v2  ;;  %v11400_v22 = vmax.f32 %v11279_v35, 0.0  ;;  %v11152_v37 = vmax.f32 %v9903_v46, %v10978_v20  ;;  %v9905_v58 = vmax.f32 %v23823_v51, %v9737_v27  ;;  %v23827_v27 = vld [vmem:[#allocation48_spill] sm:$0xff] }
 0x925   :  { %v16913_v33 = vpop.f32.mrf.mxu1  ;;  %v17161_v31 = vpop.f32.mrf.mxu0 }
 0x926   :  { %v14324_v26 = vpack.c.bf16 %v11400_v22, %v11400_v22  ;;  %v11280_v63 = vadd.f32 %v23006_v1, %v11152_v37 }
 0x927   :  { %v9740_v15 = vpop.f32.mrf.mxu1  ;;  %v10981_v4 = vpop.f32.mrf.mxu0 }
 0x928   :  { %12007 = vst.msk [vmem:[%s23253_s3 + $0x19c] sm:$0xf] %vm11903_vm3, %v14324_v26  ;;  %v11401_v53 = vmax.f32 %v11280_v63, 0.0  ;;  %v11153_v17 = vmax.f32 %v9904_v24, %v10981_v4  ;;  %v9906_v32 = vmax.f32 %v23824_v43, %v9740_v15 }
 0x929   :  { %v16914_v38 = vpop.f32.mrf.mxu1  ;;  %v17162_v6 = vpop.f32.mrf.mxu0 }
 0x92a   :  { %v14325_v56 = vpack.c.bf16 %v11401_v53, %v11401_v53  ;;  %v11281_v45 = vadd.f32 %v23006_v1, %v11153_v17 }
 0x92b   :  { %v9745_v52 = vpop.f32.mrf.mxu1  ;;  %v10986_v55 = vpop.f32.mrf.mxu0 }
 0x92c   :  { %12008 = vst.msk [vmem:[%s23253_s3 + $0x1a0] sm:$0xf] %vm11903_vm3, %v14325_v56  ;;  %v11402_v19 = vmax.f32 %v11281_v45, 0.0  ;;  %v11154_v28 = vmax.f32 %v9905_v58, %v10986_v55  ;;  %v9907_v13 = vmax.f32 %v23825_v10, %v9745_v52 }
 0x92d   :  { %v16917_v47 = vpop.f32.mrf.mxu1  ;;  %v17165_v14 = vpop.f32.mrf.mxu0 }
 0x92e   :  { %v14326_v41 = vpack.c.bf16 %v11402_v19, %v11402_v19  ;;  %v11282_v0 = vadd.f32 %v23006_v1, %v11154_v28 }
 0x92f   :  { %v9748_v50 = vpop.f32.mrf.mxu1  ;;  %v10989_v36 = vpop.f32.mrf.mxu0 }
 0x930   :  { %12009 = vst.msk [vmem:[%s23253_s3 + $0x1a4] sm:$0xf] %vm11903_vm3, %v14326_v41  ;;  %v11403_v12 = vmax.f32 %v11282_v0, 0.0  ;;  %v11155_v34 = vmax.f32 %v9906_v32, %v10989_v36  ;;  %v9908_v54 = vmax.f32 %v23826_v18, %v9748_v50 }
 0x931   :  { %v16918_v30 = vpop.f32.mrf.mxu1  ;;  %v17166_v25 = vpop.f32.mrf.mxu0 }
 0x932   :  { %v14327_v8 = vpack.c.bf16 %v11403_v12, %v11403_v12  ;;  %v11283_v11 = vadd.f32 %v23006_v1, %v11155_v34 }
 0x933   :  { %v9753_v7 = vpop.f32.mrf.mxu1  ;;  %v10994_v16 = vpop.f32.mrf.mxu0 }
 0x934   :  { %12010 = vst.msk [vmem:[%s23253_s3 + $0x1a8] sm:$0xf] %vm11903_vm3, %v14327_v8  ;;  %v11404_v48 = vmax.f32 %v11283_v11, 0.0  ;;  %v11156_v62 = vmax.f32 %v9907_v13, %v10994_v16  ;;  %v9909_v20 = vmax.f32 %v23827_v27, %v9753_v7 }
 0x935   :  { %v16921_v3 = vpop.f32.mrf.mxu1  ;;  %v17169_v59 = vpop.f32.mrf.mxu0 }
 0x936   :  { %v14328_v61 = vpack.c.bf16 %v11404_v48, %v11404_v48  ;;  %v11284_v23 = vadd.f32 %v23006_v1, %v11156_v62 }
 0x937   :  { %v9756_v44 = vpop.f32.mrf.mxu1  ;;  %v10997_v40 = vpop.f32.mrf.mxu0 }
 0x938   :  { %12011 = vst.msk [vmem:[%s23253_s3 + $0x1ac] sm:$0xf] %vm11903_vm3, %v14328_v61  ;;  %v11405_v42 = vmax.f32 %v11284_v23, 0.0  ;;  %v11157_v46 = vmax.f32 %v9908_v54, %v10997_v40  ;;  %v9910_v15 = vmax.f32 %v21994_v5, %v9756_v44 }
 0x939   :  { %v16922_v2 = vpop.f32.mrf.mxu1  ;;  %v17170_v35 = vpop.f32.mrf.mxu0 }
 0x93a   :  { %v14329_v22 = vpack.c.bf16 %v11405_v42, %v11405_v42  ;;  %v11285_v37 = vadd.f32 %v23006_v1, %v11157_v46 }
 0x93b   :  { %v9761_v33 = vpop.f32.mrf.mxu1  ;;  %v11002_v31 = vpop.f32.mrf.mxu0 }
 0x93c   :  { %12012 = vst.msk [vmem:[%s23253_s3 + $0x1b0] sm:$0xf] %vm11903_vm3, %v14329_v22  ;;  %v11406_v60 = vmax.f32 %v11285_v37, 0.0  ;;  %v11158_v24 = vmax.f32 %v9909_v20, %v11002_v31  ;;  %v9911_v45 = vmax.f32 %v21999_v29, %v9761_v33 }
 0x93d   :  { %v16925_v26 = vpop.f32.mrf.mxu1  ;;  %v17173_v63 = vpop.f32.mrf.mxu0 }
 0x93e   :  { %v14330_v4 = vpack.c.bf16 %v11406_v60, %v11406_v60  ;;  %v11286_v53 = vadd.f32 %v23006_v1, %v11158_v24 }
 0x93f   :  { %v9764_v17 = vpop.f32.mrf.mxu1  ;;  %v11005_v38 = vpop.f32.mrf.mxu0 }
 0x940   :  { %12013 = vst.msk [vmem:[%s23253_s3 + $0x1b4] sm:$0xf] %vm11903_vm3, %v14330_v4  ;;  %v11407_v6 = vmax.f32 %v11286_v53, 0.0  ;;  %v11159_v51 = vmax.f32 %v9910_v15, %v11005_v38  ;;  %v9912_v32 = vmax.f32 %v22012_v21, %v9764_v17  ;;  %v23828_v4 = vld [vmem:[#allocation49_spill] sm:$0xff] }
 0x941   :  { %v16926_v58 = vpop.f32.mrf.mxu1  ;;  %v17174_v56 = vpop.f32.mrf.mxu0 }
 0x942   :  { %v14331_v52 = vpack.c.bf16 %v11407_v6, %v11407_v6  ;;  %v11287_v55 = vadd.f32 %v23006_v1, %v11159_v51 }
 0x943   :  { %v9769_v5 = vpop.f32.mrf.mxu1  ;;  %v11010_v19 = vpop.f32.mrf.mxu0 }
 0x944   :  { %12014 = vst.msk [vmem:[%s23253_s3 + $0x1b8] sm:$0xf] %vm11903_vm3, %v14331_v52  ;;  %v11408_v28 = vmax.f32 %v11287_v55, 0.0  ;;  %v11160_v47 = vmax.f32 %v9911_v45, %v11010_v19  ;;  %v9913_v25 = vmax.f32 %v22017_v9, %v9769_v5  ;;  %v23829_v52 = vld [vmem:[#allocation50_spill] sm:$0xff] }
 0x945   :  { %v16929_v14 = vpop.f32.mrf.mxu1  ;;  %v17177_v43 = vpop.f32.mrf.mxu0 }
 0x946   :  { %v14332_v41 = vpack.c.bf16 %v11408_v28, %v11408_v28  ;;  %v11288_v0 = vadd.f32 %v23006_v1, %v11160_v47 }
 0x947   :  { %v9772_v29 = vpop.f32.mrf.mxu1  ;;  %v11013_v50 = vpop.f32.mrf.mxu0 }
 0x948   :  { %12015 = vst.msk [vmem:[%s23253_s3 + $0x1bc] sm:$0xf] %vm11903_vm3, %v14332_v41  ;;  %v11409_v36 = vmax.f32 %v11288_v0, 0.0  ;;  %v11161_v12 = vmax.f32 %v9912_v32, %v11013_v50  ;;  %v9914_v62 = vmax.f32 %v22030_v49, %v9772_v29  ;;  %v23830_v0 = vld [vmem:[#allocation51_spill] sm:$0xff] }
 0x949   :  { %v16930_v34 = vpop.f32.mrf.mxu1  ;;  %v17178_v30 = vpop.f32.mrf.mxu0 }
 0x94a   :  { %v14333_v10 = vpack.c.bf16 %v11409_v36, %v11409_v36  ;;  %v11289_v13 = vadd.f32 %v23006_v1, %v11161_v12 }
 0x94b   :  { %v9777_v21 = vpop.f32.mrf.mxu1  ;;  %v11018_v8 = vpop.f32.mrf.mxu0 }
 0x94c   :  { %12016 = vst.msk [vmem:[%s23253_s3 + $0x1c0] sm:$0xf] %vm11903_vm3, %v14333_v10  ;;  %v11410_v11 = vmax.f32 %v11289_v13, 0.0  ;;  %v11162_v7 = vmax.f32 %v9913_v25, %v11018_v8  ;;  %v9915_v40 = vmax.f32 %v22035_v39, %v9777_v21 }
 0x94d   :  { %v16933_v16 = vpop.f32.mrf.mxu1  ;;  %v17181_v48 = vpop.f32.mrf.mxu0 }
 0x94e   :  { %v14334_v3 = vpack.c.bf16 %v11410_v11, %v11410_v11  ;;  %v11290_v59 = vadd.f32 %v23006_v1, %v11162_v7 }
 0x94f   :  { %v9780_v9 = vpop.f32.mrf.mxu1  ;;  %v11021_v18 = vpop.f32.mrf.mxu0 }
 0x950   :  { %12017 = vst.msk [vmem:[%s23253_s3 + $0x1c4] sm:$0xf] %vm11903_vm3, %v14334_v3  ;;  %v11411_v54 = vmax.f32 %v11290_v59, 0.0  ;;  %v11163_v61 = vmax.f32 %v9914_v62, %v11021_v18  ;;  %v9916_v37 = vmax.f32 %v22048_v57, %v9780_v9 }
 0x951   :  { %v16934_v23 = vpop.f32.mrf.mxu1  ;;  %v17182_v44 = vpop.f32.mrf.mxu0 }
 0x952   :  { %v14335_v42 = vpack.c.bf16 %v11411_v54, %v11411_v54  ;;  %v11291_v46 = vadd.f32 %v23006_v1, %v11163_v61 }
 0x953   :  { %v9785_v49 = vpop.f32.mrf.mxu1  ;;  %v11026_v2 = vpop.f32.mrf.mxu0 }
 0x954   :  { %12018 = vst.msk [vmem:[%s23253_s3 + $0x1c8] sm:$0xf] %vm11903_vm3, %v14335_v42  ;;  %v11412_v35 = vmax.f32 %v11291_v46, 0.0  ;;  %v11164_v27 = vmax.f32 %v9915_v40, %v11026_v2  ;;  %v9917_v53 = vmax.f32 %v23828_v4, %v9785_v49 }
 0x955   :  { %v16937_v20 = vpop.f32.mrf.mxu1  ;;  %v17185_v22 = vpop.f32.mrf.mxu0 }
 0x956   :  { %v14336_v33 = vpack.c.bf16 %v11412_v35, %v11412_v35  ;;  %v11292_v31 = vadd.f32 %v23006_v1, %v11164_v27 }
 0x957   :  { %v9788_v39 = vpop.f32.mrf.mxu1  ;;  %v11029_v60 = vpop.f32.mrf.mxu0 }
 0x958   :  { %12019 = vst.msk [vmem:[%s23253_s3 + $0x1cc] sm:$0xf] %vm11903_vm3, %v14336_v33  ;;  %v11413_v24 = vmax.f32 %v11292_v31, 0.0  ;;  %v11165_v26 = vmax.f32 %v9916_v37, %v11029_v60  ;;  %v9918_v55 = vmax.f32 %v23829_v52, %v9788_v39 }
 0x959   :  { %v16938_v63 = vpop.f32.mrf.mxu1  ;;  %v17186_v15 = vpop.f32.mrf.mxu0 }
 0x95a   :  { %v14337_v17 = vpack.c.bf16 %v11413_v24, %v11413_v24  ;;  %v11293_v38 = vadd.f32 %v23006_v1, %v11165_v26 }
 0x95b   :  { %v9793_v57 = vpop.f32.mrf.mxu1  ;;  %v11034_v6 = vpop.f32.mrf.mxu0 }
 0x95c   :  { %12020 = vst.msk [vmem:[%s23253_s3 + $0x1d0] sm:$0xf] %vm11903_vm3, %v14337_v17  ;;  %v11414_v51 = vmax.f32 %v11293_v38, 0.0  ;;  %v11166_v58 = vmax.f32 %v9917_v53, %v11034_v6  ;;  %v9919_v29 = vmax.f32 %v23830_v0, %v9793_v57 }
 0x95d   :  { %v17189_v56 = vpop.f32.mrf.mxu0  ;;  %v16941_v45 = vpop.f32.mrf.mxu1 }
 0x95e   :  { %v14338_v5 = vpack.c.bf16 %v11414_v51, %v11414_v51  ;;  %v11294_v19 = vadd.f32 %v23006_v1, %v11166_v58 }
 0x95f   :  { %v11037_v28 = vpop.f32.mrf.mxu0  ;;  %v9796_v47 = vpop.f32.mrf.mxu1 }
 0x960   :  { %12021 = vst.msk [vmem:[%s23253_s3 + $0x1d4] sm:$0xf] %vm11903_vm3, %v14338_v5  ;;  %v11415_v14 = vmax.f32 %v11294_v19, 0.0  ;;  %v11167_v43 = vmax.f32 %v9918_v55, %v11037_v28 }
 0x961   :  { %v17190_v32 = vpop.f32.mrf.mxu0  ;;  %v16942_v41 = vpop.f32.mrf.mxu1 }
 0x962   :  { %v14339_v50 = vpack.c.bf16 %v11415_v14, %v11415_v14  ;;  %v11295_v36 = vadd.f32 %v23006_v1, %v11167_v43 }
 0x963   :  { %v11042_v12 = vpop.f32.mrf.mxu0 }
 0x964   :  { %12022 = vst.msk [vmem:[%s23253_s3 + $0x1d8] sm:$0xf] %vm11903_vm3, %v14339_v50  ;;  %v11416_v34 = vmax.f32 %v11295_v36, 0.0  ;;  %v11168_v30 = vmax.f32 %v9919_v29, %v11042_v12 }
 0x965   :  { %v17193_v25 = vpop.f32.mrf.mxu0 }
 0x966   :  { %v14340_v10 = vpack.c.bf16 %v11416_v34, %v11416_v34  ;;  %v11296_v13 = vadd.f32 %v23006_v1, %v11168_v30 }
 0x967   :  { %v11045_v21 = vpop.f32.mrf.mxu0 }
 0x968   :  { %12023 = vst.msk [vmem:[%s23253_s3 + $0x1dc] sm:$0xf] %vm11903_vm3, %v14340_v10  ;;  %v11417_v8 = vmax.f32 %v11296_v13, 0.0 }
 0x969   :  { %v17194_v11 = vpop.f32.mrf.mxu0 }
 0x96a   :  { %v14341_v7 = vpack.c.bf16 %v11417_v8, %v11417_v8 }
 0x96c   :  { %12024 = vst.msk [vmem:[%s23253_s3 + $0x1e0] sm:$0xf] %vm11903_vm3, %v14341_v7 }

// kernel: simple_net_forward.5
= control target key start
LH: loop header
LB: loop body
LE: loop exit
PB: predicated region body
PF: predicated region fallthrough
CT: control target
= control target key end

     0   :  { %vm305_vm0 = vcmask 1041408   ;;  %vm301_vm1 = vcmask 949248   ;;  %vm462_vm2 = vcmask 1043456   ;;  %v817_v40 = vmov 0.0   ;;  %s1033_s1 = inlined_call_operand.vmem [shape: bf16[500,120], index: 1, kind: input, shape index: {}]   ;;  %s1034_s5 = inlined_call_operand.vmem [shape: bf16[84,15], index: 5, kind: input, shape index: {}]   ;;  %s1035_s0 = inlined_call_operand.vmem [shape: bf16[8,500], index: 0, kind: input, shape index: {}]   ;;  %s1036_s3 = inlined_call_operand.vmem [shape: bf16[120,84], index: 3, kind: input, shape index: {}]   ;;  %s1037_s2 = inlined_call_operand.vmem [shape: f32[1,120], index: 2, kind: input, shape index: {}]   ;;  %s1038_s4 = inlined_call_operand.vmem [shape: f32[1,84], index: 4, kind: input, shape index: {}]   ;;  %s1039_s6 = inlined_call_operand.vmem [shape: f32[1,15], index: 6, kind: input, shape index: {}]   ;;  %s1040_s7 = inlined_call_operand.vmem [shape: f32[8,15], index: 7, kind: output, shape index: {}]  }
   0x1   :  { %v767_v0 = vld [vmem:[%s1033_s1 + $0x78] sm:$0xff]   ;;  %v772_v4 = vld [vmem:[%s1033_s1 + $0x70] sm:$0xff]   ;;  %v776_v8 = vld [vmem:[%s1033_s1 + $0x68] sm:$0xff]   ;;  %vm818_vm3 = vmmov 0   ;;  %vm458_vm4 = vcmask 982016   ;;  %vm559_vm5 = vcmask 687104  }
   0x2   :  { %v768_v1 = vld [vmem:[%s1033_s1 + $0xf8] ss:$0 sps:$4 sm:$0x33]   ;;  %668 = vmatprep.subr.bf16.mxu0 %v767_v0  ;;  %v773_v5 = vld [vmem:[%s1033_s1 + $0xf0] sm:$0xff]   ;;  %v777_v9 = vld [vmem:[%s1033_s1 + $0xe8] sm:$0xff]   ;;  %vm606_vm6 = vcmask 121856  }
   0x3   :  { %v770_v2 = vld [vmem:[%s1033_s1 + $0x38] sm:$0xff]   ;;  %764 = vmatprep.subr.msk.bf16.mxu1 %vm305_vm0, %v768_v1  ;;  %v774_v6 = vld [vmem:[%s1033_s1 + $0x30] sm:$0xff]   ;;  %v778_v10 = vld [vmem:[%s1033_s1 + $0x28] sm:$0xff]  }
   0x4   :  { %v771_v3 = vld [vmem:[%s1033_s1 + $0xb8] sm:$0xff]   ;;  %669 = vmatpush3.bf16.msra.mxu0 %v770_v2  ;;  %v775_v7 = vld [vmem:[%s1033_s1 + $0xb0] sm:$0xff]   ;;  %v779_v11 = vld [vmem:[%s1033_s1 + $0xa8] sm:$0xff]  }
   0x5   :  { %691 = vmatpush3.bf16.msra.mxu1 %v771_v3  ;;  %670 = vmatprep.subr.bf16.mxu0 %v772_v4  ;;  %v780_v12 = vld [vmem:[%s1033_s1 + $0x60] sm:$0xff]   ;;  %v784_v16 = vld [vmem:[%s1033_s1 + $0x58] sm:$0xff]   ;;  %v788_v20 = vld [vmem:[%s1033_s1 + $0x50] sm:$0xff]  }
   0x6   :  { %692 = vmatprep.subr.bf16.mxu1 %v773_v5  ;;  %v781_v13 = vld [vmem:[%s1033_s1 + $0xe0] sm:$0xff]   ;;  %v785_v17 = vld [vmem:[%s1033_s1 + $0xd8] sm:$0xff]   ;;  %v789_v21 = vld [vmem:[%s1033_s1 + $0xd0] sm:$0xff]  }
   0x7   :  { %v782_v14 = vld [vmem:[%s1033_s1 + $0x20] sm:$0xff]   ;;  %v786_v18 = vld [vmem:[%s1033_s1 + $0x18] sm:$0xff]   ;;  %v790_v22 = vld [vmem:[%s1033_s1 + $0x10] sm:$0xff]  }
   0x8   :  { %671 = vmatpush3.bf16.msra.mxu0 %v774_v6  ;;  %v783_v15 = vld [vmem:[%s1033_s1 + $0xa0] sm:$0xff]   ;;  %v787_v19 = vld [vmem:[%s1033_s1 + $0x98] sm:$0xff]   ;;  %v791_v23 = vld [vmem:[%s1033_s1 + $0x90] sm:$0xff]  }
   0x9   :  { %693 = vmatpush3.bf16.msra.mxu1 %v775_v7  ;;  %672 = vmatprep.subr.bf16.mxu0 %v776_v8  ;;  %v792_v24 = vld [vmem:[%s1033_s1 + $0x48] sm:$0xff]   ;;  %v796_v29 = vld [vmem:[%s1033_s1 + $0x40] sm:$0xff]   ;;  %v804_v39 = vld [vmem:[%s1036_s3 + $0x38] ss:$0 sps:$4 sm:$0xff]  }
   0xa   :  { %694 = vmatprep.subr.bf16.mxu1 %v777_v9  ;;  %v793_v25 = vld [vmem:[%s1033_s1 + $0xc8] sm:$0xff]   ;;  %v797_v30 = vld [vmem:[%s1033_s1 + $0xc0] sm:$0xff]   ;;  %v464_v42 = vsel %vm462_vm2, %v804_v39, 0  ;;  %v805_v43 = vld [vmem:[%s1036_s3 + $0x30] sm:$0xff]  }
   0xb   :  { %v794_v26 = vld [vmem:[%s1033_s1 + $0x8] sm:$0xff]   ;;  %v798_v31 = vld [vmem:[%s1033_s1] sm:$0xff]   ;;  %v808_v46 = vld [vmem:[%s1036_s3 + $0x18] sm:$0xff]  }
   0xc   :  { %673 = vmatpush3.bf16.msra.mxu0 %v778_v10  ;;  %v795_v27 = vld [vmem:[%s1033_s1 + $0x88] sm:$0xff]   ;;  %v799_v32 = vld [vmem:[%s1033_s1 + $0x80] sm:$0xff]   ;;  %v809_v47 = vld [vmem:[%s1036_s3 + $0x10] sm:$0xff]  }
   0xd   :  { %695 = vmatpush3.bf16.msra.mxu1 %v779_v11  ;;  %674 = vmatprep.subr.bf16.mxu0 %v780_v12  ;;  %v769_v28 = vld [vmem:[%s1034_s5 + $0x28] ss:$0 sps:$4 sm:$0x33]   ;;  %v27_v33 = vld [vmem:[%s1035_s0] sm:$0xff]  ;;  %v813_v51 = vld [vmem:[%s1034_s5 + $0x18] sm:$0xff]  }
   0xe   :  { %696 = vmatprep.subr.bf16.mxu1 %v781_v13  ;;  %v28_v34 = vld [vmem:[%s1035_s0 + $0x8] sm:$0xff]  ;;  %v613_v35 = vcombine.low %v27_v33, %v27_v33  ;;  %v614_v36 = vcombine.high %v27_v33, %v27_v33  ;;  %v564_v41 = vsel %vm305_vm0, %v769_v28, 0  ;;  %v807_v45 = vld [vmem:[%s1036_s3 + $0x20] sm:$0xff]   ;;  %v814_v52 = vld [vmem:[%s1034_s5 + $0x10] sm:$0xff]  }
   0xf   :  { %v615_v37 = vcombine.low %v28_v34, %v28_v34  ;;  %v616_v38 = vcombine.high %v28_v34, %v28_v34  ;;  %v806_v44 = vld [vmem:[%s1036_s3 + $0x28] sm:$0xff]   ;;  %v811_v49 = vld [vmem:[%s1036_s3] sm:$0xff]  }
  0x10   :  { %675 = vmatpush3.bf16.msra.mxu0 %v782_v14  ;;  %341 = vmatprep.mubr.bf16.mxu0 %v614_v36  ;;  %v810_v48 = vld [vmem:[%s1036_s3 + $0x8] sm:$0xff]   ;;  %v812_v50 = vld [vmem:[%s1034_s5 + $0x20] sm:$0xff]  }
  0x11   :  { %697 = vmatpush3.bf16.msra.mxu1 %v783_v15  ;;  %676 = vmatprep.subr.bf16.mxu0 %v784_v16  ;;  %v612_v55 = vld [vmem:[%s1037_s2] ss:$0 sm:$0xff]  ;;  %v815_v4 = vld [vmem:[%s1034_s5 + $0x8] sm:$0xff]  }
  0x12   :  { %698 = vmatprep.subr.bf16.mxu1 %v785_v17  ;;  %649 = vmatprep.mubr.msk.bf16.mxu1 %vm301_vm1, %v616_v38  ;;  %v816_v5 = vld [vmem:[%s1034_s5] sm:$0xff]  }
  0x13   :  { %v650_v6 = vld [vmem:[%s1038_s4] ss:$0 sm:$0xff] }
  0x14   :  { %677 = vmatpush3.bf16.msra.mxu0 %v786_v18  ;;  %v660_v14 = vld [vmem:[%s1039_s6] ss:$0 sm:$0xff] }
  0x15   :  { %699 = vmatpush3.bf16.msra.mxu1 %v787_v19  ;;  %678 = vmatprep.subr.bf16.mxu0 %v788_v20 }
  0x16   :  { %700 = vmatprep.subr.bf16.mxu1 %v789_v21 }
  0x18   :  { %679 = vmatpush3.bf16.msra.mxu0 %v790_v22 }
  0x19   :  { %701 = vmatpush3.bf16.msra.mxu1 %v791_v23  ;;  %680 = vmatprep.subr.bf16.mxu0 %v792_v24 }
  0x1a   :  { %702 = vmatprep.subr.bf16.mxu1 %v793_v25 }
  0x1c   :  { %681 = vmatpush3.bf16.msra.mxu0 %v794_v26 }
  0x1d   :  { %703 = vmatpush3.bf16.msra.mxu1 %v795_v27  ;;  %682 = vmatprep.subr.bf16.mxu0 %v796_v29 }
  0x1e   :  { %704 = vmatprep.subr.bf16.mxu1 %v797_v30 }
  0x20   :  { %683 = vmatpush3.bf16.msra.mxu0 %v798_v31 }
  0x21   :  { %705 = vmatpush3.bf16.msra.mxu1 %v799_v32  ;;  %728 = vmatprep.subr.bf16.mxu0 %v817_v40 }
  0x22   :  { %748 = vmatprep.subr.bf16.mxu1 %v817_v40 }
  0x23   :  { %342 = vmatmul.mubr.bf16.vlgmr.msra.gmra.mxu0 %v613_v35 }
  0x24   :  { %382 = vmatmul.mubr.bf16.vlgmr.msra.gmra.mxu1 %v615_v37  ;;  %729 = vmatpush3.bf16.msra.mxu0 %v464_v42 }
  0x25   :  { %730 = vmatprep.subr.bf16.mxu0 %v817_v40  ;;  %749 = vmatpush3.bf16.msra.mxu1 %v564_v41 }
  0x26   :  { %750 = vmatprep.subr.bf16.mxu1 %v817_v40  ;;  %744 = vmatprep.mubr.msk.bf16.mxu0 %vm818_vm3, %v817_v40 }
  0x27   :  { %760 = vmatprep.mubr.msk.bf16.mxu1 %vm818_vm3, %v817_v40 }
  0x28   :  { %731 = vmatpush3.bf16.msra.mxu0 %v805_v43 }
  0x29   :  { %732 = vmatprep.subr.bf16.mxu0 %v817_v40  ;;  %751 = vmatpush3.bf16.msra.mxu1 %v812_v50 }
  0x2a   :  { %752 = vmatprep.subr.bf16.mxu1 %v817_v40 }
  0x2c   :  { %733 = vmatpush3.bf16.msra.mxu0 %v806_v44 }
  0x2d   :  { %734 = vmatprep.subr.bf16.mxu0 %v817_v40  ;;  %753 = vmatpush3.bf16.msra.mxu1 %v813_v51 }
  0x2e   :  { %754 = vmatprep.subr.bf16.mxu1 %v817_v40 }
  0x30   :  { %735 = vmatpush3.bf16.msra.mxu0 %v807_v45 }
  0x31   :  { %736 = vmatprep.subr.bf16.mxu0 %v817_v40  ;;  %755 = vmatpush3.bf16.msra.mxu1 %v814_v52 }
  0x32   :  { %756 = vmatprep.subr.bf16.mxu1 %v817_v40 }
  0x34   :  { %737 = vmatpush3.bf16.msra.mxu0 %v808_v46 }
  0x35   :  { %738 = vmatprep.subr.bf16.mxu0 %v817_v40  ;;  %757 = vmatpush3.bf16.msra.mxu1 %v815_v4 }
  0x36   :  { %758 = vmatprep.subr.bf16.mxu1 %v817_v40 }
  0x38   :  { %739 = vmatpush3.bf16.msra.mxu0 %v809_v47 }
  0x39   :  { %740 = vmatprep.subr.bf16.mxu0 %v817_v40  ;;  %759 = vmatpush3.bf16.msra.mxu1 %v816_v5 }
  0x3c   :  { %741 = vmatpush3.bf16.msra.mxu0 %v810_v48 }
  0x3d   :  { %742 = vmatprep.subr.bf16.mxu0 %v817_v40 }
  0x40   :  { %743 = vmatpush3.bf16.msra.mxu0 %v811_v49 }
  0xe3   :  { %v684_v53 = vpop.f32.mrf.mxu0 }
  0xe4   :  { %v706_v54 = vpop.f32.mrf.mxu1 }
  0xe5   :  { %v685_v56 = vpop.f32.mrf.mxu0 }
  0xe6   :  { %v686_v57 = vadd.f32 %v685_v56, %v684_v53  ;;  %v707_v58 = vpop.f32.mrf.mxu1 }
  0xe7   :  { %v687_v59 = vpop.f32.mrf.mxu0  ;;  %v708_v61 = vadd.f32 %v707_v58, %v706_v54 }
  0xe8   :  { %v344_v60 = vadd.f32 %v686_v57, %v612_v55  ;;  %v709_v62 = vpop.f32.mrf.mxu1 }
  0xe9   :  { %v688_v63 = vpop.f32.mrf.mxu0 }
  0xea   :  { %v384_v0 = vadd.f32 %v708_v61, %v344_v60  ;;  %v710_v1 = vpop.f32.mrf.mxu1 }
  0xec   :  { %v389_v2 = vmax.f32 %v384_v0, 0.0 }
  0xee   :  { %v390_v3 = vpack.c.bf16 %v389_v2, %v389_v2 }
  0xf0   :  { %745 = vmatmul.mubr.msk.bf16.vlgmr.msra.gmra.mxu0 %vm458_vm4, %v390_v3 }
 0x1b0   :  { %v500_v7 = vpop.f32.mrf.mxu0 }
 0x1b1   :  { %v501_v8 = vadd.f32 %v650_v6, %v500_v7 }
 0x1b2   :  { %v746_v9 = vpop.f32.mrf.mxu0 }
 0x1b3   :  { %v506_v10 = vmax.f32 %v501_v8, 0.0 }
 0x1b4   :  { %v503_v11 = vpop.f32.mrf.mxu0 }
 0x1b5   :  { %v507_v12 = vpack.c.bf16 %v506_v10, %v506_v10 }
 0x1b6   :  { %v747_v13 = vpop.f32.mrf.mxu0 }
 0x1b7   :  { %761 = vmatmul.mubr.msk.bf16.vlgmr.msra.gmra.mxu1 %vm559_vm5, %v507_v12 }
 0x277   :  { %v600_v15 = vpop.f32.mrf.mxu1 }
 0x278   :  { %v601_v16 = vadd.f32 %v660_v14, %v600_v15 }
 0x279   :  { %v762_v17 = vpop.f32.mrf.mxu1 }
 0x27a   :  { %607 = vst.msk [vmem:[%s1040_s7] sm:$0xff] %vm606_vm6, %v601_v16 }
 0x27b   :  { %v603_v18 = vpop.f32.mrf.mxu1 }
 0x27d   :  { %v763_v19 = vpop.f32.mrf.mxu1 }

// kernel: simple_net_forward.4
= control target key start
LH: loop header
LB: loop body
LE: loop exit
PB: predicated region body
PF: predicated region fallthrough
CT: control target
= control target key end

     0   :  { %v3368_v21 = vmov 0   ;;  %vm346_vm0 = vcmask 867328   ;;  %vm359_vm1 = vcmask 1044480   ;;  %vm2397_vm2 = vcmask 158720   ;;  %s4864_s1 = inlined_call_operand.vmem [shape: bf16[490,20], index: 1, kind: input, shape index: {}]   ;;  %s4865_s0 = inlined_call_operand.vmem [shape: bf16[9,50,490], index: 0, kind: input, shape index: {}]   ;;  %s4866_s2 = inlined_call_operand.vmem [shape: f32[1,20], index: 2, kind: input, shape index: {}]   ;;  %s4867_s3 = inlined_call_operand.vmem [shape: bf16[50,20], index: 3, kind: output, shape index: {}]  }
   0x1   :  { %v3392_v0 = vld [vmem:[%s4864_s1 + $0x78] sm:$0xff]   ;;  %v3404_v2 = vld [vmem:[%s4864_s1 + $0x70] sm:$0xff]   ;;  %v3418_v4 = vld [vmem:[%s4864_s1 + $0x68] sm:$0xff]   ;;  %vm2404_vm3 = vcmask 155648  }
   0x2   :  { %v3397_v1 = vld [vmem:[%s4864_s1 + $0x38] sm:$0xff]   ;;  %2748 = vmatprep.subr.bf16.mxu1 %v3392_v0  ;;  %2788 = vmatprep.subr.bf16.mxu0 %v3392_v0  ;;  %v3411_v3 = vld [vmem:[%s4864_s1 + $0x30] sm:$0xff]   ;;  %v3425_v5 = vld [vmem:[%s4864_s1 + $0x28] sm:$0xff]  }
   0x3   :  { %2749 = vmatpush3.bf16.msra.mxu1 %v3397_v1  ;;  %2789 = vmatpush3.bf16.msra.mxu0 %v3397_v1  ;;  %v3432_v6 = vld [vmem:[%s4864_s1 + $0x60] sm:$0xff]   ;;  %v3446_v8 = vld [vmem:[%s4864_s1 + $0x58] sm:$0xff]   ;;  %v3460_v10 = vld [vmem:[%s4864_s1 + $0x50] sm:$0xff]  }
   0x4   :  { %2750 = vmatprep.subr.bf16.mxu1 %v3404_v2  ;;  %2790 = vmatprep.subr.bf16.mxu0 %v3404_v2  ;;  %v3439_v7 = vld [vmem:[%s4864_s1 + $0x20] sm:$0xff]   ;;  %v3453_v9 = vld [vmem:[%s4864_s1 + $0x18] sm:$0xff]   ;;  %v3473_v13 = vld [vmem:[%s4864_s1 + $0x10] sm:$0xff]  }
   0x5   :  { %v3127_v11 = vld [vmem:[%s4865_s0 + $0x4] ss:$16 sps:$4 sm:$0xff]   ;;  %v3480_v14 = vld [vmem:[%s4864_s1 + $0x48] sm:$0xff]   ;;  %v3125_v18 = vld [vmem:[%s4865_s0] ss:$16 sps:$4 sm:$0xff]  }
   0x6   :  { %v3130_v12 = vld [vmem:[%s4865_s0 + $0x74] ss:$16 sps:$4 sm:$0xff]   ;;  %395 = vmatprep.mubr.bf16.mxu1 %v3127_v11  ;;  %v3487_v15 = vld [vmem:[%s4864_s1 + $0x8] sm:$0xff]   ;;  %v3128_v19 = vld [vmem:[%s4865_s0 + $0x70] ss:$16 sps:$4 sm:$0xff]  }
   0x7   :  { %2751 = vmatpush3.bf16.msra.mxu1 %v3411_v3  ;;  %2791 = vmatpush3.bf16.msra.mxu0 %v3411_v3  ;;  %v3494_v16 = vld [vmem:[%s4864_s1 + $0x40] sm:$0xff]   ;;  %v3516_v20 = vld [vmem:[%s4864_s1 + $0xb8] sm:$0xff]   ;;  %v3531_v24 = vld [vmem:[%s4864_s1 + $0xb0] sm:$0xff]  }
   0x8   :  { %2752 = vmatprep.subr.bf16.mxu1 %v3418_v4  ;;  %2792 = vmatprep.subr.bf16.mxu0 %v3418_v4  ;;  %v3501_v17 = vld [vmem:[%s4864_s1] sm:$0xff]   ;;  %v3546_v27 = vld [vmem:[%s4864_s1 + $0xa8] sm:$0xff]   ;;  %v2473_v32 = vld [vmem:[%s4865_s0 + $0xd0] sm:$0x11] }
   0x9   :  { %620 = vmatprep.mubr.bf16.mxu0 %v3130_v12  ;;  %v3133_v22 = vld [vmem:[%s4865_s0 + $0x94] ss:$16 sps:$4 sm:$0xff]   ;;  %v3136_v25 = vld [vmem:[%s4865_s0 + $0x90] ss:$16 sps:$4 sm:$0xff]   ;;  %v3582_v35 = vld [vmem:[%s4864_s1 + $0x98] sm:$0xff]   ;;  %v2488_v36 = vcombine.high %v2473_v32, %v2473_v32  ;;  %v2487_v39 = vcombine.low %v2473_v32, %v2473_v32 }
   0xa   :  { %v3147_v23 = vld [vmem:[%s4865_s0 + $0x24] ss:$16 sps:$4 sm:$0xff]   ;;  %v3149_v26 = vld [vmem:[%s4865_s0 + $0x20] ss:$16 sps:$4 sm:$0xff]   ;;  %v3600_v41 = vld [vmem:[%s4864_s1 + $0x88] sm:$0xff]  }
   0xb   :  { %2753 = vmatpush3.bf16.msra.mxu1 %v3425_v5  ;;  %2793 = vmatpush3.bf16.msra.mxu0 %v3425_v5  ;;  %v3138_v28 = vld [vmem:[%s4865_s0 + $0xb4] ss:$16 sps:$4 sm:$0xff]   ;;  %v3141_v31 = vld [vmem:[%s4865_s0 + $0xb0] ss:$16 sps:$4 sm:$0xff]   ;;  %v3167_v43 = vld [vmem:[%s4865_s0 + $0xc] ss:$16 sps:$4 sm:$0xff]  }
   0xc   :  { %2754 = vmatprep.subr.bf16.mxu1 %v3432_v6  ;;  %2794 = vmatprep.subr.bf16.mxu0 %v3432_v6  ;;  %v3155_v29 = vld [vmem:[%s4865_s0 + $0x44] ss:$16 sps:$4 sm:$0xff]   ;;  %v3157_v33 = vld [vmem:[%s4865_s0 + $0x40] ss:$16 sps:$4 sm:$0xff]   ;;  %v3638_v49 = vld [vmem:[%s4864_s1 + $0xe8] sm:$0xff]  }
   0xd   :  { %v3561_v30 = vld [vmem:[%s4864_s1 + $0xa0] sm:$0xff]   ;;  %v3591_v38 = vld [vmem:[%s4864_s1 + $0x90] sm:$0xff]   ;;  %v3662_v53 = vld [vmem:[%s4864_s1 + $0xd8] sm:$0xff]  }
   0xe   :  { %v89_v34 = vld [vmem:[%s4865_s0 + $0x60] sm:$0x11]  ;;  %v3153_v45 = vld [vmem:[%s4864_s1 + $0xf0] sm:$0x1f]   ;;  %v3686_v57 = vld [vmem:[%s4864_s1 + $0xc8] sm:$0xff]  }
   0xf   :  { %2755 = vmatpush3.bf16.msra.mxu1 %v3439_v7  ;;  %2795 = vmatpush3.bf16.msra.mxu0 %v3439_v7  ;;  %v2423_v37 = vcombine.high %v89_v34, %v89_v34  ;;  %v2422_v40 = vcombine.low %v89_v34, %v89_v34  ;;  %v3152_v42 = vld [vmem:[%s4865_s0 + $0xe4] ss:$16 sps:$4 sm:$0xff]   ;;  %v3150_v46 = vld [vmem:[%s4865_s0 + $0xe0] ss:$16 sps:$4 sm:$0xff]   ;;  %v3630_v47 = vsel %vm359_vm1, %v3153_v45, 0 }
  0x10   :  { %2756 = vmatprep.subr.bf16.mxu1 %v3446_v8  ;;  %2796 = vmatprep.subr.bf16.mxu0 %v3446_v8  ;;  %v3615_v44 = vld [vmem:[%s4864_s1 + $0x80] sm:$0xff]   ;;  %v3674_v55 = vld [vmem:[%s4864_s1 + $0xd0] sm:$0xff]   ;;  %v3186_v61 = vld [vmem:[%s4865_s0 + $0xec] ss:$16 sps:$4 sm:$0xff]  }
  0x11   :  { %v3170_v48 = vld [vmem:[%s4865_s0 + $0x104] ss:$16 sps:$4 sm:$0xff]   ;;  %v3173_v50 = vld [vmem:[%s4865_s0 + $0x100] ss:$16 sps:$4 sm:$0xff]   ;;  %v3165_v62 = vld [vmem:[%s4865_s0 + $0x8] ss:$16 sps:$4 sm:$0xff]  }
  0x12   :  { %v3652_v51 = vld [vmem:[%s4864_s1 + $0xe0] sm:$0xff]   ;;  %v3168_v63 = vld [vmem:[%s4865_s0 + $0x2c] ss:$16 sps:$4 sm:$0xff]   ;;  %v3172_v11 = vld [vmem:[%s4865_s0 + $0x28] ss:$16 sps:$4 sm:$0xff]  }
  0x13   :  { %2757 = vmatpush3.bf16.msra.mxu1 %v3453_v9  ;;  %2797 = vmatpush3.bf16.msra.mxu0 %v3453_v9  ;;  %v3176_v52 = vld [vmem:[%s4865_s0 + $0x124] ss:$16 sps:$4 sm:$0xff]   ;;  %v3179_v54 = vld [vmem:[%s4865_s0 + $0x120] ss:$16 sps:$4 sm:$0xff]   ;;  %v3174_v12 = vld [vmem:[%s4865_s0 + $0x4c] ss:$16 sps:$4 sm:$0xff]  }
  0x14   :  { %2758 = vmatprep.subr.bf16.mxu1 %v3460_v10  ;;  %2798 = vmatprep.subr.bf16.mxu0 %v3460_v10  ;;  %v2507_v56 = vld [vmem:[%s4865_s0 + $0x140] sm:$0x11]  ;;  %v3192_v32 = vld [vmem:[%s4865_s0 + $0x128] ss:$16 sps:$4 sm:$0xff]  }
  0x15   :  { %v2522_v58 = vcombine.high %v2507_v56, %v2507_v56  ;;  %v2521_v59 = vcombine.low %v2507_v56, %v2507_v56  ;;  %v3697_v60 = vld [vmem:[%s4864_s1 + $0xc0] sm:$0xff]   ;;  %v3983_v56 = vld [vmem:[%s4864_s1 + $0x30] sm:$0xff]  }
  0x16   :  { %v3217_v45 = vld [vmem:[%s4865_s0 + $0x200] ss:$16 sps:$4 sm:$0xff]  }
  0x17   :  { %2759 = vmatpush3.bf16.msra.mxu1 %v3473_v13  ;;  %2799 = vmatpush3.bf16.msra.mxu0 %v3473_v13 }
  0x18   :  { %2760 = vmatprep.subr.bf16.mxu1 %v3480_v14  ;;  %2800 = vmatprep.subr.bf16.mxu0 %v3480_v14 }
  0x1b   :  { %2761 = vmatpush3.bf16.msra.mxu1 %v3487_v15  ;;  %2801 = vmatpush3.bf16.msra.mxu0 %v3487_v15 }
  0x1c   :  { %2762 = vmatprep.subr.bf16.mxu1 %v3494_v16  ;;  %2802 = vmatprep.subr.bf16.mxu0 %v3494_v16 }
  0x1f   :  { %2763 = vmatpush3.bf16.msra.mxu1 %v3501_v17  ;;  %2803 = vmatpush3.bf16.msra.mxu0 %v3501_v17 }
  0x20   :  { %427 = vmatprep.subr.bf16.mxu1 %v3368_v21  ;;  %2828 = vmatprep.subr.bf16.mxu0 %v3392_v0 }
  0x22   :  { %396 = vmatmul.mubr.bf16.vlgmr.msra.gmra.mxu1 %v3125_v18  ;;  %621 = vmatmul.mubr.bf16.vlgmr.msra.gmra.mxu0 %v3128_v19  ;;  %v3178_v18 = vld [vmem:[%s4865_s0 + $0x48] ss:$16 sps:$4 sm:$0xff]  }
  0x23   :  { %428 = vmatpush1.bf16.msra.mxu1 %v3516_v20  ;;  %2829 = vmatpush3.bf16.msra.mxu0 %v3397_v1  ;;  %v90_v19 = vld [vmem:[%s4865_s0 + $0x68] sm:$0x11] }
  0x24   :  { %429 = vmatprep.subr.bf16.mxu1 %v3368_v21  ;;  %2830 = vmatprep.subr.bf16.mxu0 %v3404_v2 }
  0x25   :  { %628 = vmatprep.mubr.bf16.mxu0 %v3133_v22  ;;  %403 = vmatprep.mubr.bf16.mxu1 %v3147_v23  ;;  %v2425_v22 = vcombine.high %v90_v19, %v90_v19  ;;  %v2424_v23 = vcombine.low %v90_v19, %v90_v19 }
  0x27   :  { %430 = vmatpush1.bf16.msra.mxu1 %v3531_v24  ;;  %2831 = vmatpush3.bf16.msra.mxu0 %v3411_v3 }
  0x28   :  { %431 = vmatprep.subr.bf16.mxu1 %v3368_v21  ;;  %2832 = vmatprep.subr.bf16.mxu0 %v3418_v4 }
  0x2a   :  { %629 = vmatmul.mubr.bf16.gmra.mxu0 %v3136_v25  ;;  %404 = vmatmul.mubr.bf16.gmra.mxu1 %v3149_v26  ;;  %v3197_v25 = vld [vmem:[%s4865_s0 + $0x7c] ss:$16 sps:$4 sm:$0xff]   ;;  %v3184_v26 = vld [vmem:[%s4865_s0 + $0xe8] ss:$16 sps:$4 sm:$0xff]  }
  0x2b   :  { %432 = vmatpush1.bf16.msra.mxu1 %v3546_v27  ;;  %2833 = vmatpush3.bf16.msra.mxu0 %v3425_v5 }
  0x2c   :  { %433 = vmatprep.subr.bf16.mxu1 %v3368_v21  ;;  %2834 = vmatprep.subr.bf16.mxu0 %v3432_v6 }
  0x2d   :  { %636 = vmatprep.mubr.bf16.mxu0 %v3138_v28  ;;  %411 = vmatprep.mubr.bf16.mxu1 %v3155_v29  ;;  %v3187_v28 = vld [vmem:[%s4865_s0 + $0x10c] ss:$16 sps:$4 sm:$0xff]   ;;  %v3189_v29 = vld [vmem:[%s4865_s0 + $0x108] ss:$16 sps:$4 sm:$0xff]  }
  0x2f   :  { %434 = vmatpush1.bf16.msra.mxu1 %v3561_v30  ;;  %2835 = vmatpush3.bf16.msra.mxu0 %v3439_v7 }
  0x30   :  { %435 = vmatprep.subr.bf16.mxu1 %v3368_v21  ;;  %2836 = vmatprep.subr.bf16.mxu0 %v3446_v8 }
  0x32   :  { %637 = vmatmul.mubr.bf16.gmra.mxu0 %v3141_v31  ;;  %412 = vmatmul.mubr.bf16.gmra.mxu1 %v3157_v33  ;;  %v3190_v31 = vld [vmem:[%s4865_s0 + $0x12c] ss:$16 sps:$4 sm:$0xff]  }
  0x33   :  { %436 = vmatpush1.bf16.msra.mxu1 %v3582_v35  ;;  %2837 = vmatpush3.bf16.msra.mxu0 %v3453_v9  ;;  %v2508_v33 = vld [vmem:[%s4865_s0 + $0x148] sm:$0x11] }
  0x34   :  { %437 = vmatprep.subr.bf16.mxu1 %v3368_v21  ;;  %2838 = vmatprep.subr.bf16.mxu0 %v3460_v10  ;;  %v2524_v34 = vcombine.high %v2508_v33, %v2508_v33 }
  0x35   :  { %644 = vmatprep.mubr.bf16.mxu0 %v2488_v36  ;;  %419 = vmatprep.mubr.bf16.mxu1 %v2423_v37  ;;  %v2523_v36 = vcombine.low %v2508_v33, %v2508_v33  ;;  %v3200_v37 = vld [vmem:[%s4865_s0 + $0x1c4] ss:$16 sps:$4 sm:$0xff]  }
  0x37   :  { %438 = vmatpush1.bf16.msra.mxu1 %v3591_v38  ;;  %2839 = vmatpush3.bf16.msra.mxu0 %v3473_v13 }
  0x38   :  { %439 = vmatprep.subr.bf16.mxu1 %v3368_v21  ;;  %2840 = vmatprep.subr.bf16.mxu0 %v3480_v14 }
  0x3a   :  { %645 = vmatmul.mubr.bf16.gmra.mxu0 %v2487_v39  ;;  %420 = vmatmul.mubr.bf16.gmra.mxu1 %v2422_v40  ;;  %v3195_v39 = vld [vmem:[%s4865_s0 + $0x78] ss:$16 sps:$4 sm:$0xff]   ;;  %v3201_v40 = vld [vmem:[%s4865_s0 + $0x9c] ss:$16 sps:$4 sm:$0xff]  }
  0x3b   :  { %440 = vmatpush1.bf16.msra.mxu1 %v3600_v41  ;;  %2841 = vmatpush3.bf16.msra.mxu0 %v3487_v15 }
  0x3c   :  { %441 = vmatprep.subr.bf16.mxu1 %v3368_v21  ;;  %2842 = vmatprep.subr.bf16.mxu0 %v3494_v16 }
  0x3d   :  { %852 = vmatprep.mubr.bf16.mxu0 %v3152_v42  ;;  %2457 = vmatprep.mubr.msk.bf16.mxu1 %vm346_vm0, %v3167_v43  ;;  %v3198_v42 = vld [vmem:[%s4865_s0 + $0x1c0] ss:$16 sps:$4 sm:$0xff]   ;;  %v3203_v43 = vld [vmem:[%s4865_s0 + $0x98] ss:$16 sps:$4 sm:$0xff]  }
  0x3f   :  { %442 = vmatpush1.bf16.msra.mxu1 %v3615_v44  ;;  %2843 = vmatpush3.bf16.msra.mxu0 %v3501_v17 }
  0x40   :  { %445 = vmatprep.subr.bf16.mxu1 %v3368_v21  ;;  %884 = vmatprep.subr.bf16.mxu0 %v3368_v21 }
  0x42   :  { %853 = vmatmul.mubr.bf16.vlgmr.msra.gmra.mxu0 %v3150_v46  ;;  %v2575_v46 = vld [vmem:[%s4865_s0 + $0x220] sm:$0x11] }
  0x43   :  { %446 = vmatpush2.bf16.msra.mxu1 %v3630_v47  ;;  %885 = vmatpush1.bf16.msra.mxu0 %v3516_v20 }
  0x44   :  { %447 = vmatprep.subr.bf16.mxu1 %v3368_v21  ;;  %886 = vmatprep.subr.bf16.mxu0 %v3368_v21 }
  0x45   :  { %860 = vmatprep.mubr.bf16.mxu0 %v3170_v48 }
  0x47   :  { %448 = vmatpush2.bf16.msra.mxu1 %v3638_v49  ;;  %887 = vmatpush1.bf16.msra.mxu0 %v3531_v24 }
  0x48   :  { %449 = vmatprep.subr.bf16.mxu1 %v3368_v21  ;;  %888 = vmatprep.subr.bf16.mxu0 %v3368_v21 }
  0x4a   :  { %861 = vmatmul.mubr.bf16.gmra.mxu0 %v3173_v50  ;;  %v3965_v50 = vld [vmem:[%s4864_s1 + $0x38] sm:$0xff]  }
  0x4b   :  { %450 = vmatpush2.bf16.msra.mxu1 %v3652_v51  ;;  %889 = vmatpush1.bf16.msra.mxu0 %v3546_v27 }
  0x4c   :  { %451 = vmatprep.subr.bf16.mxu1 %v3368_v21  ;;  %890 = vmatprep.subr.bf16.mxu0 %v3368_v21 }
  0x4d   :  { %868 = vmatprep.mubr.bf16.mxu0 %v3176_v52  ;;  %v3972_v52 = vld [vmem:[%s4864_s1 + $0x70] sm:$0xff]  }
  0x4f   :  { %452 = vmatpush2.bf16.msra.mxu1 %v3662_v53  ;;  %891 = vmatpush1.bf16.msra.mxu0 %v3561_v30 }
  0x50   :  { %453 = vmatprep.subr.bf16.mxu1 %v3368_v21  ;;  %892 = vmatprep.subr.bf16.mxu0 %v3368_v21 }
  0x52   :  { %869 = vmatmul.mubr.bf16.gmra.mxu0 %v3179_v54  ;;  %v3231_v54 = vld [vmem:[%s4865_s0 + $0x1e8] ss:$16 sps:$4 sm:$0xff]  }
  0x53   :  { %454 = vmatpush2.bf16.msra.mxu1 %v3674_v55  ;;  %893 = vmatpush1.bf16.msra.mxu0 %v3582_v35 }
  0x54   :  { %455 = vmatprep.subr.bf16.mxu1 %v3368_v21  ;;  %894 = vmatprep.subr.bf16.mxu0 %v3368_v21 }
  0x55   :  { %876 = vmatprep.mubr.bf16.mxu0 %v2522_v58  ;;  %v3990_v58 = vld [vmem:[%s4864_s1 + $0x68] sm:$0xff]  }
  0x57   :  { %456 = vmatpush2.bf16.msra.mxu1 %v3686_v57  ;;  %895 = vmatpush1.bf16.msra.mxu0 %v3591_v38 }
  0x58   :  { %457 = vmatprep.subr.bf16.mxu1 %v3368_v21  ;;  %896 = vmatprep.subr.bf16.mxu0 %v3368_v21 }
  0x5a   :  { %877 = vmatmul.mubr.bf16.gmra.mxu0 %v2521_v59  ;;  %v3234_v59 = vld [vmem:[%s4865_s0 + $0x20c] ss:$16 sps:$4 sm:$0xff]  }
  0x5b   :  { %458 = vmatpush2.bf16.msra.mxu1 %v3697_v60  ;;  %897 = vmatpush1.bf16.msra.mxu0 %v3600_v41 }
  0x5c   :  { %652 = vmatprep.subr.bf16.mxu1 %v3368_v21  ;;  %898 = vmatprep.subr.bf16.mxu0 %v3368_v21 }
  0x5d   :  { %2525 = vmatprep.mubr.msk.bf16.mxu0 %vm346_vm0, %v3186_v61 }
  0x5e   :  { %460 = vmatmul.mubr.bf16.vlgmr.msra.gmra.mxu1 %v3165_v62 }
  0x5f   :  { %653 = vmatpush1.bf16.msra.mxu1 %v3516_v20  ;;  %899 = vmatpush1.bf16.msra.mxu0 %v3615_v44 }
  0x60   :  { %654 = vmatprep.subr.bf16.mxu1 %v3368_v21  ;;  %902 = vmatprep.subr.bf16.mxu0 %v3368_v21 }
  0x61   :  { %2458 = vmatprep.mubr.msk.bf16.mxu1 %vm346_vm0, %v3168_v63  ;;  %v4000_v63 = vld [vmem:[%s4864_s1 + $0x28] sm:$0xff]  }
  0x63   :  { %655 = vmatpush1.bf16.msra.mxu1 %v3531_v24  ;;  %903 = vmatpush2.bf16.msra.mxu0 %v3630_v47 }
  0x64   :  { %656 = vmatprep.subr.bf16.mxu1 %v3368_v21  ;;  %904 = vmatprep.subr.bf16.mxu0 %v3368_v21 }
  0x66   :  { %468 = vmatmul.mubr.bf16.gmra.mxu1 %v3172_v11 }
  0x67   :  { %657 = vmatpush1.bf16.msra.mxu1 %v3546_v27  ;;  %905 = vmatpush2.bf16.msra.mxu0 %v3638_v49 }
  0x68   :  { %658 = vmatprep.subr.bf16.mxu1 %v3368_v21  ;;  %906 = vmatprep.subr.bf16.mxu0 %v3368_v21 }
  0x69   :  { %2459 = vmatprep.mubr.msk.bf16.mxu1 %vm346_vm0, %v3174_v12  ;;  %v4007_v12 = vld [vmem:[%s4864_s1 + $0x60] sm:$0xff]  }
  0x6b   :  { %659 = vmatpush1.bf16.msra.mxu1 %v3561_v30  ;;  %907 = vmatpush2.bf16.msra.mxu0 %v3652_v51 }
  0x6c   :  { %660 = vmatprep.subr.bf16.mxu1 %v3368_v21  ;;  %908 = vmatprep.subr.bf16.mxu0 %v3368_v21 }
  0x6e   :  { %476 = vmatmul.mubr.bf16.gmra.mxu1 %v3178_v18 }
  0x6f   :  { %661 = vmatpush1.bf16.msra.mxu1 %v3582_v35  ;;  %909 = vmatpush2.bf16.msra.mxu0 %v3662_v53 }
  0x70   :  { %662 = vmatprep.subr.bf16.mxu1 %v3368_v21  ;;  %910 = vmatprep.subr.bf16.mxu0 %v3368_v21 }
  0x71   :  { %2460 = vmatprep.mubr.msk.bf16.mxu1 %vm346_vm0, %v2425_v22 }
  0x73   :  { %663 = vmatpush1.bf16.msra.mxu1 %v3591_v38  ;;  %911 = vmatpush2.bf16.msra.mxu0 %v3674_v55 }
  0x74   :  { %664 = vmatprep.subr.bf16.mxu1 %v3368_v21  ;;  %912 = vmatprep.subr.bf16.mxu0 %v3368_v21 }
  0x76   :  { %484 = vmatmul.mubr.bf16.gmra.mxu1 %v2424_v23 }
  0x77   :  { %665 = vmatpush1.bf16.msra.mxu1 %v3600_v41  ;;  %913 = vmatpush2.bf16.msra.mxu0 %v3686_v57 }
  0x78   :  { %666 = vmatprep.subr.bf16.mxu1 %v3368_v21  ;;  %914 = vmatprep.subr.bf16.mxu0 %v3368_v21 }
  0x79   :  { %2491 = vmatprep.mubr.msk.bf16.mxu1 %vm346_vm0, %v3197_v25  ;;  %v3236_v25 = vld [vmem:[%s4865_s0 + $0x208] ss:$16 sps:$4 sm:$0xff]  }
  0x7b   :  { %667 = vmatpush1.bf16.msra.mxu1 %v3615_v44  ;;  %915 = vmatpush2.bf16.msra.mxu0 %v3697_v60 }
  0x7c   :  { %670 = vmatprep.subr.bf16.mxu1 %v3368_v21  ;;  %2908 = vmatprep.subr.bf16.mxu0 %v3392_v0 }
  0x7e   :  { %917 = vmatmul.mubr.bf16.vlgmr.msra.gmra.mxu0 %v3184_v26  ;;  %v2576_v26 = vld [vmem:[%s4865_s0 + $0x228] sm:$0x11] }
  0x7f   :  { %671 = vmatpush2.bf16.msra.mxu1 %v3630_v47  ;;  %2909 = vmatpush3.bf16.msra.mxu0 %v3397_v1 }
  0x80   :  { %672 = vmatprep.subr.bf16.mxu1 %v3368_v21  ;;  %2910 = vmatprep.subr.bf16.mxu0 %v3404_v2 }
  0x81   :  { %2526 = vmatprep.mubr.msk.bf16.mxu0 %vm346_vm0, %v3187_v28 }
  0x83   :  { %673 = vmatpush2.bf16.msra.mxu1 %v3638_v49  ;;  %2911 = vmatpush3.bf16.msra.mxu0 %v3411_v3 }
  0x84   :  { %674 = vmatprep.subr.bf16.mxu1 %v3368_v21  ;;  %2912 = vmatprep.subr.bf16.mxu0 %v3418_v4 }
  0x86   :  { %925 = vmatmul.mubr.bf16.gmra.mxu0 %v3189_v29  ;;  %v4029_v29 = vld [vmem:[%s4864_s1 + $0x20] sm:$0xff]  }
  0x87   :  { %675 = vmatpush2.bf16.msra.mxu1 %v3652_v51  ;;  %2913 = vmatpush3.bf16.msra.mxu0 %v3425_v5 }
  0x88   :  { %676 = vmatprep.subr.bf16.mxu1 %v3368_v21  ;;  %2914 = vmatprep.subr.bf16.mxu0 %v3432_v6 }
  0x89   :  { %2527 = vmatprep.mubr.msk.bf16.mxu0 %vm346_vm0, %v3190_v31 }
  0x8b   :  { %677 = vmatpush2.bf16.msra.mxu1 %v3662_v53  ;;  %2915 = vmatpush3.bf16.msra.mxu0 %v3439_v7 }
  0x8c   :  { %678 = vmatprep.subr.bf16.mxu1 %v3368_v21  ;;  %2916 = vmatprep.subr.bf16.mxu0 %v3446_v8 }
  0x8e   :  { %933 = vmatmul.mubr.bf16.gmra.mxu0 %v3192_v32  ;;  %v4038_v32 = vld [vmem:[%s4864_s1 + $0x58] sm:$0xff]  }
  0x8f   :  { %679 = vmatpush2.bf16.msra.mxu1 %v3674_v55  ;;  %2917 = vmatpush3.bf16.msra.mxu0 %v3453_v9 }
  0x90   :  { %680 = vmatprep.subr.bf16.mxu1 %v3368_v21  ;;  %2918 = vmatprep.subr.bf16.mxu0 %v3460_v10 }
  0x91   :  { %2528 = vmatprep.mubr.msk.bf16.mxu0 %vm346_vm0, %v2524_v34  ;;  %v2592_v34 = vcombine.high %v2576_v26, %v2576_v26 }
  0x93   :  { %681 = vmatpush2.bf16.msra.mxu1 %v3686_v57  ;;  %2919 = vmatpush3.bf16.msra.mxu0 %v3473_v13 }
  0x94   :  { %682 = vmatprep.subr.bf16.mxu1 %v3368_v21  ;;  %2920 = vmatprep.subr.bf16.mxu0 %v3480_v14 }
  0x96   :  { %941 = vmatmul.mubr.bf16.gmra.mxu0 %v2523_v36 }
  0x97   :  { %683 = vmatpush2.bf16.msra.mxu1 %v3697_v60  ;;  %2921 = vmatpush3.bf16.msra.mxu0 %v3487_v15 }
  0x98   :  { %2868 = vmatprep.subr.bf16.mxu1 %v3392_v0  ;;  %2922 = vmatprep.subr.bf16.mxu0 %v3494_v16  ;;  %v3212_v0 = vld [vmem:[%s4865_s0 + $0x1e4] ss:$16 sps:$4 sm:$0xff]  }
  0x99   :  { %1316 = vmatprep.mubr.bf16.mxu0 %v3200_v37 }
  0x9a   :  { %685 = vmatmul.mubr.bf16.vlgmr.msra.gmra.mxu1 %v3195_v39  ;;  %v4047_v39 = vld [vmem:[%s4864_s1 + $0x18] sm:$0xff]  }
  0x9b   :  { %2869 = vmatpush3.bf16.msra.mxu1 %v3397_v1  ;;  %2923 = vmatpush3.bf16.msra.mxu0 %v3501_v17  ;;  %v3204_v1 = vld [vmem:[%s4865_s0 + $0xbc] ss:$16 sps:$4 sm:$0xff]  }
  0x9c   :  { %2870 = vmatprep.subr.bf16.mxu1 %v3404_v2  ;;  %1348 = vmatprep.subr.bf16.mxu0 %v3368_v21  ;;  %v3214_v2 = vld [vmem:[%s4865_s0 + $0x1e0] ss:$16 sps:$4 sm:$0xff]  }
  0x9d   :  { %2492 = vmatprep.mubr.msk.bf16.mxu1 %vm346_vm0, %v3201_v40  ;;  %v4054_v40 = vld [vmem:[%s4864_s1 + $0x50] sm:$0xff]  }
  0x9e   :  { %1317 = vmatmul.mubr.bf16.vlgmr.msra.gmra.mxu0 %v3198_v42 }
  0x9f   :  { %2871 = vmatpush3.bf16.msra.mxu1 %v3411_v3  ;;  %1349 = vmatpush1.bf16.msra.mxu0 %v3516_v20  ;;  %v3215_v3 = vld [vmem:[%s4865_s0 + $0x204] ss:$16 sps:$4 sm:$0xff]  }
  0xa0   :  { %2872 = vmatprep.subr.bf16.mxu1 %v3418_v4  ;;  %1350 = vmatprep.subr.bf16.mxu0 %v3368_v21  ;;  %v3206_v4 = vld [vmem:[%s4865_s0 + $0xb8] ss:$16 sps:$4 sm:$0xff]  }
  0xa1   :  { %1324 = vmatprep.mubr.bf16.mxu0 %v3212_v0 }
  0xa2   :  { %693 = vmatmul.mubr.bf16.gmra.mxu1 %v3203_v43 }
  0xa3   :  { %2873 = vmatpush3.bf16.msra.mxu1 %v3425_v5  ;;  %1351 = vmatpush1.bf16.msra.mxu0 %v3531_v24  ;;  %v2474_v5 = vld [vmem:[%s4865_s0 + $0xd8] sm:$0x11] }
  0xa4   :  { %2874 = vmatprep.subr.bf16.mxu1 %v3432_v6  ;;  %1352 = vmatprep.subr.bf16.mxu0 %v3368_v21  ;;  %v2490_v6 = vcombine.high %v2474_v5, %v2474_v5 }
  0xa5   :  { %2493 = vmatprep.mubr.msk.bf16.mxu1 %vm346_vm0, %v3204_v1 }
  0xa6   :  { %1325 = vmatmul.mubr.bf16.gmra.mxu0 %v3214_v2  ;;  %v2591_v2 = vcombine.low %v2576_v26, %v2576_v26 }
  0xa7   :  { %2875 = vmatpush3.bf16.msra.mxu1 %v3439_v7  ;;  %1353 = vmatpush1.bf16.msra.mxu0 %v3546_v27  ;;  %v2590_v7 = vcombine.high %v2575_v46, %v2575_v46 }
  0xa8   :  { %2876 = vmatprep.subr.bf16.mxu1 %v3446_v8  ;;  %1354 = vmatprep.subr.bf16.mxu0 %v3368_v21  ;;  %v2489_v8 = vcombine.low %v2474_v5, %v2474_v5  ;;  %v4070_v5 = vld [vmem:[%s4864_s1 + $0x10] sm:$0xff]  }
  0xa9   :  { %1332 = vmatprep.mubr.bf16.mxu0 %v3215_v3 }
  0xaa   :  { %701 = vmatmul.mubr.bf16.gmra.mxu1 %v3206_v4 }
  0xab   :  { %2877 = vmatpush3.bf16.msra.mxu1 %v3453_v9  ;;  %1355 = vmatpush1.bf16.msra.mxu0 %v3561_v30  ;;  %v3211_v9 = vld [vmem:[%s4865_s0 + $0x154] ss:$16 sps:$4 sm:$0xff]  }
  0xac   :  { %2878 = vmatprep.subr.bf16.mxu1 %v3460_v10  ;;  %1356 = vmatprep.subr.bf16.mxu0 %v3368_v21  ;;  %v2589_v10 = vcombine.low %v2575_v46, %v2575_v46 }
  0xad   :  { %2494 = vmatprep.mubr.msk.bf16.mxu1 %vm346_vm0, %v2490_v6  ;;  %v4077_v6 = vld [vmem:[%s4864_s1 + $0x48] sm:$0xff]  }
  0xae   :  { %1333 = vmatmul.mubr.bf16.gmra.mxu0 %v3217_v45 }
  0xaf   :  { %2879 = vmatpush3.bf16.msra.mxu1 %v3473_v13  ;;  %1357 = vmatpush1.bf16.msra.mxu0 %v3582_v35  ;;  %v3225_v13 = vld [vmem:[%s4865_s0 + $0x1cc] ss:$16 sps:$4 sm:$0xff]  }
  0xb0   :  { %2880 = vmatprep.subr.bf16.mxu1 %v3480_v14  ;;  %1358 = vmatprep.subr.bf16.mxu0 %v3368_v21  ;;  %v3209_v14 = vld [vmem:[%s4865_s0 + $0x150] ss:$16 sps:$4 sm:$0xff]  }
  0xb1   :  { %1340 = vmatprep.mubr.bf16.mxu0 %v2590_v7  ;;  %v3244_v7 = vld [vmem:[%s4865_s0 + $0x2a4] ss:$16 sps:$4 sm:$0xff]  }
  0xb2   :  { %709 = vmatmul.mubr.bf16.gmra.mxu1 %v2489_v8  ;;  %v3239_v8 = vld [vmem:[%s4865_s0 + $0x158] ss:$16 sps:$4 sm:$0xff]  }
  0xb3   :  { %2881 = vmatpush3.bf16.msra.mxu1 %v3487_v15  ;;  %1359 = vmatpush1.bf16.msra.mxu0 %v3591_v38  ;;  %v3220_v15 = vld [vmem:[%s4865_s0 + $0x174] ss:$16 sps:$4 sm:$0xff]  }
  0xb4   :  { %2882 = vmatprep.subr.bf16.mxu1 %v3494_v16  ;;  %1360 = vmatprep.subr.bf16.mxu0 %v3368_v21  ;;  %v3222_v16 = vld [vmem:[%s4865_s0 + $0x170] ss:$16 sps:$4 sm:$0xff]  }
  0xb5   :  { %1084 = vmatprep.mubr.bf16.mxu1 %v3211_v9 }
  0xb6   :  { %1341 = vmatmul.mubr.bf16.gmra.mxu0 %v2589_v10 }
  0xb7   :  { %2883 = vmatpush3.bf16.msra.mxu1 %v3501_v17  ;;  %1361 = vmatpush1.bf16.msra.mxu0 %v3600_v41  ;;  %v3226_v17 = vld [vmem:[%s4865_s0 + $0x194] ss:$16 sps:$4 sm:$0xff]  }
  0xb8   :  { %1116 = vmatprep.subr.bf16.mxu1 %v3368_v21  ;;  %1362 = vmatprep.subr.bf16.mxu0 %v3368_v21 }
  0xb9   :  { %2593 = vmatprep.mubr.msk.bf16.mxu0 %vm346_vm0, %v3225_v13  ;;  %v4094_v13 = vld [vmem:[%s4864_s1 + $0x8] sm:$0xff]  }
  0xba   :  { %1085 = vmatmul.mubr.bf16.vlgmr.msra.gmra.mxu1 %v3209_v14  ;;  %v4101_v14 = vld [vmem:[%s4864_s1 + $0x40] sm:$0xff]  }
  0xbb   :  { %1117 = vmatpush1.bf16.msra.mxu1 %v3516_v20  ;;  %1363 = vmatpush1.bf16.msra.mxu0 %v3615_v44  ;;  %v3228_v20 = vld [vmem:[%s4865_s0 + $0x190] ss:$16 sps:$4 sm:$0xff]  }
  0xbc   :  { %1118 = vmatprep.subr.bf16.mxu1 %v3368_v21  ;;  %1366 = vmatprep.subr.bf16.mxu0 %v3368_v21 }
  0xbd   :  { %1092 = vmatprep.mubr.bf16.mxu1 %v3220_v15 }
  0xbf   :  { %1119 = vmatpush1.bf16.msra.mxu1 %v3531_v24  ;;  %1367 = vmatpush2.bf16.msra.mxu0 %v3630_v47  ;;  %v2541_v24 = vld [vmem:[%s4865_s0 + $0x1b0] sm:$0x11] }
  0xc0   :  { %1120 = vmatprep.subr.bf16.mxu1 %v3368_v21  ;;  %1368 = vmatprep.subr.bf16.mxu0 %v3368_v21  ;;  %v2555_v48 = vcombine.low %v2541_v24, %v2541_v24 }
  0xc2   :  { %1093 = vmatmul.mubr.bf16.gmra.mxu1 %v3222_v16 }
  0xc3   :  { %1121 = vmatpush1.bf16.msra.mxu1 %v3546_v27  ;;  %1369 = vmatpush2.bf16.msra.mxu0 %v3638_v49  ;;  %v2556_v27 = vcombine.high %v2541_v24, %v2541_v24 }
  0xc4   :  { %1122 = vmatprep.subr.bf16.mxu1 %v3368_v21  ;;  %1370 = vmatprep.subr.bf16.mxu0 %v3368_v21 }
  0xc5   :  { %1100 = vmatprep.mubr.bf16.mxu1 %v3226_v17  ;;  %v3245_v17 = vld [vmem:[%s4865_s0 + $0x17c] ss:$16 sps:$4 sm:$0xff]  }
  0xc7   :  { %1123 = vmatpush1.bf16.msra.mxu1 %v3561_v30  ;;  %1371 = vmatpush2.bf16.msra.mxu0 %v3652_v51  ;;  %v3241_v30 = vld [vmem:[%s4865_s0 + $0x15c] ss:$16 sps:$4 sm:$0xff]  }
  0xc8   :  { %1124 = vmatprep.subr.bf16.mxu1 %v3368_v21  ;;  %1372 = vmatprep.subr.bf16.mxu0 %v3368_v21 }
  0xca   :  { %1101 = vmatmul.mubr.bf16.gmra.mxu1 %v3228_v20 }
  0xcb   :  { %1125 = vmatpush1.bf16.msra.mxu1 %v3582_v35  ;;  %1373 = vmatpush2.bf16.msra.mxu0 %v3662_v53  ;;  %v3223_v35 = vld [vmem:[%s4865_s0 + $0x1c8] ss:$16 sps:$4 sm:$0xff]  }
  0xcc   :  { %1126 = vmatprep.subr.bf16.mxu1 %v3368_v21  ;;  %1374 = vmatprep.subr.bf16.mxu0 %v3368_v21 }
  0xcd   :  { %1108 = vmatprep.mubr.bf16.mxu1 %v2556_v27  ;;  %v3242_v27 = vld [vmem:[%s4865_s0 + $0x2a0] ss:$16 sps:$4 sm:$0xff]  }
  0xcf   :  { %1127 = vmatpush1.bf16.msra.mxu1 %v3591_v38  ;;  %1375 = vmatpush2.bf16.msra.mxu0 %v3674_v55  ;;  %v3955_v38 = vld [vmem:[%s4864_s1 + $0x78] sm:$0xff]  }
  0xd0   :  { %1128 = vmatprep.subr.bf16.mxu1 %v3368_v21  ;;  %1376 = vmatprep.subr.bf16.mxu0 %v3368_v21 }
  0xd2   :  { %1109 = vmatmul.mubr.bf16.gmra.mxu1 %v2555_v48 }
  0xd3   :  { %1129 = vmatpush1.bf16.msra.mxu1 %v3600_v41  ;;  %1377 = vmatpush2.bf16.msra.mxu0 %v3686_v57  ;;  %v3229_v41 = vld [vmem:[%s4865_s0 + $0x1ec] ss:$16 sps:$4 sm:$0xff]  }
  0xd4   :  { %1130 = vmatprep.subr.bf16.mxu1 %v3368_v21  ;;  %1378 = vmatprep.subr.bf16.mxu0 %v3368_v21 }
  0xd5   :  { %2559 = vmatprep.mubr.msk.bf16.mxu1 %vm346_vm0, %v3241_v30 }
  0xd7   :  { %1131 = vmatpush1.bf16.msra.mxu1 %v3615_v44  ;;  %1379 = vmatpush2.bf16.msra.mxu0 %v3697_v60 }
  0xd8   :  { %1134 = vmatprep.subr.bf16.mxu1 %v3368_v21  ;;  %2988 = vmatprep.subr.bf16.mxu0 %v3955_v38 }
  0xda   :  { %1381 = vmatmul.mubr.bf16.vlgmr.msra.gmra.mxu0 %v3223_v35  ;;  %v4122_v35 = vld [vmem:[%s4864_s1] sm:$0xff]  }
  0xdb   :  { %1135 = vmatpush2.bf16.msra.mxu1 %v3630_v47  ;;  %2989 = vmatpush3.bf16.msra.mxu0 %v3965_v50 }
  0xdc   :  { %1136 = vmatprep.subr.bf16.mxu1 %v3368_v21  ;;  %2990 = vmatprep.subr.bf16.mxu0 %v3972_v52 }
  0xdd   :  { %2594 = vmatprep.mubr.msk.bf16.mxu0 %vm346_vm0, %v3229_v41 }
  0xdf   :  { %1137 = vmatpush2.bf16.msra.mxu1 %v3638_v49  ;;  %2991 = vmatpush3.bf16.msra.mxu0 %v3983_v56 }
  0xe0   :  { %1138 = vmatprep.subr.bf16.mxu1 %v3368_v21  ;;  %2992 = vmatprep.subr.bf16.mxu0 %v3990_v58 }
  0xe2   :  { %v2764_v61 = vpop.f32.mrf.mxu1  ;;  %1389 = vmatmul.mubr.bf16.gmra.mxu0 %v3231_v54  ;;  %v2804_v62 = vpop.f32.mrf.mxu0 }
  0xe3   :  { %1139 = vmatpush2.bf16.msra.mxu1 %v3652_v51  ;;  %2993 = vmatpush3.bf16.msra.mxu0 %v4000_v63 }
  0xe4   :  { %v2765_v11 = vpop.f32.mrf.mxu1  ;;  %1140 = vmatprep.subr.bf16.mxu1 %v3368_v21  ;;  %2994 = vmatprep.subr.bf16.mxu0 %v4007_v12  ;;  %v2805_v18 = vpop.f32.mrf.mxu0 }
  0xe5   :  { %v4010_v19 = vadd.f32 %v2765_v11, %v2764_v61  ;;  %2595 = vmatprep.mubr.msk.bf16.mxu0 %vm346_vm0, %v3234_v59  ;;  %v4013_v22 = vadd.f32 %v2805_v18, %v2804_v62  ;;  %v3256_v59 = vld [vmem:[%s4865_s0 + $0x2c4] ss:$16 sps:$4 sm:$0xff]   ;;  %v3247_v61 = vld [vmem:[%s4865_s0 + $0x178] ss:$16 sps:$4 sm:$0xff]  }
  0xe6   :  { %v4015_v23 = vpop.f32.mrf.mxu1  ;;  %v4023_v28 = vpop.f32.mrf.mxu0  ;;  %v4142_v18 = vld [vmem:[%s4864_s1 + $0xb8] sm:$0xff]  }
  0xe7   :  { %1141 = vmatpush2.bf16.msra.mxu1 %v3662_v53  ;;  %2995 = vmatpush3.bf16.msra.mxu0 %v4029_v29 }
  0xe8   :  { %v4032_v31 = vpop.f32.mrf.mxu1  ;;  %1142 = vmatprep.subr.bf16.mxu1 %v3368_v21  ;;  %2996 = vmatprep.subr.bf16.mxu0 %v4038_v32  ;;  %v4041_v33 = vpop.f32.mrf.mxu0 }
  0xea   :  { %1397 = vmatmul.mubr.bf16.gmra.mxu0 %v3236_v25  ;;  %v2770_v36 = vpop.f32.mrf.mxu1  ;;  %v2810_v37 = vpop.f32.mrf.mxu0 }
  0xeb   :  { %1143 = vmatpush2.bf16.msra.mxu1 %v3674_v55  ;;  %2997 = vmatpush3.bf16.msra.mxu0 %v4047_v39 }
  0xec   :  { %1144 = vmatprep.subr.bf16.mxu1 %v3368_v21  ;;  %2998 = vmatprep.subr.bf16.mxu0 %v4054_v40  ;;  %v2771_v42 = vpop.f32.mrf.mxu1  ;;  %v2811_v0 = vpop.f32.mrf.mxu0 }
  0xed   :  { %2596 = vmatprep.mubr.msk.bf16.mxu0 %vm346_vm0, %v2592_v34  ;;  %v4058_v43 = vadd.f32 %v2771_v42, %v2770_v36  ;;  %v4060_v1 = vadd.f32 %v2811_v0, %v2810_v37  ;;  %v3248_v34 = vld [vmem:[%s4865_s0 + $0x19c] ss:$16 sps:$4 sm:$0xff]  }
  0xee   :  { %v4062_v3 = vpop.f32.mrf.mxu1  ;;  %v4064_v4 = vpop.f32.mrf.mxu0 }
  0xef   :  { %4868 = vst [vmem:[#allocation2_spill] sm:$0xff] %v4064_v4  ;;  %1145 = vmatpush2.bf16.msra.mxu1 %v3686_v57  ;;  %2999 = vmatpush3.bf16.msra.mxu0 %v4070_v5 }
  0xf0   :  { %1146 = vmatprep.subr.bf16.mxu1 %v3368_v21  ;;  %3000 = vmatprep.subr.bf16.mxu0 %v4077_v6  ;;  %v4080_v45 = vpop.f32.mrf.mxu1  ;;  %v4082_v46 = vpop.f32.mrf.mxu0 }
  0xf1   :  { %4869 = vst [vmem:[#allocation3_spill] sm:$0xff] %v4082_v46 }
  0xf2   :  { %1405 = vmatmul.mubr.bf16.gmra.mxu0 %v2591_v2  ;;  %v2776_v9 = vpop.f32.mrf.mxu1  ;;  %v2816_v10 = vpop.f32.mrf.mxu0  ;;  %v3258_v2 = vld [vmem:[%s4865_s0 + $0x2c0] ss:$16 sps:$4 sm:$0xff]  }
  0xf3   :  { %1147 = vmatpush2.bf16.msra.mxu1 %v3697_v60  ;;  %3001 = vmatpush3.bf16.msra.mxu0 %v4094_v13 }
  0xf4   :  { %2948 = vmatprep.subr.bf16.mxu1 %v3955_v38  ;;  %3002 = vmatprep.subr.bf16.mxu0 %v4101_v14  ;;  %v2777_v15 = vpop.f32.mrf.mxu1  ;;  %v2817_v16 = vpop.f32.mrf.mxu0 }
  0xf5   :  { %1780 = vmatprep.mubr.bf16.mxu0 %v3244_v7  ;;  %v4107_v20 = vadd.f32 %v2777_v15, %v2776_v9  ;;  %v4109_v24 = vadd.f32 %v2817_v16, %v2816_v10  ;;  %v4161_v7 = vld [vmem:[%s4864_s1 + $0xb0] sm:$0xff]   ;;  %v3250_v15 = vld [vmem:[%s4865_s0 + $0x198] ss:$16 sps:$4 sm:$0xff]  }
  0xf6   :  { %1149 = vmatmul.mubr.bf16.vlgmr.msra.gmra.mxu1 %v3239_v8  ;;  %v4114_v48 = vpop.f32.mrf.mxu1  ;;  %v4116_v30 = vpop.f32.mrf.mxu0  ;;  %v3259_v10 = vld [vmem:[%s4865_s0 + $0x2e4] ss:$16 sps:$4 sm:$0xff]   ;;  %v2542_v16 = vld [vmem:[%s4865_s0 + $0x1b8] sm:$0x11] }
  0xf7   :  { %4870 = vst [vmem:[#allocation4_spill] sm:$0xff] %v4109_v24  ;;  %4871 = vst [vmem:[#allocation5_spill] sm:$0xff] %v4116_v30  ;;  %2949 = vmatpush3.bf16.msra.mxu1 %v3965_v50  ;;  %3003 = vmatpush3.bf16.msra.mxu0 %v4122_v35 }
  0xf8   :  { %2950 = vmatprep.subr.bf16.mxu1 %v3972_v52  ;;  %1812 = vmatprep.subr.bf16.mxu0 %v3368_v21  ;;  %v4127_v41 = vpop.f32.mrf.mxu1  ;;  %v4129_v54 = vpop.f32.mrf.mxu0 }
  0xf9   :  { %4872 = vst [vmem:[#allocation6_spill] sm:$0xff] %v4129_v54  ;;  %2560 = vmatprep.mubr.msk.bf16.mxu1 %vm346_vm0, %v3245_v17 }
  0xfa   :  { %1781 = vmatmul.mubr.bf16.vlgmr.msra.gmra.mxu0 %v3242_v27  ;;  %v2782_v62 = vpop.f32.mrf.mxu1  ;;  %v2822_v11 = vpop.f32.mrf.mxu0  ;;  %v4180_v27 = vld [vmem:[%s4864_s1 + $0xa8] sm:$0xff]  }
  0xfb   :  { %2951 = vmatpush3.bf16.msra.mxu1 %v3983_v56  ;;  %1813 = vmatpush1.bf16.msra.mxu0 %v4142_v18 }
  0xfc   :  { %2952 = vmatprep.subr.bf16.mxu1 %v3990_v58  ;;  %1814 = vmatprep.subr.bf16.mxu0 %v3368_v21  ;;  %v2783_v25 = vpop.f32.mrf.mxu1  ;;  %v2823_v26 = vpop.f32.mrf.mxu0 }
  0xfd   :  { %v4150_v36 = vadd.f32 %v2783_v25, %v2782_v62  ;;  %v4152_v37 = vadd.f32 %v2823_v26, %v2822_v11  ;;  %1788 = vmatprep.mubr.bf16.mxu0 %v3256_v59  ;;  %v3261_v25 = vld [vmem:[%s4865_s0 + $0x2e0] ss:$16 sps:$4 sm:$0xff]  }
  0xfe   :  { %1157 = vmatmul.mubr.bf16.gmra.mxu1 %v3247_v61  ;;  %v2785_v42 = vpop.f32.mrf.mxu1  ;;  %v2825_v0 = vpop.f32.mrf.mxu0  ;;  %v2558_v61 = vcombine.high %v2542_v16, %v2542_v16  ;;  %v2643_v26 = vld [vmem:[%s4865_s0 + $0x300] sm:$0x11] }
  0xff   :  { %4873 = vst [vmem:[#allocation7_spill] sm:$0xff] %v4152_v37  ;;  %2953 = vmatpush3.bf16.msra.mxu1 %v4000_v63  ;;  %1815 = vmatpush1.bf16.msra.mxu0 %v4161_v7  ;;  %v2658_v0 = vcombine.high %v2643_v26, %v2643_v26 }
 0x100   :  { %2954 = vmatprep.subr.bf16.mxu1 %v4007_v12  ;;  %1816 = vmatprep.subr.bf16.mxu0 %v3368_v21  ;;  %v2786_v8 = vpop.f32.mrf.mxu1  ;;  %v2826_v9 = vpop.f32.mrf.mxu0 }
 0x101   :  { %2561 = vmatprep.mubr.msk.bf16.mxu1 %vm346_vm0, %v3248_v34  ;;  %v4199_v34 = vld [vmem:[%s4864_s1 + $0xa0] sm:$0xff]   ;;  %v4211_v9 = vld [vmem:[%s4864_s1 + $0x98] sm:$0xff]  }
 0x102   :  { %v2844_v17 = vpop.f32.mrf.mxu0  ;;  %1789 = vmatmul.mubr.bf16.gmra.mxu0 %v3258_v2  ;;  %v2557_v2 = vcombine.low %v2542_v16, %v2542_v16 }
 0x103   :  { %2955 = vmatpush3.bf16.msra.mxu1 %v4029_v29  ;;  %1817 = vmatpush1.bf16.msra.mxu0 %v4180_v27 }
 0x104   :  { %2956 = vmatprep.subr.bf16.mxu1 %v4038_v32  ;;  %1818 = vmatprep.subr.bf16.mxu0 %v3368_v21  ;;  %v2845_v59 = vpop.f32.mrf.mxu0 }
 0x105   :  { %v4185_v62 = vadd.f32 %v2845_v59, %v2844_v17  ;;  %1796 = vmatprep.mubr.bf16.mxu0 %v3259_v10  ;;  %v2657_v59 = vcombine.low %v2643_v26, %v2643_v26  ;;  %v3269_v26 = vld [vmem:[%s4865_s0 + $0x2ac] ss:$16 sps:$4 sm:$0xff]  }
 0x106   :  { %1165 = vmatmul.mubr.bf16.gmra.mxu1 %v3250_v15  ;;  %v4187_v11 = vpop.f32.mrf.mxu0  ;;  %v3255_v15 = vld [vmem:[%s4865_s0 + $0x234] ss:$16 sps:$4 sm:$0xff]  }
 0x107   :  { %2957 = vmatpush3.bf16.msra.mxu1 %v4047_v39  ;;  %1819 = vmatpush1.bf16.msra.mxu0 %v4199_v34 }
 0x108   :  { %2958 = vmatprep.subr.bf16.mxu1 %v4054_v40  ;;  %1820 = vmatprep.subr.bf16.mxu0 %v3368_v21  ;;  %v4204_v42 = vpop.f32.mrf.mxu0 }
 0x109   :  { %2562 = vmatprep.mubr.msk.bf16.mxu1 %vm346_vm0, %v2558_v61  ;;  %v4227_v61 = vld [vmem:[%s4864_s1 + $0x90] sm:$0xff]  }
 0x10a   :  { %v2850_v8 = vpop.f32.mrf.mxu0  ;;  %1797 = vmatmul.mubr.bf16.gmra.mxu0 %v3261_v25 }
 0x10b   :  { %2959 = vmatpush3.bf16.msra.mxu1 %v4070_v5  ;;  %1821 = vmatpush1.bf16.msra.mxu0 %v4211_v9 }
 0x10c   :  { %2960 = vmatprep.subr.bf16.mxu1 %v4077_v6  ;;  %1822 = vmatprep.subr.bf16.mxu0 %v3368_v21  ;;  %v2851_v10 = vpop.f32.mrf.mxu0 }
 0x10d   :  { %v4219_v16 = vadd.f32 %v2851_v10, %v2850_v8  ;;  %1804 = vmatprep.mubr.bf16.mxu0 %v2658_v0  ;;  %v3253_v0 = vld [vmem:[%s4865_s0 + $0x230] ss:$16 sps:$4 sm:$0xff]   ;;  %v4244_v8 = vld [vmem:[%s4864_s1 + $0x88] sm:$0xff]  }
 0x10e   :  { %1173 = vmatmul.mubr.bf16.gmra.mxu1 %v2557_v2  ;;  %v4221_v17 = vpop.f32.mrf.mxu0 }
 0x10f   :  { %2961 = vmatpush3.bf16.msra.mxu1 %v4094_v13  ;;  %1823 = vmatpush1.bf16.msra.mxu0 %v4227_v61 }
 0x110   :  { %2962 = vmatprep.subr.bf16.mxu1 %v4101_v14  ;;  %1824 = vmatprep.subr.bf16.mxu0 %v3368_v21  ;;  %v4232_v25 = vpop.f32.mrf.mxu0 }
 0x111   :  { %1548 = vmatprep.mubr.bf16.mxu1 %v3255_v15 }
 0x112   :  { %v2856_v2 = vpop.f32.mrf.mxu0  ;;  %1805 = vmatmul.mubr.bf16.gmra.mxu0 %v2657_v59  ;;  %v3264_v59 = vld [vmem:[%s4865_s0 + $0x254] ss:$16 sps:$4 sm:$0xff]  }
 0x113   :  { %2963 = vmatpush3.bf16.msra.mxu1 %v4122_v35  ;;  %1825 = vmatpush1.bf16.msra.mxu0 %v4244_v8 }
 0x114   :  { %1580 = vmatprep.subr.bf16.mxu1 %v3368_v21  ;;  %1826 = vmatprep.subr.bf16.mxu0 %v3368_v21  ;;  %v2857_v10 = vpop.f32.mrf.mxu0 }
 0x115   :  { %v4249_v15 = vadd.f32 %v2857_v10, %v2856_v2  ;;  %2661 = vmatprep.mubr.msk.bf16.mxu0 %vm346_vm0, %v3269_v26  ;;  %v3266_v2 = vld [vmem:[%s4865_s0 + $0x250] ss:$16 sps:$4 sm:$0xff]  }
 0x116   :  { %1549 = vmatmul.mubr.bf16.vlgmr.msra.gmra.mxu1 %v3253_v0  ;;  %v4255_v37 = vpop.f32.mrf.mxu0  ;;  %v3270_v0 = vld [vmem:[%s4865_s0 + $0x274] ss:$16 sps:$4 sm:$0xff]  }
 0x117   :  { %1581 = vmatpush1.bf16.msra.mxu1 %v4142_v18  ;;  %1827 = vmatpush1.bf16.msra.mxu0 %v3615_v44 }
 0x118   :  { %1582 = vmatprep.subr.bf16.mxu1 %v3368_v21  ;;  %1830 = vmatprep.subr.bf16.mxu0 %v3368_v21  ;;  %v4261_v54 = vpop.f32.mrf.mxu0 }
 0x119   :  { %1556 = vmatprep.mubr.bf16.mxu1 %v3264_v59 }
 0x11a   :  { %v2862_v10 = vpop.f32.mrf.mxu0 }
 0x11b   :  { %1583 = vmatpush1.bf16.msra.mxu1 %v4161_v7  ;;  %1831 = vmatpush2.bf16.msra.mxu0 %v3630_v47 }
 0x11c   :  { %1584 = vmatprep.subr.bf16.mxu1 %v3368_v21  ;;  %1832 = vmatprep.subr.bf16.mxu0 %v3368_v21  ;;  %v2863_v44 = vpop.f32.mrf.mxu0 }
 0x11d   :  { %v4270_v26 = vadd.f32 %v2863_v44, %v2862_v10  ;;  %v2769_v44 = vadd.f32 %v4032_v31, %v4015_v23 }
 0x11e   :  { %v461_v59 = vpop.f32.mrf.mxu1  ;;  %1557 = vmatmul.mubr.bf16.gmra.mxu1 %v3266_v2  ;;  %v2865_v30 = vpop.f32.mrf.mxu0 }
 0x11f   :  { %v4276_v24 = vadd.f32 %v4010_v19, %v461_v59  ;;  %1585 = vmatpush1.bf16.msra.mxu1 %v4180_v27  ;;  %1833 = vmatpush2.bf16.msra.mxu0 %v3638_v49  ;;  %v3272_v19 = vld [vmem:[%s4865_s0 + $0x270] ss:$16 sps:$4 sm:$0xff]  }
 0x120   :  { %v463_v46 = vpop.f32.mrf.mxu1  ;;  %1586 = vmatprep.subr.bf16.mxu1 %v3368_v21  ;;  %1834 = vmatprep.subr.bf16.mxu0 %v3368_v21  ;;  %v2866_v10 = vpop.f32.mrf.mxu0  ;;  %v2609_v30 = vld [vmem:[%s4865_s0 + $0x290] sm:$0x11] }
 0x121   :  { %1564 = vmatprep.mubr.bf16.mxu1 %v3270_v0  ;;  %v2624_v23 = vcombine.high %v2609_v30, %v2609_v30  ;;  %v2623_v59 = vcombine.low %v2609_v30, %v2609_v30 }
 0x122   :  { %v464_v4 = vpop.f32.mrf.mxu1 }
 0x123   :  { %v4290_v49 = vadd.f32 %v2769_v44, %v464_v4  ;;  %1587 = vmatpush1.bf16.msra.mxu1 %v4199_v34  ;;  %1835 = vmatpush2.bf16.msra.mxu0 %v3652_v51  ;;  %v2775_v51 = vadd.f32 %v4080_v45, %v4062_v3 }
 0x124   :  { %v466_v46 = vpop.f32.mrf.mxu1  ;;  %1588 = vmatprep.subr.bf16.mxu1 %v3368_v21  ;;  %1836 = vmatprep.subr.bf16.mxu0 %v3368_v21 }
 0x126   :  { %v469_v31 = vpop.f32.mrf.mxu1  ;;  %1565 = vmatmul.mubr.bf16.gmra.mxu1 %v3272_v19 }
 0x127   :  { %v4297_v2 = vadd.f32 %v4058_v43, %v469_v31  ;;  %1589 = vmatpush1.bf16.msra.mxu1 %v4211_v9  ;;  %1837 = vmatpush2.bf16.msra.mxu0 %v3662_v53  ;;  %v3285_v53 = vld [vmem:[%s4865_s0 + $0x23c] ss:$16 sps:$4 sm:$0xff]   ;;  %v3275_v31 = vld [vmem:[%s4865_s0 + $0x2c8] ss:$16 sps:$4 sm:$0xff]  }
 0x128   :  { %v471_v4 = vpop.f32.mrf.mxu1  ;;  %1590 = vmatprep.subr.bf16.mxu1 %v3368_v21  ;;  %1838 = vmatprep.subr.bf16.mxu0 %v3368_v21 }
 0x129   :  { %1572 = vmatprep.mubr.bf16.mxu1 %v2624_v23 }
 0x12a   :  { %v472_v0 = vpop.f32.mrf.mxu1 }
 0x12b   :  { %v4305_v10 = vadd.f32 %v2775_v51, %v472_v0  ;;  %1591 = vmatpush1.bf16.msra.mxu1 %v4227_v61  ;;  %1839 = vmatpush2.bf16.msra.mxu0 %v3674_v55  ;;  %v2781_v55 = vadd.f32 %v4127_v41, %v4114_v48  ;;  %v3273_v48 = vld [vmem:[%s4865_s0 + $0x2cc] ss:$16 sps:$4 sm:$0xff]  }
 0x12c   :  { %v474_v43 = vpop.f32.mrf.mxu1  ;;  %1592 = vmatprep.subr.bf16.mxu1 %v3368_v21  ;;  %1840 = vmatprep.subr.bf16.mxu0 %v3368_v21  ;;  %v3278_v0 = vld [vmem:[%s4865_s0 + $0x2ec] ss:$16 sps:$4 sm:$0xff]  }
 0x12e   :  { %v477_v44 = vpop.f32.mrf.mxu1  ;;  %1573 = vmatmul.mubr.bf16.gmra.mxu1 %v2623_v59 }
 0x12f   :  { %v4315_v3 = vadd.f32 %v4107_v20, %v477_v44  ;;  %1593 = vmatpush1.bf16.msra.mxu1 %v4244_v8  ;;  %1841 = vmatpush2.bf16.msra.mxu0 %v3686_v57  ;;  %v3267_v20 = vld [vmem:[%s4865_s0 + $0x2a8] ss:$16 sps:$4 sm:$0xff]   ;;  %v4332_v57 = vld [vmem:[%s4864_s1 + $0x80] sm:$0xff]  }
 0x130   :  { %v479_v45 = vpop.f32.mrf.mxu1  ;;  %1594 = vmatprep.subr.bf16.mxu1 %v3368_v21  ;;  %1842 = vmatprep.subr.bf16.mxu0 %v3368_v21 }
 0x131   :  { %2627 = vmatprep.mubr.msk.bf16.mxu1 %vm346_vm0, %v3285_v53  ;;  %v4370_v53 = vld [vmem:[%s4864_s1 + $0xe0] sm:$0xff]   ;;  %v2849_v45 = vadd.f32 %v4204_v42, %v4187_v11 }
 0x132   :  { %v480_v19 = vpop.f32.mrf.mxu1 }
 0x133   :  { %v4327_v30 = vadd.f32 %v2781_v55, %v480_v19  ;;  %1595 = vmatpush1.bf16.msra.mxu1 %v4332_v57  ;;  %1843 = vmatpush2.bf16.msra.mxu0 %v3697_v60  ;;  %v3280_v55 = vld [vmem:[%s4865_s0 + $0x2e8] ss:$16 sps:$4 sm:$0xff]  }
 0x134   :  { %v482_v46 = vpop.f32.mrf.mxu1  ;;  %1598 = vmatprep.subr.bf16.mxu1 %v3368_v21  ;;  %3068 = vmatprep.subr.bf16.mxu0 %v3955_v38  ;;  %v2644_v19 = vld [vmem:[%s4865_s0 + $0x308] sm:$0x11] }
 0x135   :  { %v4390_v46 = vld [vmem:[%s4864_s1 + $0xd8] sm:$0xff]   ;;  %v2660_v42 = vcombine.high %v2644_v19, %v2644_v19 }
 0x136   :  { %v485_v41 = vpop.f32.mrf.mxu1  ;;  %1845 = vmatmul.mubr.bf16.vlgmr.msra.gmra.mxu0 %v3267_v20 }
 0x137   :  { %v4342_v23 = vadd.f32 %v4150_v36, %v485_v41  ;;  %1599 = vmatpush2.bf16.msra.mxu1 %v3630_v47  ;;  %3069 = vmatpush3.bf16.msra.mxu0 %v3965_v50  ;;  %v4355_v36 = vld [vmem:[%s4864_s1 + $0xe8] sm:$0xff]  }
 0x138   :  { %1600 = vmatprep.subr.bf16.mxu1 %v3368_v21  ;;  %3070 = vmatprep.subr.bf16.mxu0 %v3972_v52  ;;  %v487_v60 = vpop.f32.mrf.mxu1 }
 0x139   :  { %2662 = vmatprep.mubr.msk.bf16.mxu0 %vm346_vm0, %v3273_v48  ;;  %v4402_v60 = vld [vmem:[%s4864_s1 + $0xd0] sm:$0xff]  }
 0x13a   :  { %v488_v4 = vpop.f32.mrf.mxu1 }
 0x13b   :  { %1601 = vmatpush2.bf16.msra.mxu1 %v4355_v36  ;;  %3071 = vmatpush3.bf16.msra.mxu0 %v3983_v56  ;;  %v2855_v4 = vadd.f32 %v4232_v25, %v4221_v17  ;;  %v3288_v17 = vld [vmem:[%s4865_s0 + $0x384] ss:$16 sps:$4 sm:$0xff]  }
 0x13c   :  { %1602 = vmatprep.subr.bf16.mxu1 %v3368_v21  ;;  %3072 = vmatprep.subr.bf16.mxu0 %v3990_v58  ;;  %v489_v51 = vpop.f32.mrf.mxu1 }
 0x13d   :  { %v2659_v51 = vcombine.low %v2644_v19, %v2644_v19 }
 0x13e   :  { %v918_v59 = vpop.f32.mrf.mxu0  ;;  %1853 = vmatmul.mubr.bf16.gmra.mxu0 %v3275_v31 }
 0x13f   :  { %v4365_v43 = vadd.f32 %v4185_v62, %v918_v59  ;;  %1603 = vmatpush2.bf16.msra.mxu1 %v4370_v53  ;;  %3073 = vmatpush3.bf16.msra.mxu0 %v4000_v63  ;;  %v4416_v59 = vld [vmem:[%s4864_s1 + $0xc8] sm:$0xff]  }
 0x140   :  { %v920_v44 = vpop.f32.mrf.mxu0  ;;  %1604 = vmatprep.subr.bf16.mxu1 %v3368_v21  ;;  %3074 = vmatprep.subr.bf16.mxu0 %v4007_v12 }
 0x141   :  { %2663 = vmatprep.mubr.msk.bf16.mxu0 %vm346_vm0, %v3278_v0 }
 0x142   :  { %v921_v62 = vpop.f32.mrf.mxu0 }
 0x143   :  { %v4385_v20 = vadd.f32 %v2849_v45, %v921_v62  ;;  %1605 = vmatpush2.bf16.msra.mxu1 %v4390_v46  ;;  %3075 = vmatpush3.bf16.msra.mxu0 %v4029_v29  ;;  %v3283_v45 = vld [vmem:[%s4865_s0 + $0x238] ss:$16 sps:$4 sm:$0xff]  }
 0x144   :  { %v923_v11 = vpop.f32.mrf.mxu0  ;;  %1606 = vmatprep.subr.bf16.mxu1 %v3368_v21  ;;  %3076 = vmatprep.subr.bf16.mxu0 %v4038_v32 }
 0x145   :  { %v2861_v11 = vadd.f32 %v4261_v54, %v4255_v37  ;;  %v3302_v54 = vld [vmem:[%s4865_s0 + $0x3a4] ss:$16 sps:$4 sm:$0xff]  }
 0x146   :  { %v926_v48 = vpop.f32.mrf.mxu0  ;;  %1861 = vmatmul.mubr.bf16.gmra.mxu0 %v3280_v55  ;;  %v4434_v55 = vld [vmem:[%s4864_s1 + $0xc0] sm:$0xff]  }
 0x147   :  { %v4397_v41 = vadd.f32 %v4219_v16, %v926_v48  ;;  %1607 = vmatpush2.bf16.msra.mxu1 %v4402_v60  ;;  %3077 = vmatpush3.bf16.msra.mxu0 %v4047_v39  ;;  %v3286_v48 = vld [vmem:[%s4865_s0 + $0x380] ss:$16 sps:$4 sm:$0xff]  }
 0x148   :  { %v928_v31 = vpop.f32.mrf.mxu0  ;;  %1608 = vmatprep.subr.bf16.mxu1 %v3368_v21  ;;  %3078 = vmatprep.subr.bf16.mxu0 %v4054_v40 }
 0x149   :  { %2664 = vmatprep.mubr.msk.bf16.mxu0 %vm346_vm0, %v2660_v42 }
 0x14a   :  { %v929_v16 = vpop.f32.mrf.mxu0 }
 0x14b   :  { %v4411_v0 = vadd.f32 %v2855_v4, %v929_v16  ;;  %1609 = vmatpush2.bf16.msra.mxu1 %v4416_v59  ;;  %3079 = vmatpush3.bf16.msra.mxu0 %v4070_v5  ;;  %v3291_v4 = vld [vmem:[%s4865_s0 + $0x258] ss:$16 sps:$4 sm:$0xff]   ;;  %v3292_v16 = vld [vmem:[%s4865_s0 + $0x27c] ss:$16 sps:$4 sm:$0xff]  }
 0x14c   :  { %v931_v44 = vpop.f32.mrf.mxu0  ;;  %1610 = vmatprep.subr.bf16.mxu1 %v3368_v21  ;;  %3080 = vmatprep.subr.bf16.mxu0 %v4077_v6 }
 0x14e   :  { %v934_v25 = vpop.f32.mrf.mxu0  ;;  %1869 = vmatmul.mubr.bf16.gmra.mxu0 %v2659_v51 }
 0x14f   :  { %v4429_v62 = vadd.f32 %v4249_v15, %v934_v25  ;;  %1611 = vmatpush2.bf16.msra.mxu1 %v4434_v55  ;;  %3081 = vmatpush3.bf16.msra.mxu0 %v4094_v13  ;;  %v3289_v15 = vld [vmem:[%s4865_s0 + $0x25c] ss:$16 sps:$4 sm:$0xff]   ;;  %v2809_v25 = vadd.f32 %v4041_v33, %v4023_v28 }
 0x150   :  { %v936_v19 = vpop.f32.mrf.mxu0  ;;  %3028 = vmatprep.subr.bf16.mxu1 %v3955_v38  ;;  %3082 = vmatprep.subr.bf16.mxu0 %v4101_v14 }
 0x151   :  { %2244 = vmatprep.mubr.bf16.mxu0 %v3288_v17  ;;  %v3294_v19 = vld [vmem:[%s4865_s0 + $0x278] ss:$16 sps:$4 sm:$0xff]  }
 0x152   :  { %v937_v42 = vpop.f32.mrf.mxu0  ;;  %1613 = vmatmul.mubr.bf16.vlgmr.msra.gmra.mxu1 %v3283_v45 }
 0x153   :  { %v4448_v31 = vadd.f32 %v2861_v11, %v937_v42  ;;  %3029 = vmatpush3.bf16.msra.mxu1 %v3965_v50  ;;  %3083 = vmatpush3.bf16.msra.mxu0 %v4122_v35 }
 0x154   :  { %v939_v38 = vpop.f32.mrf.mxu0  ;;  %3030 = vmatprep.subr.bf16.mxu1 %v3972_v52  ;;  %2276 = vmatprep.subr.bf16.mxu0 %v3368_v21 }
 0x155   :  { %2628 = vmatprep.mubr.msk.bf16.mxu1 %vm346_vm0, %v3289_v15 }
 0x156   :  { %v942_v37 = vpop.f32.mrf.mxu0  ;;  %2245 = vmatmul.mubr.bf16.vlgmr.msra.gmra.mxu0 %v3286_v48 }
 0x157   :  { %v4462_v50 = vadd.f32 %v4270_v26, %v942_v37  ;;  %3031 = vmatpush3.bf16.msra.mxu1 %v3983_v56  ;;  %2277 = vmatpush1.bf16.msra.mxu0 %v4142_v18  ;;  %v3300_v26 = vld [vmem:[%s4865_s0 + $0x3a0] ss:$16 sps:$4 sm:$0xff]  }
 0x158   :  { %3032 = vmatprep.subr.bf16.mxu1 %v3990_v58  ;;  %2278 = vmatprep.subr.bf16.mxu0 %v3368_v21  ;;  %v944_v52 = vpop.f32.mrf.mxu0 }
 0x159   :  { %2252 = vmatprep.mubr.bf16.mxu0 %v3302_v54 }
 0x15a   :  { %v686_v51 = vpop.f32.mrf.mxu1  ;;  %1621 = vmatmul.mubr.bf16.gmra.mxu1 %v3291_v4  ;;  %v945_v44 = vpop.f32.mrf.mxu0 }
 0x15b   :  { %v687_v56 = vadd.f32 %v4013_v22, %v686_v51  ;;  %3033 = vmatpush3.bf16.msra.mxu1 %v4000_v63  ;;  %2279 = vmatpush1.bf16.msra.mxu0 %v4161_v7  ;;  %v3305_v22 = vld [vmem:[%s4865_s0 + $0x3c4] ss:$16 sps:$4 sm:$0xff]   ;;  %v4875_v51 = vld [vmem:[#allocation3_spill] sm:$0xff] }
 0x15c   :  { %v688_v58 = vpop.f32.mrf.mxu1  ;;  %3034 = vmatprep.subr.bf16.mxu1 %v4007_v12  ;;  %2280 = vmatprep.subr.bf16.mxu0 %v3368_v21  ;;  %v946_v17 = vpop.f32.mrf.mxu0  ;;  %v2610_v12 = vld [vmem:[%s4865_s0 + $0x298] sm:$0x11] }
 0x15d   :  { %v716_v45 = vmax.f32 %v4276_v24, %v687_v56  ;;  %2629 = vmatprep.mubr.msk.bf16.mxu1 %vm346_vm0, %v3292_v16  ;;  %v2626_v48 = vcombine.high %v2610_v12, %v2610_v12  ;;  %v4874_v16 = vld [vmem:[#allocation2_spill] sm:$0xff]  ;;  %v2625_v58 = vcombine.low %v2610_v12, %v2610_v12  ;;  %v4876_v12 = vld [vmem:[#allocation4_spill] sm:$0xff] }
 0x15e   :  { %v689_v63 = vpop.f32.mrf.mxu1  ;;  %v2924_v11 = vpop.f32.mrf.mxu0  ;;  %2253 = vmatmul.mubr.bf16.gmra.mxu0 %v3300_v26  ;;  %v2815_v44 = vadd.f32 %v4875_v51, %v4874_v16  ;;  %v3310_v16 = vld [vmem:[%s4865_s0 + $0x334] ss:$16 sps:$4 sm:$0xff]   ;;  %v4879_v51 = vld [vmem:[#allocation7_spill] sm:$0xff] }
 0x15f   :  { %v690_v28 = vadd.f32 %v2809_v25, %v689_v63  ;;  %3035 = vmatpush3.bf16.msra.mxu1 %v4029_v29  ;;  %2281 = vmatpush1.bf16.msra.mxu0 %v4180_v27  ;;  %v4495_v33 = vmax.f32 %v716_v45, %v4365_v43  ;;  %v3303_v43 = vld [vmem:[%s4865_s0 + $0x3c0] ss:$16 sps:$4 sm:$0xff]  }
 0x160   :  { %v691_v24 = vpop.f32.mrf.mxu1  ;;  %3036 = vmatprep.subr.bf16.mxu1 %v4038_v32  ;;  %2282 = vmatprep.subr.bf16.mxu0 %v3368_v21  ;;  %v2925_v15 = vpop.f32.mrf.mxu0  ;;  %v2711_v32 = vld [vmem:[%s4865_s0 + $0x3e0] sm:$0x11] }
 0x161   :  { %v717_v42 = vmax.f32 %v4290_v49, %v690_v28  ;;  %v4500_v38 = vadd.f32 %v2925_v15, %v2924_v11  ;;  %2260 = vmatprep.mubr.bf16.mxu0 %v3305_v22  ;;  %v3299_v22 = vld [vmem:[%s4865_s0 + $0x314] ss:$16 sps:$4 sm:$0xff]   ;;  %v4877_v24 = vld [vmem:[#allocation5_spill] sm:$0xff] }
 0x162   :  { %v694_v54 = vpop.f32.mrf.mxu1  ;;  %1629 = vmatmul.mubr.bf16.gmra.mxu1 %v3294_v19  ;;  %v2927_v29 = vpop.f32.mrf.mxu0  ;;  %v4878_v15 = vld [vmem:[#allocation6_spill] sm:$0xff] }
 0x163   :  { %v695_v37 = vadd.f32 %v4060_v1, %v694_v54  ;;  %3037 = vmatpush3.bf16.msra.mxu1 %v4047_v39  ;;  %2283 = vmatpush1.bf16.msra.mxu0 %v4199_v34  ;;  %v4512_v49 = vmax.f32 %v717_v42, %v4385_v20  ;;  %v2726_v39 = vcombine.high %v2711_v32, %v2711_v32 }
 0x164   :  { %v696_v4 = vpop.f32.mrf.mxu1  ;;  %3038 = vmatprep.subr.bf16.mxu1 %v4054_v40  ;;  %2284 = vmatprep.subr.bf16.mxu0 %v3368_v21  ;;  %v2928_v52 = vpop.f32.mrf.mxu0  ;;  %v2821_v42 = vadd.f32 %v4878_v15, %v4877_v24 }
 0x165   :  { %v718_v26 = vmax.f32 %v4297_v2, %v695_v37  ;;  %2630 = vmatprep.mubr.msk.bf16.mxu1 %vm346_vm0, %v2626_v48  ;;  %v4520_v1 = vadd.f32 %v2928_v52, %v2927_v29 }
 0x166   :  { %v697_v56 = vpop.f32.mrf.mxu1  ;;  %v2930_v20 = vpop.f32.mrf.mxu0  ;;  %2261 = vmatmul.mubr.bf16.gmra.mxu0 %v3303_v43 }
 0x167   :  { %v698_v17 = vadd.f32 %v2815_v44, %v697_v56  ;;  %3039 = vmatpush3.bf16.msra.mxu1 %v4070_v5  ;;  %2285 = vmatpush1.bf16.msra.mxu0 %v4211_v9  ;;  %v4525_v40 = vmax.f32 %v718_v26, %v4397_v41  ;;  %v2725_v41 = vcombine.low %v2711_v32, %v2711_v32 }
 0x168   :  { %v699_v25 = vpop.f32.mrf.mxu1  ;;  %3040 = vmatprep.subr.bf16.mxu1 %v4077_v6  ;;  %2286 = vmatprep.subr.bf16.mxu0 %v3368_v21  ;;  %v2931_v2 = vpop.f32.mrf.mxu0 }
 0x169   :  { %v719_v45 = vmax.f32 %v4305_v10, %v698_v17  ;;  %v4533_v63 = vadd.f32 %v2931_v2, %v2930_v20  ;;  %2268 = vmatprep.mubr.bf16.mxu0 %v2726_v39 }
 0x16a   :  { %v702_v5 = vpop.f32.mrf.mxu1  ;;  %1637 = vmatmul.mubr.bf16.gmra.mxu1 %v2625_v58  ;;  %v2933_v19 = vpop.f32.mrf.mxu0 }
 0x16b   :  { %v703_v11 = vadd.f32 %v4876_v12, %v702_v5  ;;  %3041 = vmatpush3.bf16.msra.mxu1 %v4094_v13  ;;  %2287 = vmatpush1.bf16.msra.mxu0 %v4227_v61  ;;  %v4539_v6 = vmax.f32 %v719_v45, %v4411_v0  ;;  %v3313_v13 = vld [vmem:[%s4865_s0 + $0x38c] ss:$16 sps:$4 sm:$0xff]   ;;  %v3316_v45 = vld [vmem:[%s4865_s0 + $0x354] ss:$16 sps:$4 sm:$0xff]   ;;  %v3314_v12 = vld [vmem:[%s4865_s0 + $0x350] ss:$16 sps:$4 sm:$0xff]  }
 0x16c   :  { %v704_v10 = vpop.f32.mrf.mxu1  ;;  %3042 = vmatprep.subr.bf16.mxu1 %v4101_v14  ;;  %2288 = vmatprep.subr.bf16.mxu0 %v3368_v21  ;;  %v2934_v28 = vpop.f32.mrf.mxu0  ;;  %v3297_v14 = vld [vmem:[%s4865_s0 + $0x310] ss:$16 sps:$4 sm:$0xff]  }
 0x16d   :  { %v720_v48 = vmax.f32 %v4315_v3, %v703_v11  ;;  %2012 = vmatprep.mubr.bf16.mxu1 %v3299_v22  ;;  %v4546_v54 = vadd.f32 %v2934_v28, %v2933_v19 }
 0x16e   :  { %v705_v0 = vpop.f32.mrf.mxu1  ;;  %v2936_v29 = vpop.f32.mrf.mxu0  ;;  %2269 = vmatmul.mubr.bf16.gmra.mxu0 %v2725_v41 }
 0x16f   :  { %v706_v43 = vadd.f32 %v2821_v42, %v705_v0  ;;  %3043 = vmatpush3.bf16.msra.mxu1 %v4122_v35  ;;  %2289 = vmatpush1.bf16.msra.mxu0 %v4244_v8  ;;  %v4557_v3 = vmax.f32 %v720_v48, %v4429_v62  ;;  %v3329_v0 = vld [vmem:[%s4865_s0 + $0x31c] ss:$16 sps:$4 sm:$0xff]  }
 0x170   :  { %v707_v32 = vpop.f32.mrf.mxu1  ;;  %2044 = vmatprep.subr.bf16.mxu1 %v3368_v21  ;;  %2290 = vmatprep.subr.bf16.mxu0 %v3368_v21  ;;  %v2937_v37 = vpop.f32.mrf.mxu0 }
 0x171   :  { %v721_v4 = vmax.f32 %v4327_v30, %v706_v43  ;;  %v4562_v52 = vadd.f32 %v2937_v37, %v2936_v29  ;;  %2729 = vmatprep.mubr.msk.bf16.mxu0 %vm346_vm0, %v3313_v13  ;;  %v3311_v43 = vld [vmem:[%s4865_s0 + $0x388] ss:$16 sps:$4 sm:$0xff]  }
 0x172   :  { %v710_v35 = vpop.f32.mrf.mxu1  ;;  %2013 = vmatmul.mubr.bf16.vlgmr.msra.gmra.mxu1 %v3297_v14  ;;  %v2939_v62 = vpop.f32.mrf.mxu0 }
 0x173   :  { %v711_v44 = vadd.f32 %v4879_v51, %v710_v35  ;;  %2045 = vmatpush1.bf16.msra.mxu1 %v4142_v18  ;;  %2291 = vmatpush1.bf16.msra.mxu0 %v4332_v57  ;;  %v4572_v26 = vmax.f32 %v721_v4, %v4448_v31  ;;  %v3308_v18 = vld [vmem:[%s4865_s0 + $0x330] ss:$16 sps:$4 sm:$0xff]  }
 0x174   :  { %v712_v30 = vpop.f32.mrf.mxu1  ;;  %2046 = vmatprep.subr.bf16.mxu1 %v3368_v21  ;;  %2294 = vmatprep.subr.bf16.mxu0 %v3368_v21  ;;  %v2940_v39 = vpop.f32.mrf.mxu0 }
 0x175   :  { %v722_v56 = vmax.f32 %v4342_v23, %v711_v44  ;;  %2020 = vmatprep.mubr.bf16.mxu1 %v3310_v16  ;;  %v4577_v58 = vadd.f32 %v2940_v39, %v2939_v62  ;;  %v3319_v62 = vld [vmem:[%s4865_s0 + $0x3a8] ss:$16 sps:$4 sm:$0xff]   ;;  %v3322_v44 = vld [vmem:[%s4865_s0 + $0x3cc] ss:$16 sps:$4 sm:$0xff]  }
 0x176   :  { %v713_v20 = vpop.f32.mrf.mxu1  ;;  %v2942_v17 = vpop.f32.mrf.mxu0 }
 0x177   :  { %2047 = vmatpush1.bf16.msra.mxu1 %v4161_v7  ;;  %2295 = vmatpush2.bf16.msra.mxu0 %v3630_v47  ;;  %v4585_v31 = vmax.f32 %v722_v56, %v4462_v50 }
 0x178   :  { %v714_v25 = vpop.f32.mrf.mxu1  ;;  %2048 = vmatprep.subr.bf16.mxu1 %v3368_v21  ;;  %2296 = vmatprep.subr.bf16.mxu0 %v3368_v21  ;;  %v2943_v23 = vpop.f32.mrf.mxu0 }
 0x179   :  { %v4589_v2 = vadd.f32 %v2943_v23, %v2942_v17 }
 0x17a   :  { %v2884_v22 = vpop.f32.mrf.mxu1  ;;  %2021 = vmatmul.mubr.bf16.gmra.mxu1 %v3308_v18  ;;  %v2945_v7 = vpop.f32.mrf.mxu0  ;;  %v3324_v18 = vld [vmem:[%s4865_s0 + $0x3c8] ss:$16 sps:$4 sm:$0xff]  }
 0x17b   :  { %2049 = vmatpush1.bf16.msra.mxu1 %v4180_v27  ;;  %2297 = vmatpush2.bf16.msra.mxu0 %v4355_v36  ;;  %v2677_v27 = vld [vmem:[%s4865_s0 + $0x370] sm:$0x11] }
 0x17c   :  { %v2885_v50 = vpop.f32.mrf.mxu1  ;;  %2050 = vmatprep.subr.bf16.mxu1 %v3368_v21  ;;  %2298 = vmatprep.subr.bf16.mxu0 %v3368_v21  ;;  %v2946_v5 = vpop.f32.mrf.mxu0  ;;  %v2692_v28 = vcombine.high %v2677_v27, %v2677_v27  ;;  %v2691_v48 = vcombine.low %v2677_v27, %v2677_v27  ;;  %v3333_v27 = vld [vmem:[%s4865_s0 + $0x35c] ss:$16 sps:$4 sm:$0xff]  }
 0x17d   :  { %v4598_v19 = vadd.f32 %v2885_v50, %v2884_v22  ;;  %2028 = vmatprep.mubr.bf16.mxu1 %v3316_v45 }
 0x17e   :  { %v2887_v41 = vpop.f32.mrf.mxu1 }
 0x17f   :  { %2051 = vmatpush1.bf16.msra.mxu1 %v4199_v34  ;;  %2299 = vmatpush2.bf16.msra.mxu0 %v4370_v53 }
 0x180   :  { %v2888_v11 = vpop.f32.mrf.mxu1  ;;  %2052 = vmatprep.subr.bf16.mxu1 %v3368_v21  ;;  %2300 = vmatprep.subr.bf16.mxu0 %v3368_v21 }
 0x181   :  { %v4610_v10 = vadd.f32 %v2888_v11, %v2887_v41 }
 0x182   :  { %2029 = vmatmul.mubr.bf16.gmra.mxu1 %v3314_v12  ;;  %v2890_v24 = vpop.f32.mrf.mxu1 }
 0x183   :  { %2053 = vmatpush1.bf16.msra.mxu1 %v4211_v9  ;;  %2301 = vmatpush2.bf16.msra.mxu0 %v4390_v46 }
 0x184   :  { %2054 = vmatprep.subr.bf16.mxu1 %v3368_v21  ;;  %2302 = vmatprep.subr.bf16.mxu0 %v3368_v21  ;;  %v2891_v34 = vpop.f32.mrf.mxu1 }
 0x185   :  { %v4616_v15 = vadd.f32 %v2891_v34, %v2890_v24  ;;  %2036 = vmatprep.mubr.bf16.mxu1 %v2692_v28 }
 0x186   :  { %v2893_v42 = vpop.f32.mrf.mxu1 }
 0x187   :  { %2055 = vmatpush1.bf16.msra.mxu1 %v4227_v61  ;;  %2303 = vmatpush2.bf16.msra.mxu0 %v4402_v60 }
 0x188   :  { %2056 = vmatprep.subr.bf16.mxu1 %v3368_v21  ;;  %2304 = vmatprep.subr.bf16.mxu0 %v3368_v21  ;;  %v2894_v9 = vpop.f32.mrf.mxu1 }
 0x189   :  { %v4622_v13 = vadd.f32 %v2894_v9, %v2893_v42  ;;  %v2678_v42 = vld [vmem:[%s4865_s0 + $0x378] sm:$0x11] }
 0x18a   :  { %2037 = vmatmul.mubr.bf16.gmra.mxu1 %v2691_v48  ;;  %v2896_v14 = vpop.f32.mrf.mxu1 }
 0x18b   :  { %2057 = vmatpush1.bf16.msra.mxu1 %v4244_v8  ;;  %2305 = vmatpush2.bf16.msra.mxu0 %v4416_v59  ;;  %v3317_v8 = vld [vmem:[%s4865_s0 + $0x3ac] ss:$16 sps:$4 sm:$0xff]  }
 0x18c   :  { %2058 = vmatprep.subr.bf16.mxu1 %v3368_v21  ;;  %2306 = vmatprep.subr.bf16.mxu0 %v3368_v21  ;;  %v2897_v61 = vpop.f32.mrf.mxu1 }
 0x18d   :  { %v4631_v29 = vadd.f32 %v2897_v61, %v2896_v14  ;;  %2695 = vmatprep.mubr.msk.bf16.mxu1 %vm346_vm0, %v3329_v0  ;;  %v3335_v0 = vld [vmem:[%s4865_s0 + $0x358] ss:$16 sps:$4 sm:$0xff]  }
 0x18e   :  { %v2899_v32 = vpop.f32.mrf.mxu1 }
 0x18f   :  { %2059 = vmatpush1.bf16.msra.mxu1 %v4332_v57  ;;  %2307 = vmatpush2.bf16.msra.mxu0 %v4434_v55 }
 0x190   :  { %2062 = vmatprep.subr.bf16.mxu1 %v3368_v21  ;;  %v2900_v37 = vpop.f32.mrf.mxu1 }
 0x191   :  { %v4643_v4 = vadd.f32 %v2900_v37, %v2899_v32 }
 0x192   :  { %2309 = vmatmul.mubr.bf16.vlgmr.msra.gmra.mxu0 %v3311_v43  ;;  %v2902_v16 = vpop.f32.mrf.mxu1  ;;  %v2694_v43 = vcombine.high %v2678_v42, %v2678_v42 }
 0x193   :  { %2063 = vmatpush2.bf16.msra.mxu1 %v3630_v47  ;;  %2730 = vmatprep.mubr.msk.bf16.mxu0 %vm346_vm0, %v3317_v8 }
 0x194   :  { %2064 = vmatprep.subr.bf16.mxu1 %v3368_v21  ;;  %v2903_v57 = vpop.f32.mrf.mxu1 }
 0x195   :  { %v4648_v35 = vadd.f32 %v2903_v57, %v2902_v16 }
 0x196   :  { %v2905_v51 = vpop.f32.mrf.mxu1 }
 0x197   :  { %2065 = vmatpush2.bf16.msra.mxu1 %v4355_v36  ;;  %v2712_v36 = vld [vmem:[%s4865_s0 + $0x3e8] sm:$0x11] }
 0x198   :  { %2066 = vmatprep.subr.bf16.mxu1 %v3368_v21  ;;  %v2906_v47 = vpop.f32.mrf.mxu1  ;;  %v2727_v7 = vcombine.low %v2712_v36, %v2712_v36 }
 0x19a   :  { %v1382_v30 = vpop.f32.mrf.mxu0  ;;  %2317 = vmatmul.mubr.bf16.gmra.mxu0 %v3319_v62 }
 0x19b   :  { %v1383_v39 = vadd.f32 %v4500_v38, %v1382_v30  ;;  %2067 = vmatpush2.bf16.msra.mxu1 %v4370_v53  ;;  %2731 = vmatprep.mubr.msk.bf16.mxu0 %vm346_vm0, %v3322_v44  ;;  %v2728_v38 = vcombine.high %v2712_v36, %v2712_v36 }
 0x19c   :  { %v1384_v56 = vpop.f32.mrf.mxu0  ;;  %2068 = vmatprep.subr.bf16.mxu1 %v3368_v21 }
 0x19d   :  { %v2693_v56 = vcombine.low %v2678_v42, %v2678_v42 }
 0x19e   :  { %v1385_v20 = vpop.f32.mrf.mxu0 }
 0x19f   :  { %v1386_v17 = vadd.f32 %v4520_v1, %v1385_v20  ;;  %2069 = vmatpush2.bf16.msra.mxu1 %v4390_v46 }
 0x1a0   :  { %v1387_v53 = vpop.f32.mrf.mxu0  ;;  %2070 = vmatprep.subr.bf16.mxu1 %v3368_v21 }
 0x1a2   :  { %v1390_v25 = vpop.f32.mrf.mxu0  ;;  %2325 = vmatmul.mubr.bf16.gmra.mxu0 %v3324_v18 }
 0x1a3   :  { %v1391_v23 = vadd.f32 %v4533_v63, %v1390_v25  ;;  %2071 = vmatpush2.bf16.msra.mxu1 %v4402_v60  ;;  %2732 = vmatprep.mubr.msk.bf16.mxu0 %vm346_vm0, %v2728_v38  ;;  %v3327_v60 = vld [vmem:[%s4865_s0 + $0x318] ss:$16 sps:$4 sm:$0xff]  }
 0x1a4   :  { %v1392_v45 = vpop.f32.mrf.mxu0  ;;  %2072 = vmatprep.subr.bf16.mxu1 %v3368_v21 }
 0x1a6   :  { %v1393_v22 = vpop.f32.mrf.mxu0 }
 0x1a7   :  { %v4676_v1 = vadd.f32 %v4546_v54, %v1393_v22  ;;  %2073 = vmatpush2.bf16.msra.mxu1 %v4416_v59  ;;  %v3330_v54 = vld [vmem:[%s4865_s0 + $0x33c] ss:$16 sps:$4 sm:$0xff]  }
 0x1a8   :  { %v1395_v46 = vpop.f32.mrf.mxu0  ;;  %2074 = vmatprep.subr.bf16.mxu1 %v3368_v21 }
 0x1aa   :  { %v1398_v50 = vpop.f32.mrf.mxu0  ;;  %2333 = vmatmul.mubr.bf16.gmra.mxu0 %v2727_v7 }
 0x1ab   :  { %v4684_v63 = vadd.f32 %v4562_v52, %v1398_v50  ;;  %2075 = vmatpush2.bf16.msra.mxu1 %v4434_v55  ;;  %v3332_v52 = vld [vmem:[%s4865_s0 + $0x338] ss:$16 sps:$4 sm:$0xff]  }
 0x1ac   :  { %v1400_v5 = vpop.f32.mrf.mxu0 }
 0x1ae   :  { %v1401_v59 = vpop.f32.mrf.mxu0  ;;  %2077 = vmatmul.mubr.bf16.vlgmr.msra.gmra.mxu1 %v3327_v60 }
 0x1af   :  { %v4691_v21 = vadd.f32 %v4577_v58, %v1401_v59  ;;  %2696 = vmatprep.mubr.msk.bf16.mxu1 %vm346_vm0, %v3330_v54 }
 0x1b0   :  { %v1403_v41 = vpop.f32.mrf.mxu0 }
 0x1b2   :  { %v1406_v12 = vpop.f32.mrf.mxu0 }
 0x1b3   :  { %v4698_v55 = vadd.f32 %v4589_v2, %v1406_v12 }
 0x1b4   :  { %v1408_v11 = vpop.f32.mrf.mxu0 }
 0x1b6   :  { %v1150_v28 = vpop.f32.mrf.mxu1  ;;  %2085 = vmatmul.mubr.bf16.gmra.mxu1 %v3332_v52  ;;  %v1409_v58 = vpop.f32.mrf.mxu0 }
 0x1b7   :  { %v1151_v24 = vadd.f32 %v4598_v19, %v1150_v28  ;;  %2697 = vmatprep.mubr.msk.bf16.mxu1 %vm346_vm0, %v3333_v27 }
 0x1b8   :  { %v1152_v34 = vpop.f32.mrf.mxu1  ;;  %v1410_v48 = vpop.f32.mrf.mxu0 }
 0x1b9   :  { %v1180_v2 = vmax.f32 %v4495_v33, %v1151_v24 }
 0x1ba   :  { %v1153_v9 = vpop.f32.mrf.mxu1  ;;  %v3004_v14 = vpop.f32.mrf.mxu0 }
 0x1bb   :  { %v1154_v61 = vadd.f32 %v4610_v10, %v1153_v9  ;;  %v4713_v19 = vmax.f32 %v1180_v2, %v1383_v39 }
 0x1bc   :  { %v1155_v32 = vpop.f32.mrf.mxu1  ;;  %v3005_v8 = vpop.f32.mrf.mxu0 }
 0x1bd   :  { %v1181_v37 = vmax.f32 %v4512_v49, %v1154_v61  ;;  %v4716_v16 = vadd.f32 %v3005_v8, %v3004_v14 }
 0x1be   :  { %v1158_v57 = vpop.f32.mrf.mxu1  ;;  %2093 = vmatmul.mubr.bf16.gmra.mxu1 %v3335_v0  ;;  %v3007_v33 = vpop.f32.mrf.mxu0 }
 0x1bf   :  { %v1159_v62 = vadd.f32 %v4616_v15, %v1158_v57  ;;  %2698 = vmatprep.mubr.msk.bf16.mxu1 %vm346_vm0, %v2694_v43  ;;  %v4720_v51 = vmax.f32 %v1181_v37, %v1386_v17 }
 0x1c0   :  { %v1160_v44 = vpop.f32.mrf.mxu1  ;;  %v3008_v10 = vpop.f32.mrf.mxu0 }
 0x1c1   :  { %v1182_v47 = vmax.f32 %v4525_v40, %v1159_v62  ;;  %v4723_v30 = vadd.f32 %v3008_v10, %v3007_v33 }
 0x1c2   :  { %v1161_v39 = vpop.f32.mrf.mxu1  ;;  %v3010_v49 = vpop.f32.mrf.mxu0 }
 0x1c3   :  { %v1162_v36 = vadd.f32 %v4622_v13, %v1161_v39  ;;  %v4726_v20 = vmax.f32 %v1182_v47, %v1391_v23 }
 0x1c4   :  { %v1163_v18 = vpop.f32.mrf.mxu1  ;;  %v3011_v38 = vpop.f32.mrf.mxu0 }
 0x1c5   :  { %v1183_v15 = vmax.f32 %v4539_v6, %v1162_v36  ;;  %v4729_v53 = vadd.f32 %v3011_v38, %v3010_v49 }
 0x1c6   :  { %v1166_v17 = vpop.f32.mrf.mxu1  ;;  %2101 = vmatmul.mubr.bf16.gmra.mxu1 %v2693_v56  ;;  %v3013_v25 = vpop.f32.mrf.mxu0 }
 0x1c7   :  { %v1167_v40 = vadd.f32 %v4631_v29, %v1166_v17  ;;  %v4733_v45 = vmax.f32 %v1183_v15, %v4676_v1 }
 0x1c8   :  { %v1168_v22 = vpop.f32.mrf.mxu1  ;;  %v3014_v7 = vpop.f32.mrf.mxu0 }
 0x1c9   :  { %v1184_v13 = vmax.f32 %v4557_v3, %v1167_v40  ;;  %v3015_v23 = vadd.f32 %v3014_v7, %v3013_v25 }
 0x1ca   :  { %v1169_v46 = vpop.f32.mrf.mxu1  ;;  %v3016_v50 = vpop.f32.mrf.mxu0 }
 0x1cb   :  { %v1170_v60 = vadd.f32 %v4643_v4, %v1169_v46  ;;  %v4738_v6 = vmax.f32 %v1184_v13, %v4684_v63 }
 0x1cc   :  { %v1171_v54 = vpop.f32.mrf.mxu1  ;;  %v3017_v5 = vpop.f32.mrf.mxu0 }
 0x1cd   :  { %v1185_v59 = vmax.f32 %v4572_v26, %v1170_v60  ;;  %v3018_v29 = vadd.f32 %v3017_v5, %v3016_v50 }
 0x1ce   :  { %v1174_v41 = vpop.f32.mrf.mxu1  ;;  %v3019_v1 = vpop.f32.mrf.mxu0 }
 0x1cf   :  { %v1175_v12 = vadd.f32 %v4648_v35, %v1174_v41  ;;  %v4743_v52 = vmax.f32 %v1185_v59, %v4691_v21 }
 0x1d0   :  { %v1176_v3 = vpop.f32.mrf.mxu1  ;;  %v3020_v27 = vpop.f32.mrf.mxu0 }
 0x1d1   :  { %v1186_v11 = vmax.f32 %v4585_v31, %v1175_v12  ;;  %v3021_v4 = vadd.f32 %v3020_v27, %v3019_v1 }
 0x1d2   :  { %v1177_v28 = vpop.f32.mrf.mxu1  ;;  %v3022_v63 = vpop.f32.mrf.mxu0 }
 0x1d3   :  { %v4747_v58 = vmax.f32 %v1186_v11, %v4698_v55 }
 0x1d4   :  { %v1178_v24 = vpop.f32.mrf.mxu1  ;;  %v3023_v26 = vpop.f32.mrf.mxu0 }
 0x1d5   :  { %v3024_v34 = vadd.f32 %v3023_v26, %v3022_v63 }
 0x1d6   :  { %v2964_v42 = vpop.f32.mrf.mxu1  ;;  %v3025_v48 = vpop.f32.mrf.mxu0 }
 0x1d8   :  { %v2965_v2 = vpop.f32.mrf.mxu1  ;;  %v3026_v35 = vpop.f32.mrf.mxu0 }
 0x1d9   :  { %v2966_v9 = vadd.f32 %v2965_v2, %v2964_v42 }
 0x1da   :  { %v2967_v21 = vpop.f32.mrf.mxu1 }
 0x1dc   :  { %v2968_v0 = vpop.f32.mrf.mxu1 }
 0x1dd   :  { %v2969_v14 = vadd.f32 %v2968_v0, %v2967_v21 }
 0x1de   :  { %v2970_v61 = vpop.f32.mrf.mxu1 }
 0x1e0   :  { %v2971_v43 = vpop.f32.mrf.mxu1 }
 0x1e1   :  { %v2972_v31 = vadd.f32 %v2971_v43, %v2970_v61 }
 0x1e2   :  { %v2973_v32 = vpop.f32.mrf.mxu1 }
 0x1e4   :  { %v2974_v8 = vpop.f32.mrf.mxu1 }
 0x1e5   :  { %v2975_v37 = vadd.f32 %v2974_v8, %v2973_v32 }
 0x1e6   :  { %v2976_v57 = vpop.f32.mrf.mxu1 }
 0x1e8   :  { %v2977_v55 = vpop.f32.mrf.mxu1 }
 0x1e9   :  { %v2978_v33 = vadd.f32 %v2977_v55, %v2976_v57 }
 0x1ea   :  { %v2979_v62 = vpop.f32.mrf.mxu1 }
 0x1ec   :  { %v2980_v44 = vpop.f32.mrf.mxu1 }
 0x1ed   :  { %v4749_v10 = vadd.f32 %v2980_v44, %v2979_v62 }
 0x1ee   :  { %v2982_v47 = vpop.f32.mrf.mxu1 }
 0x1f0   :  { %v2983_v39 = vpop.f32.mrf.mxu1 }
 0x1f1   :  { %v4751_v56 = vadd.f32 %v2983_v39, %v2982_v47 }
 0x1f2   :  { %v2985_v49 = vpop.f32.mrf.mxu1 }
 0x1f4   :  { %v2986_v36 = vpop.f32.mrf.mxu1 }
 0x1f6   :  { %v1846_v18 = vpop.f32.mrf.mxu0 }
 0x1f7   :  { %v1847_v38 = vadd.f32 %v4716_v16, %v1846_v18 }
 0x1f8   :  { %v1848_v15 = vpop.f32.mrf.mxu0 }
 0x1fa   :  { %v1849_v17 = vpop.f32.mrf.mxu0 }
 0x1fb   :  { %v1850_v25 = vadd.f32 %v4723_v30, %v1849_v17 }
 0x1fc   :  { %v1851_v40 = vpop.f32.mrf.mxu0 }
 0x1fe   :  { %v1854_v22 = vpop.f32.mrf.mxu0 }
 0x1ff   :  { %v1855_v7 = vadd.f32 %v4729_v53, %v1854_v22 }
 0x200   :  { %v1856_v13 = vpop.f32.mrf.mxu0 }
 0x202   :  { %v1857_v46 = vpop.f32.mrf.mxu0 }
 0x203   :  { %v1858_v50 = vadd.f32 %v3015_v23, %v1857_v46 }
 0x204   :  { %v1859_v60 = vpop.f32.mrf.mxu0 }
 0x206   :  { %v1862_v54 = vpop.f32.mrf.mxu0 }
 0x207   :  { %v1863_v5 = vadd.f32 %v3018_v29, %v1862_v54 }
 0x208   :  { %v1864_v59 = vpop.f32.mrf.mxu0 }
 0x20a   :  { %v1865_v41 = vpop.f32.mrf.mxu0 }
 0x20b   :  { %v1866_v1 = vadd.f32 %v3021_v4, %v1865_v41 }
 0x20c   :  { %v1867_v12 = vpop.f32.mrf.mxu0 }
 0x20e   :  { %v1870_v3 = vpop.f32.mrf.mxu0 }
 0x20f   :  { %v1871_v16 = vadd.f32 %v3024_v34, %v1870_v3 }
 0x210   :  { %v1872_v27 = vpop.f32.mrf.mxu0 }
 0x212   :  { %v1614_v11 = vpop.f32.mrf.mxu1  ;;  %v1873_v28 = vpop.f32.mrf.mxu0 }
 0x213   :  { %v1615_v30 = vadd.f32 %v2966_v9, %v1614_v11 }
 0x214   :  { %v1616_v63 = vpop.f32.mrf.mxu1  ;;  %v1874_v24 = vpop.f32.mrf.mxu0 }
 0x215   :  { %v1644_v53 = vmax.f32 %v4713_v19, %v1615_v30 }
 0x216   :  { %v1617_v26 = vpop.f32.mrf.mxu1  ;;  %v3084_v42 = vpop.f32.mrf.mxu0 }
 0x217   :  { %v1618_v23 = vadd.f32 %v2969_v14, %v1617_v26  ;;  %v4757_v48 = vmax.f32 %v1644_v53, %v1847_v38 }
 0x218   :  { %v1619_v29 = vpop.f32.mrf.mxu1  ;;  %v3085_v2 = vpop.f32.mrf.mxu0 }
 0x219   :  { %v1645_v4 = vmax.f32 %v4720_v51, %v1618_v23  ;;  %v4760_v35 = vadd.f32 %v3085_v2, %v3084_v42 }
 0x21a   :  { %v1622_v34 = vpop.f32.mrf.mxu1  ;;  %v3087_v21 = vpop.f32.mrf.mxu0 }
 0x21b   :  { %v1623_v0 = vadd.f32 %v2972_v31, %v1622_v34  ;;  %v4762_v61 = vmax.f32 %v1645_v4, %v1850_v25 }
 0x21c   :  { %v1624_v9 = vpop.f32.mrf.mxu1  ;;  %v3088_v43 = vpop.f32.mrf.mxu0 }
 0x21d   :  { %v1646_v19 = vmax.f32 %v4726_v20, %v1623_v0  ;;  %v4765_v32 = vadd.f32 %v3088_v43, %v3087_v21 }
 0x21e   :  { %v1625_v14 = vpop.f32.mrf.mxu1  ;;  %v3090_v8 = vpop.f32.mrf.mxu0 }
 0x21f   :  { %v1626_v57 = vadd.f32 %v2975_v37, %v1625_v14  ;;  %v4767_v55 = vmax.f32 %v1646_v19, %v1855_v7 }
 0x220   :  { %v1627_v62 = vpop.f32.mrf.mxu1  ;;  %v3091_v51 = vpop.f32.mrf.mxu0 }
 0x221   :  { %v1647_v44 = vmax.f32 %v4733_v45, %v1626_v57  ;;  %v4770_v47 = vadd.f32 %v3091_v51, %v3090_v8 }
 0x222   :  { %v1630_v31 = vpop.f32.mrf.mxu1  ;;  %v3093_v39 = vpop.f32.mrf.mxu0 }
 0x223   :  { %v1631_v49 = vadd.f32 %v2978_v33, %v1630_v31  ;;  %v4772_v36 = vmax.f32 %v1647_v44, %v1858_v50 }
 0x224   :  { %v1632_v18 = vpop.f32.mrf.mxu1  ;;  %v3094_v20 = vpop.f32.mrf.mxu0 }
 0x225   :  { %v1648_v38 = vmax.f32 %v4738_v6, %v1631_v49  ;;  %v4775_v15 = vadd.f32 %v3094_v20, %v3093_v39 }
 0x226   :  { %v1633_v37 = vpop.f32.mrf.mxu1  ;;  %v3096_v17 = vpop.f32.mrf.mxu0 }
 0x227   :  { %v1634_v25 = vadd.f32 %v4749_v10, %v1633_v37  ;;  %v4778_v40 = vmax.f32 %v1648_v38, %v1863_v5 }
 0x228   :  { %v1635_v45 = vpop.f32.mrf.mxu1  ;;  %v3097_v22 = vpop.f32.mrf.mxu0 }
 0x229   :  { %v1649_v7 = vmax.f32 %v4743_v52, %v1634_v25  ;;  %v4781_v13 = vadd.f32 %v3097_v22, %v3096_v17 }
 0x22a   :  { %v1638_v33 = vpop.f32.mrf.mxu1  ;;  %v3099_v46 = vpop.f32.mrf.mxu0 }
 0x22b   :  { %v1639_v50 = vadd.f32 %v4751_v56, %v1638_v33  ;;  %v4784_v60 = vmax.f32 %v1649_v7, %v1866_v1 }
 0x22c   :  { %v1640_v6 = vpop.f32.mrf.mxu1  ;;  %v3100_v54 = vpop.f32.mrf.mxu0 }
 0x22d   :  { %v1650_v59 = vmax.f32 %v4747_v58, %v1639_v50  ;;  %v4787_v41 = vadd.f32 %v3100_v54, %v3099_v46  ;;  %v4810_v46 = vld [vmem:[%s4866_s2] ss:$0 sm:$0xff] }
 0x22e   :  { %v1641_v10 = vpop.f32.mrf.mxu1  ;;  %v3102_v5 = vpop.f32.mrf.mxu0 }
 0x22f   :  { %v4789_v12 = vmax.f32 %v1650_v59, %v1871_v16 }
 0x230   :  { %v1642_v3 = vpop.f32.mrf.mxu1  ;;  %v3103_v52 = vpop.f32.mrf.mxu0 }
 0x231   :  { %v4791_v27 = vadd.f32 %v3103_v52, %v3102_v5 }
 0x232   :  { %v3044_v11 = vpop.f32.mrf.mxu1  ;;  %v3105_v28 = vpop.f32.mrf.mxu0 }
 0x234   :  { %v3045_v30 = vpop.f32.mrf.mxu1  ;;  %v3106_v56 = vpop.f32.mrf.mxu0 }
 0x235   :  { %v3046_v20 = vadd.f32 %v3045_v30, %v3044_v11 }
 0x236   :  { %v3047_v1 = vpop.f32.mrf.mxu1 }
 0x238   :  { %v3048_v63 = vpop.f32.mrf.mxu1 }
 0x239   :  { %v3049_v22 = vadd.f32 %v3048_v63, %v3047_v1 }
 0x23a   :  { %v3050_v24 = vpop.f32.mrf.mxu1 }
 0x23c   :  { %v3051_v53 = vpop.f32.mrf.mxu1 }
 0x23d   :  { %v3052_v10 = vadd.f32 %v3051_v53, %v3050_v24 }
 0x23e   :  { %v3053_v26 = vpop.f32.mrf.mxu1 }
 0x240   :  { %v3054_v58 = vpop.f32.mrf.mxu1 }
 0x241   :  { %v3055_v30 = vadd.f32 %v3054_v58, %v3053_v26 }
 0x242   :  { %v3056_v42 = vpop.f32.mrf.mxu1 }
 0x244   :  { %v3057_v23 = vpop.f32.mrf.mxu1 }
 0x246   :  { %v4793_v29 = vpop.f32.mrf.mxu1 }
 0x248   :  { %v4795_v16 = vpop.f32.mrf.mxu1 }
 0x24a   :  { %v4797_v2 = vpop.f32.mrf.mxu1 }
 0x24c   :  { %v4799_v4 = vpop.f32.mrf.mxu1 }
 0x24e   :  { %v3065_v34 = vpop.f32.mrf.mxu1 }
 0x250   :  { %v3066_v21 = vpop.f32.mrf.mxu1 }
 0x252   :  { %v2310_v0 = vpop.f32.mrf.mxu0 }
 0x253   :  { %v2311_v7 = vadd.f32 %v4760_v35, %v2310_v0  ;;  %v3058_v0 = vadd.f32 %v3057_v23, %v3056_v42  ;;  %v3061_v42 = vadd.f32 %v4795_v16, %v4793_v29  ;;  %v3064_v29 = vadd.f32 %v4799_v4, %v4797_v2 }
 0x254   :  { %v2312_v9 = vpop.f32.mrf.mxu0 }
 0x256   :  { %v2313_v43 = vpop.f32.mrf.mxu0 }
 0x257   :  { %v2314_v5 = vadd.f32 %v4765_v32, %v2313_v43 }
 0x258   :  { %v2315_v19 = vpop.f32.mrf.mxu0 }
 0x25a   :  { %v2318_v14 = vpop.f32.mrf.mxu0 }
 0x25b   :  { %v2319_v1 = vadd.f32 %v4770_v47, %v2318_v14 }
 0x25c   :  { %v2320_v8 = vpop.f32.mrf.mxu0 }
 0x25e   :  { %v2321_v57 = vpop.f32.mrf.mxu0 }
 0x25f   :  { %v2322_v58 = vadd.f32 %v4775_v15, %v2321_v57 }
 0x260   :  { %v2323_v62 = vpop.f32.mrf.mxu0 }
 0x262   :  { %v2326_v51 = vpop.f32.mrf.mxu0 }
 0x263   :  { %v2327_v15 = vadd.f32 %v4781_v13, %v2326_v51 }
 0x264   :  { %v2328_v44 = vpop.f32.mrf.mxu0 }
 0x266   :  { %v4801_v31 = vpop.f32.mrf.mxu0 }
 0x267   :  { %v2330_v13 = vadd.f32 %v4787_v41, %v4801_v31 }
 0x268   :  { %v2331_v39 = vpop.f32.mrf.mxu0 }
 0x26a   :  { %v4803_v49 = vpop.f32.mrf.mxu0 }
 0x26b   :  { %v2335_v2 = vadd.f32 %v4791_v27, %v4803_v49 }
 0x26c   :  { %v2336_v18 = vpop.f32.mrf.mxu0 }
 0x26e   :  { %v2078_v38 = vpop.f32.mrf.mxu1  ;;  %v2337_v37 = vpop.f32.mrf.mxu0 }
 0x26f   :  { %v2079_v17 = vadd.f32 %v3046_v20, %v2078_v38 }
 0x270   :  { %v2080_v25 = vpop.f32.mrf.mxu1  ;;  %v2338_v45 = vpop.f32.mrf.mxu0 }
 0x271   :  { %v2108_v33 = vmax.f32 %v4757_v48, %v2079_v17 }
 0x272   :  { %v2081_v50 = vpop.f32.mrf.mxu1 }
 0x273   :  { %v2340_v6 = vmax.f32 %v2108_v33, %v2311_v7  ;;  %v2082_v54 = vadd.f32 %v3049_v22, %v2081_v50 }
 0x274   :  { %v2083_v59 = vpop.f32.mrf.mxu1 }
 0x275   :  { %v2354_v3 = vadd.f32 %v4810_v46, %v2340_v6  ;;  %v2109_v52 = vmax.f32 %v4762_v61, %v2082_v54 }
 0x276   :  { %v2086_v11 = vpop.f32.mrf.mxu1 }
 0x277   :  { %v2361_v35 = vmax.f32 %v2354_v3, 0.0  ;;  %v2341_v28 = vmax.f32 %v2109_v52, %v2314_v5  ;;  %v2087_v48 = vadd.f32 %v3052_v10, %v2086_v11 }
 0x278   :  { %v2088_v56 = vpop.f32.mrf.mxu1 }
 0x279   :  { %v2741_v63 = vpack.c.bf16 %v2361_v35, %v2361_v35  ;;  %v2355_v34 = vadd.f32 %v4810_v46, %v2341_v28  ;;  %v2110_v24 = vmax.f32 %v4767_v55, %v2087_v48 }
 0x27a   :  { %v2089_v53 = vpop.f32.mrf.mxu1 }
 0x27b   :  { %2398 = vst.msk [vmem:[%s4867_s3] sm:$0xf] %vm2397_vm2, %v2741_v63  ;;  %v2362_v61 = vmax.f32 %v2355_v34, 0.0  ;;  %v2342_v32 = vmax.f32 %v2110_v24, %v2319_v1  ;;  %v2090_v21 = vadd.f32 %v3055_v30, %v2089_v53 }
 0x27c   :  { %v2091_v26 = vpop.f32.mrf.mxu1 }
 0x27d   :  { %v2742_v9 = vpack.c.bf16 %v2362_v61, %v2362_v61  ;;  %v2356_v47 = vadd.f32 %v4810_v46, %v2342_v32  ;;  %v2111_v43 = vmax.f32 %v4772_v36, %v2090_v21 }
 0x27e   :  { %v2094_v19 = vpop.f32.mrf.mxu1 }
 0x27f   :  { %2399 = vst.msk [vmem:[%s4867_s3 + $0x4] sm:$0xf] %vm2397_vm2, %v2742_v9  ;;  %v2363_v55 = vmax.f32 %v2356_v47, 0.0  ;;  %v2343_v14 = vmax.f32 %v2111_v43, %v2322_v58  ;;  %v2095_v8 = vadd.f32 %v3058_v0, %v2094_v19 }
 0x280   :  { %v2096_v23 = vpop.f32.mrf.mxu1 }
 0x281   :  { %v2743_v57 = vpack.c.bf16 %v2363_v55, %v2363_v55  ;;  %v2357_v62 = vadd.f32 %v4810_v46, %v2343_v14  ;;  %v2112_v36 = vmax.f32 %v4778_v40, %v2095_v8 }
 0x282   :  { %v2097_v44 = vpop.f32.mrf.mxu1 }
 0x283   :  { %2400 = vst.msk [vmem:[%s4867_s3 + $0x8] sm:$0xf] %vm2397_vm2, %v2743_v57  ;;  %v2364_v39 = vmax.f32 %v2357_v62, 0.0  ;;  %v2344_v18 = vmax.f32 %v2112_v36, %v2327_v15  ;;  %v2098_v20 = vadd.f32 %v3061_v42, %v2097_v44 }
 0x284   :  { %v2099_v16 = vpop.f32.mrf.mxu1 }
 0x285   :  { %v2744_v51 = vpack.c.bf16 %v2364_v39, %v2364_v39  ;;  %v2358_v38 = vadd.f32 %v4810_v46, %v2344_v18  ;;  %v2113_v40 = vmax.f32 %v4784_v60, %v2098_v20 }
 0x286   :  { %v2102_v37 = vpop.f32.mrf.mxu1 }
 0x287   :  { %2401 = vst.msk [vmem:[%s4867_s3 + $0xc] sm:$0xf] %vm2397_vm2, %v2744_v51  ;;  %v2365_v17 = vmax.f32 %v2358_v38, 0.0  ;;  %v2345_v25 = vmax.f32 %v2113_v40, %v2330_v13  ;;  %v2103_v45 = vadd.f32 %v3064_v29, %v2102_v37 }
 0x288   :  { %v2104_v22 = vpop.f32.mrf.mxu1 }
 0x289   :  { %v2745_v4 = vpack.c.bf16 %v2365_v17, %v2365_v17  ;;  %v2359_v41 = vadd.f32 %v4810_v46, %v2345_v25  ;;  %v2114_v31 = vmax.f32 %v4789_v12, %v2103_v45 }
 0x28a   :  { %v2105_v7 = vpop.f32.mrf.mxu1 }
 0x28b   :  { %2402 = vst.msk [vmem:[%s4867_s3 + $0x10] sm:$0xf] %vm2397_vm2, %v2745_v4  ;;  %v2366_v60 = vmax.f32 %v2359_v41, 0.0  ;;  %v2346_v33 = vmax.f32 %v2114_v31, %v2335_v2 }
 0x28c   :  { %v2106_v50 = vpop.f32.mrf.mxu1 }
 0x28d   :  { %v2746_v6 = vpack.c.bf16 %v2366_v60, %v2366_v60  ;;  %v2360_v54 = vadd.f32 %v4810_v46, %v2346_v33 }
 0x28f   :  { %2403 = vst.msk [vmem:[%s4867_s3 + $0x14] sm:$0xf] %vm2397_vm2, %v2746_v6  ;;  %v2367_v27 = vmax.f32 %v2360_v54, 0.0 }
 0x291   :  { %v2747_v12 = vpack.c.bf16 %v2367_v27, %v2367_v27 }
 0x293   :  { %2405 = vst.msk [vmem:[%s4867_s3 + $0x18] sm:$0x1] %vm2404_vm3, %v2747_v12 }

</bundles_post_ra>
